<compile_context>
chip_gen: v6e
topology: v6e:2x2x1
jax: 0.10.0
libtpu: 0.0.40
codegen_flags: <defaults>
</compile_context>

<pallas_src>
import math

import jax
import jax.numpy as jnp
from jax.experimental import pallas as pl
from jax.experimental.pallas import tpu as pltpu

EMB = 200            # embedding dim (BiLSTM input is 200 + 1)
IN_SZ = EMB + 1      # 201
IN_PAD = 256         # lane-aligned padded input width
HS = 128             # LSTM hidden size per direction
G2 = 2 * HS          # 256  (fused hidden width, fwd|bwd)
G4 = 4 * HS          # 512  (per-direction gate width)
G8 = 8 * HS          # 1024 (fused gate width)
SEQ = 200            # required: hidden1 = Linear(127 * 200, 128)
BATCH = 2
VOCAB = 50
CHUNK = 4            # time steps per aligned 8-sublane gates read (4 * BATCH = 8)

POOL_OUT = 127               # MaxPool1d(3, stride=2) over the 256 features
POOL_PAD = 128               # padded per-step pool width (lane aligned)
FLAT_PAD = SEQ * POOL_PAD    # 25600 padded contraction dim of hidden1
TK = 5120                    # K tile of the first Linear (25600 = 5 * 5120)


# --------- fused BiLSTM kernel: shared projection + fused recurrence ----------
def _bilstm_kernel(x_ref, w_ref, b_ref, u_ref, out_ref, gates_sc):
    # x_ref    : (SEQ*BATCH, 2*IN_PAD) bf16, row t*BATCH+b = [x[t,b] | x[seq-1-t,b]]
    # w_ref    : (2*IN_PAD, G8) bf16, block structured so fwd/bwd lanes pick the
    #            right half of each x_pair row
    # b_ref    : (1, G8) f32 fused bias
    # u_ref    : (G2, G8) bf16 block-diagonal recurrent weights
    # out_ref  : (SEQ, BATCH, G2) f32, [h_fwd | h_bwd] after every fused step
    # gates_sc : (SEQ*BATCH, G8) f32 scratch holding x_pair @ W_big + b
    gates_sc[...] = (
        jnp.dot(x_ref[...], w_ref[...], preferred_element_type=jnp.float32)
        + b_ref[...])

    def chunk(j, carry):
        h, c = carry
        base = pl.multiple_of(j * (CHUNK * BATCH), 8)
        gx8 = gates_sc[pl.ds(base, CHUNK * BATCH), :]        # (8, G8) aligned read
        for k in range(CHUNK):                               # static unroll
            gx = gx8[k * BATCH:(k + 1) * BATCH, :]           # (BATCH, G8) static slice
            gates = gx + jnp.dot(h.astype(jnp.bfloat16), u_ref[...],
                                 preferred_element_type=jnp.float32)
            i_t = jax.nn.sigmoid(gates[:, 0 * G2:1 * G2])
            f_t = jax.nn.sigmoid(gates[:, 1 * G2:2 * G2])
            g_t = jnp.tanh(gates[:, 2 * G2:3 * G2])
            o_t = jax.nn.sigmoid(gates[:, 3 * G2:4 * G2])
            c = f_t * c + i_t * g_t
            h = o_t * jnp.tanh(c)
            # Reference keeps backward states in iteration order (no time flip),
            # so slot i holds cat(forward[i], backward[i]) for BOTH directions.
            out_ref[j * CHUNK + k] = h
        return (h, c)

    init = (jnp.zeros((BATCH, G2), jnp.float32),
            jnp.zeros((BATCH, G2), jnp.float32))
    jax.lax.fori_loop(0, SEQ // CHUNK, chunk, init)


def bilstm(x_pair, W_big, b_fused, U_blk):
    """x_pair: (SEQ*BATCH, 2*IN_PAD) bf16. Returns (SEQ, BATCH, 2*HS) f32."""
    return pl.pallas_call(
        _bilstm_kernel,
        out_shape=jax.ShapeDtypeStruct((SEQ, BATCH, G2), jnp.float32),
        grid=(1,),
        in_specs=[
            pl.BlockSpec((SEQ * BATCH, 2 * IN_PAD), lambda i: (0, 0)),
            pl.BlockSpec((2 * IN_PAD, G8), lambda i: (0, 0)),
            pl.BlockSpec((1, G8), lambda i: (0, 0)),
            pl.BlockSpec((G2, G8), lambda i: (0, 0)),
        ],
        out_specs=pl.BlockSpec((SEQ, BATCH, G2), lambda i: (0, 0, 0)),
        scratch_shapes=[pltpu.VMEM((SEQ * BATCH, G8), jnp.float32)],
        compiler_params=pltpu.CompilerParams(
            dimension_semantics=("arbitrary",)),
    )(x_pair, W_big, b_fused, U_blk)


# ------ fused head kernel: K-tiled Linear(25600,128) + ReLU + 2 linears ------
def _head_kernel(x_ref, w1_ref, b1_ref, w2_ref, b2_ref, w3_ref, b3_ref,
                 o_ref, acc_sc):
    k = pl.program_id(0)

    @pl.when(k == 0)
    def _():
        acc_sc[...] = jnp.zeros_like(acc_sc)

    # bf16 weight stream (HBM-bandwidth bound); f32 accumulation.
    acc_sc[...] += jnp.dot(x_ref[...].astype(jnp.bfloat16), w1_ref[...],
                           preferred_element_type=jnp.float32)

    @pl.when(k == pl.num_programs(0) - 1)
    def _():
        y = jnp.maximum(acc_sc[...] + b1_ref[...], 0.0)                # (bs,128)
        y = jnp.dot(y, w2_ref[...],
                    preferred_element_type=jnp.float32) + b2_ref[...]  # (bs,32)
        y = jnp.sum(y * w3_ref[...], axis=-1, keepdims=True) + b3_ref[...]
        o_ref[...] = y                                                 # (bs,1)


def head(flat, W1p, b1, W2, b2, w3, b3):
    kt = FLAT_PAD // TK
    return pl.pallas_call(
        _head_kernel,
        out_shape=jax.ShapeDtypeStruct((BATCH, 1), jnp.float32),
        grid=(kt,),
        in_specs=[
            pl.BlockSpec((BATCH, TK), lambda k: (0, k)),
            pl.BlockSpec((TK, HS), lambda k: (k, 0)),
            pl.BlockSpec((1, HS), lambda k: (0, 0)),
            pl.BlockSpec((HS, 32), lambda k: (0, 0)),
            pl.BlockSpec((1, 32), lambda k: (0, 0)),
            pl.BlockSpec((1, 32), lambda k: (0, 0)),
            pl.BlockSpec((1, 1), lambda k: (0, 0)),
        ],
        out_specs=pl.BlockSpec((BATCH, 1), lambda k: (0, 0)),
        scratch_shapes=[pltpu.VMEM((BATCH, HS), jnp.float32)],
        compiler_params=pltpu.CompilerParams(
            dimension_semantics=("arbitrary",)),
    )(flat, W1p, b1, W2, b2, w3, b3)


# ---------------- deterministic parameter init (module shapes) ----------------
def init_params(key):
    ks = jax.random.split(key, 13)
    stdv = 1.0 / math.sqrt(HS)

    def u(k, shp, bound):
        return jax.random.uniform(k, shp, jnp.float32, -bound, bound)

    # Per-direction CustomLSTM params (PyTorch layout: W (in,4HS), U (HS,4HS), b (4HS,)).
    Wf, Uf, bf = u(ks[1], (IN_SZ, G4), stdv), u(ks[2], (HS, G4), stdv), u(ks[3], (G4,), stdv)
    Wb, Ub, bb = u(ks[4], (IN_SZ, G4), stdv), u(ks[5], (HS, G4), stdv), u(ks[6], (G4,), stdv)

    # Fused gate-column layout: col = gate*2HS + dir*HS + unit, gate in (i,f,g,o).
    Wf_p = jnp.pad(Wf, ((0, IN_PAD - IN_SZ), (0, 0))).reshape(IN_PAD, 4, HS)
    Wb_p = jnp.pad(Wb, ((0, IN_PAD - IN_SZ), (0, 0))).reshape(IN_PAD, 4, HS)
    W_top = jnp.concatenate([Wf_p, jnp.zeros_like(Wf_p)], axis=-1)     # fwd rows
    W_bot = jnp.concatenate([jnp.zeros_like(Wb_p), Wb_p], axis=-1)     # bwd rows
    W_big = jnp.concatenate([W_top, W_bot], axis=0).reshape(2 * IN_PAD, G8)
    W_big = W_big.astype(jnp.bfloat16)

    Uf4, Ub4 = Uf.reshape(HS, 4, HS), Ub.reshape(HS, 4, HS)
    U_top = jnp.concatenate([Uf4, jnp.zeros_like(Uf4)], axis=-1)
    U_bot = jnp.concatenate([jnp.zeros_like(Ub4), Ub4], axis=-1)
    U_blk = jnp.concatenate([U_top, U_bot], axis=0).reshape(G2, G8)    # block-diag
    U_blk = U_blk.astype(jnp.bfloat16)

    b_fused = jnp.concatenate([bf.reshape(4, HS), bb.reshape(4, HS)],
                              axis=-1).reshape(1, G8)

    d1 = POOL_OUT * SEQ                       # 25400 = Linear(127*200, 128) fan-in
    b1_bound = 1.0 / math.sqrt(d1)
    # hidden1 weight in (in, out) layout, zero-padded 127->128 per timestep so the
    # padded pool lane never contributes; stored bf16 (head is HBM-BW bound).
    W1 = u(ks[7], (SEQ, POOL_OUT, HS), b1_bound)
    W1p = jnp.pad(W1, ((0, 0), (0, POOL_PAD - POOL_OUT), (0, 0)))
    W1p = W1p.reshape(FLAT_PAD, HS).astype(jnp.bfloat16)

    return dict(
        emb=jax.random.normal(ks[0], (VOCAB, EMB), jnp.float32),
        W_big=W_big, U_blk=U_blk, b_fused=b_fused,
        W1p=W1p,
        b1=u(ks[8], (1, HS), b1_bound),
        W2=u(ks[9], (HS, 32), 1.0 / math.sqrt(HS)),
        b2=u(ks[10], (1, 32), 1.0 / math.sqrt(HS)),
        w3=u(ks[11], (1, 32), 1.0 / math.sqrt(32)),   # hidden3 weight (out=1, in=32)
        b3=u(ks[12], (1, 1), 1.0 / math.sqrt(32)),
    )


# ---------------- full forward (BLSTM_python_net.forward) ----------------
@jax.jit
def forward(params, tokens):
    bs, seq = tokens.shape
    # Embedding lookup (gather) + feature concat: plain-JAX glue.
    emb = params["emb"][tokens]                               # (bs, seq, EMB)
    ts = tokens.astype(jnp.float32)[..., None]                # (bs, seq, 1)
    combined = jnp.concatenate([emb, ts], axis=-1)            # (bs, seq, 201)
    x_tm = jnp.transpose(combined, (1, 0, 2))                 # (seq, bs, 201)
    x_p = jnp.pad(x_tm, ((0, 0), (0, 0), (0, IN_PAD - IN_SZ)))        # lane pad
    # row t = [x[t] | x[seq-1-t]] so one projected row feeds both directions.
    x_pair = jnp.concatenate([x_p, x_p[::-1]], axis=-1)       # (seq, bs, 512)
    x_pair = x_pair.reshape(seq * bs, 2 * IN_PAD).astype(jnp.bfloat16)

    hid = bilstm(x_pair, params["W_big"], params["b_fused"], params["U_blk"])
    hidden = jnp.transpose(hid, (1, 0, 2))                    # (bs, seq, 256)

    # TODO(synk): nn.Dropout treated as eval-mode identity (no RNG masking).

    # MaxPool1d(3, stride=2) over the 256-feature axis, padded 127->128 so the
    # flattened activation stays lane-aligned for the head.
    taps = [hidden[..., k:k + 2 * POOL_OUT - 1:2] for k in range(3)]
    p = jnp.maximum(jnp.maximum(taps[0], taps[1]), taps[2])   # (bs, seq, 127)
    p = jnp.pad(p, ((0, 0), (0, 0), (0, POOL_PAD - POOL_OUT)))
    flat = p.reshape(bs, seq * POOL_PAD)                      # (bs, 25600)

    return head(flat, params["W1p"], params["b1"], params["W2"],
                params["b2"], params["w3"], params["b3"])     # (bs, 1)


if __name__ == "__main__":
    key = jax.random.PRNGKey(0)
    pk, dk = jax.random.split(key)
    params = init_params(pk)
    tokens = jax.random.randint(dk, (BATCH, SEQ), 0, VOCAB, dtype=jnp.int32)
    out = forward(params, tokens)
    jax.block_until_ready(out)
    assert out.shape == (BATCH, 1)
    print("KERNEL_OK")
</pallas_src>

<mosaic_0001>
module attributes {stable_mosaic.version = 11 : i64} {
  func.func @_bilstm_kernel(%arg0: i32, %arg1: memref<400x512xbf16, #tpu.memory_space<vmem>>, %arg2: memref<512x1024xbf16, #tpu.memory_space<vmem>>, %arg3: memref<1x1024xf32, #tpu.memory_space<vmem>>, %arg4: memref<256x1024xbf16, #tpu.memory_space<vmem>>, %arg5: memref<200x2x256xf32, #tpu.memory_space<vmem>>, %arg6: memref<400x1024xf32, #tpu.memory_space<vmem>>) attributes {dimension_semantics = [#tpu.dimension_semantics<arbitrary>], iteration_bounds = array<i64: 1>, scalar_prefetch = 0 : i64, scratch_operands = 1 : i64, tpu.core_type = #tpu.core_type<tc>, window_params = [{pipeline_mode = #tpu.pipeline_mode<synchronous>, transform_indices = @transform_0, window_bounds = array<i64: 400, 512>}, {pipeline_mode = #tpu.pipeline_mode<synchronous>, transform_indices = @transform_1, window_bounds = array<i64: 512, 1024>}, {pipeline_mode = #tpu.pipeline_mode<synchronous>, transform_indices = @transform_2, window_bounds = array<i64: 1, 1024>}, {pipeline_mode = #tpu.pipeline_mode<synchronous>, transform_indices = @transform_3, window_bounds = array<i64: 256, 1024>}, {pipeline_mode = #tpu.pipeline_mode<synchronous>, transform_indices = @transform_4, window_bounds = array<i64: 200, 2, 256>}]} {
    %c0 = arith.constant 0 : index
    %c0_0 = arith.constant 0 : index
    %0 = vector.load %arg1[%c0, %c0_0] : memref<400x512xbf16, #tpu.memory_space<vmem>>, vector<400x512xbf16>
    %c0_1 = arith.constant 0 : index
    %c0_2 = arith.constant 0 : index
    %1 = vector.load %arg2[%c0_1, %c0_2] : memref<512x1024xbf16, #tpu.memory_space<vmem>>, vector<512x1024xbf16>
    %cst = arith.constant dense<0.000000e+00> : vector<400x1024xf32>
    %2 = tpu.matmul %0, %1, %cst {dimension_numbers = #tpu.dot_dimension_numbers<[1], [0], [0], [1], [0, 0, 1, 1], [], []>} : vector<400x512xbf16>, vector<512x1024xbf16>, vector<400x1024xf32> -> vector<400x1024xf32>
    %c0_3 = arith.constant 0 : index
    %c0_4 = arith.constant 0 : index
    %3 = vector.load %arg3[%c0_3, %c0_4] : memref<1x1024xf32, #tpu.memory_space<vmem>>, vector<1x1024xf32>
    %4 = vector.broadcast %3 : vector<1x1024xf32> to vector<400x1024xf32>
    %5 = arith.addf %2, %4 : vector<400x1024xf32>
    %c0_5 = arith.constant 0 : index
    %c0_6 = arith.constant 0 : index
    %6 = vector.load %arg6[%c0_5, %c0_6] : memref<400x1024xf32, #tpu.memory_space<vmem>>, vector<400x1024xf32>
    tpu.vector_store %arg6[%c0_5, %c0_6], %5 {strides = array<i32>} : memref<400x1024xf32, #tpu.memory_space<vmem>>, vector<400x1024xf32>,
    %cst_7 = arith.constant 0.000000e+00 : f32
    %7 = vector.broadcast %cst_7 : f32 to vector<2x256xf32>
    %cst_8 = arith.constant 0.000000e+00 : f32
    %8 = vector.broadcast %cst_8 : f32 to vector<2x256xf32>
    %c0_i32 = arith.constant 0 : i32
    %c50_i32 = arith.constant 50 : i32
    %9 = arith.addi %c0_i32, %c50_i32 : i32
    %c1_i32 = arith.constant 1 : i32
    %10:2 = scf.for %arg7 = %c0_i32 to %9 step %c1_i32 iter_args(%arg8 = %7, %arg9 = %8) -> (vector<2x256xf32>, vector<2x256xf32>)  : i32 {
      %c8_i32 = arith.constant 8 : i32
      %11 = arith.muli %arg7, %c8_i32 : i32
      %12 = tpu.assume_multiple %11, 8 : i32
      %13 = arith.index_cast %12 : i32 to index
      %c0_10 = arith.constant 0 : index
      %14 = vector.load %arg6[%13, %c0_10] : memref<400x1024xf32, #tpu.memory_space<vmem>>, vector<8x1024xf32>
      %15 = vector.extract_strided_slice %14 {offsets = [0, 0], sizes = [2, 1024], strides = [1, 1]} : vector<8x1024xf32> to vector<2x1024xf32>
      %16 = arith.truncf %arg8 : vector<2x256xf32> to vector<2x256xbf16>
      %c0_11 = arith.constant 0 : index
      %c0_12 = arith.constant 0 : index
      %17 = vector.load %arg4[%c0_11, %c0_12] : memref<256x1024xbf16, #tpu.memory_space<vmem>>, vector<256x1024xbf16>
      %cst_13 = arith.constant dense<0.000000e+00> : vector<2x1024xf32>
      %18 = tpu.matmul %16, %17, %cst_13 {dimension_numbers = #tpu.dot_dimension_numbers<[1], [0], [0], [1], [0, 0, 1, 1], [], []>} : vector<2x256xbf16>, vector<256x1024xbf16>, vector<2x1024xf32> -> vector<2x1024xf32>
      %19 = arith.addf %15, %18 : vector<2x1024xf32>
      %20 = vector.extract_strided_slice %19 {offsets = [0, 0], sizes = [2, 256], strides = [1, 1]} : vector<2x1024xf32> to vector<2x256xf32>
      %21 = arith.negf %20 : vector<2x256xf32>
      %22 = math.exp %21 : vector<2x256xf32>
      %cst_14 = arith.constant 1.000000e+00 : f32
      %23 = vector.broadcast %cst_14 : f32 to vector<2x256xf32>
      %24 = arith.addf %23, %22 : vector<2x256xf32>
      %25 = arith.divf %23, %24 : vector<2x256xf32>
      %26 = vector.extract_strided_slice %19 {offsets = [0, 256], sizes = [2, 256], strides = [1, 1]} : vector<2x1024xf32> to vector<2x256xf32>
      %27 = arith.negf %26 : vector<2x256xf32>
      %28 = math.exp %27 : vector<2x256xf32>
      %cst_15 = arith.constant 1.000000e+00 : f32
      %29 = vector.broadcast %cst_15 : f32 to vector<2x256xf32>
      %30 = arith.addf %29, %28 : vector<2x256xf32>
      %31 = arith.divf %29, %30 : vector<2x256xf32>
      %32 = vector.extract_strided_slice %19 {offsets = [0, 512], sizes = [2, 256], strides = [1, 1]} : vector<2x1024xf32> to vector<2x256xf32>
      %33 = math.tanh %32 : vector<2x256xf32>
      %34 = vector.extract_strided_slice %19 {offsets = [0, 768], sizes = [2, 256], strides = [1, 1]} : vector<2x1024xf32> to vector<2x256xf32>
      %35 = arith.negf %34 : vector<2x256xf32>
      %36 = math.exp %35 : vector<2x256xf32>
      %cst_16 = arith.constant 1.000000e+00 : f32
      %37 = vector.broadcast %cst_16 : f32 to vector<2x256xf32>
      %38 = arith.addf %37, %36 : vector<2x256xf32>
      %39 = arith.divf %37, %38 : vector<2x256xf32>
      %40 = arith.mulf %31, %arg9 : vector<2x256xf32>
      %41 = arith.mulf %25, %33 : vector<2x256xf32>
      %42 = arith.addf %40, %41 : vector<2x256xf32>
      %43 = math.tanh %42 : vector<2x256xf32>
      %44 = arith.mulf %39, %43 : vector<2x256xf32>
      %c4_i32 = arith.constant 4 : i32
      %45 = arith.muli %arg7, %c4_i32 : i32
      %c0_i32_17 = arith.constant 0 : i32
      %46 = arith.addi %45, %c0_i32_17 : i32
      %47 = arith.index_cast %46 : i32 to index
      %c0_18 = arith.constant 0 : index
      %c0_19 = arith.constant 0 : index
      %48 = vector.load %arg5[%47, %c0_18, %c0_19] : memref<200x2x256xf32, #tpu.memory_space<vmem>>, vector<1x2x256xf32>
      %49 = vector.shape_cast %48 : vector<1x2x256xf32> to vector<2x256xf32>
      %50 = vector.shape_cast %44 : vector<2x256xf32> to vector<1x2x256xf32>
      tpu.vector_store %arg5[%47, %c0_18, %c0_19], %50 {strides = array<i32>} : memref<200x2x256xf32, #tpu.memory_space<vmem>>, vector<1x2x256xf32>,
      %51 = vector.extract_strided_slice %14 {offsets = [2, 0], sizes = [2, 1024], strides = [1, 1]} : vector<8x1024xf32> to vector<2x1024xf32>
      %52 = arith.truncf %44 : vector<2x256xf32> to vector<2x256xbf16>
      %c0_20 = arith.constant 0 : index
      %c0_21 = arith.constant 0 : index
      %53 = vector.load %arg4[%c0_20, %c0_21] : memref<256x1024xbf16, #tpu.memory_space<vmem>>, vector<256x1024xbf16>
      %cst_22 = arith.constant dense<0.000000e+00> : vector<2x1024xf32>
      %54 = tpu.matmul %52, %53, %cst_22 {dimension_numbers = #tpu.dot_dimension_numbers<[1], [0], [0], [1], [0, 0, 1, 1], [], []>} : vector<2x256xbf16>, vector<256x1024xbf16>, vector<2x1024xf32> -> vector<2x1024xf32>
      %55 = arith.addf %51, %54 : vector<2x1024xf32>
      %56 = vector.extract_strided_slice %55 {offsets = [0, 0], sizes = [2, 256], strides = [1, 1]} : vector<2x1024xf32> to vector<2x256xf32>
      %57 = arith.negf %56 : vector<2x256xf32>
      %58 = math.exp %57 : vector<2x256xf32>
      %cst_23 = arith.constant 1.000000e+00 : f32
      %59 = vector.broadcast %cst_23 : f32 to vector<2x256xf32>
      %60 = arith.addf %59, %58 : vector<2x256xf32>
      %61 = arith.divf %59, %60 : vector<2x256xf32>
      %62 = vector.extract_strided_slice %55 {offsets = [0, 256], sizes = [2, 256], strides = [1, 1]} : vector<2x1024xf32> to vector<2x256xf32>
      %63 = arith.negf %62 : vector<2x256xf32>
      %64 = math.exp %63 : vector<2x256xf32>
      %cst_24 = arith.constant 1.000000e+00 : f32
      %65 = vector.broadcast %cst_24 : f32 to vector<2x256xf32>
      %66 = arith.addf %65, %64 : vector<2x256xf32>
      %67 = arith.divf %65, %66 : vector<2x256xf32>
      %68 = vector.extract_strided_slice %55 {offsets = [0, 512], sizes = [2, 256], strides = [1, 1]} : vector<2x1024xf32> to vector<2x256xf32>
      %69 = math.tanh %68 : vector<2x256xf32>
      %70 = vector.extract_strided_slice %55 {offsets = [0, 768], sizes = [2, 256], strides = [1, 1]} : vector<2x1024xf32> to vector<2x256xf32>
      %71 = arith.negf %70 : vector<2x256xf32>
      %72 = math.exp %71 : vector<2x256xf32>
      %cst_25 = arith.constant 1.000000e+00 : f32
      %73 = vector.broadcast %cst_25 : f32 to vector<2x256xf32>
      %74 = arith.addf %73, %72 : vector<2x256xf32>
      %75 = arith.divf %73, %74 : vector<2x256xf32>
      %76 = arith.mulf %67, %42 : vector<2x256xf32>
      %77 = arith.mulf %61, %69 : vector<2x256xf32>
      %78 = arith.addf %76, %77 : vector<2x256xf32>
      %79 = math.tanh %78 : vector<2x256xf32>
      %80 = arith.mulf %75, %79 : vector<2x256xf32>
      %c4_i32_26 = arith.constant 4 : i32
      %81 = arith.muli %arg7, %c4_i32_26 : i32
      %c1_i32_27 = arith.constant 1 : i32
      %82 = arith.addi %81, %c1_i32_27 : i32
      %83 = arith.index_cast %82 : i32 to index
      %c0_28 = arith.constant 0 : index
      %c0_29 = arith.constant 0 : index
      %84 = vector.load %arg5[%83, %c0_28, %c0_29] : memref<200x2x256xf32, #tpu.memory_space<vmem>>, vector<1x2x256xf32>
      %85 = vector.shape_cast %84 : vector<1x2x256xf32> to vector<2x256xf32>
      %86 = vector.shape_cast %80 : vector<2x256xf32> to vector<1x2x256xf32>
      tpu.vector_store %arg5[%83, %c0_28, %c0_29], %86 {strides = array<i32>} : memref<200x2x256xf32, #tpu.memory_space<vmem>>, vector<1x2x256xf32>,
      %87 = vector.extract_strided_slice %14 {offsets = [4, 0], sizes = [2, 1024], strides = [1, 1]} : vector<8x1024xf32> to vector<2x1024xf32>
      %88 = arith.truncf %80 : vector<2x256xf32> to vector<2x256xbf16>
      %c0_30 = arith.constant 0 : index
      %c0_31 = arith.constant 0 : index
      %89 = vector.load %arg4[%c0_30, %c0_31] : memref<256x1024xbf16, #tpu.memory_space<vmem>>, vector<256x1024xbf16>
      %cst_32 = arith.constant dense<0.000000e+00> : vector<2x1024xf32>
      %90 = tpu.matmul %88, %89, %cst_32 {dimension_numbers = #tpu.dot_dimension_numbers<[1], [0], [0], [1], [0, 0, 1, 1], [], []>} : vector<2x256xbf16>, vector<256x1024xbf16>, vector<2x1024xf32> -> vector<2x1024xf32>
      %91 = arith.addf %87, %90 : vector<2x1024xf32>
      %92 = vector.extract_strided_slice %91 {offsets = [0, 0], sizes = [2, 256], strides = [1, 1]} : vector<2x1024xf32> to vector<2x256xf32>
      %93 = arith.negf %92 : vector<2x256xf32>
      %94 = math.exp %93 : vector<2x256xf32>
      %cst_33 = arith.constant 1.000000e+00 : f32
      %95 = vector.broadcast %cst_33 : f32 to vector<2x256xf32>
      %96 = arith.addf %95, %94 : vector<2x256xf32>
      %97 = arith.divf %95, %96 : vector<2x256xf32>
      %98 = vector.extract_strided_slice %91 {offsets = [0, 256], sizes = [2, 256], strides = [1, 1]} : vector<2x1024xf32> to vector<2x256xf32>
      %99 = arith.negf %98 : vector<2x256xf32>
      %100 = math.exp %99 : vector<2x256xf32>
      %cst_34 = arith.constant 1.000000e+00 : f32
      %101 = vector.broadcast %cst_34 : f32 to vector<2x256xf32>
      %102 = arith.addf %101, %100 : vector<2x256xf32>
      %103 = arith.divf %101, %102 : vector<2x256xf32>
      %104 = vector.extract_strided_slice %91 {offsets = [0, 512], sizes = [2, 256], strides = [1, 1]} : vector<2x1024xf32> to vector<2x256xf32>
      %105 = math.tanh %104 : vector<2x256xf32>
      %106 = vector.extract_strided_slice %91 {offsets = [0, 768], sizes = [2, 256], strides = [1, 1]} : vector<2x1024xf32> to vector<2x256xf32>
      %107 = arith.negf %106 : vector<2x256xf32>
      %108 = math.exp %107 : vector<2x256xf32>
      %cst_35 = arith.constant 1.000000e+00 : f32
      %109 = vector.broadcast %cst_35 : f32 to vector<2x256xf32>
      %110 = arith.addf %109, %108 : vector<2x256xf32>
      %111 = arith.divf %109, %110 : vector<2x256xf32>
      %112 = arith.mulf %103, %78 : vector<2x256xf32>
      %113 = arith.mulf %97, %105 : vector<2x256xf32>
      %114 = arith.addf %112, %113 : vector<2x256xf32>
      %115 = math.tanh %114 : vector<2x256xf32>
      %116 = arith.mulf %111, %115 : vector<2x256xf32>
      %c4_i32_36 = arith.constant 4 : i32
      %117 = arith.muli %arg7, %c4_i32_36 : i32
      %c2_i32 = arith.constant 2 : i32
      %118 = arith.addi %117, %c2_i32 : i32
      %119 = arith.index_cast %118 : i32 to index
      %c0_37 = arith.constant 0 : index
      %c0_38 = arith.constant 0 : index
      %120 = vector.load %arg5[%119, %c0_37, %c0_38] : memref<200x2x256xf32, #tpu.memory_space<vmem>>, vector<1x2x256xf32>
      %121 = vector.shape_cast %120 : vector<1x2x256xf32> to vector<2x256xf32>
      %122 = vector.shape_cast %116 : vector<2x256xf32> to vector<1x2x256xf32>
      tpu.vector_store %arg5[%119, %c0_37, %c0_38], %122 {strides = array<i32>} : memref<200x2x256xf32, #tpu.memory_space<vmem>>, vector<1x2x256xf32>,
      %123 = vector.extract_strided_slice %14 {offsets = [6, 0], sizes = [2, 1024], strides = [1, 1]} : vector<8x1024xf32> to vector<2x1024xf32>
      %124 = arith.truncf %116 : vector<2x256xf32> to vector<2x256xbf16>
      %c0_39 = arith.constant 0 : index
      %c0_40 = arith.constant 0 : index
      %125 = vector.load %arg4[%c0_39, %c0_40] : memref<256x1024xbf16, #tpu.memory_space<vmem>>, vector<256x1024xbf16>
      %cst_41 = arith.constant dense<0.000000e+00> : vector<2x1024xf32>
      %126 = tpu.matmul %124, %125, %cst_41 {dimension_numbers = #tpu.dot_dimension_numbers<[1], [0], [0], [1], [0, 0, 1, 1], [], []>} : vector<2x256xbf16>, vector<256x1024xbf16>, vector<2x1024xf32> -> vector<2x1024xf32>
      %127 = arith.addf %123, %126 : vector<2x1024xf32>
      %128 = vector.extract_strided_slice %127 {offsets = [0, 0], sizes = [2, 256], strides = [1, 1]} : vector<2x1024xf32> to vector<2x256xf32>
      %129 = arith.negf %128 : vector<2x256xf32>
      %130 = math.exp %129 : vector<2x256xf32>
      %cst_42 = arith.constant 1.000000e+00 : f32
      %131 = vector.broadcast %cst_42 : f32 to vector<2x256xf32>
      %132 = arith.addf %131, %130 : vector<2x256xf32>
      %133 = arith.divf %131, %132 : vector<2x256xf32>
      %134 = vector.extract_strided_slice %127 {offsets = [0, 256], sizes = [2, 256], strides = [1, 1]} : vector<2x1024xf32> to vector<2x256xf32>
      %135 = arith.negf %134 : vector<2x256xf32>
      %136 = math.exp %135 : vector<2x256xf32>
      %cst_43 = arith.constant 1.000000e+00 : f32
      %137 = vector.broadcast %cst_43 : f32 to vector<2x256xf32>
      %138 = arith.addf %137, %136 : vector<2x256xf32>
      %139 = arith.divf %137, %138 : vector<2x256xf32>
      %140 = vector.extract_strided_slice %127 {offsets = [0, 512], sizes = [2, 256], strides = [1, 1]} : vector<2x1024xf32> to vector<2x256xf32>
      %141 = math.tanh %140 : vector<2x256xf32>
      %142 = vector.extract_strided_slice %127 {offsets = [0, 768], sizes = [2, 256], strides = [1, 1]} : vector<2x1024xf32> to vector<2x256xf32>
      %143 = arith.negf %142 : vector<2x256xf32>
      %144 = math.exp %143 : vector<2x256xf32>
      %cst_44 = arith.constant 1.000000e+00 : f32
      %145 = vector.broadcast %cst_44 : f32 to vector<2x256xf32>
      %146 = arith.addf %145, %144 : vector<2x256xf32>
      %147 = arith.divf %145, %146 : vector<2x256xf32>
      %148 = arith.mulf %139, %114 : vector<2x256xf32>
      %149 = arith.mulf %133, %141 : vector<2x256xf32>
      %150 = arith.addf %148, %149 : vector<2x256xf32>
      %151 = math.tanh %150 : vector<2x256xf32>
      %152 = arith.mulf %147, %151 : vector<2x256xf32>
      %c4_i32_45 = arith.constant 4 : i32
      %153 = arith.muli %arg7, %c4_i32_45 : i32
      %c3_i32 = arith.constant 3 : i32
      %154 = arith.addi %153, %c3_i32 : i32
      %155 = arith.index_cast %154 : i32 to index
      %c0_46 = arith.constant 0 : index
      %c0_47 = arith.constant 0 : index
      %156 = vector.load %arg5[%155, %c0_46, %c0_47] : memref<200x2x256xf32, #tpu.memory_space<vmem>>, vector<1x2x256xf32>
      %157 = vector.shape_cast %156 : vector<1x2x256xf32> to vector<2x256xf32>
      %158 = vector.shape_cast %152 : vector<2x256xf32> to vector<1x2x256xf32>
      tpu.vector_store %arg5[%155, %c0_46, %c0_47], %158 {strides = array<i32>} : memref<200x2x256xf32, #tpu.memory_space<vmem>>, vector<1x2x256xf32>,
      scf.yield %152, %150 : vector<2x256xf32>, vector<2x256xf32>
    }
    %c50_i32_9 = arith.constant 50 : i32
    return
  }
  func.func @transform_0(%arg0: i32) -> (i32, i32) {
    %c0_i32 = arith.constant 0 : i32
    %c0_i32_0 = arith.constant 0 : i32
    %c0_i32_1 = arith.constant 0 : i32
    return %c0_i32, %c0_i32_0 : i32, i32
  }
  func.func @transform_1(%arg0: i32) -> (i32, i32) {
    %c0_i32 = arith.constant 0 : i32
    %c0_i32_0 = arith.constant 0 : i32
    %c0_i32_1 = arith.constant 0 : i32
    return %c0_i32, %c0_i32_0 : i32, i32
  }
  func.func @transform_2(%arg0: i32) -> (i32, i32) {
    %c0_i32 = arith.constant 0 : i32
    %c0_i32_0 = arith.constant 0 : i32
    %c0_i32_1 = arith.constant 0 : i32
    return %c0_i32, %c0_i32_0 : i32, i32
  }
  func.func @transform_3(%arg0: i32) -> (i32, i32) {
    %c0_i32 = arith.constant 0 : i32
    %c0_i32_0 = arith.constant 0 : i32
    %c0_i32_1 = arith.constant 0 : i32
    return %c0_i32, %c0_i32_0 : i32, i32
  }
  func.func @transform_4(%arg0: i32) -> (i32, i32, i32) {
    %c0_i32 = arith.constant 0 : i32
    %c0_i32_0 = arith.constant 0 : i32
    %c0_i32_1 = arith.constant 0 : i32
    %c0_i32_2 = arith.constant 0 : i32
    return %c0_i32, %c0_i32_0, %c0_i32_1 : i32, i32, i32
  }
}

module attributes {stable_mosaic.version = 11 : i64} {
  func.func @_head_kernel(%arg0: i32, %arg1: memref<2x5120xf32, #tpu.memory_space<vmem>>, %arg2: memref<5120x128xbf16, #tpu.memory_space<vmem>>, %arg3: memref<1x128xf32, #tpu.memory_space<vmem>>, %arg4: memref<128x32xf32, #tpu.memory_space<vmem>>, %arg5: memref<1x32xf32, #tpu.memory_space<vmem>>, %arg6: memref<1x32xf32, #tpu.memory_space<vmem>>, %arg7: memref<1x1xf32, #tpu.memory_space<vmem>>, %arg8: memref<2x1xf32, #tpu.memory_space<vmem>>, %arg9: memref<2x128xf32, #tpu.memory_space<vmem>>) attributes {dimension_semantics = [#tpu.dimension_semantics<arbitrary>], iteration_bounds = array<i64: 5>, scalar_prefetch = 0 : i64, scratch_operands = 1 : i64, tpu.core_type = #tpu.core_type<tc>, window_params = [{transform_indices = @transform_0, window_bounds = array<i64: 2, 5120>}, {transform_indices = @transform_1, window_bounds = array<i64: 5120, 128>}, {pipeline_mode = #tpu.pipeline_mode<synchronous>, transform_indices = @transform_2, window_bounds = array<i64: 1, 128>}, {pipeline_mode = #tpu.pipeline_mode<synchronous>, transform_indices = @transform_3, window_bounds = array<i64: 128, 32>}, {pipeline_mode = #tpu.pipeline_mode<synchronous>, transform_indices = @transform_4, window_bounds = array<i64: 1, 32>}, {pipeline_mode = #tpu.pipeline_mode<synchronous>, transform_indices = @transform_5, window_bounds = array<i64: 1, 32>}, {pipeline_mode = #tpu.pipeline_mode<synchronous>, transform_indices = @transform_6, window_bounds = array<i64: 1, 1>}, {pipeline_mode = #tpu.pipeline_mode<synchronous>, transform_indices = @transform_7, window_bounds = array<i64: 2, 1>}]} {
    %c0_i32 = arith.constant 0 : i32
    %0 = arith.cmpi eq, %arg0, %c0_i32 : i32
    %1 = arith.extui %0 : i1 to i32
    %c0_i32_0 = arith.constant 0 : i32
    %2 = arith.cmpi ne, %1, %c0_i32_0 : i32
    scf.if %2 {
      %cst_9 = arith.constant 0.000000e+00 : f32
      %13 = vector.broadcast %cst_9 : f32 to vector<2x128xf32>
      %c0_10 = arith.constant 0 : index
      %c0_11 = arith.constant 0 : index
      %14 = vector.load %arg9[%c0_10, %c0_11] : memref<2x128xf32, #tpu.memory_space<vmem>>, vector<2x128xf32>
      tpu.vector_store %arg9[%c0_10, %c0_11], %13 {strides = array<i32>} : memref<2x128xf32, #tpu.memory_space<vmem>>, vector<2x128xf32>,
    } else {
    }
    %c0 = arith.constant 0 : index
    %c0_1 = arith.constant 0 : index
    %3 = vector.load %arg9[%c0, %c0_1] : memref<2x128xf32, #tpu.memory_space<vmem>>, vector<2x128xf32>
    %c0_2 = arith.constant 0 : index
    %c0_3 = arith.constant 0 : index
    %4 = vector.load %arg1[%c0_2, %c0_3] : memref<2x5120xf32, #tpu.memory_space<vmem>>, vector<2x5120xf32>
    %5 = arith.truncf %4 : vector<2x5120xf32> to vector<2x5120xbf16>
    %c0_4 = arith.constant 0 : index
    %c0_5 = arith.constant 0 : index
    %6 = vector.load %arg2[%c0_4, %c0_5] : memref<5120x128xbf16, #tpu.memory_space<vmem>>, vector<5120x128xbf16>
    %cst = arith.constant dense<0.000000e+00> : vector<2x128xf32>
    %7 = tpu.matmul %5, %6, %cst {dimension_numbers = #tpu.dot_dimension_numbers<[1], [0], [0], [1], [0, 0, 1, 1], [], []>} : vector<2x5120xbf16>, vector<5120x128xbf16>, vector<2x128xf32> -> vector<2x128xf32>
    %8 = arith.addf %3, %7 : vector<2x128xf32>
    %c0_6 = arith.constant 0 : index
    %c0_7 = arith.constant 0 : index
    %9 = vector.load %arg9[%c0_6, %c0_7] : memref<2x128xf32, #tpu.memory_space<vmem>>, vector<2x128xf32>
    tpu.vector_store %arg9[%c0_6, %c0_7], %8 {strides = array<i32>} : memref<2x128xf32, #tpu.memory_space<vmem>>, vector<2x128xf32>,
    %c4_i32 = arith.constant 4 : i32
    %10 = arith.cmpi eq, %arg0, %c4_i32 : i32
    %11 = arith.extui %10 : i1 to i32
    %c0_i32_8 = arith.constant 0 : i32
    %12 = arith.cmpi ne, %11, %c0_i32_8 : i32
    scf.if %12 {
      %c0_9 = arith.constant 0 : index
      %c0_10 = arith.constant 0 : index
      %13 = vector.load %arg9[%c0_9, %c0_10] : memref<2x128xf32, #tpu.memory_space<vmem>>, vector<2x128xf32>
      %c0_11 = arith.constant 0 : index
      %c0_12 = arith.constant 0 : index
      %14 = vector.load %arg3[%c0_11, %c0_12] : memref<1x128xf32, #tpu.memory_space<vmem>>, vector<1x128xf32>
      %15 = vector.broadcast %14 : vector<1x128xf32> to vector<2x128xf32>
      %16 = arith.addf %13, %15 : vector<2x128xf32>
      %cst_13 = arith.constant 0.000000e+00 : f32
      %17 = vector.broadcast %cst_13 : f32 to vector<2x128xf32>
      %18 = arith.maximumf %16, %17 : vector<2x128xf32>
      %c0_14 = arith.constant 0 : index
      %c0_15 = arith.constant 0 : index
      %19 = vector.load %arg4[%c0_14, %c0_15] : memref<128x32xf32, #tpu.memory_space<vmem>>, vector<128x32xf32>
      %cst_16 = arith.constant dense<0.000000e+00> : vector<2x32xf32>
      %20 = tpu.matmul %18, %19, %cst_16 {dimension_numbers = #tpu.dot_dimension_numbers<[1], [0], [0], [1], [0, 0, 1, 1], [], []>} : vector<2x128xf32>, vector<128x32xf32>, vector<2x32xf32> -> vector<2x32xf32>
      %c0_17 = arith.constant 0 : index
      %c0_18 = arith.constant 0 : index
      %21 = vector.load %arg5[%c0_17, %c0_18] : memref<1x32xf32, #tpu.memory_space<vmem>>, vector<1x32xf32>
      %22 = vector.broadcast %21 : vector<1x32xf32> to vector<2x32xf32>
      %23 = arith.addf %20, %22 : vector<2x32xf32>
      %c0_19 = arith.constant 0 : index
      %c0_20 = arith.constant 0 : index
      %24 = vector.load %arg6[%c0_19, %c0_20] : memref<1x32xf32, #tpu.memory_space<vmem>>, vector<1x32xf32>
      %25 = vector.broadcast %24 : vector<1x32xf32> to vector<2x32xf32>
      %26 = arith.mulf %23, %25 : vector<2x32xf32>
      %cst_21 = arith.constant dense<0.000000e+00> : vector<2xf32>
      %27 = vector.multi_reduction <add>, %26, %cst_21 [1] : vector<2x32xf32> to vector<2xf32>
      %28 = vector.shape_cast %27 : vector<2xf32> to vector<2x1xf32>
      %c0_22 = arith.constant 0 : index
      %c0_23 = arith.constant 0 : index
      %29 = vector.load %arg7[%c0_22, %c0_23] : memref<1x1xf32, #tpu.memory_space<vmem>>, vector<1x1xf32>
      %30 = vector.broadcast %29 : vector<1x1xf32> to vector<2x1xf32>
      %31 = arith.addf %28, %30 : vector<2x1xf32>
      %c0_24 = arith.constant 0 : index
      %c0_25 = arith.constant 0 : index
      %32 = vector.load %arg8[%c0_24, %c0_25] : memref<2x1xf32, #tpu.memory_space<vmem>>, vector<2x1xf32>
      tpu.vector_store %arg8[%c0_24, %c0_25], %31 {strides = array<i32>} : memref<2x1xf32, #tpu.memory_space<vmem>>, vector<2x1xf32>,
    } else {
    }
    return
  }
  func.func @transform_0(%arg0: i32) -> (i32, i32) {
    %c0_i32 = arith.constant 0 : i32
    %c0_i32_0 = arith.constant 0 : i32
    return %c0_i32, %arg0 : i32, i32
  }
  func.func @transform_1(%arg0: i32) -> (i32, i32) {
    %c0_i32 = arith.constant 0 : i32
    %c0_i32_0 = arith.constant 0 : i32
    return %arg0, %c0_i32 : i32, i32
  }
  func.func @transform_2(%arg0: i32) -> (i32, i32) {
    %c0_i32 = arith.constant 0 : i32
    %c0_i32_0 = arith.constant 0 : i32
    %c0_i32_1 = arith.constant 0 : i32
    return %c0_i32, %c0_i32_0 : i32, i32
  }
  func.func @transform_3(%arg0: i32) -> (i32, i32) {
    %c0_i32 = arith.constant 0 : i32
    %c0_i32_0 = arith.constant 0 : i32
    %c0_i32_1 = arith.constant 0 : i32
    return %c0_i32, %c0_i32_0 : i32, i32
  }
  func.func @transform_4(%arg0: i32) -> (i32, i32) {
    %c0_i32 = arith.constant 0 : i32
    %c0_i32_0 = arith.constant 0 : i32
    %c0_i32_1 = arith.constant 0 : i32
    return %c0_i32, %c0_i32_0 : i32, i32
  }
  func.func @transform_5(%arg0: i32) -> (i32, i32) {
    %c0_i32 = arith.constant 0 : i32
    %c0_i32_0 = arith.constant 0 : i32
    %c0_i32_1 = arith.constant 0 : i32
    return %c0_i32, %c0_i32_0 : i32, i32
  }
  func.func @transform_6(%arg0: i32) -> (i32, i32) {
    %c0_i32 = arith.constant 0 : i32
    %c0_i32_0 = arith.constant 0 : i32
    %c0_i32_1 = arith.constant 0 : i32
    return %c0_i32, %c0_i32_0 : i32, i32
  }
  func.func @transform_7(%arg0: i32) -> (i32, i32) {
    %c0_i32 = arith.constant 0 : i32
    %c0_i32_0 = arith.constant 0 : i32
    %c0_i32_1 = arith.constant 0 : i32
    return %c0_i32, %c0_i32_0 : i32, i32
  }
}

</mosaic_0001>

<bundles_post_ra>
// kernel: forward.2
= control target key start
LH: loop header
LB: loop body
LE: loop exit
PB: predicated region body
PF: predicated region fallthrough
CT: control target
= control target key end

     0   :  { %9 = vsyncpa [#allocation4], 0  ;;  %s13795_s0 = inlined_call_operand.vmem [shape: bf16[400,512], index: 0, kind: input, shape index: {}]   ;;  %s13796_s1 = inlined_call_operand.hbm [shape: bf16[512,1024], index: 1, kind: input, shape index: {}]   ;;  %s13797_s2 = inlined_call_operand.hbm [shape: f32[1,1024], index: 2, kind: input, shape index: {}]   ;;  %s13798_s3 = inlined_call_operand.hbm [shape: bf16[256,1024], index: 3, kind: input, shape index: {}]   ;;  %s13799_s4 = inlined_call_operand.vmem [shape: f32[200,2,256], index: 4, kind: output, shape index: {}]  }
   0x1   :  { %10 = vsyncpa [#allocation6], 0  ;;  %s10738_s15 = smov [#allocation5]   ;;  %s10739_s17 = smov [#allocation3]  }
   0x2   :  { %s31_s16 = sshll.u32 %s10738_s15, 4  ;;  %s18_s18 = sshll.u32 %s10739_s17, 4  ;;  %s32_s16 = int_to_ptr.vmem [resolvable:$true] %s31_s16  ;;  %s19_s18 = int_to_ptr.vmem [resolvable:$true] %s18_s18 }
   0x3   :  { %s10642_s19 = scalar_lea.vmem %s32_s16, 128  ;;  %p10647_p1 = scmp.lt.s32.totalorder %s32_s16, %s32_s16 }
   0x4   :  { %p10643_p0 = scmp.ne.s32.totalorder %s32_s16, %s10642_s19  ;;  %p10648_p2 = scmp.lt.s32.totalorder %s10642_s19, %s10642_s19 }
   0x6   :  { %p10649_p3 = por %p10648_p2, %p10647_p1 }
   0x8   :  { %p10650_p4 = pnand %p10649_p3, %p10643_p0 }
   0xa   :  { %10653 = shalt.err (!%p10650_p4)
}
   0xb   :  { %34 = dma.hbm_to_vmem [thread:$0]  %s13797_s2, 128, %s32_s16, [#allocation6]  }
   0xc   :  { %s10662_s22 = scalar_lea.vmem %s19_s18, 32768  ;;  %p10667_p6 = scmp.lt.s32.totalorder %s19_s18, %s19_s18 }
   0xd   :  { %p10663_p5 = scmp.ne.s32.totalorder %s19_s18, %s10662_s22  ;;  %p10668_p7 = scmp.lt.s32.totalorder %s10662_s22, %s10662_s22 }
   0xf   :  { %p10669_p8 = por %p10668_p7, %p10667_p6 }
  0x11   :  { %p10670_p9 = pnand %p10669_p8, %p10663_p5 }
  0x13   :  { %10673 = shalt.err (!%p10670_p9)
}
  0x14   :  { %s10740_s23 = smov 512   ;;  %s10741_s24 = smov 32  }
  0x15   :  { %24 = dma.hbm_to_vmem [thread:$0]  %s13796_s1, 32768, %s19_s18, [#allocation4], %s10740_s23, %s10740_s23, %s10741_s24  }
  0x16   :  { %s10742_s27 = smov [#allocation7]  }
  0x17   :  { %s40_s28 = sshll.u32 %s10742_s27, 4  ;;  %s41_s28 = int_to_ptr.vmem [resolvable:$true] %s40_s28 }
  0x18   :  { %s10682_s29 = scalar_lea.vmem %s41_s28, 16384  ;;  %p10687_p11 = scmp.lt.s32.totalorder %s41_s28, %s41_s28 }
  0x19   :  { %p10683_p10 = scmp.ne.s32.totalorder %s41_s28, %s10682_s29  ;;  %p10688_p12 = scmp.lt.s32.totalorder %s10682_s29, %s10682_s29 }
  0x1b   :  { %p10689_p13 = por %p10688_p12, %p10687_p11 }
  0x1d   :  { %p10690_p0 = pnand %p10689_p13, %p10683_p10 }
  0x1f   :  { %10693 = shalt.err (!%p10690_p0)
}
  0x20   :  { %46 = dma.hbm_to_vmem [thread:$0]  %s13798_s3, 16384, %s41_s28, [#allocation6], %s10740_s23, %s10740_s23, %s10741_s24  }
  0x21   :  { %10714 = dma.done.wait [#allocation4], 32768  }
  0x22   :  { %10715 = vsyncadd [#allocation4], 4294934528 }
  0x23   :  { %10716 = dma.done.wait [#allocation6], 16512  }
  0x24   :  { %10717 = vsyncadd [#allocation6], 4294950784  ;;  %v212_v0 = vld [vmem:[#allocation3 + $0x1c0] sm:$0xff]  ;;  %v10064_v59 = vld [vmem:[%s13795_s0 + $0xc] ss:$16 sps:$4 sm:$0xff]  }
  0x25   :  { %v216_v1 = vld [vmem:[#allocation3 + $0x1e0] sm:$0xff]  ;;  %2549 = vmatprep.mubr.bf16.mxu1 %v10064_v59 }
  0x26   :  { %v340_v2 = vld [vmem:[#allocation3 + $0x5c0] sm:$0xff]  ;;  %v9258_v3 = vcombine.high %v212_v0, %v216_v1  ;;  %v9257_v5 = vcombine.low %v212_v0, %v216_v1 }
  0x27   :  { %v344_v4 = vld [vmem:[#allocation3 + $0x5e0] sm:$0xff] }
  0x28   :  { %v204_v6 = vld [vmem:[#allocation3 + $0x180] sm:$0xff]  ;;  %v9386_v8 = vcombine.high %v340_v2, %v344_v4  ;;  %v9385_v9 = vcombine.low %v340_v2, %v344_v4  ;;  %2234 = vmatprep.subr.bf16.mxu0 %v9258_v3 }
  0x29   :  { %v208_v7 = vld [vmem:[#allocation3 + $0x1a0] sm:$0xff]  ;;  %2235 = vmatpush1.bf16.msra.mxu0 %v9257_v5 }
  0x2a   :  { %v9250_v10 = vcombine.high %v204_v6, %v208_v7  ;;  %v332_v11 = vld [vmem:[#allocation3 + $0x580] sm:$0xff]  ;;  %2517 = vmatprep.subr.bf16.mxu1 %v9386_v8  ;;  %v9249_v18 = vcombine.low %v204_v6, %v208_v7 }
  0x2b   :  { %v336_v12 = vld [vmem:[#allocation3 + $0x5a0] sm:$0xff]  ;;  %2518 = vmatpush1.bf16.msra.mxu1 %v9385_v9 }
  0x2c   :  { %v196_v13 = vld [vmem:[#allocation3 + $0x140] sm:$0xff]  ;;  %v9378_v14 = vcombine.high %v332_v11, %v336_v12  ;;  %2236 = vmatprep.subr.bf16.mxu0 %v9250_v10  ;;  %v9377_v19 = vcombine.low %v332_v11, %v336_v12 }
  0x2d   :  { %v200_v15 = vld [vmem:[#allocation3 + $0x160] sm:$0xff]  ;;  %2237 = vmatpush1.bf16.msra.mxu0 %v9249_v18 }
  0x2e   :  { %v324_v16 = vld [vmem:[#allocation3 + $0x540] sm:$0xff]  ;;  %v9242_v20 = vcombine.high %v196_v13, %v200_v15  ;;  %2519 = vmatprep.subr.bf16.mxu1 %v9378_v14  ;;  %v9241_v26 = vcombine.low %v196_v13, %v200_v15 }
  0x2f   :  { %v328_v17 = vld [vmem:[#allocation3 + $0x560] sm:$0xff]  ;;  %2520 = vmatpush1.bf16.msra.mxu1 %v9377_v19 }
  0x30   :  { %v9370_v21 = vcombine.high %v324_v16, %v328_v17  ;;  %v188_v22 = vld [vmem:[#allocation3 + $0x100] sm:$0xff]  ;;  %2238 = vmatprep.subr.bf16.mxu0 %v9242_v20  ;;  %v9369_v27 = vcombine.low %v324_v16, %v328_v17 }
  0x31   :  { %v192_v23 = vld [vmem:[#allocation3 + $0x120] sm:$0xff]  ;;  %2239 = vmatpush1.bf16.msra.mxu0 %v9241_v26 }
  0x32   :  { %v316_v24 = vld [vmem:[#allocation3 + $0x500] sm:$0xff]  ;;  %v9234_v28 = vcombine.high %v188_v22, %v192_v23  ;;  %2521 = vmatprep.subr.bf16.mxu1 %v9370_v21  ;;  %v9233_v34 = vcombine.low %v188_v22, %v192_v23 }
  0x33   :  { %v320_v25 = vld [vmem:[#allocation3 + $0x520] sm:$0xff]  ;;  %2522 = vmatpush1.bf16.msra.mxu1 %v9369_v27 }
  0x34   :  { %v9362_v29 = vcombine.high %v316_v24, %v320_v25  ;;  %v180_v30 = vld [vmem:[#allocation3 + $0xc0] sm:$0xff]  ;;  %2240 = vmatprep.subr.bf16.mxu0 %v9234_v28  ;;  %v9361_v35 = vcombine.low %v316_v24, %v320_v25 }
  0x35   :  { %v184_v31 = vld [vmem:[#allocation3 + $0xe0] sm:$0xff]  ;;  %2241 = vmatpush1.bf16.msra.mxu0 %v9233_v34 }
  0x36   :  { %v308_v32 = vld [vmem:[#allocation3 + $0x4c0] sm:$0xff]  ;;  %v9226_v36 = vcombine.high %v180_v30, %v184_v31  ;;  %2523 = vmatprep.subr.bf16.mxu1 %v9362_v29  ;;  %v9225_v42 = vcombine.low %v180_v30, %v184_v31 }
  0x37   :  { %v312_v33 = vld [vmem:[#allocation3 + $0x4e0] sm:$0xff]  ;;  %2524 = vmatpush1.bf16.msra.mxu1 %v9361_v35 }
  0x38   :  { %v9354_v37 = vcombine.high %v308_v32, %v312_v33  ;;  %v172_v38 = vld [vmem:[#allocation3 + $0x80] sm:$0xff]  ;;  %2242 = vmatprep.subr.bf16.mxu0 %v9226_v36  ;;  %v9353_v43 = vcombine.low %v308_v32, %v312_v33 }
  0x39   :  { %v176_v39 = vld [vmem:[#allocation3 + $0xa0] sm:$0xff]  ;;  %2243 = vmatpush1.bf16.msra.mxu0 %v9225_v42 }
  0x3a   :  { %v300_v40 = vld [vmem:[#allocation3 + $0x480] sm:$0xff]  ;;  %v9218_v44 = vcombine.high %v172_v38, %v176_v39  ;;  %2525 = vmatprep.subr.bf16.mxu1 %v9354_v37  ;;  %v9217_v50 = vcombine.low %v172_v38, %v176_v39 }
  0x3b   :  { %v304_v41 = vld [vmem:[#allocation3 + $0x4a0] sm:$0xff]  ;;  %2526 = vmatpush1.bf16.msra.mxu1 %v9353_v43 }
  0x3c   :  { %v9346_v45 = vcombine.high %v300_v40, %v304_v41  ;;  %v164_v46 = vld [vmem:[#allocation3 + $0x40] sm:$0xff]  ;;  %2244 = vmatprep.subr.bf16.mxu0 %v9218_v44  ;;  %v9345_v52 = vcombine.low %v300_v40, %v304_v41 }
  0x3d   :  { %v168_v47 = vld [vmem:[#allocation3 + $0x60] sm:$0xff]  ;;  %2245 = vmatpush1.bf16.msra.mxu0 %v9217_v50 }
  0x3e   :  { %v292_v48 = vld [vmem:[#allocation3 + $0x440] sm:$0xff]  ;;  %v9210_v53 = vcombine.high %v164_v46, %v168_v47  ;;  %2527 = vmatprep.subr.bf16.mxu1 %v9346_v45  ;;  %v9209_v60 = vcombine.low %v164_v46, %v168_v47 }
  0x3f   :  { %v296_v49 = vld [vmem:[#allocation3 + $0x460] sm:$0xff]  ;;  %2528 = vmatpush1.bf16.msra.mxu1 %v9345_v52 }
  0x40   :  { %v156_v51 = vld [vmem:[#allocation3] sm:$0xff]  ;;  %v9338_v55 = vcombine.high %v292_v48, %v296_v49  ;;  %2246 = vmatprep.subr.bf16.mxu0 %v9210_v53  ;;  %v9337_v61 = vcombine.low %v292_v48, %v296_v49 }
  0x41   :  { %v160_v54 = vld [vmem:[#allocation3 + $0x20] sm:$0xff]  ;;  %2247 = vmatpush1.bf16.msra.mxu0 %v9209_v60 }
  0x42   :  { %v10062_v56 = vld [vmem:[%s13795_s0 + $0x4] ss:$16 sps:$4 sm:$0xff]   ;;  %v9202_v62 = vcombine.high %v156_v51, %v160_v54  ;;  %2529 = vmatprep.subr.bf16.mxu1 %v9338_v55  ;;  %v9201_v4 = vcombine.low %v156_v51, %v160_v54 }
  0x43   :  { %v284_v57 = vld [vmem:[#allocation3 + $0x400] sm:$0xff]  ;;  %2266 = vmatprep.mubr.bf16.mxu0 %v10062_v56  ;;  %2530 = vmatpush1.bf16.msra.mxu1 %v9337_v61 }
  0x44   :  { %v288_v58 = vld [vmem:[#allocation3 + $0x420] sm:$0xff]  ;;  %2248 = vmatprep.subr.bf16.mxu0 %v9202_v62 }
  0x45   :  { %v276_v63 = vld [vmem:[#allocation3 + $0x3c0] sm:$0xff]  ;;  %v9330_v0 = vcombine.high %v284_v57, %v288_v58  ;;  %v9329_v5 = vcombine.low %v284_v57, %v288_v58  ;;  %2249 = vmatpush1.bf16.msra.mxu0 %v9201_v4 }
  0x46   :  { %v280_v1 = vld [vmem:[#allocation3 + $0x3e0] sm:$0xff] }
  0x47   :  { %v404_v2 = vld [vmem:[#allocation3 + $0x7c0] sm:$0xff]  ;;  %v9322_v6 = vcombine.high %v276_v63, %v280_v1  ;;  %2531 = vmatprep.subr.bf16.mxu1 %v9330_v0  ;;  %v9321_v12 = vcombine.low %v276_v63, %v280_v1  ;;  %v213_v63 = vld [vmem:[#allocation3 + $0x1c8] sm:$0xff] }
  0x48   :  { %v408_v3 = vld [vmem:[#allocation3 + $0x7e0] sm:$0xff]  ;;  %2532 = vmatpush1.bf16.msra.mxu1 %v9329_v5  ;;  %v217_v1 = vld [vmem:[#allocation3 + $0x1e8] sm:$0xff] }
  0x49   :  { %v9450_v7 = vcombine.high %v404_v2, %v408_v3  ;;  %v268_v8 = vld [vmem:[#allocation3 + $0x380] sm:$0xff]  ;;  %2250 = vmatprep.subr.bf16.mxu0 %v9322_v6  ;;  %v9449_v13 = vcombine.low %v404_v2, %v408_v3  ;;  %v341_v2 = vld [vmem:[#allocation3 + $0x5c8] sm:$0xff]  ;;  %v9260_v6 = vcombine.high %v213_v63, %v217_v1 }
  0x4a   :  { %v272_v9 = vld [vmem:[#allocation3 + $0x3a0] sm:$0xff]  ;;  %2251 = vmatpush2.bf16.msra.mxu0 %v9321_v12  ;;  %v345_v3 = vld [vmem:[#allocation3 + $0x5e8] sm:$0xff] }
  0x4b   :  { %v396_v10 = vld [vmem:[#allocation3 + $0x780] sm:$0xff]  ;;  %v9314_v14 = vcombine.high %v268_v8, %v272_v9  ;;  %2533 = vmatprep.subr.bf16.mxu1 %v9450_v7  ;;  %v9313_v20 = vcombine.low %v268_v8, %v272_v9  ;;  %v10792_v8 = vld [vmem:[%s13795_s0 + $0x8] ss:$16 sps:$4 sm:$0xff]   ;;  %v9388_v9 = vcombine.high %v341_v2, %v345_v3 }
  0x4c   :  { %v400_v11 = vld [vmem:[#allocation3 + $0x7a0] sm:$0xff]  ;;  %2534 = vmatpush2.bf16.msra.mxu1 %v9449_v13  ;;  %v333_v12 = vld [vmem:[#allocation3 + $0x588] sm:$0xff]  ;;  %v9259_v13 = vcombine.low %v213_v63, %v217_v1 }
  0x4d   :  { %v9442_v15 = vcombine.high %v396_v10, %v400_v11  ;;  %v260_v16 = vld [vmem:[#allocation3 + $0x340] sm:$0xff]  ;;  %2252 = vmatprep.subr.bf16.mxu0 %v9314_v14  ;;  %v9441_v21 = vcombine.low %v396_v10, %v400_v11  ;;  %v205_v10 = vld [vmem:[#allocation3 + $0x188] sm:$0xff] }
  0x4e   :  { %v264_v17 = vld [vmem:[#allocation3 + $0x360] sm:$0xff]  ;;  %2253 = vmatpush2.bf16.msra.mxu0 %v9313_v20  ;;  %v209_v11 = vld [vmem:[#allocation3 + $0x1a8] sm:$0xff] }
  0x4f   :  { %v388_v18 = vld [vmem:[#allocation3 + $0x740] sm:$0xff]  ;;  %v9306_v22 = vcombine.high %v260_v16, %v264_v17  ;;  %2535 = vmatprep.subr.bf16.mxu1 %v9442_v15  ;;  %v9305_v28 = vcombine.low %v260_v16, %v264_v17  ;;  %v337_v14 = vld [vmem:[#allocation3 + $0x5a8] sm:$0xff]  ;;  %v9387_v15 = vcombine.low %v341_v2, %v345_v3 }
  0x50   :  { %v392_v19 = vld [vmem:[#allocation3 + $0x760] sm:$0xff]  ;;  %2536 = vmatpush2.bf16.msra.mxu1 %v9441_v21  ;;  %v10802_v17 = vld [vmem:[%s13795_s0 + $0x2c] ss:$16 sps:$4 sm:$0xff]   ;;  %v9380_v21 = vcombine.high %v333_v12, %v337_v14  ;;  %v10085_v2 = vld [vmem:[%s13795_s0 + $0x68] ss:$16 sps:$4 sm:$0xff]  }
  0x51   :  { %v9434_v23 = vcombine.high %v388_v18, %v392_v19  ;;  %v252_v24 = vld [vmem:[#allocation3 + $0x300] sm:$0xff]  ;;  %2254 = vmatprep.subr.bf16.mxu0 %v9306_v22  ;;  %v9433_v29 = vcombine.low %v388_v18, %v392_v19  ;;  %v9252_v18 = vcombine.high %v205_v10, %v209_v11  ;;  %v197_v19 = vld [vmem:[#allocation3 + $0x148] sm:$0xff] }
  0x52   :  { %v256_v25 = vld [vmem:[#allocation3 + $0x320] sm:$0xff]  ;;  %2255 = vmatpush2.bf16.msra.mxu0 %v9305_v28  ;;  %v201_v20 = vld [vmem:[#allocation3 + $0x168] sm:$0xff] }
  0x53   :  { %v380_v26 = vld [vmem:[#allocation3 + $0x700] sm:$0xff]  ;;  %v9298_v30 = vcombine.high %v252_v24, %v256_v25  ;;  %2537 = vmatprep.subr.bf16.mxu1 %v9434_v23  ;;  %v9297_v36 = vcombine.low %v252_v24, %v256_v25  ;;  %v325_v22 = vld [vmem:[#allocation3 + $0x548] sm:$0xff]  ;;  %v9251_v24 = vcombine.low %v205_v10, %v209_v11 }
  0x54   :  { %v384_v27 = vld [vmem:[#allocation3 + $0x720] sm:$0xff]  ;;  %2538 = vmatpush2.bf16.msra.mxu1 %v9433_v29  ;;  %v329_v23 = vld [vmem:[#allocation3 + $0x568] sm:$0xff] }
  0x55   :  { %v244_v31 = vld [vmem:[#allocation3 + $0x2c0] sm:$0xff]  ;;  %v9426_v32 = vcombine.high %v380_v26, %v384_v27  ;;  %2256 = vmatprep.subr.bf16.mxu0 %v9298_v30  ;;  %v9425_v37 = vcombine.low %v380_v26, %v384_v27  ;;  %v9379_v26 = vcombine.low %v333_v12, %v337_v14  ;;  %v9244_v27 = vcombine.high %v197_v19, %v201_v20  ;;  %v10816_v28 = vld [vmem:[%s13795_s0 + $0x28] ss:$16 sps:$4 sm:$0xff]  }
  0x56   :  { %v248_v33 = vld [vmem:[#allocation3 + $0x2e0] sm:$0xff]  ;;  %2257 = vmatpush2.bf16.msra.mxu0 %v9297_v36  ;;  %v9372_v30 = vcombine.high %v325_v22, %v329_v23  ;;  %v9243_v36 = vcombine.low %v197_v19, %v201_v20  ;;  %v297_v63 = vld [vmem:[#allocation3 + $0x468] sm:$0xff] }
  0x57   :  { %v372_v34 = vld [vmem:[#allocation3 + $0x6c0] sm:$0xff]  ;;  %v9290_v38 = vcombine.high %v244_v31, %v248_v33  ;;  %2539 = vmatprep.subr.bf16.mxu1 %v9426_v32  ;;  %v9289_v44 = vcombine.low %v244_v31, %v248_v33  ;;  %v189_v31 = vld [vmem:[#allocation3 + $0x108] sm:$0xff] }
  0x58   :  { %v376_v35 = vld [vmem:[#allocation3 + $0x6e0] sm:$0xff]  ;;  %2540 = vmatpush2.bf16.msra.mxu1 %v9425_v37  ;;  %v193_v32 = vld [vmem:[#allocation3 + $0x128] sm:$0xff]  ;;  %v9371_v37 = vcombine.low %v325_v22, %v329_v23 }
  0x59   :  { %v236_v39 = vld [vmem:[#allocation3 + $0x280] sm:$0xff]  ;;  %v9418_v40 = vcombine.high %v372_v34, %v376_v35  ;;  %2258 = vmatprep.subr.bf16.mxu0 %v9290_v38  ;;  %v9417_v45 = vcombine.low %v372_v34, %v376_v35  ;;  %v317_v33 = vld [vmem:[#allocation3 + $0x508] sm:$0xff]  ;;  %v9236_v38 = vcombine.high %v189_v31, %v193_v32 }
  0x5a   :  { %v240_v41 = vld [vmem:[#allocation3 + $0x2a0] sm:$0xff]  ;;  %2259 = vmatpush2.bf16.msra.mxu0 %v9289_v44  ;;  %v321_v34 = vld [vmem:[#allocation3 + $0x528] sm:$0xff] }
  0x5b   :  { %v364_v42 = vld [vmem:[#allocation3 + $0x680] sm:$0xff]  ;;  %v9282_v46 = vcombine.high %v236_v39, %v240_v41  ;;  %2541 = vmatprep.subr.bf16.mxu1 %v9418_v40  ;;  %v9281_v52 = vcombine.low %v236_v39, %v240_v41  ;;  %v10826_v35 = vld [vmem:[%s13795_s0 + $0x4c] ss:$16 sps:$4 sm:$0xff]   ;;  %v9364_v40 = vcombine.high %v317_v33, %v321_v34 }
  0x5c   :  { %v368_v43 = vld [vmem:[#allocation3 + $0x6a0] sm:$0xff]  ;;  %2542 = vmatpush2.bf16.msra.mxu1 %v9417_v45  ;;  %v181_v39 = vld [vmem:[#allocation3 + $0xc8] sm:$0xff]  ;;  %v9235_v45 = vcombine.low %v189_v31, %v193_v32 }
  0x5d   :  { %v228_v47 = vld [vmem:[#allocation3 + $0x240] sm:$0xff]  ;;  %v9410_v48 = vcombine.high %v364_v42, %v368_v43  ;;  %2260 = vmatprep.subr.bf16.mxu0 %v9282_v46  ;;  %v9409_v53 = vcombine.low %v364_v42, %v368_v43  ;;  %v185_v41 = vld [vmem:[#allocation3 + $0xe8] sm:$0xff] }
  0x5e   :  { %v232_v49 = vld [vmem:[#allocation3 + $0x260] sm:$0xff]  ;;  %2261 = vmatpush2.bf16.msra.mxu0 %v9281_v52  ;;  %v309_v42 = vld [vmem:[#allocation3 + $0x4c8] sm:$0xff] }
  0x5f   :  { %v356_v50 = vld [vmem:[#allocation3 + $0x640] sm:$0xff]  ;;  %v9274_v54 = vcombine.high %v228_v47, %v232_v49  ;;  %2543 = vmatprep.subr.bf16.mxu1 %v9410_v48  ;;  %v9273_v60 = vcombine.low %v228_v47, %v232_v49  ;;  %v313_v43 = vld [vmem:[#allocation3 + $0x4e8] sm:$0xff]  ;;  %v9363_v47 = vcombine.low %v317_v33, %v321_v34  ;;  %v9228_v48 = vcombine.high %v181_v39, %v185_v41 }
  0x60   :  { %v360_v51 = vld [vmem:[#allocation3 + $0x660] sm:$0xff]  ;;  %2544 = vmatpush2.bf16.msra.mxu1 %v9409_v53  ;;  %v10840_v46 = vld [vmem:[%s13795_s0 + $0x48] ss:$16 sps:$4 sm:$0xff]  }
  0x61   :  { %v220_v55 = vld [vmem:[#allocation3 + $0x200] sm:$0xff]  ;;  %v9402_v56 = vcombine.high %v356_v50, %v360_v51  ;;  %2262 = vmatprep.subr.bf16.mxu0 %v9274_v54  ;;  %v9401_v61 = vcombine.low %v356_v50, %v360_v51  ;;  %v173_v49 = vld [vmem:[#allocation3 + $0x88] sm:$0xff]  ;;  %v9356_v50 = vcombine.high %v309_v42, %v313_v43 }
  0x62   :  { %v224_v57 = vld [vmem:[#allocation3 + $0x220] sm:$0xff]  ;;  %2263 = vmatpush2.bf16.msra.mxu0 %v9273_v60  ;;  %v177_v51 = vld [vmem:[#allocation3 + $0xa8] sm:$0xff] }
  0x63   :  { %v348_v58 = vld [vmem:[#allocation3 + $0x600] sm:$0xff]  ;;  %v9266_v62 = vcombine.high %v220_v55, %v224_v57  ;;  %2545 = vmatprep.subr.bf16.mxu1 %v9402_v56  ;;  %v9265_v4 = vcombine.low %v220_v55, %v224_v57  ;;  %v301_v53 = vld [vmem:[#allocation3 + $0x488] sm:$0xff]  ;;  %v9227_v56 = vcombine.low %v181_v39, %v185_v41  ;;  %v9355_v57 = vcombine.low %v309_v42, %v313_v43 }
  0x64   :  { %v352_v59 = vld [vmem:[#allocation3 + $0x620] sm:$0xff]  ;;  %2546 = vmatpush2.bf16.msra.mxu1 %v9401_v61  ;;  %v305_v54 = vld [vmem:[#allocation3 + $0x4a8] sm:$0xff]  ;;  %v9219_v1 = vcombine.low %v173_v49, %v177_v51 }
  0x65   :  { %v9394_v0 = vcombine.high %v348_v58, %v352_v59  ;;  %2264 = vmatprep.subr.bf16.mxu0 %v9266_v62  ;;  %v9393_v5 = vcombine.low %v348_v58, %v352_v59  ;;  %v10787_v7 = vld [vmem:[%s13795_s0] ss:$16 sps:$4 sm:$0xff]   ;;  %v10797_v16 = vld [vmem:[%s13795_s0 + $0x24] ss:$16 sps:$4 sm:$0xff]   ;;  %v10850_v55 = vld [vmem:[%s13795_s0 + $0x6c] ss:$16 sps:$4 sm:$0xff]   ;;  %v9220_v58 = vcombine.high %v173_v49, %v177_v51  ;;  %v9348_v59 = vcombine.high %v301_v53, %v305_v54 }
  0x66   :  { %2265 = vmatpush2.bf16.msra.mxu0 %v9265_v4  ;;  %v10810_v25 = vld [vmem:[%s13795_s0 + $0x20] ss:$16 sps:$4 sm:$0xff]   ;;  %v10821_v29 = vld [vmem:[%s13795_s0 + $0x44] ss:$16 sps:$4 sm:$0xff]   ;;  %v165_v60 = vld [vmem:[#allocation3 + $0x48] sm:$0xff]  ;;  %v9347_v3 = vcombine.low %v301_v53, %v305_v54 }
  0x67   :  { %2547 = vmatprep.subr.bf16.mxu1 %v9394_v0  ;;  %2800 = vmatprep.subr.bf16.mxu0 %v9260_v6  ;;  %v10835_v44 = vld [vmem:[%s13795_s0 + $0x40] ss:$16 sps:$4 sm:$0xff]   ;;  %v10845_v52 = vld [vmem:[%s13795_s0 + $0x64] ss:$16 sps:$4 sm:$0xff]   ;;  %v169_v61 = vld [vmem:[#allocation3 + $0x68] sm:$0xff] }
  0x68   :  { %2548 = vmatpush2.bf16.msra.mxu1 %v9393_v5  ;;  %v293_v62 = vld [vmem:[#allocation3 + $0x448] sm:$0xff]  ;;  %v10859_v0 = vld [vmem:[%s13795_s0 + $0x60] ss:$16 sps:$4 sm:$0xff]   ;;  %v9212_v4 = vcombine.high %v165_v60, %v169_v61  ;;  %v10867_v5 = vld [vmem:[%s13795_s0 + $0x84] ss:$16 sps:$4 sm:$0xff]   ;;  %v9211_v14 = vcombine.low %v165_v60, %v169_v61 }
  0x69   :  { %3083 = vmatprep.subr.bf16.mxu1 %v9388_v9  ;;  %2267 = vmatmul.mubr.bf16.vlgmr.msra.gmra.mxu0 %v10787_v7  ;;  %v9340_v6 = vcombine.high %v293_v62, %v297_v63  ;;  %v157_v9 = vld [vmem:[#allocation3 + $0x8] sm:$0xff]  ;;  %v10092_v32 = vld [vmem:[%s13795_s0 + $0xa4] ss:$16 sps:$4 sm:$0xff]   ;;  %v10892_v51 = vld [vmem:[%s13795_s0 + $0xa0] ss:$16 sps:$4 sm:$0xff]  }
  0x6a   :  { %2801 = vmatpush1.bf16.msra.mxu0 %v9259_v13  ;;  %2276 = vmatprep.mubr.bf16.mxu0 %v10797_v16  ;;  %v161_v10 = vld [vmem:[#allocation3 + $0x28] sm:$0xff]  ;;  %v10900_v60 = vld [vmem:[%s13795_s0 + $0xc4] ss:$16 sps:$4 sm:$0xff]  }
  0x6b   :  { %2550 = vmatmul.mubr.bf16.vlgmr.msra.gmra.mxu1 %v10792_v8  ;;  %2802 = vmatprep.subr.bf16.mxu0 %v9252_v18  ;;  %v285_v11 = vld [vmem:[#allocation3 + $0x408] sm:$0xff]  ;;  %v9204_v18 = vcombine.high %v157_v9, %v161_v10 }
  0x6c   :  { %3084 = vmatpush1.bf16.msra.mxu1 %v9387_v15  ;;  %2559 = vmatprep.mubr.bf16.mxu1 %v10802_v17  ;;  %v289_v12 = vld [vmem:[#allocation3 + $0x428] sm:$0xff]  ;;  %v9339_v15 = vcombine.low %v293_v62, %v297_v63 }
  0x6d   :  { %3085 = vmatprep.subr.bf16.mxu1 %v9380_v21  ;;  %v10872_v13 = vld [vmem:[%s13795_s0 + $0x8c] ss:$16 sps:$4 sm:$0xff]   ;;  %v9332_v20 = vcombine.high %v285_v11, %v289_v12  ;;  %v10091_v31 = vld [vmem:[%s13795_s0 + $0x88] ss:$16 sps:$4 sm:$0xff]   ;;  %v9331_v33 = vcombine.low %v285_v11, %v289_v12 }
  0x6e   :  { %2803 = vmatpush1.bf16.msra.mxu0 %v9251_v24  ;;  %v277_v19 = vld [vmem:[#allocation3 + $0x3c8] sm:$0xff]  ;;  %v10090_v24 = vld [vmem:[%s13795_s0 + $0x80] ss:$16 sps:$4 sm:$0xff]  }
  0x6f   :  { %2804 = vmatprep.subr.bf16.mxu0 %v9244_v27  ;;  %v281_v21 = vld [vmem:[#allocation3 + $0x3e8] sm:$0xff] }
  0x70   :  { %3086 = vmatpush1.bf16.msra.mxu1 %v9379_v26  ;;  %v405_v22 = vld [vmem:[#allocation3 + $0x7c8] sm:$0xff]  ;;  %v9203_v26 = vcombine.low %v157_v9, %v161_v10  ;;  %v9324_v34 = vcombine.high %v277_v19, %v281_v21 }
  0x71   :  { %3087 = vmatprep.subr.bf16.mxu1 %v9372_v30  ;;  %2277 = vmatmul.mubr.bf16.gmra.mxu0 %v10810_v25  ;;  %v409_v23 = vld [vmem:[#allocation3 + $0x7e8] sm:$0xff] }
  0x72   :  { %2286 = vmatprep.mubr.bf16.mxu0 %v10821_v29  ;;  %2805 = vmatpush1.bf16.msra.mxu0 %v9243_v36  ;;  %v269_v27 = vld [vmem:[#allocation3 + $0x388] sm:$0xff]  ;;  %v9452_v39 = vcombine.high %v405_v22, %v409_v23  ;;  %v9451_v42 = vcombine.low %v405_v22, %v409_v23  ;;  %v10104_v23 = vld [vmem:[%s13795_s0 + $0xe4] ss:$16 sps:$4 sm:$0xff]  }
  0x73   :  { %2560 = vmatmul.mubr.bf16.gmra.mxu1 %v10816_v28  ;;  %2806 = vmatprep.subr.bf16.mxu0 %v9236_v38  ;;  %v273_v30 = vld [vmem:[#allocation3 + $0x3a8] sm:$0xff] }
  0x74   :  { %2569 = vmatprep.mubr.bf16.mxu1 %v10826_v35  ;;  %3088 = vmatpush1.bf16.msra.mxu1 %v9371_v37  ;;  %v397_v36 = vld [vmem:[#allocation3 + $0x788] sm:$0xff]  ;;  %v9316_v43 = vcombine.high %v269_v27, %v273_v30 }
  0x75   :  { %3089 = vmatprep.subr.bf16.mxu1 %v9364_v40  ;;  %v401_v37 = vld [vmem:[#allocation3 + $0x7a8] sm:$0xff]  ;;  %v9323_v40 = vcombine.low %v277_v19, %v281_v21 }
  0x76   :  { %2807 = vmatpush1.bf16.msra.mxu0 %v9235_v45  ;;  %v10094_v38 = vld [vmem:[%s13795_s0 + $0xac] ss:$16 sps:$4 sm:$0xff]   ;;  %v9443_v53 = vcombine.low %v397_v36, %v401_v37  ;;  %v10103_v19 = vld [vmem:[%s13795_s0 + $0xc8] ss:$16 sps:$4 sm:$0xff]  }
  0x77   :  { %2808 = vmatprep.subr.bf16.mxu0 %v9228_v48  ;;  %v261_v41 = vld [vmem:[#allocation3 + $0x348] sm:$0xff] }
  0x78   :  { %3090 = vmatpush1.bf16.msra.mxu1 %v9363_v47  ;;  %v265_v45 = vld [vmem:[#allocation3 + $0x368] sm:$0xff]  ;;  %v9444_v47 = vcombine.high %v397_v36, %v401_v37 }
  0x79   :  { %2287 = vmatmul.mubr.bf16.gmra.mxu0 %v10835_v44  ;;  %3091 = vmatprep.subr.bf16.mxu1 %v9356_v50  ;;  %v389_v48 = vld [vmem:[#allocation3 + $0x748] sm:$0xff]  ;;  %v9315_v50 = vcombine.low %v269_v27, %v273_v30  ;;  %v9308_v54 = vcombine.high %v261_v41, %v265_v45 }
  0x7a   :  { %2296 = vmatprep.mubr.bf16.mxu0 %v10845_v52  ;;  %2809 = vmatpush1.bf16.msra.mxu0 %v9227_v56  ;;  %v393_v49 = vld [vmem:[#allocation3 + $0x768] sm:$0xff] }
  0x7b   :  { %2570 = vmatmul.mubr.bf16.gmra.mxu1 %v10840_v46  ;;  %2810 = vmatprep.subr.bf16.mxu0 %v9220_v58  ;;  %v10097_v56 = vld [vmem:[%s13795_s0 + $0xa8] ss:$16 sps:$4 sm:$0xff]   ;;  %v10100_v63 = vld [vmem:[%s13795_s0 + $0xcc] ss:$16 sps:$4 sm:$0xff]  }
  0x7c   :  { %2579 = vmatprep.mubr.bf16.mxu1 %v10850_v55  ;;  %3092 = vmatpush1.bf16.msra.mxu1 %v9355_v57  ;;  %v9436_v57 = vcombine.high %v389_v48, %v393_v49  ;;  %v253_v58 = vld [vmem:[#allocation3 + $0x308] sm:$0xff] }
  0x7d   :  { %3093 = vmatprep.subr.bf16.mxu1 %v9348_v59  ;;  %v257_v59 = vld [vmem:[#allocation3 + $0x328] sm:$0xff] }
  0x7e   :  { %2811 = vmatpush1.bf16.msra.mxu0 %v9219_v1  ;;  %v381_v61 = vld [vmem:[#allocation3 + $0x708] sm:$0xff]  ;;  %v9307_v1 = vcombine.low %v261_v41, %v265_v45  ;;  %v9299_v12 = vcombine.low %v253_v58, %v257_v59 }
  0x7f   :  { %2812 = vmatprep.subr.bf16.mxu0 %v9212_v4  ;;  %v385_v62 = vld [vmem:[#allocation3 + $0x728] sm:$0xff] }
  0x80   :  { %3094 = vmatpush1.bf16.msra.mxu1 %v9347_v3  ;;  %v9300_v3 = vcombine.high %v253_v58, %v257_v59  ;;  %v9428_v4 = vcombine.high %v381_v61, %v385_v62  ;;  %v249_v9 = vld [vmem:[#allocation3 + $0x2e8] sm:$0xff] }
  0x81   :  { %2297 = vmatmul.mubr.bf16.gmra.mxu0 %v10859_v0  ;;  %3095 = vmatprep.subr.bf16.mxu1 %v9340_v6  ;;  %v245_v6 = vld [vmem:[#allocation3 + $0x2c8] sm:$0xff] }
  0x82   :  { %2306 = vmatprep.mubr.bf16.mxu0 %v10867_v5  ;;  %2813 = vmatpush1.bf16.msra.mxu0 %v9211_v14  ;;  %v373_v10 = vld [vmem:[#allocation3 + $0x6c8] sm:$0xff]  ;;  %v10102_v14 = vld [vmem:[%s13795_s0 + $0xc0] ss:$16 sps:$4 sm:$0xff]   ;;  %v9291_v30 = vcombine.low %v245_v6, %v249_v9 }
  0x83   :  { %2580 = vmatmul.mubr.bf16.gmra.mxu1 %v10085_v2  ;;  %2814 = vmatprep.subr.bf16.mxu0 %v9204_v18  ;;  %v9435_v2 = vcombine.low %v389_v48, %v393_v49  ;;  %v377_v11 = vld [vmem:[#allocation3 + $0x6e8] sm:$0xff]  ;;  %v9292_v18 = vcombine.high %v245_v6, %v249_v9  ;;  %v10122_v9 = vld [vmem:[%s13795_s0 + $0x144] ss:$16 sps:$4 sm:$0xff]  }
  0x84   :  { %2589 = vmatprep.mubr.bf16.mxu1 %v10872_v13  ;;  %3096 = vmatpush1.bf16.msra.mxu1 %v9339_v15  ;;  %v9427_v15 = vcombine.low %v381_v61, %v385_v62  ;;  %v237_v21 = vld [vmem:[#allocation3 + $0x288] sm:$0xff] }
  0x85   :  { %3097 = vmatprep.subr.bf16.mxu1 %v9332_v20  ;;  %v9420_v20 = vcombine.high %v373_v10, %v377_v11  ;;  %v241_v22 = vld [vmem:[#allocation3 + $0x2a8] sm:$0xff] }
  0x86   :  { %2815 = vmatpush1.bf16.msra.mxu0 %v9203_v26  ;;  %v369_v26 = vld [vmem:[#allocation3 + $0x6a8] sm:$0xff] }
  0x87   :  { %2816 = vmatprep.subr.bf16.mxu0 %v9324_v34  ;;  %v10106_v27 = vld [vmem:[%s13795_s0 + $0xec] ss:$16 sps:$4 sm:$0xff]   ;;  %v10109_v45 = vld [vmem:[%s13795_s0 + $0xe8] ss:$16 sps:$4 sm:$0xff]  }
  0x88   :  { %3098 = vmatpush1.bf16.msra.mxu1 %v9331_v33  ;;  %v229_v34 = vld [vmem:[#allocation3 + $0x248] sm:$0xff] }
  0x89   :  { %2307 = vmatmul.mubr.bf16.gmra.mxu0 %v10090_v24  ;;  %3099 = vmatprep.subr.bf16.mxu1 %v9452_v39  ;;  %v365_v24 = vld [vmem:[#allocation3 + $0x688] sm:$0xff]  ;;  %v9283_v39 = vcombine.low %v237_v21, %v241_v22 }
  0x8a   :  { %2316 = vmatprep.mubr.bf16.mxu0 %v10092_v32  ;;  %2817 = vmatpush2.bf16.msra.mxu0 %v9323_v40  ;;  %v9284_v32 = vcombine.high %v237_v21, %v241_v22  ;;  %v9412_v33 = vcombine.high %v365_v24, %v369_v26  ;;  %v233_v36 = vld [vmem:[#allocation3 + $0x268] sm:$0xff]  ;;  %v9411_v40 = vcombine.low %v365_v24, %v369_v26  ;;  %v10975_v22 = vld [vmem:[#allocation3 + $0x5d0] sm:$0xff] }
  0x8b   :  { %2590 = vmatmul.mubr.bf16.gmra.mxu1 %v10091_v31  ;;  %2818 = vmatprep.subr.bf16.mxu0 %v9316_v43  ;;  %v9419_v31 = vcombine.low %v373_v10, %v377_v11  ;;  %v357_v37 = vld [vmem:[#allocation3 + $0x648] sm:$0xff]  ;;  %v9276_v41 = vcombine.high %v229_v34, %v233_v36  ;;  %v9275_v49 = vcombine.low %v229_v34, %v233_v36  ;;  %v10126_v11 = vld [vmem:[%s13795_s0 + $0x140] ss:$16 sps:$4 sm:$0xff]   ;;  %v10140_v36 = vld [vmem:[%s13795_s0 + $0x1a4] ss:$16 sps:$4 sm:$0xff]  }
  0x8c   :  { %2599 = vmatprep.mubr.bf16.mxu1 %v10094_v38  ;;  %3100 = vmatpush2.bf16.msra.mxu1 %v9451_v42  ;;  %v361_v38 = vld [vmem:[#allocation3 + $0x668] sm:$0xff]  ;;  %v10108_v42 = vld [vmem:[%s13795_s0 + $0xe0] ss:$16 sps:$4 sm:$0xff]  }
  0x8d   :  { %3101 = vmatprep.subr.bf16.mxu1 %v9444_v47  ;;  %v9404_v43 = vcombine.high %v357_v37, %v361_v38  ;;  %v10110_v47 = vld [vmem:[%s13795_s0 + $0x104] ss:$16 sps:$4 sm:$0xff]   ;;  %v10112_v48 = vld [vmem:[%s13795_s0 + $0x10c] ss:$16 sps:$4 sm:$0xff]   ;;  %v10121_v6 = vld [vmem:[%s13795_s0 + $0x128] ss:$16 sps:$4 sm:$0xff]  }
  0x8e   :  { %2819 = vmatpush2.bf16.msra.mxu0 %v9315_v50  ;;  %v9403_v50 = vcombine.low %v357_v37, %v361_v38  ;;  %v353_v59 = vld [vmem:[#allocation3 + $0x628] sm:$0xff]  ;;  %v10144_v38 = vld [vmem:[%s13795_s0 + $0x1a0] ss:$16 sps:$4 sm:$0xff]  }
  0x8f   :  { %2820 = vmatprep.subr.bf16.mxu0 %v9308_v54  ;;  %v225_v54 = vld [vmem:[#allocation3 + $0x228] sm:$0xff] }
  0x90   :  { %3102 = vmatpush2.bf16.msra.mxu1 %v9443_v53  ;;  %v221_v53 = vld [vmem:[#allocation3 + $0x208] sm:$0xff] }
  0x91   :  { %2317 = vmatmul.mubr.bf16.gmra.mxu0 %v10892_v51  ;;  %3103 = vmatprep.subr.bf16.mxu1 %v9436_v57  ;;  %v9267_v57 = vcombine.low %v221_v53, %v225_v54  ;;  %v9268_v58 = vcombine.high %v221_v53, %v225_v54  ;;  %v10124_v10 = vld [vmem:[%s13795_s0 + $0x14c] ss:$16 sps:$4 sm:$0xff]   ;;  %v10139_v34 = vld [vmem:[%s13795_s0 + $0x188] ss:$16 sps:$4 sm:$0xff]   ;;  %v10162_v54 = vld [vmem:[%s13795_s0 + $0x200] ss:$16 sps:$4 sm:$0xff]  }
  0x92   :  { %2326 = vmatprep.mubr.bf16.mxu0 %v10900_v60  ;;  %2821 = vmatpush2.bf16.msra.mxu0 %v9307_v1  ;;  %v10115_v1 = vld [vmem:[%s13795_s0 + $0x108] ss:$16 sps:$4 sm:$0xff]   ;;  %v10142_v37 = vld [vmem:[%s13795_s0 + $0x1ac] ss:$16 sps:$4 sm:$0xff]  }
  0x93   :  { %2600 = vmatmul.mubr.bf16.gmra.mxu1 %v10097_v56  ;;  %2822 = vmatprep.subr.bf16.mxu0 %v9300_v3  ;;  %v349_v56 = vld [vmem:[#allocation3 + $0x608] sm:$0xff] }
  0x94   :  { %2609 = vmatprep.mubr.bf16.mxu1 %v10100_v63  ;;  %3104 = vmatpush2.bf16.msra.mxu1 %v9435_v2  ;;  %v9395_v61 = vcombine.low %v349_v56, %v353_v59  ;;  %v9396_v62 = vcombine.high %v349_v56, %v353_v59  ;;  %v10114_v63 = vld [vmem:[%s13795_s0 + $0x100] ss:$16 sps:$4 sm:$0xff]   ;;  %v10116_v2 = vld [vmem:[%s13795_s0 + $0x124] ss:$16 sps:$4 sm:$0xff]   ;;  %v10118_v3 = vld [vmem:[%s13795_s0 + $0x12c] ss:$16 sps:$4 sm:$0xff]  }
  0x95   :  { %3105 = vmatprep.subr.bf16.mxu1 %v9428_v4  ;;  %v10120_v4 = vld [vmem:[%s13795_s0 + $0x120] ss:$16 sps:$4 sm:$0xff]   ;;  %v10160_v53 = vld [vmem:[%s13795_s0 + $0x20c] ss:$16 sps:$4 sm:$0xff]   ;;  %v10163_v56 = vld [vmem:[%s13795_s0 + $0x208] ss:$16 sps:$4 sm:$0xff]  }
  0x96   :  { %2823 = vmatpush2.bf16.msra.mxu0 %v9299_v12  ;;  %v10127_v12 = vld [vmem:[%s13795_s0 + $0x148] ss:$16 sps:$4 sm:$0xff]   ;;  %v10168_v59 = vld [vmem:[%s13795_s0 + $0x220] ss:$16 sps:$4 sm:$0xff]  }
  0x97   :  { %2824 = vmatprep.subr.bf16.mxu0 %v9292_v18  ;;  %v10966_v18 = vld [vmem:[#allocation3 + $0x1f0] sm:$0xff] }
  0x98   :  { %3106 = vmatpush2.bf16.msra.mxu1 %v9427_v15  ;;  %v10964_v15 = vld [vmem:[#allocation3 + $0x1d0] sm:$0xff] }
  0x99   :  { %2327 = vmatmul.mubr.bf16.gmra.mxu0 %v10102_v14  ;;  %3107 = vmatprep.subr.bf16.mxu1 %v9420_v20  ;;  %v10128_v14 = vld [vmem:[%s13795_s0 + $0x164] ss:$16 sps:$4 sm:$0xff]   ;;  %v9261_v20 = vcombine.low %v10964_v15, %v10966_v18  ;;  %v9262_v21 = vcombine.high %v10964_v15, %v10966_v18 }
  0x9a   :  { %2336 = vmatprep.mubr.bf16.mxu0 %v10104_v23  ;;  %2825 = vmatpush2.bf16.msra.mxu0 %v9291_v30  ;;  %v10977_v23 = vld [vmem:[#allocation3 + $0x5f0] sm:$0xff]  ;;  %v10133_v30 = vld [vmem:[%s13795_s0 + $0x168] ss:$16 sps:$4 sm:$0xff]  }
  0x9b   :  { %2610 = vmatmul.mubr.bf16.gmra.mxu1 %v10103_v19  ;;  %2826 = vmatprep.subr.bf16.mxu0 %v9284_v32  ;;  %v10130_v19 = vld [vmem:[%s13795_s0 + $0x16c] ss:$16 sps:$4 sm:$0xff]   ;;  %v9389_v24 = vcombine.low %v10975_v22, %v10977_v23  ;;  %v9390_v26 = vcombine.high %v10975_v22, %v10977_v23  ;;  %v194_v22 = vld [vmem:[#allocation3 + $0x130] sm:$0xff] }
  0x9c   :  { %2619 = vmatprep.mubr.bf16.mxu1 %v10106_v27  ;;  %3108 = vmatpush2.bf16.msra.mxu1 %v9419_v31  ;;  %v10132_v27 = vld [vmem:[%s13795_s0 + $0x160] ss:$16 sps:$4 sm:$0xff]   ;;  %v10134_v31 = vld [vmem:[%s13795_s0 + $0x184] ss:$16 sps:$4 sm:$0xff]   ;;  %v10136_v32 = vld [vmem:[%s13795_s0 + $0x18c] ss:$16 sps:$4 sm:$0xff]  }
  0x9d   :  { %3109 = vmatprep.subr.bf16.mxu1 %v9412_v33  ;;  %v10138_v33 = vld [vmem:[%s13795_s0 + $0x180] ss:$16 sps:$4 sm:$0xff]  }
  0x9e   :  { %2827 = vmatpush2.bf16.msra.mxu0 %v9283_v39  ;;  %v10145_v39 = vld [vmem:[%s13795_s0 + $0x1a8] ss:$16 sps:$4 sm:$0xff]  }
  0x9f   :  { %2828 = vmatprep.subr.bf16.mxu0 %v9276_v41  ;;  %v10148_v41 = vld [vmem:[%s13795_s0 + $0x1cc] ss:$16 sps:$4 sm:$0xff]  }
  0xa0   :  { %3110 = vmatpush2.bf16.msra.mxu1 %v9411_v40  ;;  %v10146_v40 = vld [vmem:[%s13795_s0 + $0x1c4] ss:$16 sps:$4 sm:$0xff]  }
  0xa1   :  { %2337 = vmatmul.mubr.bf16.gmra.mxu0 %v10108_v42  ;;  %3111 = vmatprep.subr.bf16.mxu1 %v9404_v43  ;;  %v10150_v42 = vld [vmem:[%s13795_s0 + $0x1c0] ss:$16 sps:$4 sm:$0xff]   ;;  %v10151_v43 = vld [vmem:[%s13795_s0 + $0x1c8] ss:$16 sps:$4 sm:$0xff]  }
  0xa2   :  { %2346 = vmatprep.mubr.bf16.mxu0 %v10110_v47  ;;  %2829 = vmatpush2.bf16.msra.mxu0 %v9275_v49  ;;  %v10154_v47 = vld [vmem:[%s13795_s0 + $0x1ec] ss:$16 sps:$4 sm:$0xff]   ;;  %v10157_v49 = vld [vmem:[%s13795_s0 + $0x1e8] ss:$16 sps:$4 sm:$0xff]  }
  0xa3   :  { %2620 = vmatmul.mubr.bf16.gmra.mxu1 %v10109_v45  ;;  %2830 = vmatprep.subr.bf16.mxu0 %v9268_v58  ;;  %v10152_v45 = vld [vmem:[%s13795_s0 + $0x1e4] ss:$16 sps:$4 sm:$0xff]   ;;  %v10166_v58 = vld [vmem:[%s13795_s0 + $0x22c] ss:$16 sps:$4 sm:$0xff]  }
  0xa4   :  { %2629 = vmatprep.mubr.bf16.mxu1 %v10112_v48  ;;  %3112 = vmatpush2.bf16.msra.mxu1 %v9403_v50  ;;  %v10156_v48 = vld [vmem:[%s13795_s0 + $0x1e0] ss:$16 sps:$4 sm:$0xff]   ;;  %v10158_v50 = vld [vmem:[%s13795_s0 + $0x204] ss:$16 sps:$4 sm:$0xff]  }
  0xa5   :  { %3113 = vmatprep.subr.bf16.mxu1 %v9396_v62  ;;  %v10170_v62 = vld [vmem:[%s13795_s0 + $0x244] ss:$16 sps:$4 sm:$0xff]  }
  0xa6   :  { %2831 = vmatpush2.bf16.msra.mxu0 %v9267_v57  ;;  %v10164_v57 = vld [vmem:[%s13795_s0 + $0x224] ss:$16 sps:$4 sm:$0xff]  }
  0xa7   :  { %3366 = vmatprep.subr.bf16.mxu0 %v9262_v21  ;;  %v10190_v21 = vld [vmem:[%s13795_s0 + $0x2ac] ss:$16 sps:$4 sm:$0xff]  }
  0xa8   :  { %3114 = vmatpush2.bf16.msra.mxu1 %v9395_v61  ;;  %v10169_v61 = vld [vmem:[%s13795_s0 + $0x228] ss:$16 sps:$4 sm:$0xff]  }
  0xa9   :  { %2347 = vmatmul.mubr.bf16.gmra.mxu0 %v10114_v63  ;;  %3649 = vmatprep.subr.bf16.mxu1 %v9390_v26  ;;  %v10172_v63 = vld [vmem:[%s13795_s0 + $0x24c] ss:$16 sps:$4 sm:$0xff]   ;;  %v10192_v26 = vld [vmem:[%s13795_s0 + $0x2a0] ss:$16 sps:$4 sm:$0xff]  }
  0xaa   :  { %2356 = vmatprep.mubr.bf16.mxu0 %v10116_v2  ;;  %v10175_v2 = vld [vmem:[%s13795_s0 + $0x248] ss:$16 sps:$4 sm:$0xff]  }
  0xab   :  { %2630 = vmatmul.mubr.bf16.gmra.mxu1 %v10115_v1  ;;  %v10174_v1 = vld [vmem:[%s13795_s0 + $0x240] ss:$16 sps:$4 sm:$0xff]  }
  0xac   :  { %2639 = vmatprep.mubr.bf16.mxu1 %v10118_v3  ;;  %v10176_v3 = vld [vmem:[%s13795_s0 + $0x264] ss:$16 sps:$4 sm:$0xff]  }
  0xb1   :  { %2357 = vmatmul.mubr.bf16.gmra.mxu0 %v10120_v4  ;;  %v10178_v4 = vld [vmem:[%s13795_s0 + $0x26c] ss:$16 sps:$4 sm:$0xff]  }
  0xb2   :  { %2366 = vmatprep.mubr.bf16.mxu0 %v10122_v9  ;;  %v10181_v9 = vld [vmem:[%s13795_s0 + $0x268] ss:$16 sps:$4 sm:$0xff]  }
  0xb3   :  { %2640 = vmatmul.mubr.bf16.gmra.mxu1 %v10121_v6  ;;  %v10180_v6 = vld [vmem:[%s13795_s0 + $0x260] ss:$16 sps:$4 sm:$0xff]  }
  0xb4   :  { %2649 = vmatprep.mubr.bf16.mxu1 %v10124_v10  ;;  %v10182_v10 = vld [vmem:[%s13795_s0 + $0x284] ss:$16 sps:$4 sm:$0xff]  }
  0xb9   :  { %2367 = vmatmul.mubr.bf16.gmra.mxu0 %v10126_v11  ;;  %v10184_v11 = vld [vmem:[%s13795_s0 + $0x28c] ss:$16 sps:$4 sm:$0xff]  }
  0xba   :  { %2376 = vmatprep.mubr.bf16.mxu0 %v10128_v14  ;;  %v10187_v14 = vld [vmem:[%s13795_s0 + $0x288] ss:$16 sps:$4 sm:$0xff]  }
  0xbb   :  { %2650 = vmatmul.mubr.bf16.gmra.mxu1 %v10127_v12  ;;  %v10186_v12 = vld [vmem:[%s13795_s0 + $0x280] ss:$16 sps:$4 sm:$0xff]  }
  0xbc   :  { %2659 = vmatprep.mubr.bf16.mxu1 %v10130_v19  ;;  %v10188_v19 = vld [vmem:[%s13795_s0 + $0x2a4] ss:$16 sps:$4 sm:$0xff]  }
  0xc1   :  { %2377 = vmatmul.mubr.bf16.gmra.mxu0 %v10132_v27  ;;  %v10193_v27 = vld [vmem:[%s13795_s0 + $0x2a8] ss:$16 sps:$4 sm:$0xff]  }
  0xc2   :  { %2386 = vmatprep.mubr.bf16.mxu0 %v10134_v31  ;;  %v10196_v31 = vld [vmem:[%s13795_s0 + $0x2cc] ss:$16 sps:$4 sm:$0xff]  }
  0xc3   :  { %2660 = vmatmul.mubr.bf16.gmra.mxu1 %v10133_v30  ;;  %v10194_v30 = vld [vmem:[%s13795_s0 + $0x2c4] ss:$16 sps:$4 sm:$0xff]  }
  0xc4   :  { %2669 = vmatprep.mubr.bf16.mxu1 %v10136_v32  ;;  %v10198_v32 = vld [vmem:[%s13795_s0 + $0x2c0] ss:$16 sps:$4 sm:$0xff]  }
  0xc9   :  { %2387 = vmatmul.mubr.bf16.gmra.mxu0 %v10138_v33  ;;  %v10199_v33 = vld [vmem:[%s13795_s0 + $0x2c8] ss:$16 sps:$4 sm:$0xff]  }
  0xca   :  { %2396 = vmatprep.mubr.bf16.mxu0 %v10140_v36  ;;  %v10202_v36 = vld [vmem:[%s13795_s0 + $0x2ec] ss:$16 sps:$4 sm:$0xff]  }
  0xcb   :  { %2670 = vmatmul.mubr.bf16.gmra.mxu1 %v10139_v34  ;;  %v10200_v34 = vld [vmem:[%s13795_s0 + $0x2e4] ss:$16 sps:$4 sm:$0xff]  }
  0xcc   :  { %2679 = vmatprep.mubr.bf16.mxu1 %v10142_v37  ;;  %v414_v37 = vlaneseq }
  0xd1   :  { %2397 = vmatmul.mubr.bf16.gmra.mxu0 %v10144_v38  ;;  %v10204_v38 = vld [vmem:[%s13795_s0 + $0x2e0] ss:$16 sps:$4 sm:$0xff]  }
  0xd2   :  { %2406 = vmatprep.mubr.bf16.mxu0 %v10146_v40  ;;  %v10206_v40 = vld [vmem:[%s13795_s0 + $0x304] ss:$16 sps:$4 sm:$0xff]  }
  0xd3   :  { %2680 = vmatmul.mubr.bf16.gmra.mxu1 %v10145_v39  ;;  %v10205_v39 = vld [vmem:[%s13795_s0 + $0x2e8] ss:$16 sps:$4 sm:$0xff]  }
  0xd4   :  { %2689 = vmatprep.mubr.bf16.mxu1 %v10148_v41  ;;  %v11136_v41 = vshrl.u32 %v414_v37, 7 }
  0xd6   :  { %13949 = vst [vmem:[#allocation10_spill] sm:$0xff] %v11136_v41 }
  0xd9   :  { %2407 = vmatmul.mubr.bf16.gmra.mxu0 %v10150_v42  ;;  %v10208_v42 = vld [vmem:[%s13795_s0 + $0x30c] ss:$16 sps:$4 sm:$0xff]  }
  0xda   :  { %2416 = vmatprep.mubr.bf16.mxu0 %v10152_v45  ;;  %v412_v45 = vld [vmem:[#allocation5] sm:$0xff] }
  0xdb   :  { %2690 = vmatmul.mubr.bf16.gmra.mxu1 %v10151_v43  ;;  %v416_v43 = vsub.s32 0, %v11136_v41 }
  0xdc   :  { %2699 = vmatprep.mubr.bf16.mxu1 %v10154_v47  ;;  %v420_v47 = vsub.s32 1, %v11136_v41 }
  0xe1   :  { %2417 = vmatmul.mubr.bf16.gmra.mxu0 %v10156_v48  ;;  %v10210_v48 = vld [vmem:[%s13795_s0 + $0x300] ss:$16 sps:$4 sm:$0xff]  }
  0xe2   :  { %2426 = vmatprep.mubr.bf16.mxu0 %v10158_v50  ;;  %v10211_v50 = vld [vmem:[%s13795_s0 + $0x308] ss:$16 sps:$4 sm:$0xff]  }
  0xe3   :  { %2700 = vmatmul.mubr.bf16.gmra.mxu1 %v10157_v49  ;;  %v11146_v49 = vrot.slane %v412_v45, %v416_v43 }
  0xe4   :  { %2709 = vmatprep.mubr.bf16.mxu1 %v10160_v53  ;;  %v11151_v53 = vrot.slane %v412_v45, %v420_v47 }
  0xe9   :  { %2427 = vmatmul.mubr.bf16.gmra.mxu0 %v10162_v54 }
  0xea   :  { %2436 = vmatprep.mubr.bf16.mxu0 %v10164_v57 }
  0xeb   :  { %2710 = vmatmul.mubr.bf16.gmra.mxu1 %v10163_v56 }
  0xec   :  { %2719 = vmatprep.mubr.bf16.mxu1 %v10166_v58  ;;  %v10212_v58 = vld [vmem:[%s13795_s0 + $0x4] ss:$16 sps:$4 sm:$0xff]  }
  0xf1   :  { %2437 = vmatmul.mubr.bf16.gmra.mxu0 %v10168_v59 }
  0xf2   :  { %2446 = vmatprep.mubr.bf16.mxu0 %v10170_v62 }
  0xf3   :  { %2720 = vmatmul.mubr.bf16.gmra.mxu1 %v10169_v61  ;;  %v10213_v61 = vld [vmem:[%s13795_s0 + $0xc] ss:$16 sps:$4 sm:$0xff]  }
  0xf4   :  { %2729 = vmatprep.mubr.bf16.mxu1 %v10172_v63 }
  0xf9   :  { %2447 = vmatmul.mubr.bf16.gmra.mxu0 %v10174_v1 }
  0xfa   :  { %2456 = vmatprep.mubr.bf16.mxu0 %v10176_v3  ;;  %v206_v3 = vld [vmem:[#allocation3 + $0x190] sm:$0xff] }
  0xfb   :  { %2730 = vmatmul.mubr.bf16.gmra.mxu1 %v10175_v2 }
  0xfc   :  { %2739 = vmatprep.mubr.bf16.mxu1 %v10178_v4  ;;  %v210_v4 = vld [vmem:[#allocation3 + $0x1b0] sm:$0xff] }
 0x101   :  { %2457 = vmatmul.mubr.bf16.gmra.mxu0 %v10180_v6 }
 0x102   :  { %2466 = vmatprep.mubr.bf16.mxu0 %v10182_v10 }
 0x103   :  { %2740 = vmatmul.mubr.bf16.gmra.mxu1 %v10181_v9 }
 0x104   :  { %2749 = vmatprep.mubr.bf16.mxu1 %v10184_v11  ;;  %v334_v11 = vld [vmem:[#allocation3 + $0x590] sm:$0xff] }
 0x109   :  { %2467 = vmatmul.mubr.bf16.gmra.mxu0 %v10186_v12  ;;  %v338_v12 = vld [vmem:[#allocation3 + $0x5b0] sm:$0xff] }
 0x10a   :  { %2476 = vmatprep.mubr.bf16.mxu0 %v10188_v19 }
 0x10b   :  { %2750 = vmatmul.mubr.bf16.gmra.mxu1 %v10187_v14 }
 0x10c   :  { %2759 = vmatprep.mubr.bf16.mxu1 %v10190_v21 }
 0x111   :  { %2477 = vmatmul.mubr.bf16.gmra.mxu0 %v10192_v26 }
 0x112   :  { %2486 = vmatprep.mubr.bf16.mxu0 %v10194_v30  ;;  %v11163_v30 = vld [vmem:[#allocation3 + $0x150] sm:$0xff] }
 0x113   :  { %2760 = vmatmul.mubr.bf16.gmra.mxu1 %v10193_v27  ;;  %v9254_v27 = vcombine.high %v206_v3, %v210_v4 }
 0x114   :  { %2769 = vmatprep.mubr.bf16.mxu1 %v10196_v31  ;;  %v202_v31 = vld [vmem:[#allocation3 + $0x170] sm:$0xff] }
 0x115   :  { %v9246_v43 = vcombine.high %v11163_v30, %v202_v31 }
 0x119   :  { %2487 = vmatmul.mubr.bf16.gmra.mxu0 %v10198_v32 }
 0x11a   :  { %2496 = vmatprep.mubr.bf16.mxu0 %v10200_v34  ;;  %v11166_v34 = vld [vmem:[#allocation3 + $0x550] sm:$0xff] }
 0x11b   :  { %2770 = vmatmul.mubr.bf16.gmra.mxu1 %v10199_v33  ;;  %v9382_v33 = vcombine.high %v334_v11, %v338_v12 }
 0x11c   :  { %2779 = vmatprep.mubr.bf16.mxu1 %v10202_v36  ;;  %v11168_v36 = vld [vmem:[#allocation3 + $0x570] sm:$0xff] }
 0x11d   :  { %v9374_v15 = vcombine.high %v11166_v34, %v11168_v36 }
 0x121   :  { %2497 = vmatmul.mubr.bf16.gmra.mxu0 %v10204_v38 }
 0x122   :  { %2506 = vmatprep.mubr.bf16.mxu0 %v10206_v40  ;;  %v9253_v40 = vcombine.low %v206_v3, %v210_v4 }
 0x123   :  { %2780 = vmatmul.mubr.bf16.gmra.mxu1 %v10205_v39 }
 0x124   :  { %2789 = vmatprep.mubr.bf16.mxu1 %v10208_v42 }
 0x129   :  { %v2268_v54 = vpop.f32.mrf.mxu0  ;;  %2507 = vmatmul.mubr.bf16.gmra.mxu0 %v10210_v48  ;;  %v318_v48 = vld [vmem:[#allocation3 + $0x510] sm:$0xff] }
 0x12a   :  { %v2269_v56 = vadd.f32 %v2268_v54, %v11146_v49  ;;  %2832 = vmatprep.mubr.bf16.mxu0 %v10212_v58 }
 0x12b   :  { %v2551_v57 = vpop.f32.mrf.mxu1  ;;  %2790 = vmatmul.mubr.bf16.gmra.mxu1 %v10211_v50  ;;  %v2270_v59 = vpop.f32.mrf.mxu0  ;;  %v322_v50 = vld [vmem:[#allocation3 + $0x530] sm:$0xff] }
 0x12c   :  { %3115 = vmatprep.mubr.bf16.mxu1 %v10213_v61  ;;  %v2552_v62 = vadd.f32 %v2551_v57, %v2269_v56  ;;  %v2271_v63 = vadd.f32 %v2270_v59, %v11151_v53  ;;  %v9373_v59 = vcombine.low %v11166_v34, %v11168_v36  ;;  %v306_v34 = vld [vmem:[#allocation3 + $0x4b0] sm:$0xff] }
 0x12d   :  { %v2553_v1 = vpop.f32.mrf.mxu1  ;;  %v2272_v2 = vpop.f32.mrf.mxu0 }
 0x12e   :  { %4498 = vst [vmem:[#allocation2] sm:$0xff] %v2552_v62  ;;  %v2554_v6 = vadd.f32 %v2553_v1, %v2271_v63  ;;  %v2273_v9 = vadd.f32 %v2272_v2, %v11146_v49  ;;  %v9366_v63 = vcombine.high %v318_v48, %v322_v50  ;;  %v182_v1 = vld [vmem:[#allocation3 + $0xd0] sm:$0xff] }
 0x12f   :  { %v2555_v10 = vpop.f32.mrf.mxu1  ;;  %v2274_v14 = vpop.f32.mrf.mxu0  ;;  %v186_v2 = vld [vmem:[#allocation3 + $0xf0] sm:$0xff] }
 0x130   :  { %4499 = vst [vmem:[#allocation2 + $0x8] sm:$0xff] %v2554_v6  ;;  %v2556_v19 = vadd.f32 %v2555_v10, %v2273_v9  ;;  %v2275_v21 = vadd.f32 %v2274_v14, %v11151_v53  ;;  %v310_v9 = vld [vmem:[#allocation3 + $0x4d0] sm:$0xff] }
 0x131   :  { %v2557_v26 = vpop.f32.mrf.mxu1  ;;  %v2278_v32 = vpop.f32.mrf.mxu0  ;;  %2833 = vmatmul.mubr.bf16.vlgmr.msra.gmra.mxu0 %v10787_v7  ;;  %v9381_v7 = vcombine.low %v334_v11, %v338_v12  ;;  %v314_v10 = vld [vmem:[#allocation3 + $0x4f0] sm:$0xff] }
 0x132   :  { %4506 = vst [vmem:[#allocation2 + $0x40] sm:$0xff] %v2556_v19  ;;  %v2558_v37 = vadd.f32 %v2557_v26, %v2275_v21  ;;  %v2279_v38 = vadd.f32 %v2278_v32, %v11146_v49  ;;  %3367 = vmatpush1.bf16.msra.mxu0 %v9261_v20  ;;  %2842 = vmatprep.mubr.bf16.mxu0 %v10797_v16  ;;  %v190_v20 = vld [vmem:[#allocation3 + $0x110] sm:$0xff] }
 0x133   :  { %v2561_v39 = vpop.f32.mrf.mxu1  ;;  %3116 = vmatmul.mubr.bf16.vlgmr.msra.gmra.mxu1 %v10792_v8  ;;  %v2280_v42 = vpop.f32.mrf.mxu0  ;;  %3368 = vmatprep.subr.bf16.mxu0 %v9254_v27  ;;  %v9238_v61 = vcombine.high %v190_v20, %v194_v22  ;;  %v9237_v12 = vcombine.low %v190_v20, %v194_v22  ;;  %v9230_v26 = vcombine.high %v182_v1, %v186_v2  ;;  %v294_v22 = vld [vmem:[#allocation3 + $0x450] sm:$0xff] }
 0x134   :  { %3650 = vmatpush1.bf16.msra.mxu1 %v9389_v24  ;;  %4507 = vst [vmem:[#allocation2 + $0x48] sm:$0xff] %v2558_v37  ;;  %v2562_v45 = vadd.f32 %v2561_v39, %v2279_v38  ;;  %v2281_v47 = vadd.f32 %v2280_v42, %v11151_v53  ;;  %3125 = vmatprep.mubr.bf16.mxu1 %v10802_v17 }
 0x135   :  { %v2563_v8 = vpop.f32.mrf.mxu1  ;;  %v2282_v18 = vpop.f32.mrf.mxu0  ;;  %3651 = vmatprep.subr.bf16.mxu1 %v9382_v33  ;;  %v9245_v17 = vcombine.low %v11163_v30, %v202_v31  ;;  %v178_v30 = vld [vmem:[#allocation3 + $0xb0] sm:$0xff]  ;;  %v9229_v37 = vcombine.low %v182_v1, %v186_v2  ;;  %v9357_v38 = vcombine.low %v310_v9, %v314_v10 }
 0x136   :  { %4514 = vst [vmem:[#allocation2 + $0x80] sm:$0xff] %v2562_v45  ;;  %v2564_v16 = vadd.f32 %v2563_v8, %v2281_v47  ;;  %v2283_v23 = vadd.f32 %v2282_v18, %v11146_v49  ;;  %3369 = vmatpush1.bf16.msra.mxu0 %v9253_v40  ;;  %v302_v33 = vld [vmem:[#allocation3 + $0x490] sm:$0xff] }
 0x137   :  { %v2565_v24 = vpop.f32.mrf.mxu1  ;;  %v2284_v54 = vpop.f32.mrf.mxu0  ;;  %3370 = vmatprep.subr.bf16.mxu0 %v9246_v43  ;;  %v9350_v45 = vcombine.high %v302_v33, %v306_v34  ;;  %v166_v47 = vld [vmem:[#allocation3 + $0x50] sm:$0xff] }
 0x138   :  { %3652 = vmatpush1.bf16.msra.mxu1 %v9381_v7  ;;  %4515 = vst [vmem:[#allocation2 + $0x88] sm:$0xff] %v2564_v16  ;;  %v2566_v56 = vadd.f32 %v2565_v24, %v2283_v23  ;;  %v2285_v57 = vadd.f32 %v2284_v54, %v11151_v53  ;;  %v170_v8 = vld [vmem:[#allocation3 + $0x70] sm:$0xff]  ;;  %v9349_v24 = vcombine.low %v302_v33, %v306_v34 }
 0x139   :  { %v2567_v58 = vpop.f32.mrf.mxu1  ;;  %3653 = vmatprep.subr.bf16.mxu1 %v9374_v15  ;;  %v2288_v62 = vpop.f32.mrf.mxu0  ;;  %2843 = vmatmul.mubr.bf16.gmra.mxu0 %v10810_v25  ;;  %v9365_v25 = vcombine.low %v318_v48, %v322_v50  ;;  %v298_v16 = vld [vmem:[#allocation3 + $0x470] sm:$0xff]  ;;  %v9213_v1 = vcombine.low %v166_v47, %v170_v8 }
 0x13a   :  { %4522 = vst [vmem:[#allocation2 + $0xc0] sm:$0xff] %v2566_v56  ;;  %v2568_v3 = vadd.f32 %v2567_v58, %v2285_v57  ;;  %v2289_v4 = vadd.f32 %v2288_v62, %v11146_v49  ;;  %2852 = vmatprep.mubr.bf16.mxu0 %v10821_v29  ;;  %3371 = vmatpush1.bf16.msra.mxu0 %v9245_v17  ;;  %v174_v29 = vld [vmem:[#allocation3 + $0x90] sm:$0xff] }
 0x13b   :  { %v2571_v6 = vpop.f32.mrf.mxu1  ;;  %3126 = vmatmul.mubr.bf16.gmra.mxu1 %v10816_v28  ;;  %v2290_v11 = vpop.f32.mrf.mxu0  ;;  %3372 = vmatprep.subr.bf16.mxu0 %v9238_v61  ;;  %v9358_v28 = vcombine.high %v310_v9, %v314_v10  ;;  %v9222_v7 = vcombine.high %v174_v29, %v178_v30  ;;  %v9214_v17 = vcombine.high %v166_v47, %v170_v8  ;;  %v162_v57 = vld [vmem:[#allocation3 + $0x30] sm:$0xff] }
 0x13c   :  { %3135 = vmatprep.mubr.bf16.mxu1 %v10826_v35  ;;  %4523 = vst [vmem:[#allocation2 + $0xc8] sm:$0xff] %v2568_v3  ;;  %v2572_v14 = vadd.f32 %v2571_v6, %v2289_v4  ;;  %v2291_v19 = vadd.f32 %v2290_v11, %v11151_v53  ;;  %3654 = vmatpush1.bf16.msra.mxu1 %v9373_v59  ;;  %v286_v61 = vld [vmem:[#allocation3 + $0x410] sm:$0xff] }
 0x13d   :  { %v2573_v21 = vpop.f32.mrf.mxu1  ;;  %v2292_v27 = vpop.f32.mrf.mxu0  ;;  %3655 = vmatprep.subr.bf16.mxu1 %v9366_v63  ;;  %v290_v62 = vld [vmem:[#allocation3 + $0x430] sm:$0xff]  ;;  %v9341_v2 = vcombine.low %v294_v22, %v298_v16 }
 0x13e   :  { %4530 = vst [vmem:[#allocation2 + $0x100] sm:$0xff] %v2572_v14  ;;  %v2574_v31 = vadd.f32 %v2573_v21, %v2291_v19  ;;  %v2293_v35 = vadd.f32 %v2292_v27, %v11146_v49  ;;  %3373 = vmatpush1.bf16.msra.mxu0 %v9237_v12  ;;  %v9334_v11 = vcombine.high %v286_v61, %v290_v62  ;;  %v11206_v12 = vld [vmem:[#allocation3 + $0x3d0] sm:$0xff] }
 0x13f   :  { %v2575_v32 = vpop.f32.mrf.mxu1  ;;  %v2294_v36 = vpop.f32.mrf.mxu0  ;;  %3374 = vmatprep.subr.bf16.mxu0 %v9230_v26  ;;  %v10214_v26 = vld [vmem:[%s13795_s0 + $0x68] ss:$16 sps:$4 sm:$0xff]   ;;  %v11215_v27 = vld [vmem:[#allocation3 + $0x7d0] sm:$0xff] }
 0x140   :  { %4531 = vst [vmem:[#allocation2 + $0x108] sm:$0xff] %v2574_v31  ;;  %v2576_v39 = vadd.f32 %v2575_v32, %v2293_v35  ;;  %v2295_v40 = vadd.f32 %v2294_v36, %v11151_v53  ;;  %3656 = vmatpush1.bf16.msra.mxu1 %v9365_v25  ;;  %v11208_v25 = vld [vmem:[#allocation3 + $0x3f0] sm:$0xff] }
 0x141   :  { %v2577_v42 = vpop.f32.mrf.mxu1  ;;  %v2298_v43 = vpop.f32.mrf.mxu0  ;;  %2853 = vmatmul.mubr.bf16.gmra.mxu0 %v10835_v44  ;;  %3657 = vmatprep.subr.bf16.mxu1 %v9358_v28  ;;  %v9221_v44 = vcombine.low %v174_v29, %v178_v30  ;;  %v9333_v30 = vcombine.low %v286_v61, %v290_v62  ;;  %v9326_v33 = vcombine.high %v11206_v12, %v11208_v25  ;;  %v270_v36 = vld [vmem:[#allocation3 + $0x390] sm:$0xff] }
 0x142   :  { %4538 = vst [vmem:[#allocation2 + $0x140] sm:$0xff] %v2576_v39  ;;  %v2578_v15 = vadd.f32 %v2577_v42, %v2295_v40  ;;  %v2299_v18 = vadd.f32 %v2298_v43, %v11146_v49  ;;  %2862 = vmatprep.mubr.bf16.mxu0 %v10845_v52  ;;  %3375 = vmatpush1.bf16.msra.mxu0 %v9229_v37  ;;  %v158_v52 = vld [vmem:[#allocation3 + $0x10] sm:$0xff] }
 0x143   :  { %v2581_v20 = vpop.f32.mrf.mxu1  ;;  %3136 = vmatmul.mubr.bf16.gmra.mxu1 %v10840_v46  ;;  %v2300_v23 = vpop.f32.mrf.mxu0  ;;  %3376 = vmatprep.subr.bf16.mxu0 %v9222_v7  ;;  %v9342_v46 = vcombine.high %v294_v22, %v298_v16  ;;  %v9206_v9 = vcombine.high %v158_v52, %v162_v57  ;;  %v9205_v29 = vcombine.low %v158_v52, %v162_v57  ;;  %v274_v37 = vld [vmem:[#allocation3 + $0x3b0] sm:$0xff]  ;;  %v10218_v57 = vld [vmem:[%s13795_s0 + $0xac] ss:$16 sps:$4 sm:$0xff]  }
 0x144   :  { %3145 = vmatprep.mubr.bf16.mxu1 %v10850_v55  ;;  %4539 = vst [vmem:[#allocation2 + $0x148] sm:$0xff] %v2578_v15  ;;  %v2582_v48 = vadd.f32 %v2581_v20, %v2299_v18  ;;  %v2301_v50 = vadd.f32 %v2300_v23, %v11151_v53  ;;  %3658 = vmatpush1.bf16.msra.mxu1 %v9357_v38  ;;  %v398_v40 = vld [vmem:[#allocation3 + $0x790] sm:$0xff] }
 0x145   :  { %v2583_v54 = vpop.f32.mrf.mxu1  ;;  %v2302_v56 = vpop.f32.mrf.mxu0  ;;  %3659 = vmatprep.subr.bf16.mxu1 %v9350_v45  ;;  %v402_v42 = vld [vmem:[#allocation3 + $0x7b0] sm:$0xff]  ;;  %v9325_v43 = vcombine.low %v11206_v12, %v11208_v25  ;;  %v9318_v18 = vcombine.high %v270_v36, %v274_v37 }
 0x146   :  { %4546 = vst [vmem:[#allocation2 + $0x180] sm:$0xff] %v2582_v48  ;;  %v2584_v58 = vadd.f32 %v2583_v54, %v2301_v50  ;;  %v2303_v55 = vadd.f32 %v2302_v56, %v11146_v49  ;;  %3377 = vmatpush1.bf16.msra.mxu0 %v9221_v44  ;;  %v10215_v22 = vld [vmem:[%s13795_s0 + $0x80] ss:$16 sps:$4 sm:$0xff]   ;;  %v9446_v16 = vcombine.high %v398_v40, %v402_v42  ;;  %v10216_v54 = vld [vmem:[%s13795_s0 + $0x88] ss:$16 sps:$4 sm:$0xff]  }
 0x147   :  { %v2585_v59 = vpop.f32.mrf.mxu1  ;;  %v2304_v63 = vpop.f32.mrf.mxu0  ;;  %3378 = vmatprep.subr.bf16.mxu0 %v9214_v17  ;;  %v11230_v23 = vld [vmem:[#allocation3 + $0x350] sm:$0xff] }
 0x148   :  { %4547 = vst [vmem:[#allocation2 + $0x188] sm:$0xff] %v2584_v58  ;;  %v2586_v3 = vadd.f32 %v2585_v59, %v2303_v55  ;;  %v2305_v4 = vadd.f32 %v2304_v63, %v11151_v53  ;;  %3660 = vmatpush1.bf16.msra.mxu1 %v9349_v24  ;;  %v11232_v44 = vld [vmem:[#allocation3 + $0x370] sm:$0xff]  ;;  %v9317_v58 = vcombine.low %v270_v36, %v274_v37 }
 0x149   :  { %v2587_v6 = vpop.f32.mrf.mxu1  ;;  %v2308_v10 = vpop.f32.mrf.mxu0  ;;  %2863 = vmatmul.mubr.bf16.gmra.mxu0 %v10859_v0  ;;  %3661 = vmatprep.subr.bf16.mxu1 %v9342_v46  ;;  %v410_v0 = vld [vmem:[#allocation3 + $0x7f0] sm:$0xff]  ;;  %v9445_v55 = vcombine.low %v398_v40, %v402_v42  ;;  %v9310_v63 = vcombine.high %v11230_v23, %v11232_v44 }
 0x14a   :  { %4554 = vst [vmem:[#allocation2 + $0x1c0] sm:$0xff] %v2586_v3  ;;  %v2588_v14 = vadd.f32 %v2587_v6, %v2305_v4  ;;  %v2309_v19 = vadd.f32 %v2308_v10, %v11146_v49  ;;  %2872 = vmatprep.mubr.bf16.mxu0 %v10867_v5  ;;  %3379 = vmatpush1.bf16.msra.mxu0 %v9213_v1  ;;  %v10217_v17 = vld [vmem:[%s13795_s0 + $0xa4] ss:$16 sps:$4 sm:$0xff]  }
 0x14b   :  { %v2591_v21 = vpop.f32.mrf.mxu1  ;;  %3146 = vmatmul.mubr.bf16.gmra.mxu1 %v10214_v26  ;;  %v2310_v28 = vpop.f32.mrf.mxu0  ;;  %3380 = vmatprep.subr.bf16.mxu0 %v9206_v9  ;;  %v9454_v34 = vcombine.high %v11215_v27, %v410_v0  ;;  %v9453_v45 = vcombine.low %v11215_v27, %v410_v0  ;;  %v390_v56 = vld [vmem:[#allocation3 + $0x750] sm:$0xff] }
 0x14c   :  { %3155 = vmatprep.mubr.bf16.mxu1 %v10872_v13  ;;  %4555 = vst [vmem:[#allocation2 + $0x1c8] sm:$0xff] %v2588_v14  ;;  %v2592_v31 = vadd.f32 %v2591_v21, %v2309_v19  ;;  %v2311_v35 = vadd.f32 %v2310_v28, %v11151_v53  ;;  %3662 = vmatpush1.bf16.msra.mxu1 %v9341_v2  ;;  %v394_v46 = vld [vmem:[#allocation3 + $0x770] sm:$0xff] }
 0x14d   :  { %v2593_v32 = vpop.f32.mrf.mxu1  ;;  %v2312_v5 = vpop.f32.mrf.mxu0  ;;  %3663 = vmatprep.subr.bf16.mxu1 %v9334_v11  ;;  %v9438_v2 = vcombine.high %v390_v56, %v394_v46  ;;  %v254_v3 = vld [vmem:[#allocation3 + $0x310] sm:$0xff]  ;;  %v9309_v14 = vcombine.low %v11230_v23, %v11232_v44  ;;  %v9437_v19 = vcombine.low %v390_v56, %v394_v46 }
 0x14e   :  { %4562 = vst [vmem:[#allocation2 + $0x200] sm:$0xff] %v2592_v31  ;;  %v2594_v13 = vadd.f32 %v2593_v32, %v2311_v35  ;;  %v2313_v38 = vadd.f32 %v2312_v5, %v11146_v49  ;;  %3381 = vmatpush1.bf16.msra.mxu0 %v9205_v29  ;;  %v258_v4 = vld [vmem:[#allocation3 + $0x330] sm:$0xff]  ;;  %v10219_v5 = vld [vmem:[%s13795_s0 + $0xa8] ss:$16 sps:$4 sm:$0xff]  }
 0x14f   :  { %v2595_v39 = vpop.f32.mrf.mxu1  ;;  %v2314_v7 = vpop.f32.mrf.mxu0  ;;  %3382 = vmatprep.subr.bf16.mxu0 %v9326_v33  ;;  %v382_v11 = vld [vmem:[#allocation3 + $0x710] sm:$0xff]  ;;  %v9302_v0 = vcombine.high %v254_v3, %v258_v4 }
 0x150   :  { %4563 = vst [vmem:[#allocation2 + $0x208] sm:$0xff] %v2594_v13  ;;  %v2596_v47 = vadd.f32 %v2595_v39, %v2313_v38  ;;  %v2315_v8 = vadd.f32 %v2314_v7, %v11151_v53  ;;  %3664 = vmatpush1.bf16.msra.mxu1 %v9333_v30  ;;  %v386_v12 = vld [vmem:[#allocation3 + $0x730] sm:$0xff]  ;;  %v9301_v13 = vcombine.low %v254_v3, %v258_v4 }
 0x151   :  { %v2597_v15 = vpop.f32.mrf.mxu1  ;;  %v2318_v20 = vpop.f32.mrf.mxu0  ;;  %2873 = vmatmul.mubr.bf16.gmra.mxu0 %v10215_v22  ;;  %3665 = vmatprep.subr.bf16.mxu1 %v9454_v34  ;;  %v9430_v29 = vcombine.high %v382_v11, %v386_v12  ;;  %v246_v30 = vld [vmem:[#allocation3 + $0x2d0] sm:$0xff]  ;;  %v9429_v38 = vcombine.low %v382_v11, %v386_v12 }
 0x152   :  { %4570 = vst [vmem:[#allocation2 + $0x240] sm:$0xff] %v2596_v47  ;;  %v2598_v24 = vadd.f32 %v2597_v15, %v2315_v8  ;;  %v2319_v48 = vadd.f32 %v2318_v20, %v11146_v49  ;;  %2882 = vmatprep.mubr.bf16.mxu0 %v10217_v17  ;;  %3383 = vmatpush2.bf16.msra.mxu0 %v9325_v43  ;;  %v250_v31 = vld [vmem:[#allocation3 + $0x2f0] sm:$0xff] }
 0x153   :  { %v2601_v50 = vpop.f32.mrf.mxu1  ;;  %3156 = vmatmul.mubr.bf16.gmra.mxu1 %v10216_v54  ;;  %v2320_v52 = vpop.f32.mrf.mxu0  ;;  %3384 = vmatprep.subr.bf16.mxu0 %v9318_v18  ;;  %v374_v34 = vld [vmem:[#allocation3 + $0x6d0] sm:$0xff]  ;;  %v9294_v7 = vcombine.high %v246_v30, %v250_v31  ;;  %v9293_v23 = vcombine.low %v246_v30, %v250_v31 }
 0x154   :  { %3165 = vmatprep.mubr.bf16.mxu1 %v10218_v57  ;;  %4571 = vst [vmem:[#allocation2 + $0x248] sm:$0xff] %v2598_v24  ;;  %v2602_v59 = vadd.f32 %v2601_v50, %v2319_v48  ;;  %v2321_v61 = vadd.f32 %v2320_v52, %v11151_v53  ;;  %3666 = vmatpush2.bf16.msra.mxu1 %v9453_v45  ;;  %v378_v36 = vld [vmem:[#allocation3 + $0x6f0] sm:$0xff] }
 0x155   :  { %v2603_v62 = vpop.f32.mrf.mxu1  ;;  %v2322_v1 = vpop.f32.mrf.mxu0  ;;  %3667 = vmatprep.subr.bf16.mxu1 %v9446_v16  ;;  %v9422_v43 = vcombine.high %v374_v34, %v378_v36  ;;  %v238_v45 = vld [vmem:[#allocation3 + $0x290] sm:$0xff]  ;;  %v9421_v44 = vcombine.low %v374_v34, %v378_v36  ;;  %v10226_v36 = vld [vmem:[%s13795_s0 + $0xe8] ss:$16 sps:$4 sm:$0xff]  }
 0x156   :  { %4578 = vst [vmem:[#allocation2 + $0x280] sm:$0xff] %v2602_v59  ;;  %v2604_v6 = vadd.f32 %v2603_v62, %v2321_v61  ;;  %v2323_v9 = vadd.f32 %v2322_v1, %v11146_v49  ;;  %3385 = vmatpush2.bf16.msra.mxu0 %v9317_v58  ;;  %v242_v47 = vld [vmem:[#allocation3 + $0x2b0] sm:$0xff]  ;;  %v10224_v62 = vld [vmem:[%s13795_s0 + $0xec] ss:$16 sps:$4 sm:$0xff]  }
 0x157   :  { %v2605_v10 = vpop.f32.mrf.mxu1  ;;  %v2324_v25 = vpop.f32.mrf.mxu0  ;;  %3386 = vmatprep.subr.bf16.mxu0 %v9310_v63  ;;  %v366_v20 = vld [vmem:[#allocation3 + $0x690] sm:$0xff]  ;;  %v9286_v54 = vcombine.high %v238_v45, %v242_v47  ;;  %v9285_v63 = vcombine.low %v238_v45, %v242_v47 }
 0x158   :  { %4579 = vst [vmem:[#allocation2 + $0x288] sm:$0xff] %v2604_v6  ;;  %v2606_v21 = vadd.f32 %v2605_v10, %v2323_v9  ;;  %v2325_v26 = vadd.f32 %v2324_v25, %v11151_v53  ;;  %3668 = vmatpush2.bf16.msra.mxu1 %v9445_v55  ;;  %v370_v22 = vld [vmem:[#allocation3 + $0x6b0] sm:$0xff]  ;;  %v10222_v55 = vld [vmem:[%s13795_s0 + $0xc8] ss:$16 sps:$4 sm:$0xff]  }
 0x159   :  { %v2607_v27 = vpop.f32.mrf.mxu1  ;;  %v2328_v28 = vpop.f32.mrf.mxu0  ;;  %2883 = vmatmul.mubr.bf16.gmra.mxu0 %v10892_v51  ;;  %3669 = vmatprep.subr.bf16.mxu1 %v9438_v2  ;;  %v10220_v51 = vld [vmem:[%s13795_s0 + $0xcc] ss:$16 sps:$4 sm:$0xff]   ;;  %v10221_v56 = vld [vmem:[%s13795_s0 + $0xc0] ss:$16 sps:$4 sm:$0xff]   ;;  %v9414_v46 = vcombine.high %v366_v20, %v370_v22  ;;  %v10223_v59 = vld [vmem:[%s13795_s0 + $0xe4] ss:$16 sps:$4 sm:$0xff]   ;;  %v9413_v4 = vcombine.low %v366_v20, %v370_v22 }
 0x15a   :  { %4586 = vst [vmem:[#allocation2 + $0x2c0] sm:$0xff] %v2606_v21  ;;  %v2608_v35 = vadd.f32 %v2607_v27, %v2325_v26  ;;  %v2329_v32 = vadd.f32 %v2328_v28, %v11146_v49  ;;  %2892 = vmatprep.mubr.bf16.mxu0 %v10900_v60  ;;  %3387 = vmatpush2.bf16.msra.mxu0 %v9309_v14  ;;  %v230_v6 = vld [vmem:[#allocation3 + $0x250] sm:$0xff] }
 0x15b   :  { %v2611_v33 = vpop.f32.mrf.mxu1  ;;  %3166 = vmatmul.mubr.bf16.gmra.mxu1 %v10219_v5  ;;  %v2330_v37 = vpop.f32.mrf.mxu0  ;;  %3388 = vmatprep.subr.bf16.mxu0 %v9302_v0  ;;  %v234_v9 = vld [vmem:[#allocation3 + $0x270] sm:$0xff] }
 0x15c   :  { %3175 = vmatprep.mubr.bf16.mxu1 %v10220_v51  ;;  %4587 = vst [vmem:[#allocation2 + $0x2c8] sm:$0xff] %v2608_v35  ;;  %v2612_v39 = vadd.f32 %v2611_v33, %v2329_v32  ;;  %v2331_v40 = vadd.f32 %v2330_v37, %v11151_v53  ;;  %3670 = vmatpush2.bf16.msra.mxu1 %v9437_v19  ;;  %v358_v19 = vld [vmem:[#allocation3 + $0x650] sm:$0xff] }
 0x15d   :  { %v2613_v42 = vpop.f32.mrf.mxu1  ;;  %v2332_v60 = vpop.f32.mrf.mxu0  ;;  %3671 = vmatprep.subr.bf16.mxu1 %v9430_v29  ;;  %v9278_v11 = vcombine.high %v230_v6, %v234_v9  ;;  %v362_v21 = vld [vmem:[#allocation3 + $0x670] sm:$0xff]  ;;  %v9277_v27 = vcombine.low %v230_v6, %v234_v9 }
 0x15e   :  { %4594 = vst [vmem:[#allocation2 + $0x300] sm:$0xff] %v2612_v39  ;;  %v2614_v8 = vadd.f32 %v2613_v42, %v2331_v40  ;;  %v2333_v15 = vadd.f32 %v2332_v60, %v11146_v49  ;;  %3389 = vmatpush2.bf16.msra.mxu0 %v9301_v13  ;;  %v9406_v0 = vcombine.high %v358_v19, %v362_v21  ;;  %v10225_v32 = vld [vmem:[%s13795_s0 + $0xe0] ss:$16 sps:$4 sm:$0xff]   ;;  %v10227_v37 = vld [vmem:[%s13795_s0 + $0x104] ss:$16 sps:$4 sm:$0xff]  }
 0x15f   :  { %v2615_v18 = vpop.f32.mrf.mxu1  ;;  %v2334_v16 = vpop.f32.mrf.mxu0  ;;  %3390 = vmatprep.subr.bf16.mxu0 %v9294_v7  ;;  %v9405_v31 = vcombine.low %v358_v19, %v362_v21  ;;  %v10228_v13 = vld [vmem:[%s13795_s0 + $0x10c] ss:$16 sps:$4 sm:$0xff]   ;;  %v10229_v20 = vld [vmem:[%s13795_s0 + $0x100] ss:$16 sps:$4 sm:$0xff]   ;;  %v10234_v21 = vld [vmem:[%s13795_s0 + $0x128] ss:$16 sps:$4 sm:$0xff]  }
 0x160   :  { %4595 = vst [vmem:[#allocation2 + $0x308] sm:$0xff] %v2614_v8  ;;  %v2616_v24 = vadd.f32 %v2615_v18, %v2333_v15  ;;  %v2335_v48 = vadd.f32 %v2334_v16, %v11151_v53  ;;  %3672 = vmatpush2.bf16.msra.mxu1 %v9429_v38 }
 0x161   :  { %v2617_v50 = vpop.f32.mrf.mxu1  ;;  %v2338_v17 = vpop.f32.mrf.mxu0  ;;  %2893 = vmatmul.mubr.bf16.gmra.mxu0 %v10221_v56  ;;  %3673 = vmatprep.subr.bf16.mxu1 %v9422_v43 }
 0x162   :  { %4602 = vst [vmem:[#allocation2 + $0x340] sm:$0xff] %v2616_v24  ;;  %v2618_v52 = vadd.f32 %v2617_v50, %v2335_v48  ;;  %v2339_v57 = vadd.f32 %v2338_v17, %v11146_v49  ;;  %2902 = vmatprep.mubr.bf16.mxu0 %v10223_v59  ;;  %3391 = vmatpush2.bf16.msra.mxu0 %v9293_v23  ;;  %v10231_v24 = vld [vmem:[%s13795_s0 + $0x124] ss:$16 sps:$4 sm:$0xff]   ;;  %v10232_v17 = vld [vmem:[%s13795_s0 + $0x12c] ss:$16 sps:$4 sm:$0xff]  }
 0x163   :  { %v2621_v58 = vpop.f32.mrf.mxu1  ;;  %3176 = vmatmul.mubr.bf16.gmra.mxu1 %v10222_v55  ;;  %v2340_v61 = vpop.f32.mrf.mxu0  ;;  %3392 = vmatprep.subr.bf16.mxu0 %v9286_v54  ;;  %v222_v48 = vld [vmem:[#allocation3 + $0x210] sm:$0xff] }
 0x164   :  { %3185 = vmatprep.mubr.bf16.mxu1 %v10224_v62  ;;  %4603 = vst [vmem:[#allocation2 + $0x348] sm:$0xff] %v2618_v52  ;;  %v2622_v1 = vadd.f32 %v2621_v58, %v2339_v57  ;;  %v2341_v2 = vadd.f32 %v2340_v61, %v11151_v53  ;;  %3674 = vmatpush2.bf16.msra.mxu1 %v9421_v44  ;;  %v10230_v44 = vld [vmem:[%s13795_s0 + $0x108] ss:$16 sps:$4 sm:$0xff]   ;;  %v226_v50 = vld [vmem:[#allocation3 + $0x230] sm:$0xff] }
 0x165   :  { %v2623_v3 = vpop.f32.mrf.mxu1  ;;  %v2342_v10 = vpop.f32.mrf.mxu0  ;;  %3675 = vmatprep.subr.bf16.mxu1 %v9414_v46  ;;  %v9269_v56 = vcombine.low %v222_v48, %v226_v50  ;;  %v9270_v46 = vcombine.high %v222_v48, %v226_v50  ;;  %v350_v52 = vld [vmem:[#allocation3 + $0x610] sm:$0xff] }
 0x166   :  { %4610 = vst [vmem:[#allocation2 + $0x380] sm:$0xff] %v2622_v1  ;;  %v2624_v12 = vadd.f32 %v2623_v3, %v2341_v2  ;;  %v2343_v25 = vadd.f32 %v2342_v10, %v11146_v49  ;;  %3393 = vmatpush2.bf16.msra.mxu0 %v9285_v63  ;;  %v354_v57 = vld [vmem:[#allocation3 + $0x630] sm:$0xff] }
 0x167   :  { %v2625_v14 = vpop.f32.mrf.mxu1  ;;  %v2344_v26 = vpop.f32.mrf.mxu0  ;;  %3394 = vmatprep.subr.bf16.mxu0 %v9278_v11  ;;  %v9397_v61 = vcombine.low %v350_v52, %v354_v57  ;;  %v9398_v62 = vcombine.high %v350_v52, %v354_v57 }
 0x168   :  { %4611 = vst [vmem:[#allocation2 + $0x388] sm:$0xff] %v2624_v12  ;;  %v2626_v28 = vadd.f32 %v2625_v14, %v2343_v25  ;;  %v2345_v29 = vadd.f32 %v2344_v26, %v11151_v53  ;;  %3676 = vmatpush2.bf16.msra.mxu1 %v9413_v4  ;;  %v10233_v12 = vld [vmem:[%s13795_s0 + $0x120] ss:$16 sps:$4 sm:$0xff]   ;;  %v10235_v26 = vld [vmem:[%s13795_s0 + $0x144] ss:$16 sps:$4 sm:$0xff]  }
 0x169   :  { %v2627_v30 = vpop.f32.mrf.mxu1  ;;  %v2348_v35 = vpop.f32.mrf.mxu0  ;;  %2903 = vmatmul.mubr.bf16.gmra.mxu0 %v10225_v32  ;;  %3677 = vmatprep.subr.bf16.mxu1 %v9406_v0  ;;  %v10236_v0 = vld [vmem:[%s13795_s0 + $0x14c] ss:$16 sps:$4 sm:$0xff]  }
 0x16a   :  { %4618 = vst [vmem:[#allocation2 + $0x3c0] sm:$0xff] %v2626_v28  ;;  %v2628_v33 = vadd.f32 %v2627_v30, %v2345_v29  ;;  %v2349_v5 = vadd.f32 %v2348_v35, %v11146_v49  ;;  %2912 = vmatprep.mubr.bf16.mxu0 %v10227_v37  ;;  %3395 = vmatpush2.bf16.msra.mxu0 %v9277_v27 }
 0x16b   :  { %v2631_v34 = vpop.f32.mrf.mxu1  ;;  %3186 = vmatmul.mubr.bf16.gmra.mxu1 %v10226_v36  ;;  %v2350_v51 = vpop.f32.mrf.mxu0  ;;  %3396 = vmatprep.subr.bf16.mxu0 %v9270_v46 }
 0x16c   :  { %3195 = vmatprep.mubr.bf16.mxu1 %v10228_v13  ;;  %4619 = vst [vmem:[#allocation2 + $0x3c8] sm:$0xff] %v2628_v33  ;;  %v2632_v38 = vadd.f32 %v2631_v34, %v2349_v5  ;;  %v2351_v39 = vadd.f32 %v2350_v51, %v11151_v53  ;;  %3678 = vmatpush2.bf16.msra.mxu1 %v9405_v31  ;;  %v11326_v5 = vld [vmem:[#allocation3 + $0x1d8] sm:$0xff] }
 0x16d   :  { %v2633_v40 = vpop.f32.mrf.mxu1  ;;  %v2352_v42 = vpop.f32.mrf.mxu0  ;;  %3679 = vmatprep.subr.bf16.mxu1 %v9398_v62  ;;  %v11328_v34 = vld [vmem:[#allocation3 + $0x1f8] sm:$0xff] }
 0x16e   :  { %4626 = vst [vmem:[#allocation2 + $0x400] sm:$0xff] %v2632_v38  ;;  %v2634_v7 = vadd.f32 %v2633_v40, %v2351_v39  ;;  %v2353_v60 = vadd.f32 %v2352_v42, %v11146_v49  ;;  %3397 = vmatpush2.bf16.msra.mxu0 %v9269_v56  ;;  %v9263_v37 = vcombine.low %v11326_v5, %v11328_v34  ;;  %v11335_v40 = vld [vmem:[#allocation3 + $0x5d8] sm:$0xff] }
 0x16f   :  { %v2635_v43 = vpop.f32.mrf.mxu1  ;;  %v2354_v45 = vpop.f32.mrf.mxu0  ;;  %v9264_v51 = vcombine.high %v11326_v5, %v11328_v34  ;;  %v11337_v42 = vld [vmem:[#allocation3 + $0x5f8] sm:$0xff] }
 0x170   :  { %4627 = vst [vmem:[#allocation2 + $0x408] sm:$0xff] %v2634_v7  ;;  %v2636_v47 = vadd.f32 %v2635_v43, %v2353_v60  ;;  %v2355_v8 = vadd.f32 %v2354_v45, %v11151_v53  ;;  %3680 = vmatpush2.bf16.msra.mxu1 %v9397_v61  ;;  %v10237_v60 = vld [vmem:[%s13795_s0 + $0x140] ss:$16 sps:$4 sm:$0xff]   ;;  %v9391_v43 = vcombine.low %v11335_v40, %v11337_v42 }
 0x171   :  { %v2637_v15 = vpop.f32.mrf.mxu1  ;;  %v2358_v18 = vpop.f32.mrf.mxu0  ;;  %2913 = vmatmul.mubr.bf16.gmra.mxu0 %v10229_v20  ;;  %3932 = vmatprep.subr.bf16.mxu0 %v9264_v51  ;;  %v9392_v45 = vcombine.high %v11335_v40, %v11337_v42  ;;  %v10239_v20 = vld [vmem:[%s13795_s0 + $0x164] ss:$16 sps:$4 sm:$0xff]  }
 0x172   :  { %4634 = vst [vmem:[#allocation2 + $0x440] sm:$0xff] %v2636_v47  ;;  %v2638_v22 = vadd.f32 %v2637_v15, %v2355_v8  ;;  %v2359_v16 = vadd.f32 %v2358_v18, %v11146_v49  ;;  %2922 = vmatprep.mubr.bf16.mxu0 %v10231_v24  ;;  %v10238_v18 = vld [vmem:[%s13795_s0 + $0x148] ss:$16 sps:$4 sm:$0xff]  }
 0x173   :  { %v2641_v23 = vpop.f32.mrf.mxu1  ;;  %3196 = vmatmul.mubr.bf16.gmra.mxu1 %v10230_v44  ;;  %v2360_v54 = vpop.f32.mrf.mxu0  ;;  %4215 = vmatprep.subr.bf16.mxu1 %v9392_v45 }
 0x174   :  { %3205 = vmatprep.mubr.bf16.mxu1 %v10232_v17  ;;  %4635 = vst [vmem:[#allocation2 + $0x448] sm:$0xff] %v2638_v22  ;;  %v2642_v58 = vadd.f32 %v2641_v23, %v2359_v16  ;;  %v2361_v55 = vadd.f32 %v2360_v54, %v11151_v53  ;;  %v10240_v16 = vld [vmem:[%s13795_s0 + $0x16c] ss:$16 sps:$4 sm:$0xff]  }
 0x175   :  { %v2643_v59 = vpop.f32.mrf.mxu1  ;;  %v2362_v63 = vpop.f32.mrf.mxu0 }
 0x176   :  { %4642 = vst [vmem:[#allocation2 + $0x480] sm:$0xff] %v2642_v58  ;;  %v2644_v1 = vadd.f32 %v2643_v59, %v2361_v55  ;;  %v2363_v2 = vadd.f32 %v2362_v63, %v11146_v49  ;;  %v10241_v55 = vld [vmem:[%s13795_s0 + $0x160] ss:$16 sps:$4 sm:$0xff]   ;;  %v10242_v63 = vld [vmem:[%s13795_s0 + $0x168] ss:$16 sps:$4 sm:$0xff]  }
 0x177   :  { %v2645_v3 = vpop.f32.mrf.mxu1  ;;  %v2364_v4 = vpop.f32.mrf.mxu0 }
 0x178   :  { %4643 = vst [vmem:[#allocation2 + $0x488] sm:$0xff] %v2644_v1  ;;  %v2646_v6 = vadd.f32 %v2645_v3, %v2363_v2  ;;  %v2365_v9 = vadd.f32 %v2364_v4, %v11151_v53  ;;  %v10243_v1 = vld [vmem:[%s13795_s0 + $0x184] ss:$16 sps:$4 sm:$0xff]   ;;  %v10244_v3 = vld [vmem:[%s13795_s0 + $0x18c] ss:$16 sps:$4 sm:$0xff]  }
 0x179   :  { %v2647_v10 = vpop.f32.mrf.mxu1  ;;  %v2368_v11 = vpop.f32.mrf.mxu0  ;;  %2923 = vmatmul.mubr.bf16.gmra.mxu0 %v10233_v12 }
 0x17a   :  { %4650 = vst [vmem:[#allocation2 + $0x4c0] sm:$0xff] %v2646_v6  ;;  %v2648_v25 = vadd.f32 %v2647_v10, %v2365_v9  ;;  %v2369_v14 = vadd.f32 %v2368_v11, %v11146_v49  ;;  %2932 = vmatprep.mubr.bf16.mxu0 %v10235_v26 }
 0x17b   :  { %v2651_v19 = vpop.f32.mrf.mxu1  ;;  %3206 = vmatmul.mubr.bf16.gmra.mxu1 %v10234_v21  ;;  %v2370_v27 = vpop.f32.mrf.mxu0 }
 0x17c   :  { %3215 = vmatprep.mubr.bf16.mxu1 %v10236_v0  ;;  %4651 = vst [vmem:[#allocation2 + $0x4c8] sm:$0xff] %v2648_v25  ;;  %v2652_v28 = vadd.f32 %v2651_v19, %v2369_v14  ;;  %v2371_v29 = vadd.f32 %v2370_v27, %v11151_v53  ;;  %v10245_v0 = vld [vmem:[%s13795_s0 + $0x180] ss:$16 sps:$4 sm:$0xff]  }
 0x17d   :  { %v2653_v30 = vpop.f32.mrf.mxu1  ;;  %v2372_v31 = vpop.f32.mrf.mxu0 }
 0x17e   :  { %4658 = vst [vmem:[#allocation2 + $0x500] sm:$0xff] %v2652_v28  ;;  %v2654_v35 = vadd.f32 %v2653_v30, %v2371_v29  ;;  %v2373_v32 = vadd.f32 %v2372_v31, %v11146_v49  ;;  %v10246_v31 = vld [vmem:[%s13795_s0 + $0x188] ss:$16 sps:$4 sm:$0xff]  }
 0x17f   :  { %v2655_v33 = vpop.f32.mrf.mxu1  ;;  %v2374_v36 = vpop.f32.mrf.mxu0 }
 0x180   :  { %4659 = vst [vmem:[#allocation2 + $0x508] sm:$0xff] %v2654_v35  ;;  %v2656_v13 = vadd.f32 %v2655_v33, %v2373_v32  ;;  %v2375_v38 = vadd.f32 %v2374_v36, %v11151_v53  ;;  %v10247_v35 = vld [vmem:[%s13795_s0 + $0x1a4] ss:$16 sps:$4 sm:$0xff]   ;;  %v10248_v33 = vld [vmem:[%s13795_s0 + $0x1ac] ss:$16 sps:$4 sm:$0xff]  }
 0x181   :  { %v2657_v39 = vpop.f32.mrf.mxu1  ;;  %v2378_v7 = vpop.f32.mrf.mxu0  ;;  %2933 = vmatmul.mubr.bf16.gmra.mxu0 %v10237_v60 }
 0x182   :  { %4666 = vst [vmem:[#allocation2 + $0x540] sm:$0xff] %v2656_v13  ;;  %v2658_v47 = vadd.f32 %v2657_v39, %v2375_v38  ;;  %v2379_v8 = vadd.f32 %v2378_v7, %v11146_v49  ;;  %2942 = vmatprep.mubr.bf16.mxu0 %v10239_v20  ;;  %v10249_v20 = vld [vmem:[%s13795_s0 + $0x1a0] ss:$16 sps:$4 sm:$0xff]  }
 0x183   :  { %v2661_v15 = vpop.f32.mrf.mxu1  ;;  %3216 = vmatmul.mubr.bf16.gmra.mxu1 %v10238_v18  ;;  %v2380_v22 = vpop.f32.mrf.mxu0 }
 0x184   :  { %3225 = vmatprep.mubr.bf16.mxu1 %v10240_v16  ;;  %4667 = vst [vmem:[#allocation2 + $0x548] sm:$0xff] %v2658_v47  ;;  %v2662_v23 = vadd.f32 %v2661_v15, %v2379_v8  ;;  %v2381_v44 = vadd.f32 %v2380_v22, %v11151_v53 }
 0x185   :  { %v2663_v24 = vpop.f32.mrf.mxu1  ;;  %v2382_v48 = vpop.f32.mrf.mxu0 }
 0x186   :  { %4674 = vst [vmem:[#allocation2 + $0x580] sm:$0xff] %v2662_v23  ;;  %v2664_v50 = vadd.f32 %v2663_v24, %v2381_v44  ;;  %v2383_v54 = vadd.f32 %v2382_v48, %v11146_v49  ;;  %v10250_v44 = vld [vmem:[%s13795_s0 + $0x1a8] ss:$16 sps:$4 sm:$0xff]   ;;  %v10251_v24 = vld [vmem:[%s13795_s0 + $0x1c4] ss:$16 sps:$4 sm:$0xff]  }
 0x187   :  { %v2665_v17 = vpop.f32.mrf.mxu1  ;;  %v2384_v56 = vpop.f32.mrf.mxu0 }
 0x188   :  { %4675 = vst [vmem:[#allocation2 + $0x588] sm:$0xff] %v2664_v50  ;;  %v2666_v46 = vadd.f32 %v2665_v17, %v2383_v54  ;;  %v2385_v52 = vadd.f32 %v2384_v56, %v11151_v53  ;;  %v10252_v50 = vld [vmem:[%s13795_s0 + $0x1cc] ss:$16 sps:$4 sm:$0xff]  }
 0x189   :  { %v2667_v57 = vpop.f32.mrf.mxu1  ;;  %v2388_v58 = vpop.f32.mrf.mxu0  ;;  %2943 = vmatmul.mubr.bf16.gmra.mxu0 %v10241_v55 }
 0x18a   :  { %4682 = vst [vmem:[#allocation2 + $0x5c0] sm:$0xff] %v2666_v46  ;;  %v2668_v59 = vadd.f32 %v2667_v57, %v2385_v52  ;;  %v2389_v61 = vadd.f32 %v2388_v58, %v11146_v49  ;;  %2952 = vmatprep.mubr.bf16.mxu0 %v10243_v1  ;;  %v10253_v1 = vld [vmem:[%s13795_s0 + $0x1c0] ss:$16 sps:$4 sm:$0xff]  }
 0x18b   :  { %v2671_v62 = vpop.f32.mrf.mxu1  ;;  %3226 = vmatmul.mubr.bf16.gmra.mxu1 %v10242_v63  ;;  %v2390_v2 = vpop.f32.mrf.mxu0 }
 0x18c   :  { %3235 = vmatprep.mubr.bf16.mxu1 %v10244_v3  ;;  %4683 = vst [vmem:[#allocation2 + $0x5c8] sm:$0xff] %v2668_v59  ;;  %v2672_v4 = vadd.f32 %v2671_v62, %v2389_v61  ;;  %v2391_v6 = vadd.f32 %v2390_v2, %v11151_v53 }
 0x18d   :  { %v2673_v9 = vpop.f32.mrf.mxu1  ;;  %v2392_v10 = vpop.f32.mrf.mxu0 }
 0x18e   :  { %4690 = vst [vmem:[#allocation2 + $0x600] sm:$0xff] %v2672_v4  ;;  %v2674_v11 = vadd.f32 %v2673_v9, %v2391_v6  ;;  %v2393_v12 = vadd.f32 %v2392_v10, %v11146_v49  ;;  %v10254_v6 = vld [vmem:[%s13795_s0 + $0x1c8] ss:$16 sps:$4 sm:$0xff]   ;;  %v10255_v9 = vld [vmem:[%s13795_s0 + $0x1e4] ss:$16 sps:$4 sm:$0xff]  }
 0x18f   :  { %v2675_v25 = vpop.f32.mrf.mxu1  ;;  %v2394_v14 = vpop.f32.mrf.mxu0 }
 0x190   :  { %4691 = vst [vmem:[#allocation2 + $0x608] sm:$0xff] %v2674_v11  ;;  %v2676_v19 = vadd.f32 %v2675_v25, %v2393_v12  ;;  %v2395_v21 = vadd.f32 %v2394_v14, %v11151_v53  ;;  %v10256_v11 = vld [vmem:[%s13795_s0 + $0x1ec] ss:$16 sps:$4 sm:$0xff]  }
 0x191   :  { %v2677_v26 = vpop.f32.mrf.mxu1  ;;  %v2398_v27 = vpop.f32.mrf.mxu0  ;;  %2953 = vmatmul.mubr.bf16.gmra.mxu0 %v10245_v0 }
 0x192   :  { %4698 = vst [vmem:[#allocation2 + $0x640] sm:$0xff] %v2676_v19  ;;  %v2678_v28 = vadd.f32 %v2677_v26, %v2395_v21  ;;  %v2399_v29 = vadd.f32 %v2398_v27, %v11146_v49  ;;  %2962 = vmatprep.mubr.bf16.mxu0 %v10247_v35  ;;  %v10257_v35 = vld [vmem:[%s13795_s0 + $0x1e0] ss:$16 sps:$4 sm:$0xff]  }
 0x193   :  { %v2681_v30 = vpop.f32.mrf.mxu1  ;;  %3236 = vmatmul.mubr.bf16.gmra.mxu1 %v10246_v31  ;;  %v2400_v32 = vpop.f32.mrf.mxu0 }
 0x194   :  { %3245 = vmatprep.mubr.bf16.mxu1 %v10248_v33  ;;  %4699 = vst [vmem:[#allocation2 + $0x648] sm:$0xff] %v2678_v28  ;;  %v2682_v36 = vadd.f32 %v2681_v30, %v2399_v29  ;;  %v2401_v51 = vadd.f32 %v2400_v32, %v11151_v53 }
 0x195   :  { %v2683_v13 = vpop.f32.mrf.mxu1  ;;  %v2402_v38 = vpop.f32.mrf.mxu0 }
 0x196   :  { %4706 = vst [vmem:[#allocation2 + $0x680] sm:$0xff] %v2682_v36  ;;  %v2684_v39 = vadd.f32 %v2683_v13, %v2401_v51  ;;  %v2403_v7 = vadd.f32 %v2402_v38, %v11146_v49  ;;  %v10258_v51 = vld [vmem:[%s13795_s0 + $0x1e8] ss:$16 sps:$4 sm:$0xff]   ;;  %v10259_v13 = vld [vmem:[%s13795_s0 + $0x204] ss:$16 sps:$4 sm:$0xff]  }
 0x197   :  { %v2685_v60 = vpop.f32.mrf.mxu1  ;;  %v2404_v45 = vpop.f32.mrf.mxu0 }
 0x198   :  { %4707 = vst [vmem:[#allocation2 + $0x688] sm:$0xff] %v2684_v39  ;;  %v2686_v47 = vadd.f32 %v2685_v60, %v2403_v7  ;;  %v2405_v8 = vadd.f32 %v2404_v45, %v11151_v53  ;;  %v10260_v39 = vld [vmem:[%s13795_s0 + $0x20c] ss:$16 sps:$4 sm:$0xff]  }
 0x199   :  { %v2687_v15 = vpop.f32.mrf.mxu1  ;;  %v2408_v18 = vpop.f32.mrf.mxu0  ;;  %2963 = vmatmul.mubr.bf16.gmra.mxu0 %v10249_v20 }
 0x19a   :  { %4714 = vst [vmem:[#allocation2 + $0x6c0] sm:$0xff] %v2686_v47  ;;  %v2688_v22 = vadd.f32 %v2687_v15, %v2405_v8  ;;  %v2409_v16 = vadd.f32 %v2408_v18, %v11146_v49  ;;  %2972 = vmatprep.mubr.bf16.mxu0 %v10251_v24  ;;  %v10261_v24 = vld [vmem:[%s13795_s0 + $0x200] ss:$16 sps:$4 sm:$0xff]  }
 0x19b   :  { %v2691_v23 = vpop.f32.mrf.mxu1  ;;  %3246 = vmatmul.mubr.bf16.gmra.mxu1 %v10250_v44  ;;  %v2410_v48 = vpop.f32.mrf.mxu0 }
 0x19c   :  { %3255 = vmatprep.mubr.bf16.mxu1 %v10252_v50  ;;  %4715 = vst [vmem:[#allocation2 + $0x6c8] sm:$0xff] %v2688_v22  ;;  %v2692_v54 = vadd.f32 %v2691_v23, %v2409_v16  ;;  %v2411_v17 = vadd.f32 %v2410_v48, %v11151_v53 }
 0x19d   :  { %v2693_v56 = vpop.f32.mrf.mxu1  ;;  %v2412_v46 = vpop.f32.mrf.mxu0 }
 0x19e   :  { %4722 = vst [vmem:[#allocation2 + $0x700] sm:$0xff] %v2692_v54  ;;  %v2694_v52 = vadd.f32 %v2693_v56, %v2411_v17  ;;  %v2413_v57 = vadd.f32 %v2412_v46, %v11146_v49  ;;  %v10262_v17 = vld [vmem:[%s13795_s0 + $0x208] ss:$16 sps:$4 sm:$0xff]   ;;  %v10263_v56 = vld [vmem:[%s13795_s0 + $0x224] ss:$16 sps:$4 sm:$0xff]  }
 0x19f   :  { %v2695_v58 = vpop.f32.mrf.mxu1  ;;  %v2414_v55 = vpop.f32.mrf.mxu0 }
 0x1a0   :  { %4723 = vst [vmem:[#allocation2 + $0x708] sm:$0xff] %v2694_v52  ;;  %v2696_v59 = vadd.f32 %v2695_v58, %v2413_v57  ;;  %v2415_v61 = vadd.f32 %v2414_v55, %v11151_v53  ;;  %v10264_v52 = vld [vmem:[%s13795_s0 + $0x22c] ss:$16 sps:$4 sm:$0xff]  }
 0x1a1   :  { %v2697_v62 = vpop.f32.mrf.mxu1  ;;  %v2418_v63 = vpop.f32.mrf.mxu0  ;;  %2973 = vmatmul.mubr.bf16.gmra.mxu0 %v10253_v1 }
 0x1a2   :  { %4730 = vst [vmem:[#allocation2 + $0x740] sm:$0xff] %v2696_v59  ;;  %v2698_v2 = vadd.f32 %v2697_v62, %v2415_v61  ;;  %v2419_v3 = vadd.f32 %v2418_v63, %v11146_v49  ;;  %2982 = vmatprep.mubr.bf16.mxu0 %v10255_v9  ;;  %v10265_v9 = vld [vmem:[%s13795_s0 + $0x220] ss:$16 sps:$4 sm:$0xff]  }
 0x1a3   :  { %v2701_v4 = vpop.f32.mrf.mxu1  ;;  %3256 = vmatmul.mubr.bf16.gmra.mxu1 %v10254_v6  ;;  %v2420_v10 = vpop.f32.mrf.mxu0 }
 0x1a4   :  { %3265 = vmatprep.mubr.bf16.mxu1 %v10256_v11  ;;  %4731 = vst [vmem:[#allocation2 + $0x748] sm:$0xff] %v2698_v2  ;;  %v2702_v12 = vadd.f32 %v2701_v4, %v2419_v3  ;;  %v2421_v25 = vadd.f32 %v2420_v10, %v11151_v53 }
 0x1a5   :  { %v2703_v14 = vpop.f32.mrf.mxu1  ;;  %v2422_v19 = vpop.f32.mrf.mxu0 }
 0x1a6   :  { %4738 = vst [vmem:[#allocation2 + $0x780] sm:$0xff] %v2702_v12  ;;  %v2704_v21 = vadd.f32 %v2703_v14, %v2421_v25  ;;  %v2423_v26 = vadd.f32 %v2422_v19, %v11146_v49  ;;  %v10266_v25 = vld [vmem:[%s13795_s0 + $0x228] ss:$16 sps:$4 sm:$0xff]   ;;  %v10267_v14 = vld [vmem:[%s13795_s0 + $0x244] ss:$16 sps:$4 sm:$0xff]  }
 0x1a7   :  { %v2705_v27 = vpop.f32.mrf.mxu1  ;;  %v2424_v0 = vpop.f32.mrf.mxu0 }
 0x1a8   :  { %4739 = vst [vmem:[#allocation2 + $0x788] sm:$0xff] %v2704_v21  ;;  %v2706_v28 = vadd.f32 %v2705_v27, %v2423_v26  ;;  %v2425_v29 = vadd.f32 %v2424_v0, %v11151_v53  ;;  %v10268_v21 = vld [vmem:[%s13795_s0 + $0x24c] ss:$16 sps:$4 sm:$0xff]  }
 0x1a9   :  { %v2707_v30 = vpop.f32.mrf.mxu1  ;;  %v2428_v31 = vpop.f32.mrf.mxu0  ;;  %2983 = vmatmul.mubr.bf16.gmra.mxu0 %v10257_v35 }
 0x1aa   :  { %4746 = vst [vmem:[#allocation2 + $0x7c0] sm:$0xff] %v2706_v28  ;;  %v2708_v32 = vadd.f32 %v2707_v30, %v2425_v29  ;;  %v2429_v33 = vadd.f32 %v2428_v31, %v11146_v49  ;;  %2992 = vmatprep.mubr.bf16.mxu0 %v10259_v13  ;;  %v10269_v13 = vld [vmem:[%s13795_s0 + $0x240] ss:$16 sps:$4 sm:$0xff]  }
 0x1ab   :  { %v2711_v36 = vpop.f32.mrf.mxu1  ;;  %3266 = vmatmul.mubr.bf16.gmra.mxu1 %v10258_v51  ;;  %v2430_v38 = vpop.f32.mrf.mxu0 }
 0x1ac   :  { %3275 = vmatprep.mubr.bf16.mxu1 %v10260_v39  ;;  %4747 = vst [vmem:[#allocation2 + $0x7c8] sm:$0xff] %v2708_v32  ;;  %v2712_v7 = vadd.f32 %v2711_v36, %v2429_v33  ;;  %v2431_v60 = vadd.f32 %v2430_v38, %v11151_v53 }
 0x1ad   :  { %v2713_v45 = vpop.f32.mrf.mxu1  ;;  %v2432_v47 = vpop.f32.mrf.mxu0 }
 0x1ae   :  { %4754 = vst [vmem:[#allocation2 + $0x800] sm:$0xff] %v2712_v7  ;;  %v2714_v8 = vadd.f32 %v2713_v45, %v2431_v60  ;;  %v2433_v15 = vadd.f32 %v2432_v47, %v11146_v49  ;;  %v10270_v60 = vld [vmem:[%s13795_s0 + $0x248] ss:$16 sps:$4 sm:$0xff]   ;;  %v10271_v45 = vld [vmem:[%s13795_s0 + $0x264] ss:$16 sps:$4 sm:$0xff]  }
 0x1af   :  { %v2715_v18 = vpop.f32.mrf.mxu1  ;;  %v2434_v20 = vpop.f32.mrf.mxu0 }
 0x1b0   :  { %4755 = vst [vmem:[#allocation2 + $0x808] sm:$0xff] %v2714_v8  ;;  %v2716_v22 = vadd.f32 %v2715_v18, %v2433_v15  ;;  %v2435_v16 = vadd.f32 %v2434_v20, %v11151_v53  ;;  %v10272_v8 = vld [vmem:[%s13795_s0 + $0x26c] ss:$16 sps:$4 sm:$0xff]  }
 0x1b1   :  { %v2717_v23 = vpop.f32.mrf.mxu1  ;;  %v2438_v44 = vpop.f32.mrf.mxu0  ;;  %2993 = vmatmul.mubr.bf16.gmra.mxu0 %v10261_v24 }
 0x1b2   :  { %4762 = vst [vmem:[#allocation2 + $0x840] sm:$0xff] %v2716_v22  ;;  %v2718_v48 = vadd.f32 %v2717_v23, %v2435_v16  ;;  %v2439_v50 = vadd.f32 %v2438_v44, %v11146_v49  ;;  %3002 = vmatprep.mubr.bf16.mxu0 %v10263_v56  ;;  %v10273_v56 = vld [vmem:[%s13795_s0 + $0x260] ss:$16 sps:$4 sm:$0xff]  }
 0x1b3   :  { %v2721_v54 = vpop.f32.mrf.mxu1  ;;  %3276 = vmatmul.mubr.bf16.gmra.mxu1 %v10262_v17  ;;  %v2440_v46 = vpop.f32.mrf.mxu0 }
 0x1b4   :  { %3285 = vmatprep.mubr.bf16.mxu1 %v10264_v52  ;;  %4763 = vst [vmem:[#allocation2 + $0x848] sm:$0xff] %v2718_v48  ;;  %v2722_v57 = vadd.f32 %v2721_v54, %v2439_v50  ;;  %v2441_v58 = vadd.f32 %v2440_v46, %v11151_v53 }
 0x1b5   :  { %v2723_v55 = vpop.f32.mrf.mxu1  ;;  %v2442_v59 = vpop.f32.mrf.mxu0 }
 0x1b6   :  { %4770 = vst [vmem:[#allocation2 + $0x880] sm:$0xff] %v2722_v57  ;;  %v2724_v61 = vadd.f32 %v2723_v55, %v2441_v58  ;;  %v2443_v62 = vadd.f32 %v2442_v59, %v11146_v49  ;;  %v10274_v58 = vld [vmem:[%s13795_s0 + $0x268] ss:$16 sps:$4 sm:$0xff]   ;;  %v10275_v55 = vld [vmem:[%s13795_s0 + $0x284] ss:$16 sps:$4 sm:$0xff]  }
 0x1b7   :  { %v2725_v63 = vpop.f32.mrf.mxu1  ;;  %v2444_v1 = vpop.f32.mrf.mxu0 }
 0x1b8   :  { %4771 = vst [vmem:[#allocation2 + $0x888] sm:$0xff] %v2724_v61  ;;  %v2726_v2 = vadd.f32 %v2725_v63, %v2443_v62  ;;  %v2445_v3 = vadd.f32 %v2444_v1, %v11151_v53  ;;  %v10276_v61 = vld [vmem:[%s13795_s0 + $0x28c] ss:$16 sps:$4 sm:$0xff]  }
 0x1b9   :  { %v2727_v4 = vpop.f32.mrf.mxu1  ;;  %v2448_v6 = vpop.f32.mrf.mxu0  ;;  %3003 = vmatmul.mubr.bf16.gmra.mxu0 %v10265_v9 }
 0x1ba   :  { %4778 = vst [vmem:[#allocation2 + $0x8c0] sm:$0xff] %v2726_v2  ;;  %v2728_v10 = vadd.f32 %v2727_v4, %v2445_v3  ;;  %v2449_v11 = vadd.f32 %v2448_v6, %v11146_v49  ;;  %3012 = vmatprep.mubr.bf16.mxu0 %v10267_v14  ;;  %v10277_v14 = vld [vmem:[%s13795_s0 + $0x280] ss:$16 sps:$4 sm:$0xff]  }
 0x1bb   :  { %v2731_v12 = vpop.f32.mrf.mxu1  ;;  %3286 = vmatmul.mubr.bf16.gmra.mxu1 %v10266_v25  ;;  %v2450_v19 = vpop.f32.mrf.mxu0 }
 0x1bc   :  { %3295 = vmatprep.mubr.bf16.mxu1 %v10268_v21  ;;  %4779 = vst [vmem:[#allocation2 + $0x8c8] sm:$0xff] %v2728_v10  ;;  %v2732_v26 = vadd.f32 %v2731_v12, %v2449_v11  ;;  %v2451_v27 = vadd.f32 %v2450_v19, %v11151_v53 }
 0x1bd   :  { %v2733_v0 = vpop.f32.mrf.mxu1  ;;  %v2452_v28 = vpop.f32.mrf.mxu0 }
 0x1be   :  { %4786 = vst [vmem:[#allocation2 + $0x900] sm:$0xff] %v2732_v26  ;;  %v2734_v29 = vadd.f32 %v2733_v0, %v2451_v27  ;;  %v2453_v30 = vadd.f32 %v2452_v28, %v11146_v49  ;;  %v10278_v27 = vld [vmem:[%s13795_s0 + $0x288] ss:$16 sps:$4 sm:$0xff]   ;;  %v10279_v0 = vld [vmem:[%s13795_s0 + $0x2a4] ss:$16 sps:$4 sm:$0xff]  }
 0x1bf   :  { %v2735_v31 = vpop.f32.mrf.mxu1  ;;  %v2454_v35 = vpop.f32.mrf.mxu0 }
 0x1c0   :  { %4787 = vst [vmem:[#allocation2 + $0x908] sm:$0xff] %v2734_v29  ;;  %v2736_v32 = vadd.f32 %v2735_v31, %v2453_v30  ;;  %v2455_v33 = vadd.f32 %v2454_v35, %v11151_v53  ;;  %v10280_v29 = vld [vmem:[%s13795_s0 + $0x2ac] ss:$16 sps:$4 sm:$0xff]  }
 0x1c1   :  { %v2737_v36 = vpop.f32.mrf.mxu1  ;;  %v2458_v51 = vpop.f32.mrf.mxu0  ;;  %3013 = vmatmul.mubr.bf16.gmra.mxu0 %v10269_v13 }
 0x1c2   :  { %4794 = vst [vmem:[#allocation2 + $0x940] sm:$0xff] %v2736_v32  ;;  %v2738_v38 = vadd.f32 %v2737_v36, %v2455_v33  ;;  %v2459_v39 = vadd.f32 %v2458_v51, %v11146_v49  ;;  %3022 = vmatprep.mubr.bf16.mxu0 %v10271_v45  ;;  %v10281_v45 = vld [vmem:[%s13795_s0 + $0x2a0] ss:$16 sps:$4 sm:$0xff]  }
 0x1c3   :  { %v2741_v7 = vpop.f32.mrf.mxu1  ;;  %3296 = vmatmul.mubr.bf16.gmra.mxu1 %v10270_v60  ;;  %v2460_v47 = vpop.f32.mrf.mxu0 }
 0x1c4   :  { %3305 = vmatprep.mubr.bf16.mxu1 %v10272_v8  ;;  %4795 = vst [vmem:[#allocation2 + $0x948] sm:$0xff] %v2738_v38  ;;  %v2742_v15 = vadd.f32 %v2741_v7, %v2459_v39  ;;  %v2461_v18 = vadd.f32 %v2460_v47, %v11151_v53 }
 0x1c5   :  { %v2743_v20 = vpop.f32.mrf.mxu1  ;;  %v2462_v22 = vpop.f32.mrf.mxu0 }
 0x1c6   :  { %4802 = vst [vmem:[#allocation2 + $0x980] sm:$0xff] %v2742_v15  ;;  %v2744_v16 = vadd.f32 %v2743_v20, %v2461_v18  ;;  %v2463_v23 = vadd.f32 %v2462_v22, %v11146_v49  ;;  %v10282_v18 = vld [vmem:[%s13795_s0 + $0x2a8] ss:$16 sps:$4 sm:$0xff]   ;;  %v10283_v20 = vld [vmem:[%s13795_s0 + $0x2c4] ss:$16 sps:$4 sm:$0xff]  }
 0x1c7   :  { %v2745_v44 = vpop.f32.mrf.mxu1  ;;  %v2464_v24 = vpop.f32.mrf.mxu0 }
 0x1c8   :  { %4803 = vst [vmem:[#allocation2 + $0x988] sm:$0xff] %v2744_v16  ;;  %v2746_v48 = vadd.f32 %v2745_v44, %v2463_v23  ;;  %v2465_v50 = vadd.f32 %v2464_v24, %v11151_v53  ;;  %v10284_v16 = vld [vmem:[%s13795_s0 + $0x2cc] ss:$16 sps:$4 sm:$0xff]  }
 0x1c9   :  { %v2747_v54 = vpop.f32.mrf.mxu1  ;;  %v2468_v17 = vpop.f32.mrf.mxu0  ;;  %3023 = vmatmul.mubr.bf16.gmra.mxu0 %v10273_v56 }
 0x1ca   :  { %4810 = vst [vmem:[#allocation2 + $0x9c0] sm:$0xff] %v2746_v48  ;;  %v2748_v46 = vadd.f32 %v2747_v54, %v2465_v50  ;;  %v2469_v52 = vadd.f32 %v2468_v17, %v11146_v49  ;;  %3032 = vmatprep.mubr.bf16.mxu0 %v10275_v55  ;;  %v10285_v55 = vld [vmem:[%s13795_s0 + $0x2c0] ss:$16 sps:$4 sm:$0xff]  }
 0x1cb   :  { %v2751_v57 = vpop.f32.mrf.mxu1  ;;  %3306 = vmatmul.mubr.bf16.gmra.mxu1 %v10274_v58  ;;  %v2470_v59 = vpop.f32.mrf.mxu0 }
 0x1cc   :  { %3315 = vmatprep.mubr.bf16.mxu1 %v10276_v61  ;;  %4811 = vst [vmem:[#allocation2 + $0x9c8] sm:$0xff] %v2748_v46  ;;  %v2752_v62 = vadd.f32 %v2751_v57, %v2469_v52  ;;  %v2471_v63 = vadd.f32 %v2470_v59, %v11151_v53 }
 0x1cd   :  { %v2753_v1 = vpop.f32.mrf.mxu1  ;;  %v2472_v2 = vpop.f32.mrf.mxu0 }
 0x1ce   :  { %4818 = vst [vmem:[#allocation2 + $0xa00] sm:$0xff] %v2752_v62  ;;  %v2754_v3 = vadd.f32 %v2753_v1, %v2471_v63  ;;  %v2473_v4 = vadd.f32 %v2472_v2, %v11146_v49  ;;  %v10286_v63 = vld [vmem:[%s13795_s0 + $0x2c8] ss:$16 sps:$4 sm:$0xff]   ;;  %v10287_v1 = vld [vmem:[%s13795_s0 + $0x2e4] ss:$16 sps:$4 sm:$0xff]  }
 0x1cf   :  { %v2755_v6 = vpop.f32.mrf.mxu1  ;;  %v2474_v9 = vpop.f32.mrf.mxu0 }
 0x1d0   :  { %4819 = vst [vmem:[#allocation2 + $0xa08] sm:$0xff] %v2754_v3  ;;  %v2756_v10 = vadd.f32 %v2755_v6, %v2473_v4  ;;  %v2475_v11 = vadd.f32 %v2474_v9, %v11151_v53  ;;  %v10288_v3 = vld [vmem:[%s13795_s0 + $0x2ec] ss:$16 sps:$4 sm:$0xff]  }
 0x1d1   :  { %v2757_v12 = vpop.f32.mrf.mxu1  ;;  %v2478_v25 = vpop.f32.mrf.mxu0  ;;  %3033 = vmatmul.mubr.bf16.gmra.mxu0 %v10277_v14 }
 0x1d2   :  { %4826 = vst [vmem:[#allocation2 + $0xa40] sm:$0xff] %v2756_v10  ;;  %v2758_v19 = vadd.f32 %v2757_v12, %v2475_v11  ;;  %v2479_v21 = vadd.f32 %v2478_v25, %v11146_v49  ;;  %3042 = vmatprep.mubr.bf16.mxu0 %v10279_v0  ;;  %v10289_v0 = vld [vmem:[%s13795_s0 + $0x2e0] ss:$16 sps:$4 sm:$0xff]  }
 0x1d3   :  { %v2761_v26 = vpop.f32.mrf.mxu1  ;;  %3316 = vmatmul.mubr.bf16.gmra.mxu1 %v10278_v27  ;;  %v2480_v28 = vpop.f32.mrf.mxu0 }
 0x1d4   :  { %3325 = vmatprep.mubr.bf16.mxu1 %v10280_v29  ;;  %4827 = vst [vmem:[#allocation2 + $0xa48] sm:$0xff] %v2758_v19  ;;  %v2762_v30 = vadd.f32 %v2761_v26, %v2479_v21  ;;  %v2481_v31 = vadd.f32 %v2480_v28, %v11151_v53 }
 0x1d5   :  { %v2763_v35 = vpop.f32.mrf.mxu1  ;;  %v2482_v32 = vpop.f32.mrf.mxu0 }
 0x1d6   :  { %4834 = vst [vmem:[#allocation2 + $0xa80] sm:$0xff] %v2762_v30  ;;  %v2764_v33 = vadd.f32 %v2763_v35, %v2481_v31  ;;  %v2483_v36 = vadd.f32 %v2482_v32, %v11146_v49  ;;  %v10290_v31 = vld [vmem:[%s13795_s0 + $0x2e8] ss:$16 sps:$4 sm:$0xff]   ;;  %v10291_v35 = vld [vmem:[%s13795_s0 + $0x304] ss:$16 sps:$4 sm:$0xff]   ;;  %v424_v32 = vsub.s32 2, %v11136_v41 }
 0x1d7   :  { %v2765_v51 = vpop.f32.mrf.mxu1  ;;  %v2484_v13 = vpop.f32.mrf.mxu0 }
 0x1d8   :  { %4835 = vst [vmem:[#allocation2 + $0xa88] sm:$0xff] %v2764_v33  ;;  %v2766_v38 = vadd.f32 %v2765_v51, %v2483_v36  ;;  %v2485_v39 = vadd.f32 %v2484_v13, %v11151_v53  ;;  %v10292_v36 = vld [vmem:[%s13795_s0 + $0x30c] ss:$16 sps:$4 sm:$0xff]  }
 0x1d9   :  { %v2767_v7 = vpop.f32.mrf.mxu1  ;;  %v2488_v60 = vpop.f32.mrf.mxu0  ;;  %3043 = vmatmul.mubr.bf16.gmra.mxu0 %v10281_v45 }
 0x1da   :  { %4842 = vst [vmem:[#allocation2 + $0xac0] sm:$0xff] %v2766_v38  ;;  %v2768_v47 = vadd.f32 %v2767_v7, %v2485_v39  ;;  %v2489_v8 = vadd.f32 %v2488_v60, %v11146_v49  ;;  %3052 = vmatprep.mubr.bf16.mxu0 %v10283_v20  ;;  %v428_v39 = vsub.s32 3, %v11136_v41 }
 0x1db   :  { %v2771_v15 = vpop.f32.mrf.mxu1  ;;  %3326 = vmatmul.mubr.bf16.gmra.mxu1 %v10282_v18  ;;  %v2490_v22 = vpop.f32.mrf.mxu0 }
 0x1dc   :  { %3335 = vmatprep.mubr.bf16.mxu1 %v10284_v16  ;;  %4843 = vst [vmem:[#allocation2 + $0xac8] sm:$0xff] %v2768_v47  ;;  %v2772_v23 = vadd.f32 %v2771_v15, %v2489_v8  ;;  %v2491_v44 = vadd.f32 %v2490_v22, %v11151_v53  ;;  %v10293_v8 = vld [vmem:[#allocation5] sm:$0xff] }
 0x1dd   :  { %v2773_v24 = vpop.f32.mrf.mxu1  ;;  %v2492_v48 = vpop.f32.mrf.mxu0  ;;  %v11568_v15 = vrot.slane %v10293_v8, %v424_v32 }
 0x1de   :  { %4850 = vst [vmem:[#allocation2 + $0xb00] sm:$0xff] %v2772_v23  ;;  %v2774_v50 = vadd.f32 %v2773_v24, %v2491_v44  ;;  %v2493_v54 = vadd.f32 %v2492_v48, %v11146_v49  ;;  %v11571_v23 = vrot.slane %v10293_v8, %v428_v39  ;;  %v10294_v24 = vld [vmem:[%s13795_s0 + $0x300] ss:$16 sps:$4 sm:$0xff]  }
 0x1df   :  { %v2775_v17 = vpop.f32.mrf.mxu1  ;;  %v2494_v56 = vpop.f32.mrf.mxu0 }
 0x1e0   :  { %4851 = vst [vmem:[#allocation2 + $0xb08] sm:$0xff] %v2774_v50  ;;  %v2776_v46 = vadd.f32 %v2775_v17, %v2493_v54  ;;  %v2495_v52 = vadd.f32 %v2494_v56, %v11151_v53  ;;  %v10295_v54 = vld [vmem:[%s13795_s0 + $0x308] ss:$16 sps:$4 sm:$0xff]   ;;  %v10297_v56 = vld [vmem:[%s13795_s0 + $0xc] ss:$16 sps:$4 sm:$0xff]  }
 0x1e1   :  { %v2777_v57 = vpop.f32.mrf.mxu1  ;;  %v2498_v58 = vpop.f32.mrf.mxu0  ;;  %3053 = vmatmul.mubr.bf16.gmra.mxu0 %v10285_v55  ;;  %v207_v55 = vld [vmem:[#allocation3 + $0x198] sm:$0xff] }
 0x1e2   :  { %4858 = vst [vmem:[#allocation2 + $0xb40] sm:$0xff] %v2776_v46  ;;  %v2778_v59 = vadd.f32 %v2777_v57, %v2495_v52  ;;  %v2499_v61 = vadd.f32 %v2498_v58, %v11146_v49  ;;  %3062 = vmatprep.mubr.bf16.mxu0 %v10287_v1  ;;  %v335_v1 = vld [vmem:[#allocation3 + $0x598] sm:$0xff] }
 0x1e3   :  { %v2781_v62 = vpop.f32.mrf.mxu1  ;;  %3336 = vmatmul.mubr.bf16.gmra.mxu1 %v10286_v63  ;;  %v2500_v2 = vpop.f32.mrf.mxu0 }
 0x1e4   :  { %3345 = vmatprep.mubr.bf16.mxu1 %v10288_v3  ;;  %4859 = vst [vmem:[#allocation2 + $0xb48] sm:$0xff] %v2778_v59  ;;  %v2782_v4 = vadd.f32 %v2781_v62, %v2499_v61  ;;  %v2501_v6 = vadd.f32 %v2500_v2, %v11151_v53  ;;  %v211_v59 = vld [vmem:[#allocation3 + $0x1b8] sm:$0xff] }
 0x1e5   :  { %v2783_v9 = vpop.f32.mrf.mxu1  ;;  %v2502_v10 = vpop.f32.mrf.mxu0  ;;  %v339_v2 = vld [vmem:[#allocation3 + $0x5b8] sm:$0xff] }
 0x1e6   :  { %4866 = vst [vmem:[#allocation2 + $0xb80] sm:$0xff] %v2782_v4  ;;  %v2784_v11 = vadd.f32 %v2783_v9, %v2501_v6  ;;  %v2503_v12 = vadd.f32 %v2502_v10, %v11146_v49  ;;  %v9256_v10 = vcombine.high %v207_v55, %v211_v59  ;;  %v9383_v32 = vcombine.low %v335_v1, %v339_v2 }
 0x1e7   :  { %v2785_v25 = vpop.f32.mrf.mxu1  ;;  %v2504_v14 = vpop.f32.mrf.mxu0 }
 0x1e8   :  { %4867 = vst [vmem:[#allocation2 + $0xb88] sm:$0xff] %v2784_v11  ;;  %v2786_v19 = vadd.f32 %v2785_v25, %v2503_v12  ;;  %v2505_v21 = vadd.f32 %v2504_v14, %v11151_v53  ;;  %v11589_v11 = vld [vmem:[#allocation3 + $0x158] sm:$0xff]  ;;  %v10298_v14 = vld [vmem:[%s13795_s0] ss:$16 sps:$4 sm:$0xff]  }
 0x1e9   :  { %v2787_v26 = vpop.f32.mrf.mxu1  ;;  %v2508_v27 = vpop.f32.mrf.mxu0  ;;  %3063 = vmatmul.mubr.bf16.gmra.mxu0 %v10289_v0  ;;  %v11591_v12 = vld [vmem:[#allocation3 + $0x178] sm:$0xff] }
 0x1ea   :  { %4874 = vst [vmem:[#allocation2 + $0xbc0] sm:$0xff] %v2786_v19  ;;  %v2788_v28 = vadd.f32 %v2787_v26, %v2505_v21  ;;  %v2509_v29 = vadd.f32 %v2508_v27, %v11146_v49  ;;  %3072 = vmatprep.mubr.bf16.mxu0 %v10291_v35  ;;  %v9384_v19 = vcombine.high %v335_v1, %v339_v2  ;;  %v11596_v21 = vld [vmem:[#allocation3 + $0x558] sm:$0xff]  ;;  %v10300_v35 = vld [vmem:[%s13795_s0 + $0x24] ss:$16 sps:$4 sm:$0xff]  }
 0x1eb   :  { %v2791_v30 = vpop.f32.mrf.mxu1  ;;  %3346 = vmatmul.mubr.bf16.gmra.mxu1 %v10290_v31  ;;  %v2510_v33 = vpop.f32.mrf.mxu0  ;;  %v11598_v26 = vld [vmem:[#allocation3 + $0x578] sm:$0xff] }
 0x1ec   :  { %3355 = vmatprep.mubr.bf16.mxu1 %v10292_v36  ;;  %4875 = vst [vmem:[#allocation2 + $0xbc8] sm:$0xff] %v2788_v28  ;;  %v2792_v51 = vadd.f32 %v2791_v30, %v2509_v29  ;;  %v2511_v13 = vadd.f32 %v2510_v33, %v11151_v53  ;;  %v10299_v29 = vld [vmem:[%s13795_s0 + $0x8] ss:$16 sps:$4 sm:$0xff]   ;;  %v9255_v30 = vcombine.low %v207_v55, %v211_v59  ;;  %v10305_v55 = vld [vmem:[%s13795_s0 + $0x4c] ss:$16 sps:$4 sm:$0xff]  }
 0x1ed   :  { %v2793_v38 = vpop.f32.mrf.mxu1  ;;  %v2512_v7 = vpop.f32.mrf.mxu0  ;;  %v9248_v33 = vcombine.high %v11589_v11, %v11591_v12  ;;  %v9376_v40 = vcombine.high %v11596_v21, %v11598_v26 }
 0x1ee   :  { %4882 = vst [vmem:[#allocation2 + $0xc00] sm:$0xff] %v2792_v51  ;;  %v2794_v60 = vadd.f32 %v2793_v38, %v2511_v13  ;;  %v2513_v45 = vadd.f32 %v2512_v7, %v11146_v49  ;;  %v195_v51 = vld [vmem:[#allocation3 + $0x138] sm:$0xff] }
 0x1ef   :  { %v2795_v47 = vpop.f32.mrf.mxu1  ;;  %v2514_v18 = vpop.f32.mrf.mxu0  ;;  %v319_v7 = vld [vmem:[#allocation3 + $0x518] sm:$0xff] }
 0x1f0   :  { %4883 = vst [vmem:[#allocation2 + $0xc08] sm:$0xff] %v2794_v60  ;;  %v2796_v20 = vadd.f32 %v2795_v47, %v2513_v45  ;;  %v2515_v22 = vadd.f32 %v2514_v18, %v11151_v53  ;;  %v10296_v53 = vld [vmem:[%s13795_s0 + $0x4] ss:$16 sps:$4 sm:$0xff]   ;;  %v323_v60 = vld [vmem:[#allocation3 + $0x538] sm:$0xff]  ;;  %v9247_v47 = vcombine.low %v11589_v11, %v11591_v12 }
 0x1f1   :  { %v2797_v16 = vpop.f32.mrf.mxu1  ;;  %v2834_v44 = vpop.f32.mrf.mxu0  ;;  %3073 = vmatmul.mubr.bf16.gmra.mxu0 %v10294_v24  ;;  %v10302_v24 = vld [vmem:[%s13795_s0 + $0x20] ss:$16 sps:$4 sm:$0xff]  }
 0x1f2   :  { %4890 = vst [vmem:[#allocation2 + $0xc40] sm:$0xff] %v2796_v20  ;;  %v2798_v49 = vadd.f32 %v2797_v16, %v2515_v22  ;;  %v2835_v48 = vadd.f32 %v2834_v44, %v11568_v15  ;;  %3398 = vmatprep.mubr.bf16.mxu0 %v10296_v53  ;;  %v9375_v22 = vcombine.low %v11596_v21, %v11598_v26 }
 0x1f3   :  { %v3117_v50 = vpop.f32.mrf.mxu1  ;;  %3356 = vmatmul.mubr.bf16.gmra.mxu1 %v10295_v54  ;;  %v2836_v17 = vpop.f32.mrf.mxu0 }
 0x1f4   :  { %3681 = vmatprep.mubr.bf16.mxu1 %v10297_v56  ;;  %4891 = vst [vmem:[#allocation2 + $0xc48] sm:$0xff] %v2798_v49  ;;  %v3118_v46 = vadd.f32 %v3117_v50, %v2835_v48  ;;  %v2837_v52 = vadd.f32 %v2836_v17, %v11571_v23  ;;  %v9368_v49 = vcombine.high %v319_v7, %v323_v60  ;;  %v11630_v48 = vld [vmem:[#allocation3 + $0xd8] sm:$0xff] }
 0x1f5   :  { %v3119_v57 = vpop.f32.mrf.mxu1  ;;  %v2838_v58 = vpop.f32.mrf.mxu0  ;;  %v11632_v50 = vld [vmem:[#allocation3 + $0xf8] sm:$0xff] }
 0x1f6   :  { %4500 = vst [vmem:[#allocation2 + $0x10] sm:$0xff] %v3118_v46  ;;  %v3120_v61 = vadd.f32 %v3119_v57, %v2837_v52  ;;  %v2839_v62 = vadd.f32 %v2838_v58, %v11568_v15  ;;  %v10303_v56 = vld [vmem:[%s13795_s0 + $0x28] ss:$16 sps:$4 sm:$0xff]   ;;  %v10304_v46 = vld [vmem:[%s13795_s0 + $0x44] ss:$16 sps:$4 sm:$0xff]   ;;  %v9232_v2 = vcombine.high %v11630_v48, %v11632_v50  ;;  %v9231_v21 = vcombine.low %v11630_v48, %v11632_v50 }
 0x1f7   :  { %v3121_v63 = vpop.f32.mrf.mxu1  ;;  %v2840_v3 = vpop.f32.mrf.mxu0  ;;  %v11641_v52 = vld [vmem:[#allocation3 + $0x4d8] sm:$0xff] }
 0x1f8   :  { %4501 = vst [vmem:[#allocation2 + $0x18] sm:$0xff] %v3120_v61  ;;  %v3122_v4 = vadd.f32 %v3121_v63, %v2839_v62  ;;  %v2841_v6 = vadd.f32 %v2840_v3, %v11571_v23  ;;  %v11643_v57 = vld [vmem:[#allocation3 + $0x4f8] sm:$0xff]  ;;  %v9367_v61 = vcombine.low %v319_v7, %v323_v60 }
 0x1f9   :  { %v3123_v9 = vpop.f32.mrf.mxu1  ;;  %v2844_v25 = vpop.f32.mrf.mxu0  ;;  %3399 = vmatmul.mubr.bf16.vlgmr.msra.gmra.mxu0 %v10298_v14  ;;  %v307_v14 = vld [vmem:[#allocation3 + $0x4b8] sm:$0xff]  ;;  %v9359_v26 = vcombine.low %v11641_v52, %v11643_v57 }
 0x1fa   :  { %4508 = vst [vmem:[#allocation2 + $0x50] sm:$0xff] %v3122_v4  ;;  %v3124_v27 = vadd.f32 %v3123_v9, %v2841_v6  ;;  %v2845_v0 = vadd.f32 %v2844_v25, %v11568_v15  ;;  %3933 = vmatpush1.bf16.msra.mxu0 %v9263_v37  ;;  %3408 = vmatprep.mubr.bf16.mxu0 %v10300_v35  ;;  %v10301_v37 = vld [vmem:[%s13795_s0 + $0x2c] ss:$16 sps:$4 sm:$0xff]  }
 0x1fb   :  { %v3127_v28 = vpop.f32.mrf.mxu1  ;;  %3682 = vmatmul.mubr.bf16.vlgmr.msra.gmra.mxu1 %v10299_v29  ;;  %v2846_v31 = vpop.f32.mrf.mxu0  ;;  %3934 = vmatprep.subr.bf16.mxu0 %v9256_v10  ;;  %v9360_v4 = vcombine.high %v11641_v52, %v11643_v57  ;;  %v175_v6 = vld [vmem:[#allocation3 + $0x98] sm:$0xff] }
 0x1fc   :  { %4216 = vmatpush1.bf16.msra.mxu1 %v9391_v43  ;;  %4509 = vst [vmem:[#allocation2 + $0x58] sm:$0xff] %v3124_v27  ;;  %v3128_v36 = vadd.f32 %v3127_v28, %v2845_v0  ;;  %v2847_v5 = vadd.f32 %v2846_v31, %v11571_v23  ;;  %3691 = vmatprep.mubr.bf16.mxu1 %v10301_v37  ;;  %v191_v43 = vld [vmem:[#allocation3 + $0x118] sm:$0xff]  ;;  %v10306_v31 = vld [vmem:[%s13795_s0 + $0x40] ss:$16 sps:$4 sm:$0xff]  }
 0x1fd   :  { %v3129_v34 = vpop.f32.mrf.mxu1  ;;  %v2848_v42 = vpop.f32.mrf.mxu0  ;;  %4217 = vmatprep.subr.bf16.mxu1 %v9384_v19  ;;  %v9240_v16 = vcombine.high %v191_v43, %v195_v51  ;;  %v9239_v59 = vcombine.low %v191_v43, %v195_v51  ;;  %v179_v9 = vld [vmem:[#allocation3 + $0xb8] sm:$0xff] }
 0x1fe   :  { %4516 = vst [vmem:[#allocation2 + $0x90] sm:$0xff] %v3128_v36  ;;  %v3130_v13 = vadd.f32 %v3129_v34, %v2847_v5  ;;  %v2849_v38 = vadd.f32 %v2848_v42, %v11568_v15  ;;  %3935 = vmatpush1.bf16.msra.mxu0 %v9255_v30  ;;  %v303_v25 = vld [vmem:[#allocation3 + $0x498] sm:$0xff]  ;;  %v9224_v29 = vcombine.high %v175_v6, %v179_v9 }
 0x1ff   :  { %v3131_v39 = vpop.f32.mrf.mxu1  ;;  %v2850_v45 = vpop.f32.mrf.mxu0  ;;  %3936 = vmatprep.subr.bf16.mxu0 %v9248_v33  ;;  %v9352_v35 = vcombine.high %v303_v25, %v307_v14  ;;  %v11664_v33 = vld [vmem:[#allocation3 + $0x78] sm:$0xff] }
 0x200   :  { %4218 = vmatpush1.bf16.msra.mxu1 %v9383_v32  ;;  %4517 = vst [vmem:[#allocation2 + $0x98] sm:$0xff] %v3130_v13  ;;  %v3132_v8 = vadd.f32 %v3131_v39, %v2849_v38  ;;  %v2851_v18 = vadd.f32 %v2850_v45, %v11571_v23  ;;  %v11662_v32 = vld [vmem:[#allocation3 + $0x58] sm:$0xff]  ;;  %v9223_v38 = vcombine.low %v175_v6, %v179_v9 }
 0x201   :  { %v3133_v20 = vpop.f32.mrf.mxu1  ;;  %4219 = vmatprep.subr.bf16.mxu1 %v9376_v40  ;;  %v2854_v44 = vpop.f32.mrf.mxu0  ;;  %3409 = vmatmul.mubr.bf16.gmra.mxu0 %v10302_v24  ;;  %v10307_v37 = vld [vmem:[%s13795_s0 + $0x48] ss:$16 sps:$4 sm:$0xff]   ;;  %v10308_v40 = vld [vmem:[%s13795_s0 + $0x64] ss:$16 sps:$4 sm:$0xff]   ;;  %v10309_v13 = vld [vmem:[%s13795_s0 + $0x6c] ss:$16 sps:$4 sm:$0xff]   ;;  %v9351_v39 = vcombine.low %v303_v25, %v307_v14 }
 0x202   :  { %4524 = vst [vmem:[#allocation2 + $0xd0] sm:$0xff] %v3132_v8  ;;  %v3134_v54 = vadd.f32 %v3133_v20, %v2851_v18  ;;  %v2855_v53 = vadd.f32 %v2854_v44, %v11568_v15  ;;  %3418 = vmatprep.mubr.bf16.mxu0 %v10304_v46  ;;  %3937 = vmatpush1.bf16.msra.mxu0 %v9247_v47  ;;  %v11673_v42 = vld [vmem:[#allocation3 + $0x458] sm:$0xff] }
 0x203   :  { %v3137_v17 = vpop.f32.mrf.mxu1  ;;  %3692 = vmatmul.mubr.bf16.gmra.mxu1 %v10303_v56  ;;  %v2856_v58 = vpop.f32.mrf.mxu0  ;;  %3938 = vmatprep.subr.bf16.mxu0 %v9240_v16  ;;  %v11675_v43 = vld [vmem:[#allocation3 + $0x478] sm:$0xff]  ;;  %v9216_v47 = vcombine.high %v11662_v32, %v11664_v33 }
 0x204   :  { %3701 = vmatprep.mubr.bf16.mxu1 %v10305_v55  ;;  %4525 = vst [vmem:[#allocation2 + $0xd8] sm:$0xff] %v3134_v54  ;;  %v3138_v62 = vadd.f32 %v3137_v17, %v2855_v53  ;;  %v2857_v63 = vadd.f32 %v2856_v58, %v11571_v23  ;;  %4220 = vmatpush1.bf16.msra.mxu1 %v9375_v22  ;;  %v159_v20 = vld [vmem:[#allocation3 + $0x18] sm:$0xff]  ;;  %v10310_v58 = vld [vmem:[%s13795_s0 + $0x60] ss:$16 sps:$4 sm:$0xff]  }
 0x205   :  { %v3139_v1 = vpop.f32.mrf.mxu1  ;;  %v2858_v3 = vpop.f32.mrf.mxu0  ;;  %4221 = vmatprep.subr.bf16.mxu1 %v9368_v49  ;;  %v9344_v18 = vcombine.high %v11673_v42, %v11675_v43  ;;  %v163_v22 = vld [vmem:[#allocation3 + $0x38] sm:$0xff]  ;;  %v9215_v54 = vcombine.low %v11662_v32, %v11664_v33  ;;  %v9343_v53 = vcombine.low %v11673_v42, %v11675_v43 }
 0x206   :  { %4532 = vst [vmem:[#allocation2 + $0x110] sm:$0xff] %v3138_v62  ;;  %v3140_v10 = vadd.f32 %v3139_v1, %v2857_v63  ;;  %v2859_v11 = vadd.f32 %v2858_v3, %v11568_v15  ;;  %3939 = vmatpush1.bf16.msra.mxu0 %v9239_v59  ;;  %v287_v49 = vld [vmem:[#allocation3 + $0x418] sm:$0xff]  ;;  %v9208_v52 = vcombine.high %v159_v20, %v163_v22  ;;  %v10312_v3 = vld [vmem:[%s13795_s0 + $0x84] ss:$16 sps:$4 sm:$0xff]  }
 0x207   :  { %v3141_v12 = vpop.f32.mrf.mxu1  ;;  %v2860_v19 = vpop.f32.mrf.mxu0  ;;  %3940 = vmatprep.subr.bf16.mxu0 %v9232_v2  ;;  %v291_v48 = vld [vmem:[#allocation3 + $0x438] sm:$0xff] }
 0x208   :  { %4533 = vst [vmem:[#allocation2 + $0x118] sm:$0xff] %v3140_v10  ;;  %v3142_v27 = vadd.f32 %v3141_v12, %v2859_v11  ;;  %v2861_v0 = vadd.f32 %v2860_v19, %v11571_v23  ;;  %4222 = vmatpush1.bf16.msra.mxu1 %v9367_v61  ;;  %v9336_v55 = vcombine.high %v287_v49, %v291_v48  ;;  %v11694_v59 = vld [vmem:[#allocation3 + $0x3d8] sm:$0xff] }
 0x209   :  { %v3143_v28 = vpop.f32.mrf.mxu1  ;;  %v2864_v30 = vpop.f32.mrf.mxu0  ;;  %3419 = vmatmul.mubr.bf16.gmra.mxu0 %v10306_v31  ;;  %4223 = vmatprep.subr.bf16.mxu1 %v9360_v4  ;;  %v11696_v61 = vld [vmem:[#allocation3 + $0x3f8] sm:$0xff]  ;;  %v9207_v11 = vcombine.low %v159_v20, %v163_v22  ;;  %v9335_v12 = vcombine.low %v287_v49, %v291_v48 }
 0x20a   :  { %4540 = vst [vmem:[#allocation2 + $0x150] sm:$0xff] %v3142_v27  ;;  %v3144_v36 = vadd.f32 %v3143_v28, %v2861_v0  ;;  %v2865_v5 = vadd.f32 %v2864_v30, %v11568_v15  ;;  %3428 = vmatprep.mubr.bf16.mxu0 %v10308_v40  ;;  %3941 = vmatpush1.bf16.msra.mxu0 %v9231_v21  ;;  %v10311_v2 = vld [vmem:[%s13795_s0 + $0x68] ss:$16 sps:$4 sm:$0xff]   ;;  %v10313_v10 = vld [vmem:[%s13795_s0 + $0x8c] ss:$16 sps:$4 sm:$0xff]  }
 0x20b   :  { %v3147_v34 = vpop.f32.mrf.mxu1  ;;  %3702 = vmatmul.mubr.bf16.gmra.mxu1 %v10307_v37  ;;  %v2866_v51 = vpop.f32.mrf.mxu0  ;;  %3942 = vmatprep.subr.bf16.mxu0 %v9224_v29  ;;  %v11705_v4 = vld [vmem:[#allocation3 + $0x7d8] sm:$0xff]  ;;  %v9328_v21 = vcombine.high %v11694_v59, %v11696_v61 }
 0x20c   :  { %3711 = vmatprep.mubr.bf16.mxu1 %v10309_v13  ;;  %4541 = vst [vmem:[#allocation2 + $0x158] sm:$0xff] %v3144_v36  ;;  %v3148_v7 = vadd.f32 %v3147_v34, %v2865_v5  ;;  %v2867_v60 = vadd.f32 %v2866_v51, %v11571_v23  ;;  %4224 = vmatpush1.bf16.msra.mxu1 %v9359_v26  ;;  %v11707_v6 = vld [vmem:[#allocation3 + $0x7f8] sm:$0xff]  ;;  %v10314_v51 = vld [vmem:[%s13795_s0 + $0x80] ss:$16 sps:$4 sm:$0xff]  }
 0x20d   :  { %v3149_v45 = vpop.f32.mrf.mxu1  ;;  %v2868_v8 = vpop.f32.mrf.mxu0  ;;  %4225 = vmatprep.subr.bf16.mxu1 %v9352_v35  ;;  %v9456_v27 = vcombine.high %v11705_v4, %v11707_v6  ;;  %v271_v0 = vld [vmem:[#allocation3 + $0x398] sm:$0xff]  ;;  %v9327_v36 = vcombine.low %v11694_v59, %v11696_v61  ;;  %v9455_v5 = vcombine.low %v11705_v4, %v11707_v6 }
 0x20e   :  { %4548 = vst [vmem:[#allocation2 + $0x190] sm:$0xff] %v3148_v7  ;;  %v3150_v16 = vadd.f32 %v3149_v45, %v2867_v60  ;;  %v2869_v44 = vadd.f32 %v2868_v8, %v11568_v15  ;;  %3943 = vmatpush1.bf16.msra.mxu0 %v9223_v38  ;;  %v275_v28 = vld [vmem:[#allocation3 + $0x3b8] sm:$0xff]  ;;  %v10316_v8 = vld [vmem:[%s13795_s0 + $0xa4] ss:$16 sps:$4 sm:$0xff]  }
 0x20f   :  { %v3151_v24 = vpop.f32.mrf.mxu1  ;;  %v2870_v50 = vpop.f32.mrf.mxu0  ;;  %3944 = vmatprep.subr.bf16.mxu0 %v9216_v47  ;;  %v399_v35 = vld [vmem:[#allocation3 + $0x798] sm:$0xff]  ;;  %v9320_v42 = vcombine.high %v271_v0, %v275_v28 }
 0x210   :  { %4549 = vst [vmem:[#allocation2 + $0x198] sm:$0xff] %v3150_v16  ;;  %v3152_v17 = vadd.f32 %v3151_v24, %v2869_v44  ;;  %v2871_v56 = vadd.f32 %v2870_v50, %v11571_v23  ;;  %4226 = vmatpush1.bf16.msra.mxu1 %v9351_v39  ;;  %v403_v32 = vld [vmem:[#allocation3 + $0x7b8] sm:$0xff]  ;;  %v9319_v44 = vcombine.low %v271_v0, %v275_v28 }
 0x211   :  { %v3153_v46 = vpop.f32.mrf.mxu1  ;;  %v2874_v57 = vpop.f32.mrf.mxu0  ;;  %3429 = vmatmul.mubr.bf16.gmra.mxu0 %v10310_v58  ;;  %4227 = vmatprep.subr.bf16.mxu1 %v9344_v18  ;;  %v9448_v13 = vcombine.high %v399_v35, %v403_v32  ;;  %v11726_v38 = vld [vmem:[#allocation3 + $0x358] sm:$0xff]  ;;  %v9447_v24 = vcombine.low %v399_v35, %v403_v32 }
 0x212   :  { %4556 = vst [vmem:[#allocation2 + $0x1d0] sm:$0xff] %v3152_v17  ;;  %v3154_v62 = vadd.f32 %v3153_v46, %v2871_v56  ;;  %v2875_v63 = vadd.f32 %v2874_v57, %v11568_v15  ;;  %3438 = vmatprep.mubr.bf16.mxu0 %v10312_v3  ;;  %3945 = vmatpush1.bf16.msra.mxu0 %v9215_v54  ;;  %v11728_v39 = vld [vmem:[#allocation3 + $0x378] sm:$0xff] }
 0x213   :  { %v3157_v1 = vpop.f32.mrf.mxu1  ;;  %3712 = vmatmul.mubr.bf16.gmra.mxu1 %v10311_v2  ;;  %v2876_v9 = vpop.f32.mrf.mxu0  ;;  %3946 = vmatprep.subr.bf16.mxu0 %v9208_v52  ;;  %v10315_v47 = vld [vmem:[%s13795_s0 + $0x88] ss:$16 sps:$4 sm:$0xff]   ;;  %v10317_v16 = vld [vmem:[%s13795_s0 + $0xac] ss:$16 sps:$4 sm:$0xff]   ;;  %v9312_v54 = vcombine.high %v11726_v38, %v11728_v39 }
 0x214   :  { %3721 = vmatprep.mubr.bf16.mxu1 %v10313_v10  ;;  %4557 = vst [vmem:[#allocation2 + $0x1d8] sm:$0xff] %v3154_v62  ;;  %v3158_v25 = vadd.f32 %v3157_v1, %v2875_v63  ;;  %v2877_v14 = vadd.f32 %v2876_v9, %v11571_v23  ;;  %4228 = vmatpush1.bf16.msra.mxu1 %v9343_v53  ;;  %v11737_v18 = vld [vmem:[#allocation3 + $0x758] sm:$0xff]  ;;  %v10318_v9 = vld [vmem:[%s13795_s0 + $0xa0] ss:$16 sps:$4 sm:$0xff]  }
 0x215   :  { %v3159_v19 = vpop.f32.mrf.mxu1  ;;  %v2878_v26 = vpop.f32.mrf.mxu0  ;;  %4229 = vmatprep.subr.bf16.mxu1 %v9336_v55  ;;  %v11739_v20 = vld [vmem:[#allocation3 + $0x778] sm:$0xff]  ;;  %v9311_v62 = vcombine.low %v11726_v38, %v11728_v39 }
 0x216   :  { %4564 = vst [vmem:[#allocation2 + $0x210] sm:$0xff] %v3158_v25  ;;  %v3160_v29 = vadd.f32 %v3159_v19, %v2877_v14  ;;  %v2879_v30 = vadd.f32 %v2878_v26, %v11568_v15  ;;  %3947 = vmatpush1.bf16.msra.mxu0 %v9207_v11  ;;  %v9440_v17 = vcombine.high %v11737_v18, %v11739_v20  ;;  %v255_v56 = vld [vmem:[#allocation3 + $0x318] sm:$0xff]  ;;  %v10320_v26 = vld [vmem:[%s13795_s0 + $0xc4] ss:$16 sps:$4 sm:$0xff]  }
 0x217   :  { %v3161_v31 = vpop.f32.mrf.mxu1  ;;  %v2880_v33 = vpop.f32.mrf.mxu0  ;;  %3948 = vmatprep.subr.bf16.mxu0 %v9328_v21  ;;  %v259_v46 = vld [vmem:[#allocation3 + $0x338] sm:$0xff]  ;;  %v9439_v63 = vcombine.low %v11737_v18, %v11739_v20 }
 0x218   :  { %4565 = vst [vmem:[#allocation2 + $0x218] sm:$0xff] %v3160_v29  ;;  %v3162_v34 = vadd.f32 %v3161_v31, %v2879_v30  ;;  %v2881_v37 = vadd.f32 %v2880_v33, %v11571_v23  ;;  %4230 = vmatpush1.bf16.msra.mxu1 %v9335_v12  ;;  %v383_v55 = vld [vmem:[#allocation3 + $0x718] sm:$0xff]  ;;  %v9304_v4 = vcombine.high %v255_v56, %v259_v46 }
 0x219   :  { %v3163_v40 = vpop.f32.mrf.mxu1  ;;  %v2884_v43 = vpop.f32.mrf.mxu0  ;;  %3439 = vmatmul.mubr.bf16.gmra.mxu0 %v10314_v51  ;;  %4231 = vmatprep.subr.bf16.mxu1 %v9456_v27  ;;  %v387_v59 = vld [vmem:[#allocation3 + $0x738] sm:$0xff]  ;;  %v9303_v30 = vcombine.low %v255_v56, %v259_v46 }
 0x21a   :  { %4572 = vst [vmem:[#allocation2 + $0x250] sm:$0xff] %v3162_v34  ;;  %v3164_v7 = vadd.f32 %v3163_v40, %v2881_v37  ;;  %v2885_v60 = vadd.f32 %v2884_v43, %v11568_v15  ;;  %3448 = vmatprep.mubr.bf16.mxu0 %v10316_v8  ;;  %3949 = vmatpush2.bf16.msra.mxu0 %v9327_v36  ;;  %v11758_v11 = vld [vmem:[#allocation3 + $0x2d8] sm:$0xff] }
 0x21b   :  { %v3167_v45 = vpop.f32.mrf.mxu1  ;;  %3722 = vmatmul.mubr.bf16.gmra.mxu1 %v10315_v47  ;;  %v2886_v22 = vpop.f32.mrf.mxu0  ;;  %3950 = vmatprep.subr.bf16.mxu0 %v9320_v42  ;;  %v9432_v10 = vcombine.high %v383_v55, %v387_v59  ;;  %v251_v12 = vld [vmem:[#allocation3 + $0x2f8] sm:$0xff]  ;;  %v9431_v31 = vcombine.low %v383_v55, %v387_v59 }
 0x21c   :  { %3731 = vmatprep.mubr.bf16.mxu1 %v10317_v16  ;;  %4573 = vst [vmem:[#allocation2 + $0x258] sm:$0xff] %v3164_v7  ;;  %v3168_v49 = vadd.f32 %v3167_v45, %v2885_v60  ;;  %v2887_v48 = vadd.f32 %v2886_v22, %v11571_v23  ;;  %4232 = vmatpush2.bf16.msra.mxu1 %v9455_v5  ;;  %v10319_v21 = vld [vmem:[%s13795_s0 + $0xa8] ss:$16 sps:$4 sm:$0xff]   ;;  %v10321_v29 = vld [vmem:[%s13795_s0 + $0xcc] ss:$16 sps:$4 sm:$0xff]  }
 0x21d   :  { %v3169_v50 = vpop.f32.mrf.mxu1  ;;  %v2888_v53 = vpop.f32.mrf.mxu0  ;;  %4233 = vmatprep.subr.bf16.mxu1 %v9448_v13  ;;  %v375_v27 = vld [vmem:[#allocation3 + $0x6d8] sm:$0xff]  ;;  %v9296_v36 = vcombine.high %v11758_v11, %v251_v12  ;;  %v9295_v7 = vcombine.low %v11758_v11, %v251_v12  ;;  %v10322_v22 = vld [vmem:[%s13795_s0 + $0xc0] ss:$16 sps:$4 sm:$0xff]  }
 0x21e   :  { %4580 = vst [vmem:[#allocation2 + $0x290] sm:$0xff] %v3168_v49  ;;  %v3170_v52 = vadd.f32 %v3169_v50, %v2887_v48  ;;  %v2889_v57 = vadd.f32 %v2888_v53, %v11568_v15  ;;  %3951 = vmatpush2.bf16.msra.mxu0 %v9319_v44  ;;  %v379_v0 = vld [vmem:[#allocation3 + $0x6f8] sm:$0xff]  ;;  %v10324_v50 = vld [vmem:[%s13795_s0 + $0xe4] ss:$16 sps:$4 sm:$0xff]  }
 0x21f   :  { %v3171_v58 = vpop.f32.mrf.mxu1  ;;  %v2890_v61 = vpop.f32.mrf.mxu0  ;;  %3952 = vmatprep.subr.bf16.mxu0 %v9312_v54  ;;  %v9424_v34 = vcombine.high %v375_v27, %v379_v0  ;;  %v239_v37 = vld [vmem:[#allocation3 + $0x298] sm:$0xff]  ;;  %v9423_v60 = vcombine.low %v375_v27, %v379_v0 }
 0x220   :  { %4581 = vst [vmem:[#allocation2 + $0x298] sm:$0xff] %v3170_v52  ;;  %v3172_v1 = vadd.f32 %v3171_v58, %v2889_v57  ;;  %v2891_v2 = vadd.f32 %v2890_v61, %v11571_v23  ;;  %4234 = vmatpush2.bf16.msra.mxu1 %v9447_v24  ;;  %v243_v40 = vld [vmem:[#allocation3 + $0x2b8] sm:$0xff] }
 0x221   :  { %v3173_v3 = vpop.f32.mrf.mxu1  ;;  %v2894_v6 = vpop.f32.mrf.mxu0  ;;  %3449 = vmatmul.mubr.bf16.gmra.mxu0 %v10318_v9  ;;  %4235 = vmatprep.subr.bf16.mxu1 %v9440_v17  ;;  %v367_v13 = vld [vmem:[#allocation3 + $0x698] sm:$0xff]  ;;  %v9288_v18 = vcombine.high %v239_v37, %v243_v40  ;;  %v9287_v17 = vcombine.low %v239_v37, %v243_v40 }
 0x222   :  { %4588 = vst [vmem:[#allocation2 + $0x2d0] sm:$0xff] %v3172_v1  ;;  %v3174_v25 = vadd.f32 %v3173_v3, %v2891_v2  ;;  %v2895_v14 = vadd.f32 %v2894_v6, %v11568_v15  ;;  %3458 = vmatprep.mubr.bf16.mxu0 %v10320_v26  ;;  %3953 = vmatpush2.bf16.msra.mxu0 %v9311_v62  ;;  %v371_v38 = vld [vmem:[#allocation3 + $0x6b8] sm:$0xff] }
 0x223   :  { %v3177_v19 = vpop.f32.mrf.mxu1  ;;  %3732 = vmatmul.mubr.bf16.gmra.mxu1 %v10319_v21  ;;  %v2896_v28 = vpop.f32.mrf.mxu0  ;;  %3954 = vmatprep.subr.bf16.mxu0 %v9304_v4  ;;  %v9416_v16 = vcombine.high %v367_v13, %v371_v38  ;;  %v10323_v48 = vld [vmem:[%s13795_s0 + $0xc8] ss:$16 sps:$4 sm:$0xff]   ;;  %v10325_v53 = vld [vmem:[%s13795_s0 + $0xec] ss:$16 sps:$4 sm:$0xff]   ;;  %v9415_v57 = vcombine.low %v367_v13, %v371_v38  ;;  %v10330_v13 = vld [vmem:[%s13795_s0 + $0x100] ss:$16 sps:$4 sm:$0xff]  }
 0x224   :  { %3741 = vmatprep.mubr.bf16.mxu1 %v10321_v29  ;;  %4589 = vst [vmem:[#allocation2 + $0x2d8] sm:$0xff] %v3174_v25  ;;  %v3178_v35 = vadd.f32 %v3177_v19, %v2895_v14  ;;  %v2897_v32 = vadd.f32 %v2896_v28, %v11571_v23  ;;  %4236 = vmatpush2.bf16.msra.mxu1 %v9439_v63  ;;  %v231_v58 = vld [vmem:[#allocation3 + $0x258] sm:$0xff]  ;;  %v10326_v19 = vld [vmem:[%s13795_s0 + $0xe0] ss:$16 sps:$4 sm:$0xff]   ;;  %v10328_v28 = vld [vmem:[%s13795_s0 + $0x104] ss:$16 sps:$4 sm:$0xff]  }
 0x225   :  { %v3179_v33 = vpop.f32.mrf.mxu1  ;;  %v2898_v5 = vpop.f32.mrf.mxu0  ;;  %4237 = vmatprep.subr.bf16.mxu1 %v9432_v10  ;;  %v235_v55 = vld [vmem:[#allocation3 + $0x278] sm:$0xff] }
 0x226   :  { %4596 = vst [vmem:[#allocation2 + $0x310] sm:$0xff] %v3178_v35  ;;  %v3180_v42 = vadd.f32 %v3179_v33, %v2897_v32  ;;  %v2899_v43 = vadd.f32 %v2898_v5, %v11568_v15  ;;  %3955 = vmatpush2.bf16.msra.mxu0 %v9303_v30  ;;  %v9280_v61 = vcombine.high %v231_v58, %v235_v55  ;;  %v359_v2 = vld [vmem:[#allocation3 + $0x658] sm:$0xff] }
 0x227   :  { %v3181_v51 = vpop.f32.mrf.mxu1  ;;  %v2900_v39 = vpop.f32.mrf.mxu0  ;;  %3956 = vmatprep.subr.bf16.mxu0 %v9296_v36  ;;  %v363_v3 = vld [vmem:[#allocation3 + $0x678] sm:$0xff]  ;;  %v9279_v6 = vcombine.low %v231_v58, %v235_v55 }
 0x228   :  { %4597 = vst [vmem:[#allocation2 + $0x318] sm:$0xff] %v3180_v42  ;;  %v3182_v45 = vadd.f32 %v3181_v51, %v2899_v43  ;;  %v2901_v47 = vadd.f32 %v2900_v39, %v11571_v23  ;;  %4238 = vmatpush2.bf16.msra.mxu1 %v9431_v31  ;;  %v9408_v9 = vcombine.high %v359_v2, %v363_v3  ;;  %v10327_v0 = vld [vmem:[%s13795_s0 + $0xe8] ss:$16 sps:$4 sm:$0xff]   ;;  %v10329_v30 = vld [vmem:[%s13795_s0 + $0x10c] ss:$16 sps:$4 sm:$0xff]  }
 0x229   :  { %v3183_v8 = vpop.f32.mrf.mxu1  ;;  %v2904_v20 = vpop.f32.mrf.mxu0  ;;  %3459 = vmatmul.mubr.bf16.gmra.mxu0 %v10322_v22  ;;  %4239 = vmatprep.subr.bf16.mxu1 %v9424_v34  ;;  %v9407_v25 = vcombine.low %v359_v2, %v363_v3  ;;  %v10335_v3 = vld [vmem:[%s13795_s0 + $0x128] ss:$16 sps:$4 sm:$0xff]  }
 0x22a   :  { %4604 = vst [vmem:[#allocation2 + $0x350] sm:$0xff] %v3182_v45  ;;  %v3184_v44 = vadd.f32 %v3183_v8, %v2901_v47  ;;  %v2905_v24 = vadd.f32 %v2904_v20, %v11568_v15  ;;  %3468 = vmatprep.mubr.bf16.mxu0 %v10324_v50  ;;  %3957 = vmatpush2.bf16.msra.mxu0 %v9295_v7  ;;  %v10332_v45 = vld [vmem:[%s13795_s0 + $0x124] ss:$16 sps:$4 sm:$0xff]   ;;  %v223_v47 = vld [vmem:[#allocation3 + $0x218] sm:$0xff] }
 0x22b   :  { %v3187_v49 = vpop.f32.mrf.mxu1  ;;  %3742 = vmatmul.mubr.bf16.gmra.mxu1 %v10323_v48  ;;  %v2906_v54 = vpop.f32.mrf.mxu0  ;;  %3958 = vmatprep.subr.bf16.mxu0 %v9288_v18  ;;  %v227_v8 = vld [vmem:[#allocation3 + $0x238] sm:$0xff] }
 0x22c   :  { %3751 = vmatprep.mubr.bf16.mxu1 %v10325_v53  ;;  %4605 = vst [vmem:[#allocation2 + $0x358] sm:$0xff] %v3184_v44  ;;  %v3188_v56 = vadd.f32 %v3187_v49, %v2905_v24  ;;  %v2907_v46 = vadd.f32 %v2906_v54, %v11571_v23  ;;  %4240 = vmatpush2.bf16.msra.mxu1 %v9423_v60  ;;  %v10331_v60 = vld [vmem:[%s13795_s0 + $0x108] ss:$16 sps:$4 sm:$0xff]   ;;  %v10333_v20 = vld [vmem:[%s13795_s0 + $0x12c] ss:$16 sps:$4 sm:$0xff]  }
 0x22d   :  { %v3189_v52 = vpop.f32.mrf.mxu1  ;;  %v2908_v59 = vpop.f32.mrf.mxu0  ;;  %4241 = vmatprep.subr.bf16.mxu1 %v9416_v16  ;;  %v9271_v22 = vcombine.low %v223_v47, %v227_v8  ;;  %v9272_v16 = vcombine.high %v223_v47, %v227_v8  ;;  %v351_v44 = vld [vmem:[#allocation3 + $0x618] sm:$0xff]  ;;  %v10342_v8 = vld [vmem:[%s13795_s0 + $0x160] ss:$16 sps:$4 sm:$0xff]  }
 0x22e   :  { %4612 = vst [vmem:[#allocation2 + $0x390] sm:$0xff] %v3188_v56  ;;  %v3190_v62 = vadd.f32 %v3189_v52, %v2907_v46  ;;  %v2909_v63 = vadd.f32 %v2908_v59, %v11568_v15  ;;  %3959 = vmatpush2.bf16.msra.mxu0 %v9287_v17  ;;  %v355_v24 = vld [vmem:[#allocation3 + $0x638] sm:$0xff] }
 0x22f   :  { %v3191_v1 = vpop.f32.mrf.mxu1  ;;  %v2910_v4 = vpop.f32.mrf.mxu0  ;;  %3960 = vmatprep.subr.bf16.mxu0 %v9280_v61  ;;  %v9399_v54 = vcombine.low %v351_v44, %v355_v24  ;;  %v9400_v53 = vcombine.high %v351_v44, %v355_v24  ;;  %v10344_v44 = vld [vmem:[%s13795_s0 + $0x184] ss:$16 sps:$4 sm:$0xff]  }
 0x230   :  { %4613 = vst [vmem:[#allocation2 + $0x398] sm:$0xff] %v3190_v62  ;;  %v3192_v10 = vadd.f32 %v3191_v1, %v2909_v63  ;;  %v2911_v11 = vadd.f32 %v2910_v4, %v11571_v23  ;;  %4242 = vmatpush2.bf16.msra.mxu1 %v9415_v57  ;;  %v10334_v62 = vld [vmem:[%s13795_s0 + $0x120] ss:$16 sps:$4 sm:$0xff]   ;;  %v10336_v4 = vld [vmem:[%s13795_s0 + $0x144] ss:$16 sps:$4 sm:$0xff]  }
 0x231   :  { %v3193_v12 = vpop.f32.mrf.mxu1  ;;  %v2914_v14 = vpop.f32.mrf.mxu0  ;;  %3469 = vmatmul.mubr.bf16.gmra.mxu0 %v10326_v19  ;;  %4243 = vmatprep.subr.bf16.mxu1 %v9408_v9  ;;  %v10337_v9 = vld [vmem:[%s13795_s0 + $0x14c] ss:$16 sps:$4 sm:$0xff]  }
 0x232   :  { %4620 = vst [vmem:[#allocation2 + $0x3d0] sm:$0xff] %v3192_v10  ;;  %v3194_v21 = vadd.f32 %v3193_v12, %v2911_v11  ;;  %v2915_v26 = vadd.f32 %v2914_v14, %v11568_v15  ;;  %3478 = vmatprep.mubr.bf16.mxu0 %v10328_v28  ;;  %3961 = vmatpush2.bf16.msra.mxu0 %v9279_v6 }
 0x233   :  { %v3197_v27 = vpop.f32.mrf.mxu1  ;;  %3752 = vmatmul.mubr.bf16.gmra.mxu1 %v10327_v0  ;;  %v2916_v29 = vpop.f32.mrf.mxu0  ;;  %3962 = vmatprep.subr.bf16.mxu0 %v9272_v16  ;;  %v10343_v16 = vld [vmem:[%s13795_s0 + $0x168] ss:$16 sps:$4 sm:$0xff]  }
 0x234   :  { %3761 = vmatprep.mubr.bf16.mxu1 %v10329_v30  ;;  %4621 = vst [vmem:[#allocation2 + $0x3d8] sm:$0xff] %v3194_v21  ;;  %v3198_v31 = vadd.f32 %v3197_v27, %v2915_v26  ;;  %v2917_v35 = vadd.f32 %v2916_v29, %v11571_v23  ;;  %4244 = vmatpush2.bf16.msra.mxu1 %v9407_v25  ;;  %v10338_v30 = vld [vmem:[%s13795_s0 + $0x140] ss:$16 sps:$4 sm:$0xff]  }
 0x235   :  { %v3199_v32 = vpop.f32.mrf.mxu1  ;;  %v2918_v33 = vpop.f32.mrf.mxu0  ;;  %4245 = vmatprep.subr.bf16.mxu1 %v9400_v53 }
 0x236   :  { %4628 = vst [vmem:[#allocation2 + $0x410] sm:$0xff] %v3198_v31  ;;  %v3200_v36 = vadd.f32 %v3199_v32, %v2917_v35  ;;  %v2919_v5 = vadd.f32 %v2918_v33, %v11568_v15  ;;  %3963 = vmatpush2.bf16.msra.mxu0 %v9271_v22  ;;  %v10339_v33 = vld [vmem:[%s13795_s0 + $0x148] ss:$16 sps:$4 sm:$0xff]  }
 0x237   :  { %v3201_v34 = vpop.f32.mrf.mxu1  ;;  %v2920_v37 = vpop.f32.mrf.mxu0 }
 0x238   :  { %4629 = vst [vmem:[#allocation2 + $0x418] sm:$0xff] %v3200_v36  ;;  %v3202_v40 = vadd.f32 %v3201_v34, %v2919_v5  ;;  %v2921_v42 = vadd.f32 %v2920_v37, %v11571_v23  ;;  %4246 = vmatpush2.bf16.msra.mxu1 %v9399_v54  ;;  %v10340_v36 = vld [vmem:[%s13795_s0 + $0x164] ss:$16 sps:$4 sm:$0xff]   ;;  %v10341_v34 = vld [vmem:[%s13795_s0 + $0x16c] ss:$16 sps:$4 sm:$0xff]  }
 0x239   :  { %v3203_v43 = vpop.f32.mrf.mxu1  ;;  %v2924_v51 = vpop.f32.mrf.mxu0  ;;  %3479 = vmatmul.mubr.bf16.gmra.mxu0 %v10330_v13 }
 0x23a   :  { %4636 = vst [vmem:[#allocation2 + $0x450] sm:$0xff] %v3202_v40  ;;  %v3204_v38 = vadd.f32 %v3203_v43, %v2921_v42  ;;  %v2925_v39 = vadd.f32 %v2924_v51, %v11568_v15  ;;  %3488 = vmatprep.mubr.bf16.mxu0 %v10332_v45 }
 0x23b   :  { %v3207_v7 = vpop.f32.mrf.mxu1  ;;  %3762 = vmatmul.mubr.bf16.gmra.mxu1 %v10331_v60  ;;  %v2926_v18 = vpop.f32.mrf.mxu0 }
 0x23c   :  { %3771 = vmatprep.mubr.bf16.mxu1 %v10333_v20  ;;  %4637 = vst [vmem:[#allocation2 + $0x458] sm:$0xff] %v3204_v38  ;;  %v3208_v49 = vadd.f32 %v3207_v7, %v2925_v39  ;;  %v2927_v48 = vadd.f32 %v2926_v18, %v11571_v23 }
 0x23d   :  { %v3209_v50 = vpop.f32.mrf.mxu1  ;;  %v2928_v17 = vpop.f32.mrf.mxu0 }
 0x23e   :  { %4644 = vst [vmem:[#allocation2 + $0x490] sm:$0xff] %v3208_v49  ;;  %v3210_v56 = vadd.f32 %v3209_v50, %v2927_v48  ;;  %v2929_v46 = vadd.f32 %v2928_v17, %v11568_v15  ;;  %v10345_v49 = vld [vmem:[%s13795_s0 + $0x18c] ss:$16 sps:$4 sm:$0xff]  }
 0x23f   :  { %v3211_v52 = vpop.f32.mrf.mxu1  ;;  %v2930_v57 = vpop.f32.mrf.mxu0 }
 0x240   :  { %4645 = vst [vmem:[#allocation2 + $0x498] sm:$0xff] %v3210_v56  ;;  %v3212_v58 = vadd.f32 %v3211_v52, %v2929_v46  ;;  %v2931_v55 = vadd.f32 %v2930_v57, %v11571_v23 }
 0x241   :  { %v3213_v59 = vpop.f32.mrf.mxu1  ;;  %v2934_v61 = vpop.f32.mrf.mxu0  ;;  %3489 = vmatmul.mubr.bf16.gmra.mxu0 %v10334_v62 }
 0x242   :  { %4652 = vst [vmem:[#allocation2 + $0x4d0] sm:$0xff] %v3212_v58  ;;  %v3214_v63 = vadd.f32 %v3213_v59, %v2931_v55  ;;  %v2935_v1 = vadd.f32 %v2934_v61, %v11568_v15  ;;  %3498 = vmatprep.mubr.bf16.mxu0 %v10336_v4  ;;  %v10346_v61 = vld [vmem:[%s13795_s0 + $0x180] ss:$16 sps:$4 sm:$0xff]  }
 0x243   :  { %v3217_v2 = vpop.f32.mrf.mxu1  ;;  %3772 = vmatmul.mubr.bf16.gmra.mxu1 %v10335_v3  ;;  %v2936_v6 = vpop.f32.mrf.mxu0  ;;  %v10348_v3 = vld [vmem:[%s13795_s0 + $0x1a4] ss:$16 sps:$4 sm:$0xff]  }
 0x244   :  { %3781 = vmatprep.mubr.bf16.mxu1 %v10337_v9  ;;  %4653 = vst [vmem:[#allocation2 + $0x4d8] sm:$0xff] %v3214_v63  ;;  %v3218_v10 = vadd.f32 %v3217_v2, %v2935_v1  ;;  %v2937_v11 = vadd.f32 %v2936_v6, %v11571_v23  ;;  %v10347_v2 = vld [vmem:[%s13795_s0 + $0x188] ss:$16 sps:$4 sm:$0xff]   ;;  %v10349_v6 = vld [vmem:[%s13795_s0 + $0x1ac] ss:$16 sps:$4 sm:$0xff]  }
 0x245   :  { %v3219_v12 = vpop.f32.mrf.mxu1  ;;  %v2938_v25 = vpop.f32.mrf.mxu0 }
 0x246   :  { %4660 = vst [vmem:[#allocation2 + $0x510] sm:$0xff] %v3218_v10  ;;  %v3220_v14 = vadd.f32 %v3219_v12, %v2937_v11  ;;  %v2939_v19 = vadd.f32 %v2938_v25, %v11568_v15 }
 0x247   :  { %v3221_v21 = vpop.f32.mrf.mxu1  ;;  %v2940_v26 = vpop.f32.mrf.mxu0 }
 0x248   :  { %4661 = vst [vmem:[#allocation2 + $0x518] sm:$0xff] %v3220_v14  ;;  %v3222_v27 = vadd.f32 %v3221_v21, %v2939_v19  ;;  %v2941_v0 = vadd.f32 %v2940_v26, %v11571_v23 }
 0x249   :  { %v3223_v28 = vpop.f32.mrf.mxu1  ;;  %v2944_v29 = vpop.f32.mrf.mxu0  ;;  %3499 = vmatmul.mubr.bf16.gmra.mxu0 %v10338_v30 }
 0x24a   :  { %4668 = vst [vmem:[#allocation2 + $0x550] sm:$0xff] %v3222_v27  ;;  %v3224_v31 = vadd.f32 %v3223_v28, %v2941_v0  ;;  %v2945_v35 = vadd.f32 %v2944_v29, %v11568_v15  ;;  %3508 = vmatprep.mubr.bf16.mxu0 %v10340_v36  ;;  %v10350_v29 = vld [vmem:[%s13795_s0 + $0x1a0] ss:$16 sps:$4 sm:$0xff]  }
 0x24b   :  { %v3227_v32 = vpop.f32.mrf.mxu1  ;;  %3782 = vmatmul.mubr.bf16.gmra.mxu1 %v10339_v33  ;;  %v2946_v5 = vpop.f32.mrf.mxu0  ;;  %v10352_v33 = vld [vmem:[%s13795_s0 + $0x1c4] ss:$16 sps:$4 sm:$0xff]  }
 0x24c   :  { %3791 = vmatprep.mubr.bf16.mxu1 %v10341_v34  ;;  %4669 = vst [vmem:[#allocation2 + $0x558] sm:$0xff] %v3224_v31  ;;  %v3228_v37 = vadd.f32 %v3227_v32, %v2945_v35  ;;  %v2947_v40 = vadd.f32 %v2946_v5, %v11571_v23  ;;  %v10351_v32 = vld [vmem:[%s13795_s0 + $0x1a8] ss:$16 sps:$4 sm:$0xff]   ;;  %v10353_v5 = vld [vmem:[%s13795_s0 + $0x1cc] ss:$16 sps:$4 sm:$0xff]  }
 0x24d   :  { %v3229_v42 = vpop.f32.mrf.mxu1  ;;  %v2948_v43 = vpop.f32.mrf.mxu0 }
 0x24e   :  { %4676 = vst [vmem:[#allocation2 + $0x590] sm:$0xff] %v3228_v37  ;;  %v3230_v51 = vadd.f32 %v3229_v42, %v2947_v40  ;;  %v2949_v13 = vadd.f32 %v2948_v43, %v11568_v15 }
 0x24f   :  { %v3231_v38 = vpop.f32.mrf.mxu1  ;;  %v2950_v39 = vpop.f32.mrf.mxu0 }
 0x250   :  { %4677 = vst [vmem:[#allocation2 + $0x598] sm:$0xff] %v3230_v51  ;;  %v3232_v7 = vadd.f32 %v3231_v38, %v2949_v13  ;;  %v2951_v60 = vadd.f32 %v2950_v39, %v11571_v23 }
 0x251   :  { %v3233_v45 = vpop.f32.mrf.mxu1  ;;  %v2954_v47 = vpop.f32.mrf.mxu0  ;;  %3509 = vmatmul.mubr.bf16.gmra.mxu0 %v10342_v8 }
 0x252   :  { %4684 = vst [vmem:[#allocation2 + $0x5d0] sm:$0xff] %v3232_v7  ;;  %v3234_v18 = vadd.f32 %v3233_v45, %v2951_v60  ;;  %v2955_v20 = vadd.f32 %v2954_v47, %v11568_v15  ;;  %3518 = vmatprep.mubr.bf16.mxu0 %v10344_v44  ;;  %v10354_v47 = vld [vmem:[%s13795_s0 + $0x1c0] ss:$16 sps:$4 sm:$0xff]  }
 0x253   :  { %v3237_v22 = vpop.f32.mrf.mxu1  ;;  %3792 = vmatmul.mubr.bf16.gmra.mxu1 %v10343_v16  ;;  %v2956_v24 = vpop.f32.mrf.mxu0  ;;  %v10356_v16 = vld [vmem:[%s13795_s0 + $0x1e4] ss:$16 sps:$4 sm:$0xff]  }
 0x254   :  { %3801 = vmatprep.mubr.bf16.mxu1 %v10345_v49  ;;  %4685 = vst [vmem:[#allocation2 + $0x5d8] sm:$0xff] %v3234_v18  ;;  %v3238_v48 = vadd.f32 %v3237_v22, %v2955_v20  ;;  %v2957_v50 = vadd.f32 %v2956_v24, %v11571_v23  ;;  %v10355_v22 = vld [vmem:[%s13795_s0 + $0x1c8] ss:$16 sps:$4 sm:$0xff]   ;;  %v10357_v24 = vld [vmem:[%s13795_s0 + $0x1ec] ss:$16 sps:$4 sm:$0xff]  }
 0x255   :  { %v3239_v54 = vpop.f32.mrf.mxu1  ;;  %v2958_v53 = vpop.f32.mrf.mxu0 }
 0x256   :  { %4692 = vst [vmem:[#allocation2 + $0x610] sm:$0xff] %v3238_v48  ;;  %v3240_v17 = vadd.f32 %v3239_v54, %v2957_v50  ;;  %v2959_v56 = vadd.f32 %v2958_v53, %v11568_v15 }
 0x257   :  { %v3241_v46 = vpop.f32.mrf.mxu1  ;;  %v2960_v52 = vpop.f32.mrf.mxu0 }
 0x258   :  { %4693 = vst [vmem:[#allocation2 + $0x618] sm:$0xff] %v3240_v17  ;;  %v3242_v57 = vadd.f32 %v3241_v46, %v2959_v56  ;;  %v2961_v58 = vadd.f32 %v2960_v52, %v11571_v23 }
 0x259   :  { %v3243_v55 = vpop.f32.mrf.mxu1  ;;  %v2964_v59 = vpop.f32.mrf.mxu0  ;;  %3519 = vmatmul.mubr.bf16.gmra.mxu0 %v10346_v61 }
 0x25a   :  { %4700 = vst [vmem:[#allocation2 + $0x650] sm:$0xff] %v3242_v57  ;;  %v3244_v62 = vadd.f32 %v3243_v55, %v2961_v58  ;;  %v2965_v63 = vadd.f32 %v2964_v59, %v11568_v15  ;;  %3528 = vmatprep.mubr.bf16.mxu0 %v10348_v3  ;;  %v10358_v59 = vld [vmem:[%s13795_s0 + $0x1e0] ss:$16 sps:$4 sm:$0xff]  }
 0x25b   :  { %v3247_v1 = vpop.f32.mrf.mxu1  ;;  %3802 = vmatmul.mubr.bf16.gmra.mxu1 %v10347_v2  ;;  %v2966_v4 = vpop.f32.mrf.mxu0  ;;  %v10360_v2 = vld [vmem:[%s13795_s0 + $0x204] ss:$16 sps:$4 sm:$0xff]  }
 0x25c   :  { %3811 = vmatprep.mubr.bf16.mxu1 %v10349_v6  ;;  %4701 = vst [vmem:[#allocation2 + $0x658] sm:$0xff] %v3244_v62  ;;  %v3248_v9 = vadd.f32 %v3247_v1, %v2965_v63  ;;  %v2967_v10 = vadd.f32 %v2966_v4, %v11571_v23  ;;  %v10359_v1 = vld [vmem:[%s13795_s0 + $0x1e8] ss:$16 sps:$4 sm:$0xff]   ;;  %v10361_v4 = vld [vmem:[%s13795_s0 + $0x20c] ss:$16 sps:$4 sm:$0xff]  }
 0x25d   :  { %v3249_v11 = vpop.f32.mrf.mxu1  ;;  %v2968_v12 = vpop.f32.mrf.mxu0 }
 0x25e   :  { %4708 = vst [vmem:[#allocation2 + $0x690] sm:$0xff] %v3248_v9  ;;  %v3250_v25 = vadd.f32 %v3249_v11, %v2967_v10  ;;  %v2969_v14 = vadd.f32 %v2968_v12, %v11568_v15 }
 0x25f   :  { %v3251_v19 = vpop.f32.mrf.mxu1  ;;  %v2970_v21 = vpop.f32.mrf.mxu0 }
 0x260   :  { %4709 = vst [vmem:[#allocation2 + $0x698] sm:$0xff] %v3250_v25  ;;  %v3252_v26 = vadd.f32 %v3251_v19, %v2969_v14  ;;  %v2971_v27 = vadd.f32 %v2970_v21, %v11571_v23 }
 0x261   :  { %v3253_v0 = vpop.f32.mrf.mxu1  ;;  %v2974_v28 = vpop.f32.mrf.mxu0  ;;  %3529 = vmatmul.mubr.bf16.gmra.mxu0 %v10350_v29 }
 0x262   :  { %4716 = vst [vmem:[#allocation2 + $0x6d0] sm:$0xff] %v3252_v26  ;;  %v3254_v30 = vadd.f32 %v3253_v0, %v2971_v27  ;;  %v2975_v31 = vadd.f32 %v2974_v28, %v11568_v15  ;;  %3538 = vmatprep.mubr.bf16.mxu0 %v10352_v33  ;;  %v10362_v28 = vld [vmem:[%s13795_s0 + $0x200] ss:$16 sps:$4 sm:$0xff]  }
 0x263   :  { %v3257_v35 = vpop.f32.mrf.mxu1  ;;  %3812 = vmatmul.mubr.bf16.gmra.mxu1 %v10351_v32  ;;  %v2976_v36 = vpop.f32.mrf.mxu0  ;;  %v10364_v32 = vld [vmem:[%s13795_s0 + $0x224] ss:$16 sps:$4 sm:$0xff]  }
 0x264   :  { %3821 = vmatprep.mubr.bf16.mxu1 %v10353_v5  ;;  %4717 = vst [vmem:[#allocation2 + $0x6d8] sm:$0xff] %v3254_v30  ;;  %v3258_v34 = vadd.f32 %v3257_v35, %v2975_v31  ;;  %v2977_v37 = vadd.f32 %v2976_v36, %v11571_v23  ;;  %v10363_v35 = vld [vmem:[%s13795_s0 + $0x208] ss:$16 sps:$4 sm:$0xff]   ;;  %v10365_v36 = vld [vmem:[%s13795_s0 + $0x22c] ss:$16 sps:$4 sm:$0xff]  }
 0x265   :  { %v3259_v40 = vpop.f32.mrf.mxu1  ;;  %v2978_v42 = vpop.f32.mrf.mxu0 }
 0x266   :  { %4724 = vst [vmem:[#allocation2 + $0x710] sm:$0xff] %v3258_v34  ;;  %v3260_v43 = vadd.f32 %v3259_v40, %v2977_v37  ;;  %v2979_v51 = vadd.f32 %v2978_v42, %v11568_v15 }
 0x267   :  { %v3261_v13 = vpop.f32.mrf.mxu1  ;;  %v2980_v38 = vpop.f32.mrf.mxu0 }
 0x268   :  { %4725 = vst [vmem:[#allocation2 + $0x718] sm:$0xff] %v3260_v43  ;;  %v3262_v39 = vadd.f32 %v3261_v13, %v2979_v51  ;;  %v2981_v7 = vadd.f32 %v2980_v38, %v11571_v23 }
 0x269   :  { %v3263_v60 = vpop.f32.mrf.mxu1  ;;  %v2984_v45 = vpop.f32.mrf.mxu0  ;;  %3539 = vmatmul.mubr.bf16.gmra.mxu0 %v10354_v47 }
 0x26a   :  { %4732 = vst [vmem:[#allocation2 + $0x750] sm:$0xff] %v3262_v39  ;;  %v3264_v8 = vadd.f32 %v3263_v60, %v2981_v7  ;;  %v2985_v18 = vadd.f32 %v2984_v45, %v11568_v15  ;;  %3548 = vmatprep.mubr.bf16.mxu0 %v10356_v16  ;;  %v10366_v45 = vld [vmem:[%s13795_s0 + $0x220] ss:$16 sps:$4 sm:$0xff]  }
 0x26b   :  { %v3267_v20 = vpop.f32.mrf.mxu1  ;;  %3822 = vmatmul.mubr.bf16.gmra.mxu1 %v10355_v22  ;;  %v2986_v44 = vpop.f32.mrf.mxu0  ;;  %v10368_v22 = vld [vmem:[%s13795_s0 + $0x244] ss:$16 sps:$4 sm:$0xff]  }
 0x26c   :  { %3831 = vmatprep.mubr.bf16.mxu1 %v10357_v24  ;;  %4733 = vst [vmem:[#allocation2 + $0x758] sm:$0xff] %v3264_v8  ;;  %v3268_v49 = vadd.f32 %v3267_v20, %v2985_v18  ;;  %v2987_v48 = vadd.f32 %v2986_v44, %v11571_v23  ;;  %v10367_v20 = vld [vmem:[%s13795_s0 + $0x228] ss:$16 sps:$4 sm:$0xff]   ;;  %v10369_v44 = vld [vmem:[%s13795_s0 + $0x24c] ss:$16 sps:$4 sm:$0xff]  }
 0x26d   :  { %v3269_v50 = vpop.f32.mrf.mxu1  ;;  %v2988_v54 = vpop.f32.mrf.mxu0 }
 0x26e   :  { %4740 = vst [vmem:[#allocation2 + $0x790] sm:$0xff] %v3268_v49  ;;  %v3270_v53 = vadd.f32 %v3269_v50, %v2987_v48  ;;  %v2989_v17 = vadd.f32 %v2988_v54, %v11568_v15 }
 0x26f   :  { %v3271_v56 = vpop.f32.mrf.mxu1  ;;  %v2990_v46 = vpop.f32.mrf.mxu0 }
 0x270   :  { %4741 = vst [vmem:[#allocation2 + $0x798] sm:$0xff] %v3270_v53  ;;  %v3272_v52 = vadd.f32 %v3271_v56, %v2989_v17  ;;  %v2991_v57 = vadd.f32 %v2990_v46, %v11571_v23 }
 0x271   :  { %v3273_v58 = vpop.f32.mrf.mxu1  ;;  %v2994_v55 = vpop.f32.mrf.mxu0  ;;  %3549 = vmatmul.mubr.bf16.gmra.mxu0 %v10358_v59 }
 0x272   :  { %4748 = vst [vmem:[#allocation2 + $0x7d0] sm:$0xff] %v3272_v52  ;;  %v3274_v61 = vadd.f32 %v3273_v58, %v2991_v57  ;;  %v2995_v62 = vadd.f32 %v2994_v55, %v11568_v15  ;;  %3558 = vmatprep.mubr.bf16.mxu0 %v10360_v2  ;;  %v10370_v55 = vld [vmem:[%s13795_s0 + $0x240] ss:$16 sps:$4 sm:$0xff]  }
 0x273   :  { %v3277_v63 = vpop.f32.mrf.mxu1  ;;  %3832 = vmatmul.mubr.bf16.gmra.mxu1 %v10359_v1  ;;  %v2996_v3 = vpop.f32.mrf.mxu0  ;;  %v10372_v1 = vld [vmem:[%s13795_s0 + $0x264] ss:$16 sps:$4 sm:$0xff]  }
 0x274   :  { %3841 = vmatprep.mubr.bf16.mxu1 %v10361_v4  ;;  %4749 = vst [vmem:[#allocation2 + $0x7d8] sm:$0xff] %v3274_v61  ;;  %v3278_v6 = vadd.f32 %v3277_v63, %v2995_v62  ;;  %v2997_v9 = vadd.f32 %v2996_v3, %v11571_v23  ;;  %v10371_v63 = vld [vmem:[%s13795_s0 + $0x248] ss:$16 sps:$4 sm:$0xff]   ;;  %v10373_v3 = vld [vmem:[%s13795_s0 + $0x26c] ss:$16 sps:$4 sm:$0xff]  }
 0x275   :  { %v3279_v10 = vpop.f32.mrf.mxu1  ;;  %v2998_v11 = vpop.f32.mrf.mxu0 }
 0x276   :  { %4756 = vst [vmem:[#allocation2 + $0x810] sm:$0xff] %v3278_v6  ;;  %v3280_v12 = vadd.f32 %v3279_v10, %v2997_v9  ;;  %v2999_v25 = vadd.f32 %v2998_v11, %v11568_v15 }
 0x277   :  { %v3281_v14 = vpop.f32.mrf.mxu1  ;;  %v3000_v19 = vpop.f32.mrf.mxu0 }
 0x278   :  { %4757 = vst [vmem:[#allocation2 + $0x818] sm:$0xff] %v3280_v12  ;;  %v3282_v21 = vadd.f32 %v3281_v14, %v2999_v25  ;;  %v3001_v26 = vadd.f32 %v3000_v19, %v11571_v23 }
 0x279   :  { %v3283_v27 = vpop.f32.mrf.mxu1  ;;  %v3004_v0 = vpop.f32.mrf.mxu0  ;;  %3559 = vmatmul.mubr.bf16.gmra.mxu0 %v10362_v28 }
 0x27a   :  { %4764 = vst [vmem:[#allocation2 + $0x850] sm:$0xff] %v3282_v21  ;;  %v3284_v29 = vadd.f32 %v3283_v27, %v3001_v26  ;;  %v3005_v30 = vadd.f32 %v3004_v0, %v11568_v15  ;;  %3568 = vmatprep.mubr.bf16.mxu0 %v10364_v32  ;;  %v10374_v0 = vld [vmem:[%s13795_s0 + $0x260] ss:$16 sps:$4 sm:$0xff]  }
 0x27b   :  { %v3287_v31 = vpop.f32.mrf.mxu1  ;;  %3842 = vmatmul.mubr.bf16.gmra.mxu1 %v10363_v35  ;;  %v3006_v33 = vpop.f32.mrf.mxu0  ;;  %v10376_v35 = vld [vmem:[%s13795_s0 + $0x284] ss:$16 sps:$4 sm:$0xff]  }
 0x27c   :  { %3851 = vmatprep.mubr.bf16.mxu1 %v10365_v36  ;;  %4765 = vst [vmem:[#allocation2 + $0x858] sm:$0xff] %v3284_v29  ;;  %v3288_v5 = vadd.f32 %v3287_v31, %v3005_v30  ;;  %v3007_v34 = vadd.f32 %v3006_v33, %v11571_v23  ;;  %v10375_v31 = vld [vmem:[%s13795_s0 + $0x268] ss:$16 sps:$4 sm:$0xff]   ;;  %v10377_v33 = vld [vmem:[%s13795_s0 + $0x28c] ss:$16 sps:$4 sm:$0xff]  }
 0x27d   :  { %v3289_v37 = vpop.f32.mrf.mxu1  ;;  %v3008_v40 = vpop.f32.mrf.mxu0 }
 0x27e   :  { %4772 = vst [vmem:[#allocation2 + $0x890] sm:$0xff] %v3288_v5  ;;  %v3290_v42 = vadd.f32 %v3289_v37, %v3007_v34  ;;  %v3009_v43 = vadd.f32 %v3008_v40, %v11568_v15 }
 0x27f   :  { %v3291_v51 = vpop.f32.mrf.mxu1  ;;  %v3010_v13 = vpop.f32.mrf.mxu0 }
 0x280   :  { %4773 = vst [vmem:[#allocation2 + $0x898] sm:$0xff] %v3290_v42  ;;  %v3292_v38 = vadd.f32 %v3291_v51, %v3009_v43  ;;  %v3011_v39 = vadd.f32 %v3010_v13, %v11571_v23 }
 0x281   :  { %v3293_v7 = vpop.f32.mrf.mxu1  ;;  %v3014_v60 = vpop.f32.mrf.mxu0  ;;  %3569 = vmatmul.mubr.bf16.gmra.mxu0 %v10366_v45 }
 0x282   :  { %4780 = vst [vmem:[#allocation2 + $0x8d0] sm:$0xff] %v3292_v38  ;;  %v3294_v47 = vadd.f32 %v3293_v7, %v3011_v39  ;;  %v3015_v8 = vadd.f32 %v3014_v60, %v11568_v15  ;;  %3578 = vmatprep.mubr.bf16.mxu0 %v10368_v22  ;;  %v10378_v60 = vld [vmem:[%s13795_s0 + $0x280] ss:$16 sps:$4 sm:$0xff]  }
 0x283   :  { %v3297_v18 = vpop.f32.mrf.mxu1  ;;  %3852 = vmatmul.mubr.bf16.gmra.mxu1 %v10367_v20  ;;  %v3016_v16 = vpop.f32.mrf.mxu0  ;;  %v10380_v20 = vld [vmem:[%s13795_s0 + $0x2a4] ss:$16 sps:$4 sm:$0xff]  }
 0x284   :  { %3861 = vmatprep.mubr.bf16.mxu1 %v10369_v44  ;;  %4781 = vst [vmem:[#allocation2 + $0x8d8] sm:$0xff] %v3294_v47  ;;  %v3298_v24 = vadd.f32 %v3297_v18, %v3015_v8  ;;  %v3017_v49 = vadd.f32 %v3016_v16, %v11571_v23  ;;  %v10379_v18 = vld [vmem:[%s13795_s0 + $0x288] ss:$16 sps:$4 sm:$0xff]   ;;  %v10381_v16 = vld [vmem:[%s13795_s0 + $0x2ac] ss:$16 sps:$4 sm:$0xff]  }
 0x285   :  { %v3299_v48 = vpop.f32.mrf.mxu1  ;;  %v3018_v50 = vpop.f32.mrf.mxu0 }
 0x286   :  { %4788 = vst [vmem:[#allocation2 + $0x910] sm:$0xff] %v3298_v24  ;;  %v3300_v54 = vadd.f32 %v3299_v48, %v3017_v49  ;;  %v3019_v53 = vadd.f32 %v3018_v50, %v11568_v15 }
 0x287   :  { %v3301_v17 = vpop.f32.mrf.mxu1  ;;  %v3020_v56 = vpop.f32.mrf.mxu0 }
 0x288   :  { %4789 = vst [vmem:[#allocation2 + $0x918] sm:$0xff] %v3300_v54  ;;  %v3302_v46 = vadd.f32 %v3301_v17, %v3019_v53  ;;  %v3021_v52 = vadd.f32 %v3020_v56, %v11571_v23 }
 0x289   :  { %v3303_v57 = vpop.f32.mrf.mxu1  ;;  %v3024_v58 = vpop.f32.mrf.mxu0  ;;  %3579 = vmatmul.mubr.bf16.gmra.mxu0 %v10370_v55 }
 0x28a   :  { %4796 = vst [vmem:[#allocation2 + $0x950] sm:$0xff] %v3302_v46  ;;  %v3304_v59 = vadd.f32 %v3303_v57, %v3021_v52  ;;  %v3025_v61 = vadd.f32 %v3024_v58, %v11568_v15  ;;  %3588 = vmatprep.mubr.bf16.mxu0 %v10372_v1  ;;  %v10382_v58 = vld [vmem:[%s13795_s0 + $0x2a0] ss:$16 sps:$4 sm:$0xff]  }
 0x28b   :  { %v3307_v62 = vpop.f32.mrf.mxu1  ;;  %3862 = vmatmul.mubr.bf16.gmra.mxu1 %v10371_v63  ;;  %v3026_v2 = vpop.f32.mrf.mxu0  ;;  %v10384_v63 = vld [vmem:[%s13795_s0 + $0x2c4] ss:$16 sps:$4 sm:$0xff]  }
 0x28c   :  { %3871 = vmatprep.mubr.bf16.mxu1 %v10373_v3  ;;  %4797 = vst [vmem:[#allocation2 + $0x958] sm:$0xff] %v3304_v59  ;;  %v3308_v4 = vadd.f32 %v3307_v62, %v3025_v61  ;;  %v3027_v6 = vadd.f32 %v3026_v2, %v11571_v23  ;;  %v10383_v62 = vld [vmem:[%s13795_s0 + $0x2a8] ss:$16 sps:$4 sm:$0xff]   ;;  %v10385_v2 = vld [vmem:[%s13795_s0 + $0x2cc] ss:$16 sps:$4 sm:$0xff]  }
 0x28d   :  { %v3309_v9 = vpop.f32.mrf.mxu1  ;;  %v3028_v10 = vpop.f32.mrf.mxu0 }
 0x28e   :  { %4804 = vst [vmem:[#allocation2 + $0x990] sm:$0xff] %v3308_v4  ;;  %v3310_v11 = vadd.f32 %v3309_v9, %v3027_v6  ;;  %v3029_v12 = vadd.f32 %v3028_v10, %v11568_v15 }
 0x28f   :  { %v3311_v25 = vpop.f32.mrf.mxu1  ;;  %v3030_v14 = vpop.f32.mrf.mxu0 }
 0x290   :  { %4805 = vst [vmem:[#allocation2 + $0x998] sm:$0xff] %v3310_v11  ;;  %v3312_v19 = vadd.f32 %v3311_v25, %v3029_v12  ;;  %v3031_v21 = vadd.f32 %v3030_v14, %v11571_v23 }
 0x291   :  { %v3313_v26 = vpop.f32.mrf.mxu1  ;;  %v3034_v27 = vpop.f32.mrf.mxu0  ;;  %3589 = vmatmul.mubr.bf16.gmra.mxu0 %v10374_v0 }
 0x292   :  { %4812 = vst [vmem:[#allocation2 + $0x9d0] sm:$0xff] %v3312_v19  ;;  %v3314_v28 = vadd.f32 %v3313_v26, %v3031_v21  ;;  %v3035_v29 = vadd.f32 %v3034_v27, %v11568_v15  ;;  %3598 = vmatprep.mubr.bf16.mxu0 %v10376_v35  ;;  %v10386_v27 = vld [vmem:[%s13795_s0 + $0x2c0] ss:$16 sps:$4 sm:$0xff]  }
 0x293   :  { %v3317_v30 = vpop.f32.mrf.mxu1  ;;  %3872 = vmatmul.mubr.bf16.gmra.mxu1 %v10375_v31  ;;  %v3036_v32 = vpop.f32.mrf.mxu0  ;;  %v10388_v31 = vld [vmem:[%s13795_s0 + $0x2e4] ss:$16 sps:$4 sm:$0xff]  }
 0x294   :  { %3881 = vmatprep.mubr.bf16.mxu1 %v10377_v33  ;;  %4813 = vst [vmem:[#allocation2 + $0x9d8] sm:$0xff] %v3314_v28  ;;  %v3318_v36 = vadd.f32 %v3317_v30, %v3035_v29  ;;  %v3037_v5 = vadd.f32 %v3036_v32, %v11571_v23  ;;  %v10387_v30 = vld [vmem:[%s13795_s0 + $0x2c8] ss:$16 sps:$4 sm:$0xff]   ;;  %v10389_v32 = vld [vmem:[%s13795_s0 + $0x2ec] ss:$16 sps:$4 sm:$0xff]  }
 0x295   :  { %v3319_v34 = vpop.f32.mrf.mxu1  ;;  %v3038_v37 = vpop.f32.mrf.mxu0 }
 0x296   :  { %4820 = vst [vmem:[#allocation2 + $0xa10] sm:$0xff] %v3318_v36  ;;  %v3320_v40 = vadd.f32 %v3319_v34, %v3037_v5  ;;  %v3039_v42 = vadd.f32 %v3038_v37, %v11568_v15 }
 0x297   :  { %v3321_v43 = vpop.f32.mrf.mxu1  ;;  %v3040_v51 = vpop.f32.mrf.mxu0 }
 0x298   :  { %4821 = vst [vmem:[#allocation2 + $0xa18] sm:$0xff] %v3320_v40  ;;  %v3322_v13 = vadd.f32 %v3321_v43, %v3039_v42  ;;  %v3041_v38 = vadd.f32 %v3040_v51, %v11571_v23 }
 0x299   :  { %v3323_v39 = vpop.f32.mrf.mxu1  ;;  %v3044_v7 = vpop.f32.mrf.mxu0  ;;  %3599 = vmatmul.mubr.bf16.gmra.mxu0 %v10378_v60 }
 0x29a   :  { %4828 = vst [vmem:[#allocation2 + $0xa50] sm:$0xff] %v3322_v13  ;;  %v3324_v45 = vadd.f32 %v3323_v39, %v3041_v38  ;;  %v3045_v47 = vadd.f32 %v3044_v7, %v11568_v15  ;;  %3608 = vmatprep.mubr.bf16.mxu0 %v10380_v20  ;;  %v10390_v7 = vld [vmem:[%s13795_s0 + $0x2e0] ss:$16 sps:$4 sm:$0xff]   ;;  %v432_v20 = vsub.s32 4, %v11136_v41 }
 0x29b   :  { %v3327_v8 = vpop.f32.mrf.mxu1  ;;  %3882 = vmatmul.mubr.bf16.gmra.mxu1 %v10379_v18  ;;  %v3046_v22 = vpop.f32.mrf.mxu0  ;;  %v10392_v18 = vld [vmem:[%s13795_s0 + $0x304] ss:$16 sps:$4 sm:$0xff]  }
 0x29c   :  { %3891 = vmatprep.mubr.bf16.mxu1 %v10381_v16  ;;  %4829 = vst [vmem:[#allocation2 + $0xa58] sm:$0xff] %v3324_v45  ;;  %v3328_v44 = vadd.f32 %v3327_v8, %v3045_v47  ;;  %v3047_v24 = vadd.f32 %v3046_v22, %v11571_v23  ;;  %v10391_v8 = vld [vmem:[%s13795_s0 + $0x2e8] ss:$16 sps:$4 sm:$0xff]   ;;  %v10393_v16 = vld [vmem:[%s13795_s0 + $0x30c] ss:$16 sps:$4 sm:$0xff]  }
 0x29d   :  { %v3329_v49 = vpop.f32.mrf.mxu1  ;;  %v3048_v48 = vpop.f32.mrf.mxu0 }
 0x29e   :  { %4836 = vst [vmem:[#allocation2 + $0xa90] sm:$0xff] %v3328_v44  ;;  %v3330_v50 = vadd.f32 %v3329_v49, %v3047_v24  ;;  %v3049_v54 = vadd.f32 %v3048_v48, %v11568_v15  ;;  %v436_v48 = vsub.s32 5, %v11136_v41 }
 0x29f   :  { %v3331_v53 = vpop.f32.mrf.mxu1  ;;  %v3050_v17 = vpop.f32.mrf.mxu0 }
 0x2a0   :  { %4837 = vst [vmem:[#allocation2 + $0xa98] sm:$0xff] %v3330_v50  ;;  %v3332_v56 = vadd.f32 %v3331_v53, %v3049_v54  ;;  %v3051_v46 = vadd.f32 %v3050_v17, %v11571_v23 }
 0x2a1   :  { %v3333_v52 = vpop.f32.mrf.mxu1  ;;  %v3054_v57 = vpop.f32.mrf.mxu0  ;;  %3609 = vmatmul.mubr.bf16.gmra.mxu0 %v10382_v58 }
 0x2a2   :  { %4844 = vst [vmem:[#allocation2 + $0xad0] sm:$0xff] %v3332_v56  ;;  %v3334_v55 = vadd.f32 %v3333_v52, %v3051_v46  ;;  %v3055_v59 = vadd.f32 %v3054_v57, %v11568_v15  ;;  %3618 = vmatprep.mubr.bf16.mxu0 %v10384_v63  ;;  %v10394_v56 = vld [vmem:[#allocation5] sm:$0xff] }
 0x2a3   :  { %v3337_v61 = vpop.f32.mrf.mxu1  ;;  %3892 = vmatmul.mubr.bf16.gmra.mxu1 %v10383_v62  ;;  %v3056_v1 = vpop.f32.mrf.mxu0  ;;  %v12064_v46 = vrot.slane %v10394_v56, %v432_v20  ;;  %v10395_v62 = vld [vmem:[%s13795_s0 + $0x300] ss:$16 sps:$4 sm:$0xff]   ;;  %v10404_v20 = vld [vmem:[%s13795_s0 + $0x28] ss:$16 sps:$4 sm:$0xff]  }
 0x2a4   :  { %3901 = vmatprep.mubr.bf16.mxu1 %v10385_v2  ;;  %4845 = vst [vmem:[#allocation2 + $0xad8] sm:$0xff] %v3334_v55  ;;  %v3338_v3 = vadd.f32 %v3337_v61, %v3055_v59  ;;  %v3057_v4 = vadd.f32 %v3056_v1, %v11571_v23  ;;  %v12067_v59 = vrot.slane %v10394_v56, %v436_v48  ;;  %v10396_v2 = vld [vmem:[%s13795_s0 + $0x308] ss:$16 sps:$4 sm:$0xff]  }
 0x2a5   :  { %v3339_v6 = vpop.f32.mrf.mxu1  ;;  %v3058_v9 = vpop.f32.mrf.mxu0 }
 0x2a6   :  { %4852 = vst [vmem:[#allocation2 + $0xb10] sm:$0xff] %v3338_v3  ;;  %v3340_v10 = vadd.f32 %v3339_v6, %v3057_v4  ;;  %v3059_v11 = vadd.f32 %v3058_v9, %v11568_v15  ;;  %v10398_v4 = vld [vmem:[%s13795_s0 + $0xc] ss:$16 sps:$4 sm:$0xff]  }
 0x2a7   :  { %v3341_v12 = vpop.f32.mrf.mxu1  ;;  %v3060_v25 = vpop.f32.mrf.mxu0 }
 0x2a8   :  { %4853 = vst [vmem:[#allocation2 + $0xb18] sm:$0xff] %v3340_v10  ;;  %v3342_v14 = vadd.f32 %v3341_v12, %v3059_v11  ;;  %v3061_v19 = vadd.f32 %v3060_v25, %v11571_v23 }
 0x2a9   :  { %v3343_v21 = vpop.f32.mrf.mxu1  ;;  %v3064_v26 = vpop.f32.mrf.mxu0  ;;  %3619 = vmatmul.mubr.bf16.gmra.mxu0 %v10386_v27 }
 0x2aa   :  { %4860 = vst [vmem:[#allocation2 + $0xb50] sm:$0xff] %v3342_v14  ;;  %v3344_v0 = vadd.f32 %v3343_v21, %v3061_v19  ;;  %v3065_v28 = vadd.f32 %v3064_v26, %v11568_v15  ;;  %3628 = vmatprep.mubr.bf16.mxu0 %v10388_v31 }
 0x2ab   :  { %v3347_v29 = vpop.f32.mrf.mxu1  ;;  %3902 = vmatmul.mubr.bf16.gmra.mxu1 %v10387_v30  ;;  %v3066_v35 = vpop.f32.mrf.mxu0 }
 0x2ac   :  { %3911 = vmatprep.mubr.bf16.mxu1 %v10389_v32  ;;  %4861 = vst [vmem:[#allocation2 + $0xb58] sm:$0xff] %v3344_v0  ;;  %v3348_v33 = vadd.f32 %v3347_v29, %v3065_v28  ;;  %v3067_v36 = vadd.f32 %v3066_v35, %v11571_v23  ;;  %v10399_v28 = vld [vmem:[%s13795_s0] ss:$16 sps:$4 sm:$0xff]   ;;  %v10400_v35 = vld [vmem:[%s13795_s0 + $0x8] ss:$16 sps:$4 sm:$0xff]  }
 0x2ad   :  { %v3349_v5 = vpop.f32.mrf.mxu1  ;;  %v3068_v34 = vpop.f32.mrf.mxu0  ;;  %v10401_v32 = vld [vmem:[%s13795_s0 + $0x24] ss:$16 sps:$4 sm:$0xff]  }
 0x2ae   :  { %4868 = vst [vmem:[#allocation2 + $0xb90] sm:$0xff] %v3348_v33  ;;  %v3350_v37 = vadd.f32 %v3349_v5, %v3067_v36  ;;  %v3069_v40 = vadd.f32 %v3068_v34, %v11568_v15  ;;  %v10402_v36 = vld [vmem:[%s13795_s0 + $0x2c] ss:$16 sps:$4 sm:$0xff]  }
 0x2af   :  { %v3351_v42 = vpop.f32.mrf.mxu1  ;;  %v3070_v43 = vpop.f32.mrf.mxu0 }
 0x2b0   :  { %4869 = vst [vmem:[#allocation2 + $0xb98] sm:$0xff] %v3350_v37  ;;  %v3352_v51 = vadd.f32 %v3351_v42, %v3069_v40  ;;  %v3071_v13 = vadd.f32 %v3070_v43, %v11571_v23 }
 0x2b1   :  { %v3353_v38 = vpop.f32.mrf.mxu1  ;;  %v3074_v39 = vpop.f32.mrf.mxu0  ;;  %3629 = vmatmul.mubr.bf16.gmra.mxu0 %v10390_v7 }
 0x2b2   :  { %4876 = vst [vmem:[#allocation2 + $0xbd0] sm:$0xff] %v3352_v51  ;;  %v3354_v60 = vadd.f32 %v3353_v38, %v3071_v13  ;;  %v3075_v45 = vadd.f32 %v3074_v39, %v11568_v15  ;;  %3638 = vmatprep.mubr.bf16.mxu0 %v10392_v18 }
 0x2b3   :  { %v3357_v47 = vpop.f32.mrf.mxu1  ;;  %3912 = vmatmul.mubr.bf16.gmra.mxu1 %v10391_v8  ;;  %v3076_v22 = vpop.f32.mrf.mxu0 }
 0x2b4   :  { %3921 = vmatprep.mubr.bf16.mxu1 %v10393_v16  ;;  %4877 = vst [vmem:[#allocation2 + $0xbd8] sm:$0xff] %v3354_v60  ;;  %v3358_v44 = vadd.f32 %v3357_v47, %v3075_v45  ;;  %v3077_v24 = vadd.f32 %v3076_v22, %v11571_v23  ;;  %v10403_v45 = vld [vmem:[%s13795_s0 + $0x20] ss:$16 sps:$4 sm:$0xff]   ;;  %v10405_v22 = vld [vmem:[%s13795_s0 + $0x44] ss:$16 sps:$4 sm:$0xff]  }
 0x2b5   :  { %v3359_v49 = vpop.f32.mrf.mxu1  ;;  %v3078_v50 = vpop.f32.mrf.mxu0 }
 0x2b6   :  { %4884 = vst [vmem:[#allocation2 + $0xc10] sm:$0xff] %v3358_v44  ;;  %v3360_v54 = vadd.f32 %v3359_v49, %v3077_v24  ;;  %v3079_v53 = vadd.f32 %v3078_v50, %v11568_v15  ;;  %v10406_v44 = vld [vmem:[%s13795_s0 + $0x4c] ss:$16 sps:$4 sm:$0xff]  }
 0x2b7   :  { %v3361_v17 = vpop.f32.mrf.mxu1  ;;  %v3080_v52 = vpop.f32.mrf.mxu0 }
 0x2b8   :  { %4885 = vst [vmem:[#allocation2 + $0xc18] sm:$0xff] %v3360_v54  ;;  %v3362_v57 = vadd.f32 %v3361_v17, %v3079_v53  ;;  %v3081_v58 = vadd.f32 %v3080_v52, %v11571_v23  ;;  %v10397_v23 = vld [vmem:[%s13795_s0 + $0x4] ss:$16 sps:$4 sm:$0xff]  }
 0x2b9   :  { %v3363_v55 = vpop.f32.mrf.mxu1  ;;  %v3400_v61 = vpop.f32.mrf.mxu0  ;;  %3639 = vmatmul.mubr.bf16.gmra.mxu0 %v10395_v62 }
 0x2ba   :  { %4892 = vst [vmem:[#allocation2 + $0xc50] sm:$0xff] %v3362_v57  ;;  %v3364_v15 = vadd.f32 %v3363_v55, %v3081_v58  ;;  %v3401_v63 = vadd.f32 %v3400_v61, %v12064_v46  ;;  %3964 = vmatprep.mubr.bf16.mxu0 %v10397_v23  ;;  %v10407_v61 = vld [vmem:[%s13795_s0 + $0x40] ss:$16 sps:$4 sm:$0xff]  }
 0x2bb   :  { %v3683_v1 = vpop.f32.mrf.mxu1  ;;  %3922 = vmatmul.mubr.bf16.gmra.mxu1 %v10396_v2  ;;  %v3402_v3 = vpop.f32.mrf.mxu0  ;;  %v10409_v2 = vld [vmem:[%s13795_s0 + $0x64] ss:$16 sps:$4 sm:$0xff]  }
 0x2bc   :  { %4247 = vmatprep.mubr.bf16.mxu1 %v10398_v4  ;;  %4893 = vst [vmem:[#allocation2 + $0xc58] sm:$0xff] %v3364_v15  ;;  %v3684_v6 = vadd.f32 %v3683_v1, %v3401_v63  ;;  %v3403_v9 = vadd.f32 %v3402_v3, %v12067_v59  ;;  %v10408_v1 = vld [vmem:[%s13795_s0 + $0x48] ss:$16 sps:$4 sm:$0xff]   ;;  %v10410_v3 = vld [vmem:[%s13795_s0 + $0x6c] ss:$16 sps:$4 sm:$0xff]  }
 0x2bd   :  { %v3685_v10 = vpop.f32.mrf.mxu1  ;;  %v3404_v11 = vpop.f32.mrf.mxu0 }
 0x2be   :  { %4502 = vst [vmem:[#allocation2 + $0x20] sm:$0xff] %v3684_v6  ;;  %v3686_v12 = vadd.f32 %v3685_v10, %v3403_v9  ;;  %v3405_v25 = vadd.f32 %v3404_v11, %v12064_v46 }
 0x2bf   :  { %v3687_v14 = vpop.f32.mrf.mxu1  ;;  %v3406_v19 = vpop.f32.mrf.mxu0 }
 0x2c0   :  { %4503 = vst [vmem:[#allocation2 + $0x28] sm:$0xff] %v3686_v12  ;;  %v3688_v21 = vadd.f32 %v3687_v14, %v3405_v25  ;;  %v3407_v26 = vadd.f32 %v3406_v19, %v12067_v59 }
 0x2c1   :  { %v3689_v27 = vpop.f32.mrf.mxu1  ;;  %v3410_v0 = vpop.f32.mrf.mxu0  ;;  %3965 = vmatmul.mubr.bf16.vlgmr.msra.gmra.mxu0 %v10399_v28 }
 0x2c2   :  { %4510 = vst [vmem:[#allocation2 + $0x60] sm:$0xff] %v3688_v21  ;;  %v3690_v29 = vadd.f32 %v3689_v27, %v3407_v26  ;;  %v3411_v30 = vadd.f32 %v3410_v0, %v12064_v46  ;;  %3974 = vmatprep.mubr.bf16.mxu0 %v10401_v32  ;;  %v10411_v0 = vld [vmem:[%s13795_s0 + $0x60] ss:$16 sps:$4 sm:$0xff]  }
 0x2c3   :  { %v3693_v31 = vpop.f32.mrf.mxu1  ;;  %4248 = vmatmul.mubr.bf16.vlgmr.msra.gmra.mxu1 %v10400_v35  ;;  %v3412_v33 = vpop.f32.mrf.mxu0  ;;  %v10413_v35 = vld [vmem:[%s13795_s0 + $0x84] ss:$16 sps:$4 sm:$0xff]  }
 0x2c4   :  { %4257 = vmatprep.mubr.bf16.mxu1 %v10402_v36  ;;  %4511 = vst [vmem:[#allocation2 + $0x68] sm:$0xff] %v3690_v29  ;;  %v3694_v5 = vadd.f32 %v3693_v31, %v3411_v30  ;;  %v3413_v34 = vadd.f32 %v3412_v33, %v12067_v59  ;;  %v10412_v31 = vld [vmem:[%s13795_s0 + $0x68] ss:$16 sps:$4 sm:$0xff]   ;;  %v10414_v33 = vld [vmem:[%s13795_s0 + $0x8c] ss:$16 sps:$4 sm:$0xff]  }
 0x2c5   :  { %v3695_v37 = vpop.f32.mrf.mxu1  ;;  %v3414_v40 = vpop.f32.mrf.mxu0 }
 0x2c6   :  { %4518 = vst [vmem:[#allocation2 + $0xa0] sm:$0xff] %v3694_v5  ;;  %v3696_v42 = vadd.f32 %v3695_v37, %v3413_v34  ;;  %v3415_v43 = vadd.f32 %v3414_v40, %v12064_v46 }
 0x2c7   :  { %v3697_v51 = vpop.f32.mrf.mxu1  ;;  %v3416_v13 = vpop.f32.mrf.mxu0 }
 0x2c8   :  { %4519 = vst [vmem:[#allocation2 + $0xa8] sm:$0xff] %v3696_v42  ;;  %v3698_v38 = vadd.f32 %v3697_v51, %v3415_v43  ;;  %v3417_v39 = vadd.f32 %v3416_v13, %v12067_v59 }
 0x2c9   :  { %v3699_v7 = vpop.f32.mrf.mxu1  ;;  %v3420_v60 = vpop.f32.mrf.mxu0  ;;  %3975 = vmatmul.mubr.bf16.gmra.mxu0 %v10403_v45 }
 0x2ca   :  { %4526 = vst [vmem:[#allocation2 + $0xe0] sm:$0xff] %v3698_v38  ;;  %v3700_v47 = vadd.f32 %v3699_v7, %v3417_v39  ;;  %v3421_v8 = vadd.f32 %v3420_v60, %v12064_v46  ;;  %3984 = vmatprep.mubr.bf16.mxu0 %v10405_v22  ;;  %v10415_v60 = vld [vmem:[%s13795_s0 + $0x80] ss:$16 sps:$4 sm:$0xff]  }
 0x2cb   :  { %v3703_v18 = vpop.f32.mrf.mxu1  ;;  %4258 = vmatmul.mubr.bf16.gmra.mxu1 %v10404_v20  ;;  %v3422_v16 = vpop.f32.mrf.mxu0  ;;  %v10417_v20 = vld [vmem:[%s13795_s0 + $0xa4] ss:$16 sps:$4 sm:$0xff]  }
 0x2cc   :  { %4267 = vmatprep.mubr.bf16.mxu1 %v10406_v44  ;;  %4527 = vst [vmem:[#allocation2 + $0xe8] sm:$0xff] %v3700_v47  ;;  %v3704_v24 = vadd.f32 %v3703_v18, %v3421_v8  ;;  %v3423_v49 = vadd.f32 %v3422_v16, %v12067_v59  ;;  %v10416_v18 = vld [vmem:[%s13795_s0 + $0x88] ss:$16 sps:$4 sm:$0xff]   ;;  %v10418_v16 = vld [vmem:[%s13795_s0 + $0xac] ss:$16 sps:$4 sm:$0xff]  }
 0x2cd   :  { %v3705_v48 = vpop.f32.mrf.mxu1  ;;  %v3424_v50 = vpop.f32.mrf.mxu0 }
 0x2ce   :  { %4534 = vst [vmem:[#allocation2 + $0x120] sm:$0xff] %v3704_v24  ;;  %v3706_v54 = vadd.f32 %v3705_v48, %v3423_v49  ;;  %v3425_v53 = vadd.f32 %v3424_v50, %v12064_v46 }
 0x2cf   :  { %v3707_v17 = vpop.f32.mrf.mxu1  ;;  %v3426_v56 = vpop.f32.mrf.mxu0 }
 0x2d0   :  { %4535 = vst [vmem:[#allocation2 + $0x128] sm:$0xff] %v3706_v54  ;;  %v3708_v52 = vadd.f32 %v3707_v17, %v3425_v53  ;;  %v3427_v57 = vadd.f32 %v3426_v56, %v12067_v59 }
 0x2d1   :  { %v3709_v58 = vpop.f32.mrf.mxu1  ;;  %v3430_v55 = vpop.f32.mrf.mxu0  ;;  %3985 = vmatmul.mubr.bf16.gmra.mxu0 %v10407_v61 }
 0x2d2   :  { %4542 = vst [vmem:[#allocation2 + $0x160] sm:$0xff] %v3708_v52  ;;  %v3710_v62 = vadd.f32 %v3709_v58, %v3427_v57  ;;  %v3431_v15 = vadd.f32 %v3430_v55, %v12064_v46  ;;  %3994 = vmatprep.mubr.bf16.mxu0 %v10409_v2  ;;  %v10419_v55 = vld [vmem:[%s13795_s0 + $0xa0] ss:$16 sps:$4 sm:$0xff]  }
 0x2d3   :  { %v3713_v63 = vpop.f32.mrf.mxu1  ;;  %4268 = vmatmul.mubr.bf16.gmra.mxu1 %v10408_v1  ;;  %v3432_v23 = vpop.f32.mrf.mxu0  ;;  %v10421_v1 = vld [vmem:[%s13795_s0 + $0xc4] ss:$16 sps:$4 sm:$0xff]  }
 0x2d4   :  { %4277 = vmatprep.mubr.bf16.mxu1 %v10410_v3  ;;  %4543 = vst [vmem:[#allocation2 + $0x168] sm:$0xff] %v3710_v62  ;;  %v3714_v4 = vadd.f32 %v3713_v63, %v3431_v15  ;;  %v3433_v6 = vadd.f32 %v3432_v23, %v12067_v59  ;;  %v10420_v63 = vld [vmem:[%s13795_s0 + $0xa8] ss:$16 sps:$4 sm:$0xff]   ;;  %v10422_v23 = vld [vmem:[%s13795_s0 + $0xcc] ss:$16 sps:$4 sm:$0xff]  }
 0x2d5   :  { %v3715_v9 = vpop.f32.mrf.mxu1  ;;  %v3434_v10 = vpop.f32.mrf.mxu0 }
 0x2d6   :  { %4550 = vst [vmem:[#allocation2 + $0x1a0] sm:$0xff] %v3714_v4  ;;  %v3716_v11 = vadd.f32 %v3715_v9, %v3433_v6  ;;  %v3435_v12 = vadd.f32 %v3434_v10, %v12064_v46 }
 0x2d7   :  { %v3717_v25 = vpop.f32.mrf.mxu1  ;;  %v3436_v14 = vpop.f32.mrf.mxu0 }
 0x2d8   :  { %4551 = vst [vmem:[#allocation2 + $0x1a8] sm:$0xff] %v3716_v11  ;;  %v3718_v19 = vadd.f32 %v3717_v25, %v3435_v12  ;;  %v3437_v21 = vadd.f32 %v3436_v14, %v12067_v59 }
 0x2d9   :  { %v3719_v26 = vpop.f32.mrf.mxu1  ;;  %v3440_v27 = vpop.f32.mrf.mxu0  ;;  %3995 = vmatmul.mubr.bf16.gmra.mxu0 %v10411_v0 }
 0x2da   :  { %4558 = vst [vmem:[#allocation2 + $0x1e0] sm:$0xff] %v3718_v19  ;;  %v3720_v28 = vadd.f32 %v3719_v26, %v3437_v21  ;;  %v3441_v29 = vadd.f32 %v3440_v27, %v12064_v46  ;;  %4004 = vmatprep.mubr.bf16.mxu0 %v10413_v35  ;;  %v10423_v27 = vld [vmem:[%s13795_s0 + $0xc0] ss:$16 sps:$4 sm:$0xff]  }
 0x2db   :  { %v3723_v30 = vpop.f32.mrf.mxu1  ;;  %4278 = vmatmul.mubr.bf16.gmra.mxu1 %v10412_v31  ;;  %v3442_v32 = vpop.f32.mrf.mxu0  ;;  %v10425_v31 = vld [vmem:[%s13795_s0 + $0xe4] ss:$16 sps:$4 sm:$0xff]  }
 0x2dc   :  { %4287 = vmatprep.mubr.bf16.mxu1 %v10414_v33  ;;  %4559 = vst [vmem:[#allocation2 + $0x1e8] sm:$0xff] %v3720_v28  ;;  %v3724_v36 = vadd.f32 %v3723_v30, %v3441_v29  ;;  %v3443_v5 = vadd.f32 %v3442_v32, %v12067_v59  ;;  %v10424_v30 = vld [vmem:[%s13795_s0 + $0xc8] ss:$16 sps:$4 sm:$0xff]   ;;  %v10426_v32 = vld [vmem:[%s13795_s0 + $0xec] ss:$16 sps:$4 sm:$0xff]  }
 0x2dd   :  { %v3725_v34 = vpop.f32.mrf.mxu1  ;;  %v3444_v37 = vpop.f32.mrf.mxu0 }
 0x2de   :  { %4566 = vst [vmem:[#allocation2 + $0x220] sm:$0xff] %v3724_v36  ;;  %v3726_v40 = vadd.f32 %v3725_v34, %v3443_v5  ;;  %v3445_v42 = vadd.f32 %v3444_v37, %v12064_v46 }
 0x2df   :  { %v3727_v43 = vpop.f32.mrf.mxu1  ;;  %v3446_v51 = vpop.f32.mrf.mxu0 }
 0x2e0   :  { %4567 = vst [vmem:[#allocation2 + $0x228] sm:$0xff] %v3726_v40  ;;  %v3728_v13 = vadd.f32 %v3727_v43, %v3445_v42  ;;  %v3447_v38 = vadd.f32 %v3446_v51, %v12067_v59 }
 0x2e1   :  { %v3729_v39 = vpop.f32.mrf.mxu1  ;;  %v3450_v7 = vpop.f32.mrf.mxu0  ;;  %4005 = vmatmul.mubr.bf16.gmra.mxu0 %v10415_v60 }
 0x2e2   :  { %4574 = vst [vmem:[#allocation2 + $0x260] sm:$0xff] %v3728_v13  ;;  %v3730_v45 = vadd.f32 %v3729_v39, %v3447_v38  ;;  %v3451_v47 = vadd.f32 %v3450_v7, %v12064_v46  ;;  %4014 = vmatprep.mubr.bf16.mxu0 %v10417_v20  ;;  %v10427_v7 = vld [vmem:[%s13795_s0 + $0xe0] ss:$16 sps:$4 sm:$0xff]  }
 0x2e3   :  { %v3733_v8 = vpop.f32.mrf.mxu1  ;;  %4288 = vmatmul.mubr.bf16.gmra.mxu1 %v10416_v18  ;;  %v3452_v22 = vpop.f32.mrf.mxu0  ;;  %v10429_v18 = vld [vmem:[%s13795_s0 + $0x104] ss:$16 sps:$4 sm:$0xff]  }
 0x2e4   :  { %4297 = vmatprep.mubr.bf16.mxu1 %v10418_v16  ;;  %4575 = vst [vmem:[#allocation2 + $0x268] sm:$0xff] %v3730_v45  ;;  %v3734_v44 = vadd.f32 %v3733_v8, %v3451_v47  ;;  %v3453_v24 = vadd.f32 %v3452_v22, %v12067_v59  ;;  %v10428_v8 = vld [vmem:[%s13795_s0 + $0xe8] ss:$16 sps:$4 sm:$0xff]   ;;  %v10430_v22 = vld [vmem:[%s13795_s0 + $0x10c] ss:$16 sps:$4 sm:$0xff]  }
 0x2e5   :  { %v3735_v49 = vpop.f32.mrf.mxu1  ;;  %v3454_v48 = vpop.f32.mrf.mxu0 }
 0x2e6   :  { %4582 = vst [vmem:[#allocation2 + $0x2a0] sm:$0xff] %v3734_v44  ;;  %v3736_v50 = vadd.f32 %v3735_v49, %v3453_v24  ;;  %v3455_v54 = vadd.f32 %v3454_v48, %v12064_v46 }
 0x2e7   :  { %v3737_v53 = vpop.f32.mrf.mxu1  ;;  %v3456_v17 = vpop.f32.mrf.mxu0 }
 0x2e8   :  { %4583 = vst [vmem:[#allocation2 + $0x2a8] sm:$0xff] %v3736_v50  ;;  %v3738_v56 = vadd.f32 %v3737_v53, %v3455_v54  ;;  %v3457_v52 = vadd.f32 %v3456_v17, %v12067_v59 }
 0x2e9   :  { %v3739_v57 = vpop.f32.mrf.mxu1  ;;  %v3460_v58 = vpop.f32.mrf.mxu0  ;;  %4015 = vmatmul.mubr.bf16.gmra.mxu0 %v10419_v55 }
 0x2ea   :  { %4590 = vst [vmem:[#allocation2 + $0x2e0] sm:$0xff] %v3738_v56  ;;  %v3740_v61 = vadd.f32 %v3739_v57, %v3457_v52  ;;  %v3461_v62 = vadd.f32 %v3460_v58, %v12064_v46  ;;  %4024 = vmatprep.mubr.bf16.mxu0 %v10421_v1  ;;  %v10431_v58 = vld [vmem:[%s13795_s0 + $0x100] ss:$16 sps:$4 sm:$0xff]  }
 0x2eb   :  { %v3743_v15 = vpop.f32.mrf.mxu1  ;;  %4298 = vmatmul.mubr.bf16.gmra.mxu1 %v10420_v63  ;;  %v3462_v2 = vpop.f32.mrf.mxu0  ;;  %v10433_v63 = vld [vmem:[%s13795_s0 + $0x124] ss:$16 sps:$4 sm:$0xff]  }
 0x2ec   :  { %4307 = vmatprep.mubr.bf16.mxu1 %v10422_v23  ;;  %4591 = vst [vmem:[#allocation2 + $0x2e8] sm:$0xff] %v3740_v61  ;;  %v3744_v3 = vadd.f32 %v3743_v15, %v3461_v62  ;;  %v3463_v4 = vadd.f32 %v3462_v2, %v12067_v59  ;;  %v10432_v15 = vld [vmem:[%s13795_s0 + $0x108] ss:$16 sps:$4 sm:$0xff]   ;;  %v10434_v2 = vld [vmem:[%s13795_s0 + $0x12c] ss:$16 sps:$4 sm:$0xff]  }
 0x2ed   :  { %v3745_v6 = vpop.f32.mrf.mxu1  ;;  %v3464_v9 = vpop.f32.mrf.mxu0 }
 0x2ee   :  { %4598 = vst [vmem:[#allocation2 + $0x320] sm:$0xff] %v3744_v3  ;;  %v3746_v10 = vadd.f32 %v3745_v6, %v3463_v4  ;;  %v3465_v11 = vadd.f32 %v3464_v9, %v12064_v46 }
 0x2ef   :  { %v3747_v12 = vpop.f32.mrf.mxu1  ;;  %v3466_v25 = vpop.f32.mrf.mxu0 }
 0x2f0   :  { %4599 = vst [vmem:[#allocation2 + $0x328] sm:$0xff] %v3746_v10  ;;  %v3748_v14 = vadd.f32 %v3747_v12, %v3465_v11  ;;  %v3467_v19 = vadd.f32 %v3466_v25, %v12067_v59 }
 0x2f1   :  { %v3749_v21 = vpop.f32.mrf.mxu1  ;;  %v3470_v26 = vpop.f32.mrf.mxu0  ;;  %4025 = vmatmul.mubr.bf16.gmra.mxu0 %v10423_v27 }
 0x2f2   :  { %4606 = vst [vmem:[#allocation2 + $0x360] sm:$0xff] %v3748_v14  ;;  %v3750_v0 = vadd.f32 %v3749_v21, %v3467_v19  ;;  %v3471_v28 = vadd.f32 %v3470_v26, %v12064_v46  ;;  %4034 = vmatprep.mubr.bf16.mxu0 %v10425_v31  ;;  %v10435_v26 = vld [vmem:[%s13795_s0 + $0x120] ss:$16 sps:$4 sm:$0xff]  }
 0x2f3   :  { %v3753_v29 = vpop.f32.mrf.mxu1  ;;  %4308 = vmatmul.mubr.bf16.gmra.mxu1 %v10424_v30  ;;  %v3472_v35 = vpop.f32.mrf.mxu0  ;;  %v10437_v30 = vld [vmem:[%s13795_s0 + $0x144] ss:$16 sps:$4 sm:$0xff]  }
 0x2f4   :  { %4317 = vmatprep.mubr.bf16.mxu1 %v10426_v32  ;;  %4607 = vst [vmem:[#allocation2 + $0x368] sm:$0xff] %v3750_v0  ;;  %v3754_v33 = vadd.f32 %v3753_v29, %v3471_v28  ;;  %v3473_v36 = vadd.f32 %v3472_v35, %v12067_v59  ;;  %v10436_v29 = vld [vmem:[%s13795_s0 + $0x128] ss:$16 sps:$4 sm:$0xff]   ;;  %v10438_v35 = vld [vmem:[%s13795_s0 + $0x14c] ss:$16 sps:$4 sm:$0xff]  }
 0x2f5   :  { %v3755_v5 = vpop.f32.mrf.mxu1  ;;  %v3474_v34 = vpop.f32.mrf.mxu0 }
 0x2f6   :  { %4614 = vst [vmem:[#allocation2 + $0x3a0] sm:$0xff] %v3754_v33  ;;  %v3756_v37 = vadd.f32 %v3755_v5, %v3473_v36  ;;  %v3475_v40 = vadd.f32 %v3474_v34, %v12064_v46 }
 0x2f7   :  { %v3757_v42 = vpop.f32.mrf.mxu1  ;;  %v3476_v43 = vpop.f32.mrf.mxu0 }
 0x2f8   :  { %4615 = vst [vmem:[#allocation2 + $0x3a8] sm:$0xff] %v3756_v37  ;;  %v3758_v51 = vadd.f32 %v3757_v42, %v3475_v40  ;;  %v3477_v13 = vadd.f32 %v3476_v43, %v12067_v59 }
 0x2f9   :  { %v3759_v38 = vpop.f32.mrf.mxu1  ;;  %v3480_v39 = vpop.f32.mrf.mxu0  ;;  %4035 = vmatmul.mubr.bf16.gmra.mxu0 %v10427_v7 }
 0x2fa   :  { %4622 = vst [vmem:[#allocation2 + $0x3e0] sm:$0xff] %v3758_v51  ;;  %v3760_v60 = vadd.f32 %v3759_v38, %v3477_v13  ;;  %v3481_v45 = vadd.f32 %v3480_v39, %v12064_v46  ;;  %4044 = vmatprep.mubr.bf16.mxu0 %v10429_v18  ;;  %v10439_v39 = vld [vmem:[%s13795_s0 + $0x140] ss:$16 sps:$4 sm:$0xff]  }
 0x2fb   :  { %v3763_v47 = vpop.f32.mrf.mxu1  ;;  %4318 = vmatmul.mubr.bf16.gmra.mxu1 %v10428_v8  ;;  %v3482_v20 = vpop.f32.mrf.mxu0  ;;  %v10441_v8 = vld [vmem:[%s13795_s0 + $0x164] ss:$16 sps:$4 sm:$0xff]  }
 0x2fc   :  { %4327 = vmatprep.mubr.bf16.mxu1 %v10430_v22  ;;  %4623 = vst [vmem:[#allocation2 + $0x3e8] sm:$0xff] %v3760_v60  ;;  %v3764_v16 = vadd.f32 %v3763_v47, %v3481_v45  ;;  %v3483_v44 = vadd.f32 %v3482_v20, %v12067_v59  ;;  %v10440_v47 = vld [vmem:[%s13795_s0 + $0x148] ss:$16 sps:$4 sm:$0xff]   ;;  %v10442_v20 = vld [vmem:[%s13795_s0 + $0x16c] ss:$16 sps:$4 sm:$0xff]  }
 0x2fd   :  { %v3765_v24 = vpop.f32.mrf.mxu1  ;;  %v3484_v49 = vpop.f32.mrf.mxu0 }
 0x2fe   :  { %4630 = vst [vmem:[#allocation2 + $0x420] sm:$0xff] %v3764_v16  ;;  %v3766_v48 = vadd.f32 %v3765_v24, %v3483_v44  ;;  %v3485_v50 = vadd.f32 %v3484_v49, %v12064_v46 }
 0x2ff   :  { %v3767_v54 = vpop.f32.mrf.mxu1  ;;  %v3486_v53 = vpop.f32.mrf.mxu0 }
 0x300   :  { %4631 = vst [vmem:[#allocation2 + $0x428] sm:$0xff] %v3766_v48  ;;  %v3768_v17 = vadd.f32 %v3767_v54, %v3485_v50  ;;  %v3487_v56 = vadd.f32 %v3486_v53, %v12067_v59 }
 0x301   :  { %v3769_v52 = vpop.f32.mrf.mxu1  ;;  %v3490_v57 = vpop.f32.mrf.mxu0  ;;  %4045 = vmatmul.mubr.bf16.gmra.mxu0 %v10431_v58 }
 0x302   :  { %4638 = vst [vmem:[#allocation2 + $0x460] sm:$0xff] %v3768_v17  ;;  %v3770_v55 = vadd.f32 %v3769_v52, %v3487_v56  ;;  %v3491_v61 = vadd.f32 %v3490_v57, %v12064_v46  ;;  %4054 = vmatprep.mubr.bf16.mxu0 %v10433_v63  ;;  %v10443_v57 = vld [vmem:[%s13795_s0 + $0x160] ss:$16 sps:$4 sm:$0xff]  }
 0x303   :  { %v3773_v62 = vpop.f32.mrf.mxu1  ;;  %4328 = vmatmul.mubr.bf16.gmra.mxu1 %v10432_v15  ;;  %v3492_v1 = vpop.f32.mrf.mxu0  ;;  %v10445_v15 = vld [vmem:[%s13795_s0 + $0x184] ss:$16 sps:$4 sm:$0xff]  }
 0x304   :  { %4337 = vmatprep.mubr.bf16.mxu1 %v10434_v2  ;;  %4639 = vst [vmem:[#allocation2 + $0x468] sm:$0xff] %v3770_v55  ;;  %v3774_v23 = vadd.f32 %v3773_v62, %v3491_v61  ;;  %v3493_v3 = vadd.f32 %v3492_v1, %v12067_v59  ;;  %v10444_v62 = vld [vmem:[%s13795_s0 + $0x168] ss:$16 sps:$4 sm:$0xff]   ;;  %v10446_v1 = vld [vmem:[%s13795_s0 + $0x18c] ss:$16 sps:$4 sm:$0xff]  }
 0x305   :  { %v3775_v4 = vpop.f32.mrf.mxu1  ;;  %v3494_v6 = vpop.f32.mrf.mxu0 }
 0x306   :  { %4646 = vst [vmem:[#allocation2 + $0x4a0] sm:$0xff] %v3774_v23  ;;  %v3776_v9 = vadd.f32 %v3775_v4, %v3493_v3  ;;  %v3495_v10 = vadd.f32 %v3494_v6, %v12064_v46 }
 0x307   :  { %v3777_v11 = vpop.f32.mrf.mxu1  ;;  %v3496_v12 = vpop.f32.mrf.mxu0 }
 0x308   :  { %4647 = vst [vmem:[#allocation2 + $0x4a8] sm:$0xff] %v3776_v9  ;;  %v3778_v25 = vadd.f32 %v3777_v11, %v3495_v10  ;;  %v3497_v14 = vadd.f32 %v3496_v12, %v12067_v59 }
 0x309   :  { %v3779_v19 = vpop.f32.mrf.mxu1  ;;  %v3500_v21 = vpop.f32.mrf.mxu0  ;;  %4055 = vmatmul.mubr.bf16.gmra.mxu0 %v10435_v26 }
 0x30a   :  { %4654 = vst [vmem:[#allocation2 + $0x4e0] sm:$0xff] %v3778_v25  ;;  %v3780_v27 = vadd.f32 %v3779_v19, %v3497_v14  ;;  %v3501_v0 = vadd.f32 %v3500_v21, %v12064_v46  ;;  %4064 = vmatprep.mubr.bf16.mxu0 %v10437_v30  ;;  %v10447_v21 = vld [vmem:[%s13795_s0 + $0x180] ss:$16 sps:$4 sm:$0xff]  }
 0x30b   :  { %v3783_v28 = vpop.f32.mrf.mxu1  ;;  %4338 = vmatmul.mubr.bf16.gmra.mxu1 %v10436_v29  ;;  %v3502_v31 = vpop.f32.mrf.mxu0  ;;  %v10449_v29 = vld [vmem:[%s13795_s0 + $0x1a4] ss:$16 sps:$4 sm:$0xff]  }
 0x30c   :  { %4347 = vmatprep.mubr.bf16.mxu1 %v10438_v35  ;;  %4655 = vst [vmem:[#allocation2 + $0x4e8] sm:$0xff] %v3780_v27  ;;  %v3784_v32 = vadd.f32 %v3783_v28, %v3501_v0  ;;  %v3503_v33 = vadd.f32 %v3502_v31, %v12067_v59  ;;  %v10448_v28 = vld [vmem:[%s13795_s0 + $0x188] ss:$16 sps:$4 sm:$0xff]   ;;  %v10450_v31 = vld [vmem:[%s13795_s0 + $0x1ac] ss:$16 sps:$4 sm:$0xff]  }
 0x30d   :  { %v3785_v36 = vpop.f32.mrf.mxu1  ;;  %v3504_v5 = vpop.f32.mrf.mxu0 }
 0x30e   :  { %4662 = vst [vmem:[#allocation2 + $0x520] sm:$0xff] %v3784_v32  ;;  %v3786_v34 = vadd.f32 %v3785_v36, %v3503_v33  ;;  %v3505_v37 = vadd.f32 %v3504_v5, %v12064_v46 }
 0x30f   :  { %v3787_v40 = vpop.f32.mrf.mxu1  ;;  %v3506_v42 = vpop.f32.mrf.mxu0 }
 0x310   :  { %4663 = vst [vmem:[#allocation2 + $0x528] sm:$0xff] %v3786_v34  ;;  %v3788_v43 = vadd.f32 %v3787_v40, %v3505_v37  ;;  %v3507_v51 = vadd.f32 %v3506_v42, %v12067_v59 }
 0x311   :  { %v3789_v13 = vpop.f32.mrf.mxu1  ;;  %v3510_v38 = vpop.f32.mrf.mxu0  ;;  %4065 = vmatmul.mubr.bf16.gmra.mxu0 %v10439_v39 }
 0x312   :  { %4670 = vst [vmem:[#allocation2 + $0x560] sm:$0xff] %v3788_v43  ;;  %v3790_v7 = vadd.f32 %v3789_v13, %v3507_v51  ;;  %v3511_v60 = vadd.f32 %v3510_v38, %v12064_v46  ;;  %4074 = vmatprep.mubr.bf16.mxu0 %v10441_v8  ;;  %v10451_v38 = vld [vmem:[%s13795_s0 + $0x1a0] ss:$16 sps:$4 sm:$0xff]  }
 0x313   :  { %v3793_v45 = vpop.f32.mrf.mxu1  ;;  %4348 = vmatmul.mubr.bf16.gmra.mxu1 %v10440_v47  ;;  %v3512_v18 = vpop.f32.mrf.mxu0  ;;  %v10453_v47 = vld [vmem:[%s13795_s0 + $0x1c4] ss:$16 sps:$4 sm:$0xff]  }
 0x314   :  { %4357 = vmatprep.mubr.bf16.mxu1 %v10442_v20  ;;  %4671 = vst [vmem:[#allocation2 + $0x568] sm:$0xff] %v3790_v7  ;;  %v3794_v22 = vadd.f32 %v3793_v45, %v3511_v60  ;;  %v3513_v16 = vadd.f32 %v3512_v18, %v12067_v59  ;;  %v10452_v45 = vld [vmem:[%s13795_s0 + $0x1a8] ss:$16 sps:$4 sm:$0xff]   ;;  %v10454_v18 = vld [vmem:[%s13795_s0 + $0x1cc] ss:$16 sps:$4 sm:$0xff]  }
 0x315   :  { %v3795_v44 = vpop.f32.mrf.mxu1  ;;  %v3514_v24 = vpop.f32.mrf.mxu0 }
 0x316   :  { %4678 = vst [vmem:[#allocation2 + $0x5a0] sm:$0xff] %v3794_v22  ;;  %v3796_v49 = vadd.f32 %v3795_v44, %v3513_v16  ;;  %v3515_v48 = vadd.f32 %v3514_v24, %v12064_v46 }
 0x317   :  { %v3797_v50 = vpop.f32.mrf.mxu1  ;;  %v3516_v54 = vpop.f32.mrf.mxu0 }
 0x318   :  { %4679 = vst [vmem:[#allocation2 + $0x5a8] sm:$0xff] %v3796_v49  ;;  %v3798_v53 = vadd.f32 %v3797_v50, %v3515_v48  ;;  %v3517_v17 = vadd.f32 %v3516_v54, %v12067_v59 }
 0x319   :  { %v3799_v56 = vpop.f32.mrf.mxu1  ;;  %v3520_v52 = vpop.f32.mrf.mxu0  ;;  %4075 = vmatmul.mubr.bf16.gmra.mxu0 %v10443_v57 }
 0x31a   :  { %4686 = vst [vmem:[#allocation2 + $0x5e0] sm:$0xff] %v3798_v53  ;;  %v3800_v58 = vadd.f32 %v3799_v56, %v3517_v17  ;;  %v3521_v55 = vadd.f32 %v3520_v52, %v12064_v46  ;;  %4084 = vmatprep.mubr.bf16.mxu0 %v10445_v15  ;;  %v10455_v52 = vld [vmem:[%s13795_s0 + $0x1c0] ss:$16 sps:$4 sm:$0xff]  }
 0x31b   :  { %v3803_v61 = vpop.f32.mrf.mxu1  ;;  %4358 = vmatmul.mubr.bf16.gmra.mxu1 %v10444_v62  ;;  %v3522_v63 = vpop.f32.mrf.mxu0  ;;  %v10457_v62 = vld [vmem:[%s13795_s0 + $0x1e4] ss:$16 sps:$4 sm:$0xff]  }
 0x31c   :  { %4367 = vmatprep.mubr.bf16.mxu1 %v10446_v1  ;;  %4687 = vst [vmem:[#allocation2 + $0x5e8] sm:$0xff] %v3800_v58  ;;  %v3804_v2 = vadd.f32 %v3803_v61, %v3521_v55  ;;  %v3523_v23 = vadd.f32 %v3522_v63, %v12067_v59  ;;  %v10456_v61 = vld [vmem:[%s13795_s0 + $0x1c8] ss:$16 sps:$4 sm:$0xff]   ;;  %v10458_v63 = vld [vmem:[%s13795_s0 + $0x1ec] ss:$16 sps:$4 sm:$0xff]  }
 0x31d   :  { %v3805_v3 = vpop.f32.mrf.mxu1  ;;  %v3524_v4 = vpop.f32.mrf.mxu0 }
 0x31e   :  { %4694 = vst [vmem:[#allocation2 + $0x620] sm:$0xff] %v3804_v2  ;;  %v3806_v6 = vadd.f32 %v3805_v3, %v3523_v23  ;;  %v3525_v9 = vadd.f32 %v3524_v4, %v12064_v46 }
 0x31f   :  { %v3807_v10 = vpop.f32.mrf.mxu1  ;;  %v3526_v11 = vpop.f32.mrf.mxu0 }
 0x320   :  { %4695 = vst [vmem:[#allocation2 + $0x628] sm:$0xff] %v3806_v6  ;;  %v3808_v12 = vadd.f32 %v3807_v10, %v3525_v9  ;;  %v3527_v25 = vadd.f32 %v3526_v11, %v12067_v59 }
 0x321   :  { %v3809_v14 = vpop.f32.mrf.mxu1  ;;  %v3530_v19 = vpop.f32.mrf.mxu0  ;;  %4085 = vmatmul.mubr.bf16.gmra.mxu0 %v10447_v21 }
 0x322   :  { %4702 = vst [vmem:[#allocation2 + $0x660] sm:$0xff] %v3808_v12  ;;  %v3810_v26 = vadd.f32 %v3809_v14, %v3527_v25  ;;  %v3531_v27 = vadd.f32 %v3530_v19, %v12064_v46  ;;  %4094 = vmatprep.mubr.bf16.mxu0 %v10449_v29  ;;  %v10459_v19 = vld [vmem:[%s13795_s0 + $0x1e0] ss:$16 sps:$4 sm:$0xff]  }
 0x323   :  { %v3813_v0 = vpop.f32.mrf.mxu1  ;;  %4368 = vmatmul.mubr.bf16.gmra.mxu1 %v10448_v28  ;;  %v3532_v30 = vpop.f32.mrf.mxu0  ;;  %v10461_v28 = vld [vmem:[%s13795_s0 + $0x204] ss:$16 sps:$4 sm:$0xff]  }
 0x324   :  { %4377 = vmatprep.mubr.bf16.mxu1 %v10450_v31  ;;  %4703 = vst [vmem:[#allocation2 + $0x668] sm:$0xff] %v3810_v26  ;;  %v3814_v35 = vadd.f32 %v3813_v0, %v3531_v27  ;;  %v3533_v32 = vadd.f32 %v3532_v30, %v12067_v59  ;;  %v10460_v0 = vld [vmem:[%s13795_s0 + $0x1e8] ss:$16 sps:$4 sm:$0xff]   ;;  %v10462_v30 = vld [vmem:[%s13795_s0 + $0x20c] ss:$16 sps:$4 sm:$0xff]  }
 0x325   :  { %v3815_v33 = vpop.f32.mrf.mxu1  ;;  %v3534_v36 = vpop.f32.mrf.mxu0 }
 0x326   :  { %4710 = vst [vmem:[#allocation2 + $0x6a0] sm:$0xff] %v3814_v35  ;;  %v3816_v5 = vadd.f32 %v3815_v33, %v3533_v32  ;;  %v3535_v34 = vadd.f32 %v3534_v36, %v12064_v46 }
 0x327   :  { %v3817_v37 = vpop.f32.mrf.mxu1  ;;  %v3536_v40 = vpop.f32.mrf.mxu0 }
 0x328   :  { %4711 = vst [vmem:[#allocation2 + $0x6a8] sm:$0xff] %v3816_v5  ;;  %v3818_v42 = vadd.f32 %v3817_v37, %v3535_v34  ;;  %v3537_v43 = vadd.f32 %v3536_v40, %v12067_v59 }
 0x329   :  { %v3819_v51 = vpop.f32.mrf.mxu1  ;;  %v3540_v13 = vpop.f32.mrf.mxu0  ;;  %4095 = vmatmul.mubr.bf16.gmra.mxu0 %v10451_v38 }
 0x32a   :  { %4718 = vst [vmem:[#allocation2 + $0x6e0] sm:$0xff] %v3818_v42  ;;  %v3820_v39 = vadd.f32 %v3819_v51, %v3537_v43  ;;  %v3541_v7 = vadd.f32 %v3540_v13, %v12064_v46  ;;  %4104 = vmatprep.mubr.bf16.mxu0 %v10453_v47  ;;  %v10463_v13 = vld [vmem:[%s13795_s0 + $0x200] ss:$16 sps:$4 sm:$0xff]  }
 0x32b   :  { %v3823_v60 = vpop.f32.mrf.mxu1  ;;  %4378 = vmatmul.mubr.bf16.gmra.mxu1 %v10452_v45  ;;  %v3542_v8 = vpop.f32.mrf.mxu0  ;;  %v10465_v45 = vld [vmem:[%s13795_s0 + $0x224] ss:$16 sps:$4 sm:$0xff]  }
 0x32c   :  { %4387 = vmatprep.mubr.bf16.mxu1 %v10454_v18  ;;  %4719 = vst [vmem:[#allocation2 + $0x6e8] sm:$0xff] %v3820_v39  ;;  %v3824_v20 = vadd.f32 %v3823_v60, %v3541_v7  ;;  %v3543_v22 = vadd.f32 %v3542_v8, %v12067_v59  ;;  %v10464_v60 = vld [vmem:[%s13795_s0 + $0x208] ss:$16 sps:$4 sm:$0xff]   ;;  %v10466_v8 = vld [vmem:[%s13795_s0 + $0x22c] ss:$16 sps:$4 sm:$0xff]  }
 0x32d   :  { %v3825_v16 = vpop.f32.mrf.mxu1  ;;  %v3544_v44 = vpop.f32.mrf.mxu0 }
 0x32e   :  { %4726 = vst [vmem:[#allocation2 + $0x720] sm:$0xff] %v3824_v20  ;;  %v3826_v24 = vadd.f32 %v3825_v16, %v3543_v22  ;;  %v3545_v49 = vadd.f32 %v3544_v44, %v12064_v46 }
 0x32f   :  { %v3827_v48 = vpop.f32.mrf.mxu1  ;;  %v3546_v50 = vpop.f32.mrf.mxu0 }
 0x330   :  { %4727 = vst [vmem:[#allocation2 + $0x728] sm:$0xff] %v3826_v24  ;;  %v3828_v54 = vadd.f32 %v3827_v48, %v3545_v49  ;;  %v3547_v53 = vadd.f32 %v3546_v50, %v12067_v59 }
 0x331   :  { %v3829_v17 = vpop.f32.mrf.mxu1  ;;  %v3550_v56 = vpop.f32.mrf.mxu0  ;;  %4105 = vmatmul.mubr.bf16.gmra.mxu0 %v10455_v52 }
 0x332   :  { %4734 = vst [vmem:[#allocation2 + $0x760] sm:$0xff] %v3828_v54  ;;  %v3830_v57 = vadd.f32 %v3829_v17, %v3547_v53  ;;  %v3551_v58 = vadd.f32 %v3550_v56, %v12064_v46  ;;  %4114 = vmatprep.mubr.bf16.mxu0 %v10457_v62  ;;  %v10467_v56 = vld [vmem:[%s13795_s0 + $0x220] ss:$16 sps:$4 sm:$0xff]  }
 0x333   :  { %v3833_v55 = vpop.f32.mrf.mxu1  ;;  %4388 = vmatmul.mubr.bf16.gmra.mxu1 %v10456_v61  ;;  %v3552_v15 = vpop.f32.mrf.mxu0  ;;  %v10469_v61 = vld [vmem:[%s13795_s0 + $0x244] ss:$16 sps:$4 sm:$0xff]  }
 0x334   :  { %4397 = vmatprep.mubr.bf16.mxu1 %v10458_v63  ;;  %4735 = vst [vmem:[#allocation2 + $0x768] sm:$0xff] %v3830_v57  ;;  %v3834_v1 = vadd.f32 %v3833_v55, %v3551_v58  ;;  %v3553_v2 = vadd.f32 %v3552_v15, %v12067_v59  ;;  %v10468_v55 = vld [vmem:[%s13795_s0 + $0x228] ss:$16 sps:$4 sm:$0xff]   ;;  %v10470_v15 = vld [vmem:[%s13795_s0 + $0x24c] ss:$16 sps:$4 sm:$0xff]  }
 0x335   :  { %v3835_v23 = vpop.f32.mrf.mxu1  ;;  %v3554_v3 = vpop.f32.mrf.mxu0 }
 0x336   :  { %4742 = vst [vmem:[#allocation2 + $0x7a0] sm:$0xff] %v3834_v1  ;;  %v3836_v4 = vadd.f32 %v3835_v23, %v3553_v2  ;;  %v3555_v6 = vadd.f32 %v3554_v3, %v12064_v46 }
 0x337   :  { %v3837_v9 = vpop.f32.mrf.mxu1  ;;  %v3556_v10 = vpop.f32.mrf.mxu0 }
 0x338   :  { %4743 = vst [vmem:[#allocation2 + $0x7a8] sm:$0xff] %v3836_v4  ;;  %v3838_v11 = vadd.f32 %v3837_v9, %v3555_v6  ;;  %v3557_v12 = vadd.f32 %v3556_v10, %v12067_v59 }
 0x339   :  { %v3839_v25 = vpop.f32.mrf.mxu1  ;;  %v3560_v14 = vpop.f32.mrf.mxu0  ;;  %4115 = vmatmul.mubr.bf16.gmra.mxu0 %v10459_v19 }
 0x33a   :  { %4750 = vst [vmem:[#allocation2 + $0x7e0] sm:$0xff] %v3838_v11  ;;  %v3840_v21 = vadd.f32 %v3839_v25, %v3557_v12  ;;  %v3561_v26 = vadd.f32 %v3560_v14, %v12064_v46  ;;  %4124 = vmatprep.mubr.bf16.mxu0 %v10461_v28  ;;  %v10471_v14 = vld [vmem:[%s13795_s0 + $0x240] ss:$16 sps:$4 sm:$0xff]  }
 0x33b   :  { %v3843_v27 = vpop.f32.mrf.mxu1  ;;  %4398 = vmatmul.mubr.bf16.gmra.mxu1 %v10460_v0  ;;  %v3562_v29 = vpop.f32.mrf.mxu0  ;;  %v10473_v0 = vld [vmem:[%s13795_s0 + $0x264] ss:$16 sps:$4 sm:$0xff]  }
 0x33c   :  { %4407 = vmatprep.mubr.bf16.mxu1 %v10462_v30  ;;  %4751 = vst [vmem:[#allocation2 + $0x7e8] sm:$0xff] %v3840_v21  ;;  %v3844_v31 = vadd.f32 %v3843_v27, %v3561_v26  ;;  %v3563_v35 = vadd.f32 %v3562_v29, %v12067_v59  ;;  %v10472_v27 = vld [vmem:[%s13795_s0 + $0x248] ss:$16 sps:$4 sm:$0xff]   ;;  %v10474_v29 = vld [vmem:[%s13795_s0 + $0x26c] ss:$16 sps:$4 sm:$0xff]  }
 0x33d   :  { %v3845_v32 = vpop.f32.mrf.mxu1  ;;  %v3564_v33 = vpop.f32.mrf.mxu0 }
 0x33e   :  { %4758 = vst [vmem:[#allocation2 + $0x820] sm:$0xff] %v3844_v31  ;;  %v3846_v36 = vadd.f32 %v3845_v32, %v3563_v35  ;;  %v3565_v5 = vadd.f32 %v3564_v33, %v12064_v46 }
 0x33f   :  { %v3847_v34 = vpop.f32.mrf.mxu1  ;;  %v3566_v37 = vpop.f32.mrf.mxu0 }
 0x340   :  { %4759 = vst [vmem:[#allocation2 + $0x828] sm:$0xff] %v3846_v36  ;;  %v3848_v40 = vadd.f32 %v3847_v34, %v3565_v5  ;;  %v3567_v42 = vadd.f32 %v3566_v37, %v12067_v59 }
 0x341   :  { %v3849_v43 = vpop.f32.mrf.mxu1  ;;  %v3570_v51 = vpop.f32.mrf.mxu0  ;;  %4125 = vmatmul.mubr.bf16.gmra.mxu0 %v10463_v13 }
 0x342   :  { %4766 = vst [vmem:[#allocation2 + $0x860] sm:$0xff] %v3848_v40  ;;  %v3850_v38 = vadd.f32 %v3849_v43, %v3567_v42  ;;  %v3571_v39 = vadd.f32 %v3570_v51, %v12064_v46  ;;  %4134 = vmatprep.mubr.bf16.mxu0 %v10465_v45  ;;  %v10475_v51 = vld [vmem:[%s13795_s0 + $0x260] ss:$16 sps:$4 sm:$0xff]  }
 0x343   :  { %v3853_v7 = vpop.f32.mrf.mxu1  ;;  %4408 = vmatmul.mubr.bf16.gmra.mxu1 %v10464_v60  ;;  %v3572_v47 = vpop.f32.mrf.mxu0  ;;  %v10477_v60 = vld [vmem:[%s13795_s0 + $0x284] ss:$16 sps:$4 sm:$0xff]  }
 0x344   :  { %4417 = vmatprep.mubr.bf16.mxu1 %v10466_v8  ;;  %4767 = vst [vmem:[#allocation2 + $0x868] sm:$0xff] %v3850_v38  ;;  %v3854_v18 = vadd.f32 %v3853_v7, %v3571_v39  ;;  %v3573_v20 = vadd.f32 %v3572_v47, %v12067_v59  ;;  %v10476_v7 = vld [vmem:[%s13795_s0 + $0x268] ss:$16 sps:$4 sm:$0xff]   ;;  %v10478_v47 = vld [vmem:[%s13795_s0 + $0x28c] ss:$16 sps:$4 sm:$0xff]  }
 0x345   :  { %v3855_v22 = vpop.f32.mrf.mxu1  ;;  %v3574_v16 = vpop.f32.mrf.mxu0 }
 0x346   :  { %4774 = vst [vmem:[#allocation2 + $0x8a0] sm:$0xff] %v3854_v18  ;;  %v3856_v44 = vadd.f32 %v3855_v22, %v3573_v20  ;;  %v3575_v24 = vadd.f32 %v3574_v16, %v12064_v46 }
 0x347   :  { %v3857_v49 = vpop.f32.mrf.mxu1  ;;  %v3576_v48 = vpop.f32.mrf.mxu0 }
 0x348   :  { %4775 = vst [vmem:[#allocation2 + $0x8a8] sm:$0xff] %v3856_v44  ;;  %v3858_v50 = vadd.f32 %v3857_v49, %v3575_v24  ;;  %v3577_v54 = vadd.f32 %v3576_v48, %v12067_v59 }
 0x349   :  { %v3859_v53 = vpop.f32.mrf.mxu1  ;;  %v3580_v17 = vpop.f32.mrf.mxu0  ;;  %4135 = vmatmul.mubr.bf16.gmra.mxu0 %v10467_v56 }
 0x34a   :  { %4782 = vst [vmem:[#allocation2 + $0x8e0] sm:$0xff] %v3858_v50  ;;  %v3860_v52 = vadd.f32 %v3859_v53, %v3577_v54  ;;  %v3581_v57 = vadd.f32 %v3580_v17, %v12064_v46  ;;  %4144 = vmatprep.mubr.bf16.mxu0 %v10469_v61  ;;  %v10479_v17 = vld [vmem:[%s13795_s0 + $0x280] ss:$16 sps:$4 sm:$0xff]  }
 0x34b   :  { %v3863_v58 = vpop.f32.mrf.mxu1  ;;  %4418 = vmatmul.mubr.bf16.gmra.mxu1 %v10468_v55  ;;  %v3582_v62 = vpop.f32.mrf.mxu0  ;;  %v10481_v55 = vld [vmem:[%s13795_s0 + $0x2a4] ss:$16 sps:$4 sm:$0xff]  }
 0x34c   :  { %4427 = vmatprep.mubr.bf16.mxu1 %v10470_v15  ;;  %4783 = vst [vmem:[#allocation2 + $0x8e8] sm:$0xff] %v3860_v52  ;;  %v3864_v63 = vadd.f32 %v3863_v58, %v3581_v57  ;;  %v3583_v1 = vadd.f32 %v3582_v62, %v12067_v59  ;;  %v10480_v58 = vld [vmem:[%s13795_s0 + $0x288] ss:$16 sps:$4 sm:$0xff]   ;;  %v10482_v62 = vld [vmem:[%s13795_s0 + $0x2ac] ss:$16 sps:$4 sm:$0xff]  }
 0x34d   :  { %v3865_v2 = vpop.f32.mrf.mxu1  ;;  %v3584_v23 = vpop.f32.mrf.mxu0 }
 0x34e   :  { %4790 = vst [vmem:[#allocation2 + $0x920] sm:$0xff] %v3864_v63  ;;  %v3866_v3 = vadd.f32 %v3865_v2, %v3583_v1  ;;  %v3585_v4 = vadd.f32 %v3584_v23, %v12064_v46 }
 0x34f   :  { %v3867_v6 = vpop.f32.mrf.mxu1  ;;  %v3586_v9 = vpop.f32.mrf.mxu0 }
 0x350   :  { %4791 = vst [vmem:[#allocation2 + $0x928] sm:$0xff] %v3866_v3  ;;  %v3868_v10 = vadd.f32 %v3867_v6, %v3585_v4  ;;  %v3587_v11 = vadd.f32 %v3586_v9, %v12067_v59 }
 0x351   :  { %v3869_v12 = vpop.f32.mrf.mxu1  ;;  %v3590_v25 = vpop.f32.mrf.mxu0  ;;  %4145 = vmatmul.mubr.bf16.gmra.mxu0 %v10471_v14 }
 0x352   :  { %4798 = vst [vmem:[#allocation2 + $0x960] sm:$0xff] %v3868_v10  ;;  %v3870_v19 = vadd.f32 %v3869_v12, %v3587_v11  ;;  %v3591_v21 = vadd.f32 %v3590_v25, %v12064_v46  ;;  %4154 = vmatprep.mubr.bf16.mxu0 %v10473_v0  ;;  %v10483_v25 = vld [vmem:[%s13795_s0 + $0x2a0] ss:$16 sps:$4 sm:$0xff]  }
 0x353   :  { %v3873_v26 = vpop.f32.mrf.mxu1  ;;  %4428 = vmatmul.mubr.bf16.gmra.mxu1 %v10472_v27  ;;  %v3592_v28 = vpop.f32.mrf.mxu0  ;;  %v10485_v27 = vld [vmem:[%s13795_s0 + $0x2c4] ss:$16 sps:$4 sm:$0xff]  }
 0x354   :  { %4437 = vmatprep.mubr.bf16.mxu1 %v10474_v29  ;;  %4799 = vst [vmem:[#allocation2 + $0x968] sm:$0xff] %v3870_v19  ;;  %v3874_v30 = vadd.f32 %v3873_v26, %v3591_v21  ;;  %v3593_v31 = vadd.f32 %v3592_v28, %v12067_v59  ;;  %v10484_v26 = vld [vmem:[%s13795_s0 + $0x2a8] ss:$16 sps:$4 sm:$0xff]   ;;  %v10486_v28 = vld [vmem:[%s13795_s0 + $0x2cc] ss:$16 sps:$4 sm:$0xff]  }
 0x355   :  { %v3875_v35 = vpop.f32.mrf.mxu1  ;;  %v3594_v32 = vpop.f32.mrf.mxu0 }
 0x356   :  { %4806 = vst [vmem:[#allocation2 + $0x9a0] sm:$0xff] %v3874_v30  ;;  %v3876_v33 = vadd.f32 %v3875_v35, %v3593_v31  ;;  %v3595_v36 = vadd.f32 %v3594_v32, %v12064_v46 }
 0x357   :  { %v3877_v5 = vpop.f32.mrf.mxu1  ;;  %v3596_v34 = vpop.f32.mrf.mxu0 }
 0x358   :  { %4807 = vst [vmem:[#allocation2 + $0x9a8] sm:$0xff] %v3876_v33  ;;  %v3878_v37 = vadd.f32 %v3877_v5, %v3595_v36  ;;  %v3597_v40 = vadd.f32 %v3596_v34, %v12067_v59 }
 0x359   :  { %v3879_v42 = vpop.f32.mrf.mxu1  ;;  %v3600_v43 = vpop.f32.mrf.mxu0  ;;  %4155 = vmatmul.mubr.bf16.gmra.mxu0 %v10475_v51 }
 0x35a   :  { %4814 = vst [vmem:[#allocation2 + $0x9e0] sm:$0xff] %v3878_v37  ;;  %v3880_v13 = vadd.f32 %v3879_v42, %v3597_v40  ;;  %v3601_v38 = vadd.f32 %v3600_v43, %v12064_v46  ;;  %4164 = vmatprep.mubr.bf16.mxu0 %v10477_v60  ;;  %v10487_v43 = vld [vmem:[%s13795_s0 + $0x2c0] ss:$16 sps:$4 sm:$0xff]  }
 0x35b   :  { %v3883_v39 = vpop.f32.mrf.mxu1  ;;  %4438 = vmatmul.mubr.bf16.gmra.mxu1 %v10476_v7  ;;  %v3602_v45 = vpop.f32.mrf.mxu0  ;;  %v10489_v7 = vld [vmem:[%s13795_s0 + $0x2e4] ss:$16 sps:$4 sm:$0xff]  }
 0x35c   :  { %4447 = vmatprep.mubr.bf16.mxu1 %v10478_v47  ;;  %4815 = vst [vmem:[#allocation2 + $0x9e8] sm:$0xff] %v3880_v13  ;;  %v3884_v8 = vadd.f32 %v3883_v39, %v3601_v38  ;;  %v3603_v18 = vadd.f32 %v3602_v45, %v12067_v59  ;;  %v10488_v39 = vld [vmem:[%s13795_s0 + $0x2c8] ss:$16 sps:$4 sm:$0xff]   ;;  %v10490_v45 = vld [vmem:[%s13795_s0 + $0x2ec] ss:$16 sps:$4 sm:$0xff]  }
 0x35d   :  { %v3885_v20 = vpop.f32.mrf.mxu1  ;;  %v3604_v22 = vpop.f32.mrf.mxu0 }
 0x35e   :  { %4822 = vst [vmem:[#allocation2 + $0xa20] sm:$0xff] %v3884_v8  ;;  %v3886_v16 = vadd.f32 %v3885_v20, %v3603_v18  ;;  %v3605_v44 = vadd.f32 %v3604_v22, %v12064_v46 }
 0x35f   :  { %v3887_v24 = vpop.f32.mrf.mxu1  ;;  %v3606_v49 = vpop.f32.mrf.mxu0 }
 0x360   :  { %4823 = vst [vmem:[#allocation2 + $0xa28] sm:$0xff] %v3886_v16  ;;  %v3888_v48 = vadd.f32 %v3887_v24, %v3605_v44  ;;  %v3607_v50 = vadd.f32 %v3606_v49, %v12067_v59 }
 0x361   :  { %v3889_v54 = vpop.f32.mrf.mxu1  ;;  %v3610_v53 = vpop.f32.mrf.mxu0  ;;  %4165 = vmatmul.mubr.bf16.gmra.mxu0 %v10479_v17 }
 0x362   :  { %4830 = vst [vmem:[#allocation2 + $0xa60] sm:$0xff] %v3888_v48  ;;  %v3890_v56 = vadd.f32 %v3889_v54, %v3607_v50  ;;  %v3611_v52 = vadd.f32 %v3610_v53, %v12064_v46  ;;  %4174 = vmatprep.mubr.bf16.mxu0 %v10481_v55  ;;  %v10491_v53 = vld [vmem:[%s13795_s0 + $0x2e0] ss:$16 sps:$4 sm:$0xff]   ;;  %v440_v55 = vsub.s32 6, %v11136_v41 }
 0x363   :  { %v3893_v57 = vpop.f32.mrf.mxu1  ;;  %4448 = vmatmul.mubr.bf16.gmra.mxu1 %v10480_v58  ;;  %v3612_v61 = vpop.f32.mrf.mxu0  ;;  %v10493_v58 = vld [vmem:[%s13795_s0 + $0x304] ss:$16 sps:$4 sm:$0xff]  }
 0x364   :  { %4457 = vmatprep.mubr.bf16.mxu1 %v10482_v62  ;;  %4831 = vst [vmem:[#allocation2 + $0xa68] sm:$0xff] %v3890_v56  ;;  %v3894_v15 = vadd.f32 %v3893_v57, %v3611_v52  ;;  %v3613_v63 = vadd.f32 %v3612_v61, %v12067_v59  ;;  %v10492_v57 = vld [vmem:[%s13795_s0 + $0x2e8] ss:$16 sps:$4 sm:$0xff]   ;;  %v10494_v62 = vld [vmem:[%s13795_s0 + $0x30c] ss:$16 sps:$4 sm:$0xff]  }
 0x365   :  { %v3895_v1 = vpop.f32.mrf.mxu1  ;;  %v3614_v2 = vpop.f32.mrf.mxu0 }
 0x366   :  { %4838 = vst [vmem:[#allocation2 + $0xaa0] sm:$0xff] %v3894_v15  ;;  %v3896_v23 = vadd.f32 %v3895_v1, %v3613_v63  ;;  %v3615_v3 = vadd.f32 %v3614_v2, %v12064_v46  ;;  %v444_v2 = vsub.s32 7, %v11136_v41 }
 0x367   :  { %v3897_v4 = vpop.f32.mrf.mxu1  ;;  %v3616_v6 = vpop.f32.mrf.mxu0 }
 0x368   :  { %4839 = vst [vmem:[#allocation2 + $0xaa8] sm:$0xff] %v3896_v23  ;;  %v3898_v9 = vadd.f32 %v3897_v4, %v3615_v3  ;;  %v3617_v10 = vadd.f32 %v3616_v6, %v12067_v59 }
 0x369   :  { %v3899_v11 = vpop.f32.mrf.mxu1  ;;  %v3620_v12 = vpop.f32.mrf.mxu0  ;;  %4175 = vmatmul.mubr.bf16.gmra.mxu0 %v10483_v25 }
 0x36a   :  { %4846 = vst [vmem:[#allocation2 + $0xae0] sm:$0xff] %v3898_v9  ;;  %v3900_v14 = vadd.f32 %v3899_v11, %v3617_v10  ;;  %v3621_v19 = vadd.f32 %v3620_v12, %v12064_v46  ;;  %4184 = vmatprep.mubr.bf16.mxu0 %v10485_v27  ;;  %v10495_v9 = vld [vmem:[#allocation5] sm:$0xff] }
 0x36b   :  { %v3903_v21 = vpop.f32.mrf.mxu1  ;;  %4458 = vmatmul.mubr.bf16.gmra.mxu1 %v10484_v26  ;;  %v3622_v0 = vpop.f32.mrf.mxu0  ;;  %v12470_v10 = vrot.slane %v10495_v9, %v440_v55  ;;  %v10496_v26 = vld [vmem:[%s13795_s0 + $0x300] ss:$16 sps:$4 sm:$0xff]  }
 0x36c   :  { %4467 = vmatprep.mubr.bf16.mxu1 %v10486_v28  ;;  %4847 = vst [vmem:[#allocation2 + $0xae8] sm:$0xff] %v3900_v14  ;;  %v3904_v29 = vadd.f32 %v3903_v21, %v3621_v19  ;;  %v3623_v30 = vadd.f32 %v3622_v0, %v12067_v59  ;;  %v12473_v19 = vrot.slane %v10495_v9, %v444_v2  ;;  %v10497_v28 = vld [vmem:[%s13795_s0 + $0x308] ss:$16 sps:$4 sm:$0xff]   ;;  %s12589_s0 = smov 0  }
 0x36d   :  { %v3905_v31 = vpop.f32.mrf.mxu1  ;;  %v3624_v35 = vpop.f32.mrf.mxu0 }
 0x36e   :  { %4854 = vst [vmem:[#allocation2 + $0xb20] sm:$0xff] %v3904_v29  ;;  %v3906_v32 = vadd.f32 %v3905_v31, %v3623_v30  ;;  %v3625_v33 = vadd.f32 %v3624_v35, %v12064_v46 }
 0x36f   :  { %v3907_v36 = vpop.f32.mrf.mxu1  ;;  %v3626_v5 = vpop.f32.mrf.mxu0 }
 0x370   :  { %4855 = vst [vmem:[#allocation2 + $0xb28] sm:$0xff] %v3906_v32  ;;  %v3908_v34 = vadd.f32 %v3907_v36, %v3625_v33  ;;  %v3627_v37 = vadd.f32 %v3626_v5, %v12067_v59 }
 0x371   :  { %v3909_v40 = vpop.f32.mrf.mxu1  ;;  %v3630_v42 = vpop.f32.mrf.mxu0  ;;  %4185 = vmatmul.mubr.bf16.gmra.mxu0 %v10487_v43 }
 0x372   :  { %4862 = vst [vmem:[#allocation2 + $0xb60] sm:$0xff] %v3908_v34  ;;  %v3910_v51 = vadd.f32 %v3909_v40, %v3627_v37  ;;  %v3631_v13 = vadd.f32 %v3630_v42, %v12064_v46  ;;  %4194 = vmatprep.mubr.bf16.mxu0 %v10489_v7 }
 0x373   :  { %v3913_v38 = vpop.f32.mrf.mxu1  ;;  %4468 = vmatmul.mubr.bf16.gmra.mxu1 %v10488_v39  ;;  %v3632_v60 = vpop.f32.mrf.mxu0 }
 0x374   :  { %4477 = vmatprep.mubr.bf16.mxu1 %v10490_v45  ;;  %4863 = vst [vmem:[#allocation2 + $0xb68] sm:$0xff] %v3910_v51  ;;  %v3914_v47 = vadd.f32 %v3913_v38, %v3631_v13  ;;  %v3633_v8 = vadd.f32 %v3632_v60, %v12067_v59 }
 0x375   :  { %v3915_v18 = vpop.f32.mrf.mxu1  ;;  %v3634_v20 = vpop.f32.mrf.mxu0 }
 0x376   :  { %4870 = vst [vmem:[#allocation2 + $0xba0] sm:$0xff] %v3914_v47  ;;  %v3916_v22 = vadd.f32 %v3915_v18, %v3633_v8  ;;  %v3635_v16 = vadd.f32 %v3634_v20, %v12064_v46 }
 0x377   :  { %v3917_v44 = vpop.f32.mrf.mxu1  ;;  %v3636_v24 = vpop.f32.mrf.mxu0 }
 0x378   :  { %4871 = vst [vmem:[#allocation2 + $0xba8] sm:$0xff] %v3916_v22  ;;  %v3918_v49 = vadd.f32 %v3917_v44, %v3635_v16  ;;  %v3637_v48 = vadd.f32 %v3636_v24, %v12067_v59 }
 0x379   :  { %v3919_v50 = vpop.f32.mrf.mxu1  ;;  %v3640_v54 = vpop.f32.mrf.mxu0  ;;  %4195 = vmatmul.mubr.bf16.gmra.mxu0 %v10491_v53 }
 0x37a   :  { %4878 = vst [vmem:[#allocation2 + $0xbe0] sm:$0xff] %v3918_v49  ;;  %v3920_v17 = vadd.f32 %v3919_v50, %v3637_v48  ;;  %v3641_v56 = vadd.f32 %v3640_v54, %v12064_v46  ;;  %4204 = vmatprep.mubr.bf16.mxu0 %v10493_v58 }
 0x37b   :  { %v3923_v52 = vpop.f32.mrf.mxu1  ;;  %4478 = vmatmul.mubr.bf16.gmra.mxu1 %v10492_v57  ;;  %v3642_v61 = vpop.f32.mrf.mxu0 }
 0x37c   :  { %4487 = vmatprep.mubr.bf16.mxu1 %v10494_v62  ;;  %4879 = vst [vmem:[#allocation2 + $0xbe8] sm:$0xff] %v3920_v17  ;;  %v3924_v15 = vadd.f32 %v3923_v52, %v3641_v56  ;;  %v3643_v63 = vadd.f32 %v3642_v61, %v12067_v59 }
 0x37d   :  { %v3925_v1 = vpop.f32.mrf.mxu1  ;;  %v3644_v23 = vpop.f32.mrf.mxu0 }
 0x37e   :  { %4886 = vst [vmem:[#allocation2 + $0xc20] sm:$0xff] %v3924_v15  ;;  %v3926_v3 = vadd.f32 %v3925_v1, %v3643_v63  ;;  %v3645_v4 = vadd.f32 %v3644_v23, %v12064_v46 }
 0x37f   :  { %v3927_v6 = vpop.f32.mrf.mxu1  ;;  %v3646_v11 = vpop.f32.mrf.mxu0 }
 0x380   :  { %4887 = vst [vmem:[#allocation2 + $0xc28] sm:$0xff] %v3926_v3  ;;  %v3928_v12 = vadd.f32 %v3927_v6, %v3645_v4  ;;  %v3647_v25 = vadd.f32 %v3646_v11, %v12067_v59 }
 0x381   :  { %v3929_v14 = vpop.f32.mrf.mxu1  ;;  %v3966_v21 = vpop.f32.mrf.mxu0  ;;  %4205 = vmatmul.mubr.bf16.gmra.mxu0 %v10496_v26 }
 0x382   :  { %4894 = vst [vmem:[#allocation2 + $0xc60] sm:$0xff] %v3928_v12  ;;  %v3930_v46 = vadd.f32 %v3929_v14, %v3647_v25  ;;  %v3967_v27 = vadd.f32 %v3966_v21, %v12470_v10 }
 0x383   :  { %v4249_v0 = vpop.f32.mrf.mxu1  ;;  %4488 = vmatmul.mubr.bf16.gmra.mxu1 %v10497_v28  ;;  %v3968_v59 = vpop.f32.mrf.mxu0 }
 0x384   :  { %4895 = vst [vmem:[#allocation2 + $0xc68] sm:$0xff] %v3930_v46  ;;  %v4250_v29 = vadd.f32 %v4249_v0, %v3967_v27  ;;  %v3969_v30 = vadd.f32 %v3968_v59, %v12473_v19 }
 0x385   :  { %v4251_v31 = vpop.f32.mrf.mxu1  ;;  %v3970_v35 = vpop.f32.mrf.mxu0 }
 0x386   :  { %4504 = vst [vmem:[#allocation2 + $0x30] sm:$0xff] %v4250_v29  ;;  %v4252_v32 = vadd.f32 %v4251_v31, %v3969_v30  ;;  %v3971_v33 = vadd.f32 %v3970_v35, %v12470_v10 }
 0x387   :  { %v4253_v36 = vpop.f32.mrf.mxu1  ;;  %v3972_v5 = vpop.f32.mrf.mxu0 }
 0x388   :  { %4505 = vst [vmem:[#allocation2 + $0x38] sm:$0xff] %v4252_v32  ;;  %v4254_v34 = vadd.f32 %v4253_v36, %v3971_v33  ;;  %v3973_v37 = vadd.f32 %v3972_v5, %v12473_v19 }
 0x389   :  { %v4255_v40 = vpop.f32.mrf.mxu1  ;;  %v3976_v42 = vpop.f32.mrf.mxu0 }
 0x38a   :  { %4512 = vst [vmem:[#allocation2 + $0x70] sm:$0xff] %v4254_v34  ;;  %v4256_v43 = vadd.f32 %v4255_v40, %v3973_v37  ;;  %v3977_v51 = vadd.f32 %v3976_v42, %v12470_v10 }
 0x38b   :  { %v4259_v13 = vpop.f32.mrf.mxu1  ;;  %v3978_v38 = vpop.f32.mrf.mxu0 }
 0x38c   :  { %4513 = vst [vmem:[#allocation2 + $0x78] sm:$0xff] %v4256_v43  ;;  %v4260_v39 = vadd.f32 %v4259_v13, %v3977_v51  ;;  %v3979_v7 = vadd.f32 %v3978_v38, %v12473_v19 }
 0x38d   :  { %v4261_v60 = vpop.f32.mrf.mxu1  ;;  %v3980_v45 = vpop.f32.mrf.mxu0 }
 0x38e   :  { %4520 = vst [vmem:[#allocation2 + $0xb0] sm:$0xff] %v4260_v39  ;;  %v4262_v47 = vadd.f32 %v4261_v60, %v3979_v7  ;;  %v3981_v8 = vadd.f32 %v3980_v45, %v12470_v10 }
 0x38f   :  { %v4263_v18 = vpop.f32.mrf.mxu1  ;;  %v3982_v20 = vpop.f32.mrf.mxu0 }
 0x390   :  { %4521 = vst [vmem:[#allocation2 + $0xb8] sm:$0xff] %v4262_v47  ;;  %v4264_v22 = vadd.f32 %v4263_v18, %v3981_v8  ;;  %v3983_v16 = vadd.f32 %v3982_v20, %v12473_v19 }
 0x391   :  { %v4265_v44 = vpop.f32.mrf.mxu1  ;;  %v3986_v24 = vpop.f32.mrf.mxu0 }
 0x392   :  { %4528 = vst [vmem:[#allocation2 + $0xf0] sm:$0xff] %v4264_v22  ;;  %v4266_v49 = vadd.f32 %v4265_v44, %v3983_v16  ;;  %v3987_v48 = vadd.f32 %v3986_v24, %v12470_v10 }
 0x393   :  { %v4269_v50 = vpop.f32.mrf.mxu1  ;;  %v3988_v54 = vpop.f32.mrf.mxu0 }
 0x394   :  { %4529 = vst [vmem:[#allocation2 + $0xf8] sm:$0xff] %v4266_v49  ;;  %v4270_v53 = vadd.f32 %v4269_v50, %v3987_v48  ;;  %v3989_v17 = vadd.f32 %v3988_v54, %v12473_v19 }
 0x395   :  { %v4271_v56 = vpop.f32.mrf.mxu1  ;;  %v3990_v52 = vpop.f32.mrf.mxu0 }
 0x396   :  { %4536 = vst [vmem:[#allocation2 + $0x130] sm:$0xff] %v4270_v53  ;;  %v4272_v57 = vadd.f32 %v4271_v56, %v3989_v17  ;;  %v3991_v58 = vadd.f32 %v3990_v52, %v12470_v10 }
 0x397   :  { %v4273_v55 = vpop.f32.mrf.mxu1  ;;  %v3992_v61 = vpop.f32.mrf.mxu0 }
 0x398   :  { %4537 = vst [vmem:[#allocation2 + $0x138] sm:$0xff] %v4272_v57  ;;  %v4274_v62 = vadd.f32 %v4273_v55, %v3991_v58  ;;  %v3993_v15 = vadd.f32 %v3992_v61, %v12473_v19 }
 0x399   :  { %v4275_v63 = vpop.f32.mrf.mxu1  ;;  %v3996_v1 = vpop.f32.mrf.mxu0 }
 0x39a   :  { %4544 = vst [vmem:[#allocation2 + $0x170] sm:$0xff] %v4274_v62  ;;  %v4276_v2 = vadd.f32 %v4275_v63, %v3993_v15  ;;  %v3997_v23 = vadd.f32 %v3996_v1, %v12470_v10 }
 0x39b   :  { %v4279_v3 = vpop.f32.mrf.mxu1  ;;  %v3998_v4 = vpop.f32.mrf.mxu0 }
 0x39c   :  { %4545 = vst [vmem:[#allocation2 + $0x178] sm:$0xff] %v4276_v2  ;;  %v4280_v6 = vadd.f32 %v4279_v3, %v3997_v23  ;;  %v3999_v9 = vadd.f32 %v3998_v4, %v12473_v19 }
 0x39d   :  { %v4281_v11 = vpop.f32.mrf.mxu1  ;;  %v4000_v12 = vpop.f32.mrf.mxu0 }
 0x39e   :  { %4552 = vst [vmem:[#allocation2 + $0x1b0] sm:$0xff] %v4280_v6  ;;  %v4282_v25 = vadd.f32 %v4281_v11, %v3999_v9  ;;  %v4001_v14 = vadd.f32 %v4000_v12, %v12470_v10 }
 0x39f   :  { %v4283_v21 = vpop.f32.mrf.mxu1  ;;  %v4002_v26 = vpop.f32.mrf.mxu0 }
 0x3a0   :  { %4553 = vst [vmem:[#allocation2 + $0x1b8] sm:$0xff] %v4282_v25  ;;  %v4284_v46 = vadd.f32 %v4283_v21, %v4001_v14  ;;  %v4003_v27 = vadd.f32 %v4002_v26, %v12473_v19 }
 0x3a1   :  { %v4285_v0 = vpop.f32.mrf.mxu1  ;;  %v4006_v28 = vpop.f32.mrf.mxu0 }
 0x3a2   :  { %4560 = vst [vmem:[#allocation2 + $0x1f0] sm:$0xff] %v4284_v46  ;;  %v4286_v59 = vadd.f32 %v4285_v0, %v4003_v27  ;;  %v4007_v29 = vadd.f32 %v4006_v28, %v12470_v10 }
 0x3a3   :  { %v4289_v30 = vpop.f32.mrf.mxu1  ;;  %v4008_v31 = vpop.f32.mrf.mxu0 }
 0x3a4   :  { %4561 = vst [vmem:[#allocation2 + $0x1f8] sm:$0xff] %v4286_v59  ;;  %v4290_v35 = vadd.f32 %v4289_v30, %v4007_v29  ;;  %v4009_v32 = vadd.f32 %v4008_v31, %v12473_v19 }
 0x3a5   :  { %v4291_v33 = vpop.f32.mrf.mxu1  ;;  %v4010_v36 = vpop.f32.mrf.mxu0 }
 0x3a6   :  { %4568 = vst [vmem:[#allocation2 + $0x230] sm:$0xff] %v4290_v35  ;;  %v4292_v5 = vadd.f32 %v4291_v33, %v4009_v32  ;;  %v4011_v34 = vadd.f32 %v4010_v36, %v12470_v10 }
 0x3a7   :  { %v4293_v37 = vpop.f32.mrf.mxu1  ;;  %v4012_v40 = vpop.f32.mrf.mxu0 }
 0x3a8   :  { %4569 = vst [vmem:[#allocation2 + $0x238] sm:$0xff] %v4292_v5  ;;  %v4294_v42 = vadd.f32 %v4293_v37, %v4011_v34  ;;  %v4013_v43 = vadd.f32 %v4012_v40, %v12473_v19 }
 0x3a9   :  { %v4295_v51 = vpop.f32.mrf.mxu1  ;;  %v4016_v13 = vpop.f32.mrf.mxu0 }
 0x3aa   :  { %4576 = vst [vmem:[#allocation2 + $0x270] sm:$0xff] %v4294_v42  ;;  %v4296_v38 = vadd.f32 %v4295_v51, %v4013_v43  ;;  %v4017_v39 = vadd.f32 %v4016_v13, %v12470_v10 }
 0x3ab   :  { %v4299_v7 = vpop.f32.mrf.mxu1  ;;  %v4018_v60 = vpop.f32.mrf.mxu0 }
 0x3ac   :  { %4577 = vst [vmem:[#allocation2 + $0x278] sm:$0xff] %v4296_v38  ;;  %v4300_v45 = vadd.f32 %v4299_v7, %v4017_v39  ;;  %v4019_v47 = vadd.f32 %v4018_v60, %v12473_v19 }
 0x3ad   :  { %v4301_v8 = vpop.f32.mrf.mxu1  ;;  %v4020_v18 = vpop.f32.mrf.mxu0 }
 0x3ae   :  { %4584 = vst [vmem:[#allocation2 + $0x2b0] sm:$0xff] %v4300_v45  ;;  %v4302_v20 = vadd.f32 %v4301_v8, %v4019_v47  ;;  %v4021_v22 = vadd.f32 %v4020_v18, %v12470_v10 }
 0x3af   :  { %v4303_v16 = vpop.f32.mrf.mxu1  ;;  %v4022_v44 = vpop.f32.mrf.mxu0 }
 0x3b0   :  { %4585 = vst [vmem:[#allocation2 + $0x2b8] sm:$0xff] %v4302_v20  ;;  %v4304_v24 = vadd.f32 %v4303_v16, %v4021_v22  ;;  %v4023_v49 = vadd.f32 %v4022_v44, %v12473_v19 }
 0x3b1   :  { %v4305_v48 = vpop.f32.mrf.mxu1  ;;  %v4026_v50 = vpop.f32.mrf.mxu0 }
 0x3b2   :  { %4592 = vst [vmem:[#allocation2 + $0x2f0] sm:$0xff] %v4304_v24  ;;  %v4306_v54 = vadd.f32 %v4305_v48, %v4023_v49  ;;  %v4027_v53 = vadd.f32 %v4026_v50, %v12470_v10 }
 0x3b3   :  { %v4309_v17 = vpop.f32.mrf.mxu1  ;;  %v4028_v56 = vpop.f32.mrf.mxu0 }
 0x3b4   :  { %4593 = vst [vmem:[#allocation2 + $0x2f8] sm:$0xff] %v4306_v54  ;;  %v4310_v52 = vadd.f32 %v4309_v17, %v4027_v53  ;;  %v4029_v57 = vadd.f32 %v4028_v56, %v12473_v19 }
 0x3b5   :  { %v4311_v58 = vpop.f32.mrf.mxu1  ;;  %v4030_v55 = vpop.f32.mrf.mxu0 }
 0x3b6   :  { %4600 = vst [vmem:[#allocation2 + $0x330] sm:$0xff] %v4310_v52  ;;  %v4312_v61 = vadd.f32 %v4311_v58, %v4029_v57  ;;  %v4031_v62 = vadd.f32 %v4030_v55, %v12470_v10 }
 0x3b7   :  { %v4313_v15 = vpop.f32.mrf.mxu1  ;;  %v4032_v63 = vpop.f32.mrf.mxu0 }
 0x3b8   :  { %4601 = vst [vmem:[#allocation2 + $0x338] sm:$0xff] %v4312_v61  ;;  %v4314_v1 = vadd.f32 %v4313_v15, %v4031_v62  ;;  %v4033_v2 = vadd.f32 %v4032_v63, %v12473_v19 }
 0x3b9   :  { %v4315_v23 = vpop.f32.mrf.mxu1  ;;  %v4036_v3 = vpop.f32.mrf.mxu0 }
 0x3ba   :  { %4608 = vst [vmem:[#allocation2 + $0x370] sm:$0xff] %v4314_v1  ;;  %v4316_v4 = vadd.f32 %v4315_v23, %v4033_v2  ;;  %v4037_v6 = vadd.f32 %v4036_v3, %v12470_v10 }
 0x3bb   :  { %v4319_v9 = vpop.f32.mrf.mxu1  ;;  %v4038_v11 = vpop.f32.mrf.mxu0 }
 0x3bc   :  { %4609 = vst [vmem:[#allocation2 + $0x378] sm:$0xff] %v4316_v4  ;;  %v4320_v12 = vadd.f32 %v4319_v9, %v4037_v6  ;;  %v4039_v25 = vadd.f32 %v4038_v11, %v12473_v19 }
 0x3bd   :  { %v4321_v14 = vpop.f32.mrf.mxu1  ;;  %v4040_v21 = vpop.f32.mrf.mxu0 }
 0x3be   :  { %4616 = vst [vmem:[#allocation2 + $0x3b0] sm:$0xff] %v4320_v12  ;;  %v4322_v26 = vadd.f32 %v4321_v14, %v4039_v25  ;;  %v4041_v46 = vadd.f32 %v4040_v21, %v12470_v10 }
 0x3bf   :  { %v4323_v27 = vpop.f32.mrf.mxu1  ;;  %v4042_v0 = vpop.f32.mrf.mxu0 }
 0x3c0   :  { %4617 = vst [vmem:[#allocation2 + $0x3b8] sm:$0xff] %v4322_v26  ;;  %v4324_v28 = vadd.f32 %v4323_v27, %v4041_v46  ;;  %v4043_v59 = vadd.f32 %v4042_v0, %v12473_v19 }
 0x3c1   :  { %v4325_v29 = vpop.f32.mrf.mxu1  ;;  %v4046_v30 = vpop.f32.mrf.mxu0 }
 0x3c2   :  { %4624 = vst [vmem:[#allocation2 + $0x3f0] sm:$0xff] %v4324_v28  ;;  %v4326_v31 = vadd.f32 %v4325_v29, %v4043_v59  ;;  %v4047_v35 = vadd.f32 %v4046_v30, %v12470_v10 }
 0x3c3   :  { %v4329_v32 = vpop.f32.mrf.mxu1  ;;  %v4048_v33 = vpop.f32.mrf.mxu0 }
 0x3c4   :  { %4625 = vst [vmem:[#allocation2 + $0x3f8] sm:$0xff] %v4326_v31  ;;  %v4330_v36 = vadd.f32 %v4329_v32, %v4047_v35  ;;  %v4049_v5 = vadd.f32 %v4048_v33, %v12473_v19 }
 0x3c5   :  { %v4331_v34 = vpop.f32.mrf.mxu1  ;;  %v4050_v37 = vpop.f32.mrf.mxu0 }
 0x3c6   :  { %4632 = vst [vmem:[#allocation2 + $0x430] sm:$0xff] %v4330_v36  ;;  %v4332_v40 = vadd.f32 %v4331_v34, %v4049_v5  ;;  %v4051_v42 = vadd.f32 %v4050_v37, %v12470_v10 }
 0x3c7   :  { %v4333_v43 = vpop.f32.mrf.mxu1  ;;  %v4052_v51 = vpop.f32.mrf.mxu0 }
 0x3c8   :  { %4633 = vst [vmem:[#allocation2 + $0x438] sm:$0xff] %v4332_v40  ;;  %v4334_v13 = vadd.f32 %v4333_v43, %v4051_v42  ;;  %v4053_v38 = vadd.f32 %v4052_v51, %v12473_v19 }
 0x3c9   :  { %v4335_v39 = vpop.f32.mrf.mxu1  ;;  %v4056_v7 = vpop.f32.mrf.mxu0 }
 0x3ca   :  { %4640 = vst [vmem:[#allocation2 + $0x470] sm:$0xff] %v4334_v13  ;;  %v4336_v60 = vadd.f32 %v4335_v39, %v4053_v38  ;;  %v4057_v45 = vadd.f32 %v4056_v7, %v12470_v10 }
 0x3cb   :  { %v4339_v47 = vpop.f32.mrf.mxu1  ;;  %v4058_v8 = vpop.f32.mrf.mxu0 }
 0x3cc   :  { %4641 = vst [vmem:[#allocation2 + $0x478] sm:$0xff] %v4336_v60  ;;  %v4340_v18 = vadd.f32 %v4339_v47, %v4057_v45  ;;  %v4059_v20 = vadd.f32 %v4058_v8, %v12473_v19 }
 0x3cd   :  { %v4341_v22 = vpop.f32.mrf.mxu1  ;;  %v4060_v16 = vpop.f32.mrf.mxu0 }
 0x3ce   :  { %4648 = vst [vmem:[#allocation2 + $0x4b0] sm:$0xff] %v4340_v18  ;;  %v4342_v44 = vadd.f32 %v4341_v22, %v4059_v20  ;;  %v4061_v24 = vadd.f32 %v4060_v16, %v12470_v10 }
 0x3cf   :  { %v4343_v49 = vpop.f32.mrf.mxu1  ;;  %v4062_v48 = vpop.f32.mrf.mxu0 }
 0x3d0   :  { %4649 = vst [vmem:[#allocation2 + $0x4b8] sm:$0xff] %v4342_v44  ;;  %v4344_v50 = vadd.f32 %v4343_v49, %v4061_v24  ;;  %v4063_v54 = vadd.f32 %v4062_v48, %v12473_v19 }
 0x3d1   :  { %v4345_v53 = vpop.f32.mrf.mxu1  ;;  %v4066_v17 = vpop.f32.mrf.mxu0 }
 0x3d2   :  { %4656 = vst [vmem:[#allocation2 + $0x4f0] sm:$0xff] %v4344_v50  ;;  %v4346_v56 = vadd.f32 %v4345_v53, %v4063_v54  ;;  %v4067_v52 = vadd.f32 %v4066_v17, %v12470_v10 }
 0x3d3   :  { %v4349_v57 = vpop.f32.mrf.mxu1  ;;  %v4068_v58 = vpop.f32.mrf.mxu0 }
 0x3d4   :  { %4657 = vst [vmem:[#allocation2 + $0x4f8] sm:$0xff] %v4346_v56  ;;  %v4350_v55 = vadd.f32 %v4349_v57, %v4067_v52  ;;  %v4069_v61 = vadd.f32 %v4068_v58, %v12473_v19 }
 0x3d5   :  { %v4351_v62 = vpop.f32.mrf.mxu1  ;;  %v4070_v15 = vpop.f32.mrf.mxu0 }
 0x3d6   :  { %4664 = vst [vmem:[#allocation2 + $0x530] sm:$0xff] %v4350_v55  ;;  %v4352_v63 = vadd.f32 %v4351_v62, %v4069_v61  ;;  %v4071_v1 = vadd.f32 %v4070_v15, %v12470_v10 }
 0x3d7   :  { %v4353_v2 = vpop.f32.mrf.mxu1  ;;  %v4072_v23 = vpop.f32.mrf.mxu0 }
 0x3d8   :  { %4665 = vst [vmem:[#allocation2 + $0x538] sm:$0xff] %v4352_v63  ;;  %v4354_v3 = vadd.f32 %v4353_v2, %v4071_v1  ;;  %v4073_v4 = vadd.f32 %v4072_v23, %v12473_v19 }
 0x3d9   :  { %v4355_v6 = vpop.f32.mrf.mxu1  ;;  %v4076_v9 = vpop.f32.mrf.mxu0 }
 0x3da   :  { %4672 = vst [vmem:[#allocation2 + $0x570] sm:$0xff] %v4354_v3  ;;  %v4356_v11 = vadd.f32 %v4355_v6, %v4073_v4  ;;  %v4077_v12 = vadd.f32 %v4076_v9, %v12470_v10 }
 0x3db   :  { %v4359_v25 = vpop.f32.mrf.mxu1  ;;  %v4078_v14 = vpop.f32.mrf.mxu0 }
 0x3dc   :  { %4673 = vst [vmem:[#allocation2 + $0x578] sm:$0xff] %v4356_v11  ;;  %v4360_v21 = vadd.f32 %v4359_v25, %v4077_v12  ;;  %v4079_v26 = vadd.f32 %v4078_v14, %v12473_v19 }
 0x3dd   :  { %v4361_v46 = vpop.f32.mrf.mxu1  ;;  %v4080_v27 = vpop.f32.mrf.mxu0 }
 0x3de   :  { %4680 = vst [vmem:[#allocation2 + $0x5b0] sm:$0xff] %v4360_v21  ;;  %v4362_v0 = vadd.f32 %v4361_v46, %v4079_v26  ;;  %v4081_v28 = vadd.f32 %v4080_v27, %v12470_v10 }
 0x3df   :  { %v4363_v59 = vpop.f32.mrf.mxu1  ;;  %v4082_v29 = vpop.f32.mrf.mxu0 }
 0x3e0   :  { %4681 = vst [vmem:[#allocation2 + $0x5b8] sm:$0xff] %v4362_v0  ;;  %v4364_v30 = vadd.f32 %v4363_v59, %v4081_v28  ;;  %v4083_v31 = vadd.f32 %v4082_v29, %v12473_v19 }
 0x3e1   :  { %v4365_v35 = vpop.f32.mrf.mxu1  ;;  %v4086_v32 = vpop.f32.mrf.mxu0 }
 0x3e2   :  { %4688 = vst [vmem:[#allocation2 + $0x5f0] sm:$0xff] %v4364_v30  ;;  %v4366_v33 = vadd.f32 %v4365_v35, %v4083_v31  ;;  %v4087_v36 = vadd.f32 %v4086_v32, %v12470_v10 }
 0x3e3   :  { %v4369_v5 = vpop.f32.mrf.mxu1  ;;  %v4088_v34 = vpop.f32.mrf.mxu0 }
 0x3e4   :  { %4689 = vst [vmem:[#allocation2 + $0x5f8] sm:$0xff] %v4366_v33  ;;  %v4370_v37 = vadd.f32 %v4369_v5, %v4087_v36  ;;  %v4089_v40 = vadd.f32 %v4088_v34, %v12473_v19 }
 0x3e5   :  { %v4371_v42 = vpop.f32.mrf.mxu1  ;;  %v4090_v43 = vpop.f32.mrf.mxu0 }
 0x3e6   :  { %4696 = vst [vmem:[#allocation2 + $0x630] sm:$0xff] %v4370_v37  ;;  %v4372_v51 = vadd.f32 %v4371_v42, %v4089_v40  ;;  %v4091_v13 = vadd.f32 %v4090_v43, %v12470_v10 }
 0x3e7   :  { %v4373_v38 = vpop.f32.mrf.mxu1  ;;  %v4092_v39 = vpop.f32.mrf.mxu0 }
 0x3e8   :  { %4697 = vst [vmem:[#allocation2 + $0x638] sm:$0xff] %v4372_v51  ;;  %v4374_v7 = vadd.f32 %v4373_v38, %v4091_v13  ;;  %v4093_v60 = vadd.f32 %v4092_v39, %v12473_v19 }
 0x3e9   :  { %v4375_v45 = vpop.f32.mrf.mxu1  ;;  %v4096_v47 = vpop.f32.mrf.mxu0 }
 0x3ea   :  { %4704 = vst [vmem:[#allocation2 + $0x670] sm:$0xff] %v4374_v7  ;;  %v4376_v8 = vadd.f32 %v4375_v45, %v4093_v60  ;;  %v4097_v18 = vadd.f32 %v4096_v47, %v12470_v10 }
 0x3eb   :  { %v4379_v20 = vpop.f32.mrf.mxu1  ;;  %v4098_v22 = vpop.f32.mrf.mxu0 }
 0x3ec   :  { %4705 = vst [vmem:[#allocation2 + $0x678] sm:$0xff] %v4376_v8  ;;  %v4380_v16 = vadd.f32 %v4379_v20, %v4097_v18  ;;  %v4099_v44 = vadd.f32 %v4098_v22, %v12473_v19 }
 0x3ed   :  { %v4381_v24 = vpop.f32.mrf.mxu1  ;;  %v4100_v49 = vpop.f32.mrf.mxu0 }
 0x3ee   :  { %4712 = vst [vmem:[#allocation2 + $0x6b0] sm:$0xff] %v4380_v16  ;;  %v4382_v48 = vadd.f32 %v4381_v24, %v4099_v44  ;;  %v4101_v50 = vadd.f32 %v4100_v49, %v12470_v10 }
 0x3ef   :  { %v4383_v54 = vpop.f32.mrf.mxu1  ;;  %v4102_v53 = vpop.f32.mrf.mxu0 }
 0x3f0   :  { %4713 = vst [vmem:[#allocation2 + $0x6b8] sm:$0xff] %v4382_v48  ;;  %v4384_v17 = vadd.f32 %v4383_v54, %v4101_v50  ;;  %v4103_v56 = vadd.f32 %v4102_v53, %v12473_v19 }
 0x3f1   :  { %v4385_v52 = vpop.f32.mrf.mxu1  ;;  %v4106_v57 = vpop.f32.mrf.mxu0 }
 0x3f2   :  { %4720 = vst [vmem:[#allocation2 + $0x6f0] sm:$0xff] %v4384_v17  ;;  %v4386_v58 = vadd.f32 %v4385_v52, %v4103_v56  ;;  %v4107_v55 = vadd.f32 %v4106_v57, %v12470_v10 }
 0x3f3   :  { %v4389_v61 = vpop.f32.mrf.mxu1  ;;  %v4108_v62 = vpop.f32.mrf.mxu0 }
 0x3f4   :  { %4721 = vst [vmem:[#allocation2 + $0x6f8] sm:$0xff] %v4386_v58  ;;  %v4390_v15 = vadd.f32 %v4389_v61, %v4107_v55  ;;  %v4109_v63 = vadd.f32 %v4108_v62, %v12473_v19 }
 0x3f5   :  { %v4391_v1 = vpop.f32.mrf.mxu1  ;;  %v4110_v2 = vpop.f32.mrf.mxu0 }
 0x3f6   :  { %4728 = vst [vmem:[#allocation2 + $0x730] sm:$0xff] %v4390_v15  ;;  %v4392_v23 = vadd.f32 %v4391_v1, %v4109_v63  ;;  %v4111_v3 = vadd.f32 %v4110_v2, %v12470_v10 }
 0x3f7   :  { %v4393_v4 = vpop.f32.mrf.mxu1  ;;  %v4112_v6 = vpop.f32.mrf.mxu0 }
 0x3f8   :  { %4729 = vst [vmem:[#allocation2 + $0x738] sm:$0xff] %v4392_v23  ;;  %v4394_v9 = vadd.f32 %v4393_v4, %v4111_v3  ;;  %v4113_v11 = vadd.f32 %v4112_v6, %v12473_v19 }
 0x3f9   :  { %v4395_v12 = vpop.f32.mrf.mxu1  ;;  %v4116_v25 = vpop.f32.mrf.mxu0 }
 0x3fa   :  { %4736 = vst [vmem:[#allocation2 + $0x770] sm:$0xff] %v4394_v9  ;;  %v4396_v14 = vadd.f32 %v4395_v12, %v4113_v11  ;;  %v4117_v21 = vadd.f32 %v4116_v25, %v12470_v10 }
 0x3fb   :  { %v4399_v26 = vpop.f32.mrf.mxu1  ;;  %v4118_v46 = vpop.f32.mrf.mxu0 }
 0x3fc   :  { %4737 = vst [vmem:[#allocation2 + $0x778] sm:$0xff] %v4396_v14  ;;  %v4400_v27 = vadd.f32 %v4399_v26, %v4117_v21  ;;  %v4119_v0 = vadd.f32 %v4118_v46, %v12473_v19 }
 0x3fd   :  { %v4401_v28 = vpop.f32.mrf.mxu1  ;;  %v4120_v59 = vpop.f32.mrf.mxu0 }
 0x3fe   :  { %4744 = vst [vmem:[#allocation2 + $0x7b0] sm:$0xff] %v4400_v27  ;;  %v4402_v29 = vadd.f32 %v4401_v28, %v4119_v0  ;;  %v4121_v30 = vadd.f32 %v4120_v59, %v12470_v10 }
 0x3ff   :  { %v4403_v31 = vpop.f32.mrf.mxu1  ;;  %v4122_v35 = vpop.f32.mrf.mxu0 }
 0x400   :  { %4745 = vst [vmem:[#allocation2 + $0x7b8] sm:$0xff] %v4402_v29  ;;  %v4404_v32 = vadd.f32 %v4403_v31, %v4121_v30  ;;  %v4123_v33 = vadd.f32 %v4122_v35, %v12473_v19 }
 0x401   :  { %v4405_v36 = vpop.f32.mrf.mxu1  ;;  %v4126_v5 = vpop.f32.mrf.mxu0 }
 0x402   :  { %4752 = vst [vmem:[#allocation2 + $0x7f0] sm:$0xff] %v4404_v32  ;;  %v4406_v34 = vadd.f32 %v4405_v36, %v4123_v33  ;;  %v4127_v37 = vadd.f32 %v4126_v5, %v12470_v10 }
 0x403   :  { %v4409_v40 = vpop.f32.mrf.mxu1  ;;  %v4128_v42 = vpop.f32.mrf.mxu0 }
 0x404   :  { %4753 = vst [vmem:[#allocation2 + $0x7f8] sm:$0xff] %v4406_v34  ;;  %v4410_v43 = vadd.f32 %v4409_v40, %v4127_v37  ;;  %v4129_v51 = vadd.f32 %v4128_v42, %v12473_v19 }
 0x405   :  { %v4411_v13 = vpop.f32.mrf.mxu1  ;;  %v4130_v38 = vpop.f32.mrf.mxu0 }
 0x406   :  { %4760 = vst [vmem:[#allocation2 + $0x830] sm:$0xff] %v4410_v43  ;;  %v4412_v39 = vadd.f32 %v4411_v13, %v4129_v51  ;;  %v4131_v7 = vadd.f32 %v4130_v38, %v12470_v10 }
 0x407   :  { %v4413_v60 = vpop.f32.mrf.mxu1  ;;  %v4132_v45 = vpop.f32.mrf.mxu0 }
 0x408   :  { %4761 = vst [vmem:[#allocation2 + $0x838] sm:$0xff] %v4412_v39  ;;  %v4414_v47 = vadd.f32 %v4413_v60, %v4131_v7  ;;  %v4133_v8 = vadd.f32 %v4132_v45, %v12473_v19 }
 0x409   :  { %v4415_v18 = vpop.f32.mrf.mxu1  ;;  %v4136_v20 = vpop.f32.mrf.mxu0 }
 0x40a   :  { %4768 = vst [vmem:[#allocation2 + $0x870] sm:$0xff] %v4414_v47  ;;  %v4416_v22 = vadd.f32 %v4415_v18, %v4133_v8  ;;  %v4137_v16 = vadd.f32 %v4136_v20, %v12470_v10 }
 0x40b   :  { %v4419_v44 = vpop.f32.mrf.mxu1  ;;  %v4138_v24 = vpop.f32.mrf.mxu0 }
 0x40c   :  { %4769 = vst [vmem:[#allocation2 + $0x878] sm:$0xff] %v4416_v22  ;;  %v4420_v49 = vadd.f32 %v4419_v44, %v4137_v16  ;;  %v4139_v48 = vadd.f32 %v4138_v24, %v12473_v19 }
 0x40d   :  { %v4421_v50 = vpop.f32.mrf.mxu1  ;;  %v4140_v54 = vpop.f32.mrf.mxu0 }
 0x40e   :  { %4776 = vst [vmem:[#allocation2 + $0x8b0] sm:$0xff] %v4420_v49  ;;  %v4422_v53 = vadd.f32 %v4421_v50, %v4139_v48  ;;  %v4141_v17 = vadd.f32 %v4140_v54, %v12470_v10 }
 0x40f   :  { %v4423_v56 = vpop.f32.mrf.mxu1  ;;  %v4142_v52 = vpop.f32.mrf.mxu0 }
 0x410   :  { %4777 = vst [vmem:[#allocation2 + $0x8b8] sm:$0xff] %v4422_v53  ;;  %v4424_v57 = vadd.f32 %v4423_v56, %v4141_v17  ;;  %v4143_v58 = vadd.f32 %v4142_v52, %v12473_v19 }
 0x411   :  { %v4425_v55 = vpop.f32.mrf.mxu1  ;;  %v4146_v61 = vpop.f32.mrf.mxu0 }
 0x412   :  { %4784 = vst [vmem:[#allocation2 + $0x8f0] sm:$0xff] %v4424_v57  ;;  %v4426_v62 = vadd.f32 %v4425_v55, %v4143_v58  ;;  %v4147_v15 = vadd.f32 %v4146_v61, %v12470_v10 }
 0x413   :  { %v4429_v63 = vpop.f32.mrf.mxu1  ;;  %v4148_v1 = vpop.f32.mrf.mxu0 }
 0x414   :  { %4785 = vst [vmem:[#allocation2 + $0x8f8] sm:$0xff] %v4426_v62  ;;  %v4430_v2 = vadd.f32 %v4429_v63, %v4147_v15  ;;  %v4149_v23 = vadd.f32 %v4148_v1, %v12473_v19 }
 0x415   :  { %v4431_v3 = vpop.f32.mrf.mxu1  ;;  %v4150_v4 = vpop.f32.mrf.mxu0 }
 0x416   :  { %4792 = vst [vmem:[#allocation2 + $0x930] sm:$0xff] %v4430_v2  ;;  %v4432_v6 = vadd.f32 %v4431_v3, %v4149_v23  ;;  %v4151_v9 = vadd.f32 %v4150_v4, %v12470_v10 }
 0x417   :  { %v4433_v11 = vpop.f32.mrf.mxu1  ;;  %v4152_v12 = vpop.f32.mrf.mxu0 }
 0x418   :  { %4793 = vst [vmem:[#allocation2 + $0x938] sm:$0xff] %v4432_v6  ;;  %v4434_v25 = vadd.f32 %v4433_v11, %v4151_v9  ;;  %v4153_v14 = vadd.f32 %v4152_v12, %v12473_v19 }
 0x419   :  { %v4435_v21 = vpop.f32.mrf.mxu1  ;;  %v4156_v26 = vpop.f32.mrf.mxu0 }
 0x41a   :  { %4800 = vst [vmem:[#allocation2 + $0x970] sm:$0xff] %v4434_v25  ;;  %v4436_v46 = vadd.f32 %v4435_v21, %v4153_v14  ;;  %v4157_v27 = vadd.f32 %v4156_v26, %v12470_v10 }
 0x41b   :  { %v4439_v0 = vpop.f32.mrf.mxu1  ;;  %v4158_v28 = vpop.f32.mrf.mxu0 }
 0x41c   :  { %4801 = vst [vmem:[#allocation2 + $0x978] sm:$0xff] %v4436_v46  ;;  %v4440_v59 = vadd.f32 %v4439_v0, %v4157_v27  ;;  %v4159_v29 = vadd.f32 %v4158_v28, %v12473_v19 }
 0x41d   :  { %v4441_v30 = vpop.f32.mrf.mxu1  ;;  %v4160_v31 = vpop.f32.mrf.mxu0 }
 0x41e   :  { %4808 = vst [vmem:[#allocation2 + $0x9b0] sm:$0xff] %v4440_v59  ;;  %v4442_v35 = vadd.f32 %v4441_v30, %v4159_v29  ;;  %v4161_v32 = vadd.f32 %v4160_v31, %v12470_v10 }
 0x41f   :  { %v4443_v33 = vpop.f32.mrf.mxu1  ;;  %v4162_v36 = vpop.f32.mrf.mxu0 }
 0x420   :  { %4809 = vst [vmem:[#allocation2 + $0x9b8] sm:$0xff] %v4442_v35  ;;  %v4444_v5 = vadd.f32 %v4443_v33, %v4161_v32  ;;  %v4163_v34 = vadd.f32 %v4162_v36, %v12473_v19 }
 0x421   :  { %v4445_v37 = vpop.f32.mrf.mxu1  ;;  %v4166_v40 = vpop.f32.mrf.mxu0 }
 0x422   :  { %4816 = vst [vmem:[#allocation2 + $0x9f0] sm:$0xff] %v4444_v5  ;;  %v4446_v42 = vadd.f32 %v4445_v37, %v4163_v34  ;;  %v4167_v43 = vadd.f32 %v4166_v40, %v12470_v10 }
 0x423   :  { %v4449_v51 = vpop.f32.mrf.mxu1  ;;  %v4168_v13 = vpop.f32.mrf.mxu0 }
 0x424   :  { %4817 = vst [vmem:[#allocation2 + $0x9f8] sm:$0xff] %v4446_v42  ;;  %v4450_v38 = vadd.f32 %v4449_v51, %v4167_v43  ;;  %v4169_v39 = vadd.f32 %v4168_v13, %v12473_v19 }
 0x425   :  { %v4451_v7 = vpop.f32.mrf.mxu1  ;;  %v4170_v60 = vpop.f32.mrf.mxu0 }
 0x426   :  { %4824 = vst [vmem:[#allocation2 + $0xa30] sm:$0xff] %v4450_v38  ;;  %v4452_v45 = vadd.f32 %v4451_v7, %v4169_v39  ;;  %v4171_v47 = vadd.f32 %v4170_v60, %v12470_v10 }
 0x427   :  { %v4453_v8 = vpop.f32.mrf.mxu1  ;;  %v4172_v18 = vpop.f32.mrf.mxu0 }
 0x428   :  { %4825 = vst [vmem:[#allocation2 + $0xa38] sm:$0xff] %v4452_v45  ;;  %v4454_v20 = vadd.f32 %v4453_v8, %v4171_v47  ;;  %v4173_v22 = vadd.f32 %v4172_v18, %v12473_v19 }
 0x429   :  { %v4455_v16 = vpop.f32.mrf.mxu1  ;;  %v4176_v44 = vpop.f32.mrf.mxu0 }
 0x42a   :  { %4832 = vst [vmem:[#allocation2 + $0xa70] sm:$0xff] %v4454_v20  ;;  %v4456_v24 = vadd.f32 %v4455_v16, %v4173_v22  ;;  %v4177_v49 = vadd.f32 %v4176_v44, %v12470_v10 }
 0x42b   :  { %v4459_v48 = vpop.f32.mrf.mxu1  ;;  %v4178_v50 = vpop.f32.mrf.mxu0 }
 0x42c   :  { %4833 = vst [vmem:[#allocation2 + $0xa78] sm:$0xff] %v4456_v24  ;;  %v4460_v54 = vadd.f32 %v4459_v48, %v4177_v49  ;;  %v4179_v53 = vadd.f32 %v4178_v50, %v12473_v19  ;;  %v12581_v50 = vmov 0.0  }
 0x42d   :  { %v4461_v17 = vpop.f32.mrf.mxu1  ;;  %v4180_v56 = vpop.f32.mrf.mxu0 }
 0x42e   :  { %4840 = vst [vmem:[#allocation2 + $0xab0] sm:$0xff] %v4460_v54  ;;  %v4462_v52 = vadd.f32 %v4461_v17, %v4179_v53  ;;  %v4181_v57 = vadd.f32 %v4180_v56, %v12470_v10  ;;  %v12583_v54 = vmov 0.0   ;;  %v12585_v53 = vmov 0.0  }
 0x42f   :  { %v4463_v58 = vpop.f32.mrf.mxu1  ;;  %v4182_v55 = vpop.f32.mrf.mxu0  ;;  %v12587_v17 = vmov 0.0  }
 0x430   :  { %4841 = vst [vmem:[#allocation2 + $0xab8] sm:$0xff] %v4462_v52  ;;  %v4464_v61 = vadd.f32 %v4463_v58, %v4181_v57  ;;  %v4183_v62 = vadd.f32 %v4182_v55, %v12473_v19 }
 0x431   :  { %v4465_v15 = vpop.f32.mrf.mxu1  ;;  %v4186_v63 = vpop.f32.mrf.mxu0 }
 0x432   :  { %4848 = vst [vmem:[#allocation2 + $0xaf0] sm:$0xff] %v4464_v61  ;;  %v4466_v1 = vadd.f32 %v4465_v15, %v4183_v62  ;;  %v4187_v2 = vadd.f32 %v4186_v63, %v12470_v10 }
 0x433   :  { %v4469_v23 = vpop.f32.mrf.mxu1  ;;  %v4188_v3 = vpop.f32.mrf.mxu0 }
 0x434   :  { %4849 = vst [vmem:[#allocation2 + $0xaf8] sm:$0xff] %v4466_v1  ;;  %v4470_v4 = vadd.f32 %v4469_v23, %v4187_v2  ;;  %v4189_v6 = vadd.f32 %v4188_v3, %v12473_v19 }
 0x435   :  { %v4471_v9 = vpop.f32.mrf.mxu1  ;;  %v4190_v11 = vpop.f32.mrf.mxu0 }
 0x436   :  { %4856 = vst [vmem:[#allocation2 + $0xb30] sm:$0xff] %v4470_v4  ;;  %v4472_v12 = vadd.f32 %v4471_v9, %v4189_v6  ;;  %v4191_v25 = vadd.f32 %v4190_v11, %v12470_v10 }
 0x437   :  { %v4473_v14 = vpop.f32.mrf.mxu1  ;;  %v4192_v21 = vpop.f32.mrf.mxu0 }
 0x438   :  { %4857 = vst [vmem:[#allocation2 + $0xb38] sm:$0xff] %v4472_v12  ;;  %v4474_v26 = vadd.f32 %v4473_v14, %v4191_v25  ;;  %v4193_v46 = vadd.f32 %v4192_v21, %v12473_v19 }
 0x439   :  { %v4475_v27 = vpop.f32.mrf.mxu1  ;;  %v4196_v0 = vpop.f32.mrf.mxu0 }
 0x43a   :  { %4864 = vst [vmem:[#allocation2 + $0xb70] sm:$0xff] %v4474_v26  ;;  %v4476_v28 = vadd.f32 %v4475_v27, %v4193_v46  ;;  %v4197_v59 = vadd.f32 %v4196_v0, %v12470_v10 }
 0x43b   :  { %v4479_v29 = vpop.f32.mrf.mxu1  ;;  %v4198_v30 = vpop.f32.mrf.mxu0 }
 0x43c   :  { %4865 = vst [vmem:[#allocation2 + $0xb78] sm:$0xff] %v4476_v28  ;;  %v4480_v31 = vadd.f32 %v4479_v29, %v4197_v59  ;;  %v4199_v35 = vadd.f32 %v4198_v30, %v12473_v19 }
 0x43d   :  { %v4481_v32 = vpop.f32.mrf.mxu1  ;;  %v4200_v33 = vpop.f32.mrf.mxu0 }
 0x43e   :  { %4872 = vst [vmem:[#allocation2 + $0xbb0] sm:$0xff] %v4480_v31  ;;  %v4482_v36 = vadd.f32 %v4481_v32, %v4199_v35  ;;  %v4201_v5 = vadd.f32 %v4200_v33, %v12470_v10 }
 0x43f   :  { %v4483_v34 = vpop.f32.mrf.mxu1  ;;  %v4202_v37 = vpop.f32.mrf.mxu0 }
 0x440   :  { %4873 = vst [vmem:[#allocation2 + $0xbb8] sm:$0xff] %v4482_v36  ;;  %v4484_v40 = vadd.f32 %v4483_v34, %v4201_v5  ;;  %v4203_v42 = vadd.f32 %v4202_v37, %v12473_v19 }
 0x441   :  { %v4485_v43 = vpop.f32.mrf.mxu1  ;;  %v4206_v51 = vpop.f32.mrf.mxu0 }
 0x442   :  { %4880 = vst [vmem:[#allocation2 + $0xbf0] sm:$0xff] %v4484_v40  ;;  %v4486_v13 = vadd.f32 %v4485_v43, %v4203_v42  ;;  %v4207_v38 = vadd.f32 %v4206_v51, %v12470_v10 }
 0x443   :  { %v4489_v39 = vpop.f32.mrf.mxu1  ;;  %v4208_v7 = vpop.f32.mrf.mxu0 }
 0x444   :  { %4881 = vst [vmem:[#allocation2 + $0xbf8] sm:$0xff] %v4486_v13  ;;  %v4490_v60 = vadd.f32 %v4489_v39, %v4207_v38  ;;  %v4209_v45 = vadd.f32 %v4208_v7, %v12473_v19 }
 0x445   :  { %v4491_v47 = vpop.f32.mrf.mxu1  ;;  %v4210_v8 = vpop.f32.mrf.mxu0 }
 0x446   :  { %4888 = vst [vmem:[#allocation2 + $0xc30] sm:$0xff] %v4490_v60  ;;  %v4492_v18 = vadd.f32 %v4491_v47, %v4209_v45  ;;  %v4211_v20 = vadd.f32 %v4210_v8, %v12470_v10 }
 0x447   :  { %v4493_v22 = vpop.f32.mrf.mxu1  ;;  %v4212_v16 = vpop.f32.mrf.mxu0 }
 0x448   :  { %4889 = vst [vmem:[#allocation2 + $0xc38] sm:$0xff] %v4492_v18  ;;  %v4494_v44 = vadd.f32 %v4493_v22, %v4211_v20  ;;  %v4213_v24 = vadd.f32 %v4212_v16, %v12473_v19 }
 0x449   :  { %v4495_v49 = vpop.f32.mrf.mxu1 }
 0x44a   :  { %4896 = vst [vmem:[#allocation2 + $0xc70] sm:$0xff] %v4494_v44  ;;  %v4496_v48 = vadd.f32 %v4495_v49, %v4213_v24 }
 0x44c   :  { %4897 = vst [vmem:[#allocation2 + $0xc78] sm:$0xff] %v4496_v48 }
 0x44d LB: > { %13950 = vst [vmem:[#allocation11_spill] sm:$0xff] %v10720_v50  ;;  %13951 = vst [vmem:[#allocation12_spill] sm:$0xff] %v10724_v54  ;;  %v4980_v10 = vld [vmem:[#allocation7 + $0x1c0] sm:$0xff]  ;;  %v4981_v56 = vld [vmem:[#allocation7 + $0x1c8] sm:$0xff]  ;;  %v4923_v11 = vpack.c.bf16 %v10728_v53, %v10728_v53  ;;  %s9457_s15 = sshll.u32 %s10736_s0, 3  ;;  %s10011_s19 = sshll.u32 %s10736_s0, 4  ;;  %s10736_s0 = sphi %s12589_s0, %s4903_s0   ;;  %v10732_v17 = vphi %v12587_v17, %v9043_v17   ;;  %v10728_v53 = vphi %v12585_v53, %v9044_v53   ;;  %v10724_v54 = vphi %v12583_v54, %v9039_v54   ;;  %v10720_v50 = vphi %v12581_v50, %v9040_v50  }
 0x44e   : > { %v4984_v19 = vld [vmem:[#allocation7 + $0x1e0] sm:$0xff]  ;;  %v4985_v57 = vld [vmem:[#allocation7 + $0x1e8] sm:$0xff]  ;;  %s4909_s16 = sshra.s32 %s9457_s15, 3  ;;  %s13115_s22 = scalar_lea.vmem %s13799_s4, %s10011_s19 }
 0x44f   : > { %v12604_v52 = vcombine.high %v4980_v10, %v4984_v19  ;;  %v12606_v58 = vcombine.low %v4980_v10, %v4984_v19  ;;  %v4972_v55 = vld [vmem:[#allocation7 + $0x180] sm:$0xff]  ;;  %v12608_v62 = vcombine.high %v4981_v56, %v4985_v57  ;;  %v12610_v15 = vcombine.low %v4981_v56, %v4985_v57  ;;  %v4973_v1 = vld [vmem:[#allocation7 + $0x188] sm:$0xff]  ;;  %s10009_s17 = sshll.u32 %s4909_s16, 6  ;;  %s4903_s0 = sadd.s32 1, %s10736_s0  }
 0x450   : > { %v4976_v61 = vld [vmem:[#allocation7 + $0x1a0] sm:$0xff]  ;;  %v4977_v2 = vld [vmem:[#allocation7 + $0x1a8] sm:$0xff]  ;;  %v12627_v21 = vrot.slane %v4923_v11, 3  ;;  %s13069_s18 = scalar_lea.vmem [#allocation2], %s10009_s17  ;;  %p4900_p1 = scmp.ge.s32.totalorder %s4903_s0, 50  }
 0x451   : > { %v12612_v63 = vcombine.high %v4972_v55, %v4976_v61  ;;  %v4964_v23 = vld [vmem:[#allocation7 + $0x140] sm:$0xff]  ;;  %5698 = vmatprep.subr.bf16.mxu0 %v12604_v52  ;;  %v12615_v3 = vcombine.high %v4973_v1, %v4977_v2  ;;  %v4965_v6 = vld [vmem:[#allocation7 + $0x148] sm:$0xff]  ;;  %5739 = vmatprep.subr.bf16.mxu1 %v12608_v62  ;;  %v12619_v12 = vcombine.low %v4972_v55, %v4976_v61 }
 0x452   : > { %v4968_v4 = vld [vmem:[#allocation7 + $0x160] sm:$0xff]  ;;  %v4969_v9 = vld [vmem:[#allocation7 + $0x168] sm:$0xff]  ;;  %5699 = vmatpush1.bf16.msra.mxu0 %v12606_v58  ;;  %5740 = vmatpush1.bf16.msra.mxu1 %v12610_v15  ;;  %v12623_v25 = vcombine.low %v4973_v1, %v4977_v2 }
 0x453   : > { %5700 = vmatprep.subr.bf16.mxu0 %v12612_v63  ;;  %v12625_v14 = vcombine.high %v4964_v23, %v4968_v4  ;;  %5741 = vmatprep.subr.bf16.mxu1 %v12615_v3  ;;  %v12630_v26 = vcombine.high %v4965_v6, %v4969_v9  ;;  %v4956_v46 = vld [vmem:[#allocation7 + $0x100] sm:$0xff]  ;;  %v4957_v0 = vld [vmem:[#allocation7 + $0x108] sm:$0xff]  ;;  %v12635_v59 = vcombine.low %v4964_v23, %v4968_v4 }
 0x454   : > { %v4960_v27 = vld [vmem:[#allocation7 + $0x120] sm:$0xff]  ;;  %v4961_v28 = vld [vmem:[#allocation7 + $0x128] sm:$0xff]  ;;  %5730 = vmatprep.mubr.bf16.mxu0 %v12627_v21  ;;  %5771 = vmatprep.mubr.bf16.mxu1 %v12627_v21  ;;  %v12639_v29 = vcombine.low %v4965_v6, %v4969_v9 }
 0x455   : > { %v12641_v30 = vcombine.high %v4956_v46, %v4960_v27  ;;  %v12644_v31 = vcombine.high %v4957_v0, %v4961_v28  ;;  %v4948_v35 = vld [vmem:[#allocation7 + $0xc0] sm:$0xff]  ;;  %v4949_v33 = vld [vmem:[#allocation7 + $0xc8] sm:$0xff]  ;;  %v12647_v5 = vcombine.low %v4956_v46, %v4960_v27  ;;  %v12651_v34 = vcombine.low %v4957_v0, %v4961_v28 }
 0x456   : > { %5701 = vmatpush1.bf16.msra.mxu0 %v12619_v12  ;;  %5742 = vmatpush1.bf16.msra.mxu1 %v12623_v25  ;;  %v4952_v32 = vld [vmem:[#allocation7 + $0xe0] sm:$0xff]  ;;  %v4953_v36 = vld [vmem:[#allocation7 + $0xe8] sm:$0xff] }
 0x457   : > { %5702 = vmatprep.subr.bf16.mxu0 %v12625_v14  ;;  %5743 = vmatprep.subr.bf16.mxu1 %v12630_v26  ;;  %v12653_v37 = vcombine.high %v4948_v35, %v4952_v32  ;;  %v12656_v40 = vcombine.high %v4949_v33, %v4953_v36  ;;  %v4940_v42 = vld [vmem:[#allocation7 + $0x80] sm:$0xff]  ;;  %v4941_v51 = vld [vmem:[#allocation7 + $0x88] sm:$0xff]  ;;  %v12659_v38 = vcombine.low %v4948_v35, %v4952_v32 }
 0x458   : > { %v4944_v43 = vld [vmem:[#allocation7 + $0xa0] sm:$0xff]  ;;  %v4945_v13 = vld [vmem:[#allocation7 + $0xa8] sm:$0xff]  ;;  %v12663_v39 = vcombine.low %v4949_v33, %v4953_v36 }
 0x459   : > { %v12665_v7 = vcombine.high %v4940_v42, %v4944_v43  ;;  %v12668_v60 = vcombine.high %v4941_v51, %v4945_v13  ;;  %v4932_v45 = vld [vmem:[#allocation7 + $0x40] sm:$0xff]  ;;  %v4933_v8 = vld [vmem:[#allocation7 + $0x48] sm:$0xff]  ;;  %v12671_v20 = vcombine.low %v4940_v42, %v4944_v43  ;;  %v12675_v22 = vcombine.low %v4941_v51, %v4945_v13 }
 0x45a   : > { %5703 = vmatpush1.bf16.msra.mxu0 %v12635_v59  ;;  %5744 = vmatpush1.bf16.msra.mxu1 %v12639_v29  ;;  %v4936_v47 = vld [vmem:[#allocation7 + $0x60] sm:$0xff]  ;;  %v4937_v18 = vld [vmem:[#allocation7 + $0x68] sm:$0xff] }
 0x45b   : > { %5704 = vmatprep.subr.bf16.mxu0 %v12641_v30  ;;  %5745 = vmatprep.subr.bf16.mxu1 %v12644_v31  ;;  %v12677_v16 = vcombine.high %v4932_v45, %v4936_v47  ;;  %v12680_v44 = vcombine.high %v4933_v8, %v4937_v18  ;;  %v4924_v24 = vld [vmem:[#allocation7] sm:$0xff]  ;;  %v4925_v48 = vld [vmem:[#allocation7 + $0x8] sm:$0xff]  ;;  %v12683_v10 = vcombine.low %v4932_v45, %v4936_v47 }
 0x45c   : > { %v4928_v49 = vld [vmem:[#allocation7 + $0x20] sm:$0xff]  ;;  %v4929_v53 = vld [vmem:[#allocation7 + $0x28] sm:$0xff]  ;;  %v12687_v19 = vcombine.low %v4933_v8, %v4937_v18 }
 0x45d   : > { %v12689_v56 = vcombine.high %v4924_v24, %v4928_v49  ;;  %v12692_v57 = vcombine.high %v4925_v48, %v4929_v53  ;;  %v5044_v55 = vld [vmem:[#allocation7 + $0x3c0] sm:$0xff]  ;;  %v5045_v1 = vld [vmem:[#allocation7 + $0x3c8] sm:$0xff]  ;;  %v12695_v23 = vcombine.low %v4924_v24, %v4928_v49  ;;  %v12699_v4 = vcombine.low %v4925_v48, %v4929_v53 }
 0x45e   : > { %5705 = vmatpush1.bf16.msra.mxu0 %v12647_v5  ;;  %5746 = vmatpush1.bf16.msra.mxu1 %v12651_v34  ;;  %v5048_v61 = vld [vmem:[#allocation7 + $0x3e0] sm:$0xff]  ;;  %v5049_v2 = vld [vmem:[#allocation7 + $0x3e8] sm:$0xff] }
 0x45f   : > { %5706 = vmatprep.subr.bf16.mxu0 %v12653_v37  ;;  %5747 = vmatprep.subr.bf16.mxu1 %v12656_v40  ;;  %v12701_v6 = vcombine.high %v5044_v55, %v5048_v61  ;;  %v12704_v9 = vcombine.high %v5045_v1, %v5049_v2  ;;  %v5036_v11 = vld [vmem:[#allocation7 + $0x380] sm:$0xff]  ;;  %v5037_v27 = vld [vmem:[#allocation7 + $0x388] sm:$0xff]  ;;  %v12707_v28 = vcombine.low %v5044_v55, %v5048_v61 }
 0x460   : > { %v5040_v46 = vld [vmem:[#allocation7 + $0x3a0] sm:$0xff]  ;;  %v5041_v0 = vld [vmem:[#allocation7 + $0x3a8] sm:$0xff]  ;;  %v12711_v35 = vcombine.low %v5045_v1, %v5049_v2 }
 0x461   : > { %v12713_v32 = vcombine.high %v5036_v11, %v5040_v46  ;;  %v12716_v33 = vcombine.high %v5037_v27, %v5041_v0  ;;  %v5028_v36 = vld [vmem:[#allocation7 + $0x340] sm:$0xff]  ;;  %v5029_v43 = vld [vmem:[#allocation7 + $0x348] sm:$0xff]  ;;  %v12719_v13 = vcombine.low %v5036_v11, %v5040_v46  ;;  %v12723_v45 = vcombine.low %v5037_v27, %v5041_v0 }
 0x462   : > { %5707 = vmatpush1.bf16.msra.mxu0 %v12659_v38  ;;  %5748 = vmatpush1.bf16.msra.mxu1 %v12663_v39  ;;  %v5032_v42 = vld [vmem:[#allocation7 + $0x360] sm:$0xff]  ;;  %v5033_v51 = vld [vmem:[#allocation7 + $0x368] sm:$0xff] }
 0x463   : > { %5708 = vmatprep.subr.bf16.mxu0 %v12665_v7  ;;  %5749 = vmatprep.subr.bf16.mxu1 %v12668_v60  ;;  %v12725_v47 = vcombine.high %v5028_v36, %v5032_v42  ;;  %v12728_v8 = vcombine.high %v5029_v43, %v5033_v51  ;;  %v5020_v18 = vld [vmem:[#allocation7 + $0x300] sm:$0xff]  ;;  %v5021_v49 = vld [vmem:[#allocation7 + $0x308] sm:$0xff]  ;;  %v12731_v53 = vcombine.low %v5028_v36, %v5032_v42 }
 0x464   : > { %v5024_v24 = vld [vmem:[#allocation7 + $0x320] sm:$0xff]  ;;  %v5025_v48 = vld [vmem:[#allocation7 + $0x328] sm:$0xff]  ;;  %v12735_v55 = vcombine.low %v5029_v43, %v5033_v51 }
 0x465   : > { %13952 = vst [vmem:[#allocation13_spill] sm:$0xff] %v12731_v53  ;;  %v12737_v61 = vcombine.high %v5020_v18, %v5024_v24  ;;  %v12740_v1 = vcombine.high %v5021_v49, %v5025_v48  ;;  %v5012_v2 = vld [vmem:[#allocation7 + $0x2c0] sm:$0xff]  ;;  %v5013_v46 = vld [vmem:[#allocation7 + $0x2c8] sm:$0xff]  ;;  %v12743_v0 = vcombine.low %v5020_v18, %v5024_v24  ;;  %v12747_v36 = vcombine.low %v5021_v49, %v5025_v48 }
 0x466   : > { %5709 = vmatpush1.bf16.msra.mxu0 %v12671_v20  ;;  %5750 = vmatpush1.bf16.msra.mxu1 %v12675_v22  ;;  %13953 = vst [vmem:[#allocation14_spill] sm:$0xff] %v12735_v55  ;;  %v5016_v11 = vld [vmem:[#allocation7 + $0x2e0] sm:$0xff]  ;;  %v5017_v27 = vld [vmem:[#allocation7 + $0x2e8] sm:$0xff] }
 0x467   : > { %5710 = vmatprep.subr.bf16.mxu0 %v12677_v16  ;;  %5751 = vmatprep.subr.bf16.mxu1 %v12680_v44  ;;  %13954 = vst [vmem:[#allocation15_spill] sm:$0xff] %v12737_v61  ;;  %13955 = vst [vmem:[#allocation16_spill] sm:$0xff] %v12740_v1  ;;  %v12749_v42 = vcombine.high %v5012_v2, %v5016_v11  ;;  %v12752_v43 = vcombine.high %v5013_v46, %v5017_v27  ;;  %v5004_v51 = vld [vmem:[#allocation7 + $0x280] sm:$0xff]  ;;  %v5005_v50 = vld [vmem:[#allocation7 + $0x288] sm:$0xff] }
 0x468   : > { %13956 = vst [vmem:[#allocation17_spill] sm:$0xff] %v12743_v0  ;;  %13957 = vst [vmem:[#allocation18_spill] sm:$0xff] %v12747_v36  ;;  %v5008_v41 = vld [vmem:[#allocation7 + $0x2a0] sm:$0xff]  ;;  %v5009_v54 = vld [vmem:[#allocation7 + $0x2a8] sm:$0xff]  ;;  %v12755_v18 = vcombine.low %v5012_v2, %v5016_v11  ;;  %v12759_v24 = vcombine.low %v5013_v46, %v5017_v27 }
 0x469   : > { %13958 = vst [vmem:[#allocation19_spill] sm:$0xff] %v12749_v42  ;;  %13959 = vst [vmem:[#allocation20_spill] sm:$0xff] %v12752_v43  ;;  %v12761_v49 = vcombine.high %v5004_v51, %v5008_v41  ;;  %v12764_v48 = vcombine.high %v5005_v50, %v5009_v54  ;;  %v12767_v2 = vcombine.low %v5004_v51, %v5008_v41 }
 0x46a   : > { %5711 = vmatpush1.bf16.msra.mxu0 %v12683_v10  ;;  %5752 = vmatpush1.bf16.msra.mxu1 %v12687_v19  ;;  %13960 = vst [vmem:[#allocation21_spill] sm:$0xff] %v12755_v18  ;;  %13961 = vst [vmem:[#allocation22_spill] sm:$0xff] %v12759_v24  ;;  %v12771_v11 = vcombine.low %v5005_v50, %v5009_v54 }
 0x46b   : > { %5712 = vmatprep.subr.bf16.mxu0 %v12689_v56  ;;  %5753 = vmatprep.subr.bf16.mxu1 %v12692_v57  ;;  %13962 = vst [vmem:[#allocation23_spill] sm:$0xff] %v12761_v49  ;;  %13963 = vst [vmem:[#allocation24_spill] sm:$0xff] %v12764_v48 }
 0x46c   : > { %13964 = vst [vmem:[#allocation25_spill] sm:$0xff] %v12767_v2  ;;  %13965 = vst [vmem:[#allocation26_spill] sm:$0xff] %v12771_v11 }
 0x46e   : > { %5713 = vmatpush1.bf16.msra.mxu0 %v12695_v23  ;;  %5754 = vmatpush1.bf16.msra.mxu1 %v12699_v4 }
 0x46f   : > { %5714 = vmatprep.subr.bf16.mxu0 %v12701_v6  ;;  %5755 = vmatprep.subr.bf16.mxu1 %v12704_v9 }
 0x472   : > { %5715 = vmatpush2.bf16.msra.mxu0 %v12707_v28  ;;  %5756 = vmatpush2.bf16.msra.mxu1 %v12711_v35 }
 0x473   : > { %5716 = vmatprep.subr.bf16.mxu0 %v12713_v32  ;;  %5757 = vmatprep.subr.bf16.mxu1 %v12716_v33 }
 0x476   : > { %5717 = vmatpush2.bf16.msra.mxu0 %v12719_v13  ;;  %5758 = vmatpush2.bf16.msra.mxu1 %v12723_v45 }
 0x477   : > { %5718 = vmatprep.subr.bf16.mxu0 %v12725_v47  ;;  %5759 = vmatprep.subr.bf16.mxu1 %v12728_v8 }
 0x47a   : > { %5719 = vmatpush2.bf16.msra.mxu0 %v12731_v53  ;;  %5760 = vmatpush2.bf16.msra.mxu1 %v12735_v55  ;;  %v4997_v55 = vld [vmem:[#allocation7 + $0x248] sm:$0xff] }
 0x47b   : > { %5720 = vmatprep.subr.bf16.mxu0 %v12737_v61  ;;  %5761 = vmatprep.subr.bf16.mxu1 %v12740_v1  ;;  %v4996_v1 = vld [vmem:[#allocation7 + $0x240] sm:$0xff]  ;;  %v5001_v53 = vld [vmem:[#allocation7 + $0x268] sm:$0xff] }
 0x47c   : > { %v5000_v61 = vld [vmem:[#allocation7 + $0x260] sm:$0xff]  ;;  %v12776_v27 = vcombine.high %v4997_v55, %v5001_v53  ;;  %v12783_v50 = vcombine.low %v4997_v55, %v5001_v53 }
 0x47d   : > { %v12773_v46 = vcombine.high %v4996_v1, %v5000_v61  ;;  %v12779_v41 = vcombine.low %v4996_v1, %v5000_v61  ;;  %v4987_v61 = vld [vmem:[#allocation7 + $0x1f8] sm:$0xff] }
 0x47e   : > { %5721 = vmatpush2.bf16.msra.mxu0 %v12743_v0  ;;  %5762 = vmatpush2.bf16.msra.mxu1 %v12747_v36  ;;  %13967 = vst [vmem:[#allocation28_spill] sm:$0xff] %v12776_v27  ;;  %v4989_v36 = vld [vmem:[#allocation7 + $0x208] sm:$0xff] }
 0x47f   : > { %5722 = vmatprep.subr.bf16.mxu0 %v12749_v42  ;;  %5763 = vmatprep.subr.bf16.mxu1 %v12752_v43  ;;  %13966 = vst [vmem:[#allocation27_spill] sm:$0xff] %v12773_v46  ;;  %v4988_v43 = vld [vmem:[#allocation7 + $0x200] sm:$0xff]  ;;  %v4993_v0 = vld [vmem:[#allocation7 + $0x228] sm:$0xff]  ;;  %13968 = vst [vmem:[#allocation29_spill] sm:$0xff] %v12779_v41 }
 0x480   : > { %v4992_v42 = vld [vmem:[#allocation7 + $0x220] sm:$0xff]  ;;  %v12788_v51 = vcombine.high %v4989_v36, %v4993_v0  ;;  %v12797_v53 = vcombine.low %v4989_v36, %v4993_v0 }
 0x481   : > { %v12785_v54 = vcombine.high %v4988_v43, %v4992_v42  ;;  %v12793_v1 = vcombine.low %v4988_v43, %v4992_v42 }
 0x482   : > { %5723 = vmatpush2.bf16.msra.mxu0 %v12755_v18  ;;  %5764 = vmatpush2.bf16.msra.mxu1 %v12759_v24  ;;  %13970 = vst [vmem:[#allocation31_spill] sm:$0xff] %v12788_v51  ;;  %v4922_v24 = vpack.c.bf16 %v10732_v17, %v10732_v17  ;;  %13972 = vst [vmem:[#allocation33_spill] sm:$0xff] %v12797_v53  ;;  %v4978_v17 = vld [vmem:[#allocation7 + $0x1b0] sm:$0xff]  ;;  %v4975_v18 = vld [vmem:[#allocation7 + $0x198] sm:$0xff] }
 0x483   : > { %5724 = vmatprep.subr.bf16.mxu0 %v12761_v49  ;;  %5765 = vmatprep.subr.bf16.mxu1 %v12764_v48  ;;  %13969 = vst [vmem:[#allocation30_spill] sm:$0xff] %v12785_v54  ;;  %v4982_v48 = vld [vmem:[#allocation7 + $0x1d0] sm:$0xff]  ;;  %13971 = vst [vmem:[#allocation32_spill] sm:$0xff] %v12793_v1 }
 0x484   : > { %v4986_v49 = vld [vmem:[#allocation7 + $0x1f0] sm:$0xff] }
 0x485   : > { %v12799_v55 = vcombine.high %v4982_v48, %v4986_v49  ;;  %v12807_v42 = vcombine.low %v4982_v48, %v4986_v49 }
 0x486   : > { %5725 = vmatpush2.bf16.msra.mxu0 %v12767_v2  ;;  %5766 = vmatpush2.bf16.msra.mxu1 %v12771_v11  ;;  %v4983_v2 = vld [vmem:[#allocation7 + $0x1d8] sm:$0xff]  ;;  %v12804_v11 = vrot.slane %v4922_v24, 3  ;;  %v4966_v24 = vld [vmem:[#allocation7 + $0x150] sm:$0xff] }
 0x487   : > { %5726 = vmatprep.subr.bf16.mxu0 %v12773_v46  ;;  %5767 = vmatprep.subr.bf16.mxu1 %v12776_v27  ;;  %13973 = vst [vmem:[#allocation34_spill] sm:$0xff] %v12799_v55  ;;  %v12802_v27 = vcombine.high %v4983_v2, %v4987_v61  ;;  %v4974_v46 = vld [vmem:[#allocation7 + $0x190] sm:$0xff]  ;;  %13975 = vst [vmem:[#allocation36_spill] sm:$0xff] %v12807_v42  ;;  %v12811_v0 = vcombine.low %v4983_v2, %v4987_v61 }
 0x488   : > { %v12813_v36 = vcombine.high %v4974_v46, %v4978_v17  ;;  %v12821_v49 = vcombine.low %v4974_v46, %v4978_v17 }
 0x489   : > { %13974 = vst [vmem:[#allocation35_spill] sm:$0xff] %v12802_v27  ;;  %13976 = vst [vmem:[#allocation37_spill] sm:$0xff] %v12811_v0 }
 0x48a   : > { %5727 = vmatpush2.bf16.msra.mxu0 %v12779_v41  ;;  %5768 = vmatpush2.bf16.msra.mxu1 %v12783_v50  ;;  %v4979_v41 = vld [vmem:[#allocation7 + $0x1b8] sm:$0xff]  ;;  %13977 = vst [vmem:[#allocation38_spill] sm:$0xff] %v12813_v36  ;;  %13979 = vst [vmem:[#allocation40_spill] sm:$0xff] %v12821_v49 }
 0x48b   : > { %5728 = vmatprep.subr.bf16.mxu0 %v12785_v54  ;;  %5769 = vmatprep.subr.bf16.mxu1 %v12788_v51  ;;  %v12816_v43 = vcombine.high %v4975_v18, %v4979_v41  ;;  %v4970_v51 = vld [vmem:[#allocation7 + $0x170] sm:$0xff]  ;;  %v4967_v54 = vld [vmem:[#allocation7 + $0x158] sm:$0xff]  ;;  %v12825_v48 = vcombine.low %v4975_v18, %v4979_v41 }
 0x48c   : > { %v12827_v2 = vcombine.high %v4966_v24, %v4970_v51  ;;  %v12835_v46 = vcombine.low %v4966_v24, %v4970_v51 }
 0x48d   : > { %13978 = vst [vmem:[#allocation39_spill] sm:$0xff] %v12816_v43  ;;  %13980 = vst [vmem:[#allocation41_spill] sm:$0xff] %v12825_v48 }
 0x48e   : > { %5729 = vmatpush2.bf16.msra.mxu0 %v12793_v1  ;;  %5770 = vmatpush2.bf16.msra.mxu1 %v12797_v53  ;;  %v4971_v1 = vld [vmem:[#allocation7 + $0x178] sm:$0xff]  ;;  %13981 = vst [vmem:[#allocation42_spill] sm:$0xff] %v12827_v2  ;;  %13983 = vst [vmem:[#allocation44_spill] sm:$0xff] %v12835_v46 }
 0x48f   : > { %5780 = vmatprep.subr.bf16.mxu0 %v12799_v55  ;;  %5821 = vmatprep.subr.bf16.mxu1 %v12802_v27  ;;  %v12830_v61 = vcombine.high %v4967_v54, %v4971_v1  ;;  %v4958_v27 = vld [vmem:[#allocation7 + $0x110] sm:$0xff]  ;;  %v4959_v53 = vld [vmem:[#allocation7 + $0x118] sm:$0xff]  ;;  %v12839_v18 = vcombine.low %v4967_v54, %v4971_v1 }
 0x490   : > { %v4962_v55 = vld [vmem:[#allocation7 + $0x130] sm:$0xff] }
 0x491   : > { %5731 = vmatmul.mubr.bf16.vlgmr.msra.gmra.mxu0 %v12804_v11  ;;  %5772 = vmatmul.mubr.bf16.vlgmr.msra.gmra.mxu1 %v12804_v11  ;;  %13982 = vst [vmem:[#allocation43_spill] sm:$0xff] %v12830_v61  ;;  %13984 = vst [vmem:[#allocation45_spill] sm:$0xff] %v12839_v18  ;;  %v12841_v41 = vcombine.high %v4958_v27, %v4962_v55  ;;  %v12847_v51 = vcombine.low %v4958_v27, %v4962_v55 }
 0x492   : > { %5781 = vmatpush1.bf16.msra.mxu0 %v12807_v42  ;;  %5822 = vmatpush1.bf16.msra.mxu1 %v12811_v0  ;;  %v4963_v42 = vld [vmem:[#allocation7 + $0x138] sm:$0xff] }
 0x493   : > { %5782 = vmatprep.subr.bf16.mxu0 %v12813_v36  ;;  %5823 = vmatprep.subr.bf16.mxu1 %v12816_v43  ;;  %13985 = vst [vmem:[#allocation46_spill] sm:$0xff] %v12841_v41  ;;  %v12844_v17 = vcombine.high %v4959_v53, %v4963_v42  ;;  %v4950_v43 = vld [vmem:[#allocation7 + $0xd0] sm:$0xff]  ;;  %v4951_v0 = vld [vmem:[#allocation7 + $0xd8] sm:$0xff]  ;;  %13987 = vst [vmem:[#allocation48_spill] sm:$0xff] %v12847_v51  ;;  %v12851_v54 = vcombine.low %v4959_v53, %v4963_v42 }
 0x494   : > { %5812 = vmatprep.mubr.bf16.mxu0 %v12627_v21  ;;  %5853 = vmatprep.mubr.bf16.mxu1 %v12627_v21  ;;  %v4954_v36 = vld [vmem:[#allocation7 + $0xf0] sm:$0xff]  ;;  %v4955_v21 = vld [vmem:[#allocation7 + $0xf8] sm:$0xff] }
 0x495   : > { %13986 = vst [vmem:[#allocation47_spill] sm:$0xff] %v12844_v17  ;;  %13988 = vst [vmem:[#allocation49_spill] sm:$0xff] %v12851_v54  ;;  %v12853_v1 = vcombine.high %v4950_v43, %v4954_v36  ;;  %v12856_v24 = vcombine.high %v4951_v0, %v4955_v21  ;;  %v12859_v27 = vcombine.low %v4950_v43, %v4954_v36 }
 0x496   : > { %5783 = vmatpush1.bf16.msra.mxu0 %v12821_v49  ;;  %5824 = vmatpush1.bf16.msra.mxu1 %v12825_v48  ;;  %v4943_v48 = vld [vmem:[#allocation7 + $0x98] sm:$0xff]  ;;  %v12863_v53 = vcombine.low %v4951_v0, %v4955_v21 }
 0x497   : > { %5784 = vmatprep.subr.bf16.mxu0 %v12827_v2  ;;  %5825 = vmatprep.subr.bf16.mxu1 %v12830_v61  ;;  %13989 = vst [vmem:[#allocation50_spill] sm:$0xff] %v12853_v1  ;;  %13990 = vst [vmem:[#allocation51_spill] sm:$0xff] %v12856_v24  ;;  %v4942_v61 = vld [vmem:[#allocation7 + $0x90] sm:$0xff]  ;;  %v4947_v49 = vld [vmem:[#allocation7 + $0xb8] sm:$0xff] }
 0x498   : > { %v4946_v2 = vld [vmem:[#allocation7 + $0xb0] sm:$0xff]  ;;  %13991 = vst [vmem:[#allocation52_spill] sm:$0xff] %v12859_v27  ;;  %13992 = vst [vmem:[#allocation53_spill] sm:$0xff] %v12863_v53  ;;  %v12868_v42 = vcombine.high %v4943_v48, %v4947_v49  ;;  %v12875_v0 = vcombine.low %v4943_v48, %v4947_v49 }
 0x499   : > { %v12865_v55 = vcombine.high %v4942_v61, %v4946_v2  ;;  %v12871_v36 = vcombine.low %v4942_v61, %v4946_v2 }
 0x49a   : > { %5785 = vmatpush1.bf16.msra.mxu0 %v12835_v46  ;;  %5826 = vmatpush1.bf16.msra.mxu1 %v12839_v18  ;;  %13994 = vst [vmem:[#allocation55_spill] sm:$0xff] %v12868_v42  ;;  %v4935_v18 = vld [vmem:[#allocation7 + $0x58] sm:$0xff]  ;;  %13996 = vst [vmem:[#allocation57_spill] sm:$0xff] %v12875_v0 }
 0x49b   : > { %5786 = vmatprep.subr.bf16.mxu0 %v12841_v41  ;;  %5827 = vmatprep.subr.bf16.mxu1 %v12844_v17  ;;  %13993 = vst [vmem:[#allocation54_spill] sm:$0xff] %v12865_v55  ;;  %v4934_v17 = vld [vmem:[#allocation7 + $0x50] sm:$0xff]  ;;  %v4939_v46 = vld [vmem:[#allocation7 + $0x78] sm:$0xff]  ;;  %13995 = vst [vmem:[#allocation56_spill] sm:$0xff] %v12871_v36 }
 0x49c   : > { %v4938_v41 = vld [vmem:[#allocation7 + $0x70] sm:$0xff]  ;;  %v12880_v21 = vcombine.high %v4935_v18, %v4939_v46  ;;  %v12887_v49 = vcombine.low %v4935_v18, %v4939_v46 }
 0x49d   : > { %v12877_v43 = vcombine.high %v4934_v17, %v4938_v41  ;;  %v12883_v2 = vcombine.low %v4934_v17, %v4938_v41 }
 0x49e   : > { %5787 = vmatpush1.bf16.msra.mxu0 %v12847_v51  ;;  %5828 = vmatpush1.bf16.msra.mxu1 %v12851_v54  ;;  %13998 = vst [vmem:[#allocation59_spill] sm:$0xff] %v12880_v21  ;;  %v4927_v54 = vld [vmem:[#allocation7 + $0x18] sm:$0xff]  ;;  %14000 = vst [vmem:[#allocation61_spill] sm:$0xff] %v12887_v49 }
 0x49f   : > { %5788 = vmatprep.subr.bf16.mxu0 %v12853_v1  ;;  %5829 = vmatprep.subr.bf16.mxu1 %v12856_v24  ;;  %13997 = vst [vmem:[#allocation58_spill] sm:$0xff] %v12877_v43  ;;  %v4926_v24 = vld [vmem:[#allocation7 + $0x10] sm:$0xff]  ;;  %v4931_v51 = vld [vmem:[#allocation7 + $0x38] sm:$0xff]  ;;  %13999 = vst [vmem:[#allocation60_spill] sm:$0xff] %v12883_v2 }
 0x4a0   : > { %v4930_v1 = vld [vmem:[#allocation7 + $0x30] sm:$0xff]  ;;  %v12892_v61 = vcombine.high %v4927_v54, %v4931_v51  ;;  %v12899_v46 = vcombine.low %v4927_v54, %v4931_v51 }
 0x4a1   : > { %v12889_v48 = vcombine.high %v4926_v24, %v4930_v1  ;;  %v12895_v41 = vcombine.low %v4926_v24, %v4930_v1 }
 0x4a2   : > { %5789 = vmatpush1.bf16.msra.mxu0 %v12859_v27  ;;  %5830 = vmatpush1.bf16.msra.mxu1 %v12863_v53  ;;  %14002 = vst [vmem:[#allocation63_spill] sm:$0xff] %v12892_v61  ;;  %v5047_v53 = vld [vmem:[#allocation7 + $0x3d8] sm:$0xff]  ;;  %14004 = vst [vmem:[#allocation65_spill] sm:$0xff] %v12899_v46 }
 0x4a3   : > { %5790 = vmatprep.subr.bf16.mxu0 %v12865_v55  ;;  %5831 = vmatprep.subr.bf16.mxu1 %v12868_v42  ;;  %14001 = vst [vmem:[#allocation62_spill] sm:$0xff] %v12889_v48  ;;  %v5046_v42 = vld [vmem:[#allocation7 + $0x3d0] sm:$0xff]  ;;  %v5051_v27 = vld [vmem:[#allocation7 + $0x3f8] sm:$0xff]  ;;  %14003 = vst [vmem:[#allocation64_spill] sm:$0xff] %v12895_v41 }
 0x4a4   : > { %v5050_v55 = vld [vmem:[#allocation7 + $0x3f0] sm:$0xff]  ;;  %v12904_v17 = vcombine.high %v5047_v53, %v5051_v27  ;;  %v12911_v51 = vcombine.low %v5047_v53, %v5051_v27 }
 0x4a5   : > { %v12901_v18 = vcombine.high %v5046_v42, %v5050_v55  ;;  %v12907_v1 = vcombine.low %v5046_v42, %v5050_v55 }
 0x4a6   : > { %5791 = vmatpush1.bf16.msra.mxu0 %v12871_v36  ;;  %5832 = vmatpush1.bf16.msra.mxu1 %v12875_v0  ;;  %14006 = vst [vmem:[#allocation67_spill] sm:$0xff] %v12904_v17  ;;  %v5039_v0 = vld [vmem:[#allocation7 + $0x398] sm:$0xff]  ;;  %14008 = vst [vmem:[#allocation69_spill] sm:$0xff] %v12911_v51 }
 0x4a7   : > { %5792 = vmatprep.subr.bf16.mxu0 %v12877_v43  ;;  %5833 = vmatprep.subr.bf16.mxu1 %v12880_v21  ;;  %14005 = vst [vmem:[#allocation66_spill] sm:$0xff] %v12901_v18  ;;  %v5038_v21 = vld [vmem:[#allocation7 + $0x390] sm:$0xff]  ;;  %v5043_v36 = vld [vmem:[#allocation7 + $0x3b8] sm:$0xff]  ;;  %14007 = vst [vmem:[#allocation68_spill] sm:$0xff] %v12907_v1 }
 0x4a8   : > { %v5042_v43 = vld [vmem:[#allocation7 + $0x3b0] sm:$0xff]  ;;  %v12916_v24 = vcombine.high %v5039_v0, %v5043_v36  ;;  %v12923_v27 = vcombine.low %v5039_v0, %v5043_v36 }
 0x4a9   : > { %v12913_v54 = vcombine.high %v5038_v21, %v5042_v43  ;;  %v12919_v55 = vcombine.low %v5038_v21, %v5042_v43 }
 0x4aa   : > { %5793 = vmatpush1.bf16.msra.mxu0 %v12883_v2  ;;  %5834 = vmatpush1.bf16.msra.mxu1 %v12887_v49  ;;  %14010 = vst [vmem:[#allocation71_spill] sm:$0xff] %v12916_v24  ;;  %v5031_v49 = vld [vmem:[#allocation7 + $0x358] sm:$0xff]  ;;  %14012 = vst [vmem:[#allocation73_spill] sm:$0xff] %v12923_v27 }
 0x4ab   : > { %5794 = vmatprep.subr.bf16.mxu0 %v12889_v48  ;;  %5835 = vmatprep.subr.bf16.mxu1 %v12892_v61  ;;  %14009 = vst [vmem:[#allocation70_spill] sm:$0xff] %v12913_v54  ;;  %v5030_v61 = vld [vmem:[#allocation7 + $0x350] sm:$0xff]  ;;  %v5035_v2 = vld [vmem:[#allocation7 + $0x378] sm:$0xff]  ;;  %14011 = vst [vmem:[#allocation72_spill] sm:$0xff] %v12919_v55 }
 0x4ac   : > { %v5034_v48 = vld [vmem:[#allocation7 + $0x370] sm:$0xff]  ;;  %v12928_v42 = vcombine.high %v5031_v49, %v5035_v2  ;;  %v12935_v36 = vcombine.low %v5031_v49, %v5035_v2 }
 0x4ad   : > { %v12925_v53 = vcombine.high %v5030_v61, %v5034_v48  ;;  %v12931_v43 = vcombine.low %v5030_v61, %v5034_v48 }
 0x4ae   : > { %5795 = vmatpush1.bf16.msra.mxu0 %v12895_v41  ;;  %5836 = vmatpush1.bf16.msra.mxu1 %v12899_v46  ;;  %14014 = vst [vmem:[#allocation75_spill] sm:$0xff] %v12928_v42  ;;  %v5023_v46 = vld [vmem:[#allocation7 + $0x318] sm:$0xff]  ;;  %14016 = vst [vmem:[#allocation77_spill] sm:$0xff] %v12935_v36 }
 0x4af   : > { %5796 = vmatprep.subr.bf16.mxu0 %v12901_v18  ;;  %5837 = vmatprep.subr.bf16.mxu1 %v12904_v17  ;;  %14013 = vst [vmem:[#allocation74_spill] sm:$0xff] %v12925_v53  ;;  %v5022_v17 = vld [vmem:[#allocation7 + $0x310] sm:$0xff]  ;;  %v5027_v41 = vld [vmem:[#allocation7 + $0x338] sm:$0xff]  ;;  %14015 = vst [vmem:[#allocation76_spill] sm:$0xff] %v12931_v43 }
 0x4b0   : > { %v5026_v18 = vld [vmem:[#allocation7 + $0x330] sm:$0xff]  ;;  %v12940_v21 = vcombine.high %v5023_v46, %v5027_v41  ;;  %v12947_v2 = vcombine.low %v5023_v46, %v5027_v41 }
 0x4b1   : > { %v12937_v0 = vcombine.high %v5022_v17, %v5026_v18  ;;  %v12943_v48 = vcombine.low %v5022_v17, %v5026_v18 }
 0x4b2   : > { %5797 = vmatpush2.bf16.msra.mxu0 %v12907_v1  ;;  %5838 = vmatpush2.bf16.msra.mxu1 %v12911_v51  ;;  %14018 = vst [vmem:[#allocation79_spill] sm:$0xff] %v12940_v21  ;;  %v5015_v51 = vld [vmem:[#allocation7 + $0x2d8] sm:$0xff]  ;;  %14020 = vst [vmem:[#allocation81_spill] sm:$0xff] %v12947_v2 }
 0x4b3   : > { %5798 = vmatprep.subr.bf16.mxu0 %v12913_v54  ;;  %5839 = vmatprep.subr.bf16.mxu1 %v12916_v24  ;;  %14017 = vst [vmem:[#allocation78_spill] sm:$0xff] %v12937_v0  ;;  %v5014_v24 = vld [vmem:[#allocation7 + $0x2d0] sm:$0xff]  ;;  %v5019_v1 = vld [vmem:[#allocation7 + $0x2f8] sm:$0xff]  ;;  %14019 = vst [vmem:[#allocation80_spill] sm:$0xff] %v12943_v48 }
 0x4b4   : > { %v5018_v54 = vld [vmem:[#allocation7 + $0x2f0] sm:$0xff]  ;;  %v12952_v61 = vcombine.high %v5015_v51, %v5019_v1  ;;  %v12959_v41 = vcombine.low %v5015_v51, %v5019_v1 }
 0x4b5   : > { %v12949_v49 = vcombine.high %v5014_v24, %v5018_v54  ;;  %v12955_v18 = vcombine.low %v5014_v24, %v5018_v54 }
 0x4b6   : > { %5799 = vmatpush2.bf16.msra.mxu0 %v12919_v55  ;;  %5840 = vmatpush2.bf16.msra.mxu1 %v12923_v27  ;;  %14022 = vst [vmem:[#allocation83_spill] sm:$0xff] %v12952_v61  ;;  %v5007_v27 = vld [vmem:[#allocation7 + $0x298] sm:$0xff] }
 0x4b7   : > { %5800 = vmatprep.subr.bf16.mxu0 %v12925_v53  ;;  %5841 = vmatprep.subr.bf16.mxu1 %v12928_v42  ;;  %14021 = vst [vmem:[#allocation82_spill] sm:$0xff] %v12949_v49  ;;  %v5006_v42 = vld [vmem:[#allocation7 + $0x290] sm:$0xff]  ;;  %v5011_v55 = vld [vmem:[#allocation7 + $0x2b8] sm:$0xff] }
 0x4b8   : > { %v5010_v53 = vld [vmem:[#allocation7 + $0x2b0] sm:$0xff]  ;;  %v12964_v17 = vcombine.high %v5007_v27, %v5011_v55  ;;  %v12971_v1 = vcombine.low %v5007_v27, %v5011_v55 }
 0x4b9   : > { %v12961_v46 = vcombine.high %v5006_v42, %v5010_v53  ;;  %v12967_v54 = vcombine.low %v5006_v42, %v5010_v53 }
 0x4ba   : > { %5801 = vmatpush2.bf16.msra.mxu0 %v12931_v43  ;;  %5842 = vmatpush2.bf16.msra.mxu1 %v12935_v36  ;;  %14023 = vst [vmem:[#allocation84_spill] sm:$0xff] %v12964_v17  ;;  %v4999_v36 = vld [vmem:[#allocation7 + $0x258] sm:$0xff] }
 0x4bb   : > { %5802 = vmatprep.subr.bf16.mxu0 %v12937_v0  ;;  %5843 = vmatprep.subr.bf16.mxu1 %v12940_v21  ;;  %v4998_v21 = vld [vmem:[#allocation7 + $0x250] sm:$0xff]  ;;  %v5003_v43 = vld [vmem:[#allocation7 + $0x278] sm:$0xff] }
 0x4bc   : > { %v5002_v0 = vld [vmem:[#allocation7 + $0x270] sm:$0xff]  ;;  %v12976_v24 = vcombine.high %v4999_v36, %v5003_v43  ;;  %v12983_v55 = vcombine.low %v4999_v36, %v5003_v43 }
 0x4bd   : > { %v12973_v51 = vcombine.high %v4998_v21, %v5002_v0  ;;  %v12979_v53 = vcombine.low %v4998_v21, %v5002_v0 }
 0x4be   : > { %5803 = vmatpush2.bf16.msra.mxu0 %v12943_v48  ;;  %5844 = vmatpush2.bf16.msra.mxu1 %v12947_v2  ;;  %v4991_v2 = vld [vmem:[#allocation7 + $0x218] sm:$0xff] }
 0x4bf   : > { %5804 = vmatprep.subr.bf16.mxu0 %v12949_v49  ;;  %5845 = vmatprep.subr.bf16.mxu1 %v12952_v61  ;;  %v4990_v61 = vld [vmem:[#allocation7 + $0x210] sm:$0xff]  ;;  %v4995_v48 = vld [vmem:[#allocation7 + $0x238] sm:$0xff] }
 0x4c0   : > { %v4994_v49 = vld [vmem:[#allocation7 + $0x230] sm:$0xff]  ;;  %v12988_v42 = vcombine.high %v4991_v2, %v4995_v48  ;;  %v12995_v0 = vcombine.low %v4991_v2, %v4995_v48 }
 0x4c1   : > { %v12985_v27 = vcombine.high %v4990_v61, %v4994_v49 }
 0x4c2   : > { %5805 = vmatpush2.bf16.msra.mxu0 %v12955_v18  ;;  %5846 = vmatpush2.bf16.msra.mxu1 %v12959_v41 }
 0x4c3   : > { %5806 = vmatprep.subr.bf16.mxu0 %v12961_v46  ;;  %5847 = vmatprep.subr.bf16.mxu1 %v12964_v17  ;;  %v12991_v17 = vcombine.low %v4990_v61, %v4994_v49  ;;  %v13088_v61 = vld [vmem:[%s13069_s18 + $0x20] sm:$0xff] }
 0x4c6   : > { %5807 = vmatpush2.bf16.msra.mxu0 %v12967_v54  ;;  %5848 = vmatpush2.bf16.msra.mxu1 %v12971_v1 }
 0x4c7   : > { %5808 = vmatprep.subr.bf16.mxu0 %v12973_v51  ;;  %5849 = vmatprep.subr.bf16.mxu1 %v12976_v24 }
 0x4ca   : > { %5809 = vmatpush2.bf16.msra.mxu0 %v12979_v53  ;;  %5850 = vmatpush2.bf16.msra.mxu1 %v12983_v55 }
 0x4cb   : > { %5810 = vmatprep.subr.bf16.mxu0 %v12985_v27  ;;  %5851 = vmatprep.subr.bf16.mxu1 %v12988_v42 }
 0x4ce   : > { %5811 = vmatpush2.bf16.msra.mxu0 %v12991_v17  ;;  %5852 = vmatpush2.bf16.msra.mxu1 %v12995_v0 }
 0x4cf   : > { %6710 = vmatprep.subr.bf16.mxu0 %v12604_v52  ;;  %6751 = vmatprep.subr.bf16.mxu1 %v12608_v62  ;;  %v14024_v52 = vld [vmem:[#allocation13_spill] sm:$0xff]  ;;  %v14026_v62 = vld [vmem:[#allocation15_spill] sm:$0xff] }
 0x4d1   : > { %5813 = vmatmul.mubr.bf16.vlgmr.msra.gmra.mxu0 %v12804_v11  ;;  %5854 = vmatmul.mubr.bf16.vlgmr.msra.gmra.mxu1 %v12804_v11 }
 0x4d2   : > { %6711 = vmatpush1.bf16.msra.mxu0 %v12606_v58  ;;  %6752 = vmatpush1.bf16.msra.mxu1 %v12610_v15  ;;  %v14025_v58 = vld [vmem:[#allocation14_spill] sm:$0xff]  ;;  %v14027_v15 = vld [vmem:[#allocation16_spill] sm:$0xff] }
 0x4d3   : > { %6712 = vmatprep.subr.bf16.mxu0 %v12612_v63  ;;  %6753 = vmatprep.subr.bf16.mxu1 %v12615_v3  ;;  %v14028_v63 = vld [vmem:[#allocation17_spill] sm:$0xff]  ;;  %v14029_v3 = vld [vmem:[#allocation18_spill] sm:$0xff] }
 0x4d6   : > { %6713 = vmatpush1.bf16.msra.mxu0 %v12619_v12  ;;  %6754 = vmatpush1.bf16.msra.mxu1 %v12623_v25  ;;  %v14030_v12 = vld [vmem:[#allocation19_spill] sm:$0xff]  ;;  %v14031_v25 = vld [vmem:[#allocation20_spill] sm:$0xff] }
 0x4d7   : > { %6714 = vmatprep.subr.bf16.mxu0 %v12625_v14  ;;  %6755 = vmatprep.subr.bf16.mxu1 %v12630_v26  ;;  %v14032_v14 = vld [vmem:[#allocation21_spill] sm:$0xff]  ;;  %v14033_v26 = vld [vmem:[#allocation22_spill] sm:$0xff] }
 0x4da   : > { %6715 = vmatpush1.bf16.msra.mxu0 %v12635_v59  ;;  %6756 = vmatpush1.bf16.msra.mxu1 %v12639_v29  ;;  %v14034_v59 = vld [vmem:[#allocation23_spill] sm:$0xff]  ;;  %v14035_v29 = vld [vmem:[#allocation24_spill] sm:$0xff] }
 0x4db   : > { %6716 = vmatprep.subr.bf16.mxu0 %v12641_v30  ;;  %6757 = vmatprep.subr.bf16.mxu1 %v12644_v31  ;;  %v14036_v30 = vld [vmem:[#allocation25_spill] sm:$0xff]  ;;  %v14037_v31 = vld [vmem:[#allocation26_spill] sm:$0xff] }
 0x4de   : > { %6717 = vmatpush1.bf16.msra.mxu0 %v12647_v5  ;;  %6758 = vmatpush1.bf16.msra.mxu1 %v12651_v34  ;;  %v14038_v5 = vld [vmem:[#allocation27_spill] sm:$0xff]  ;;  %v14039_v34 = vld [vmem:[#allocation28_spill] sm:$0xff] }
 0x4df   : > { %6718 = vmatprep.subr.bf16.mxu0 %v12653_v37  ;;  %6759 = vmatprep.subr.bf16.mxu1 %v12656_v40  ;;  %v14040_v37 = vld [vmem:[#allocation29_spill] sm:$0xff]  ;;  %v14041_v40 = vld [vmem:[#allocation30_spill] sm:$0xff] }
 0x4e2   : > { %6719 = vmatpush1.bf16.msra.mxu0 %v12659_v38  ;;  %6760 = vmatpush1.bf16.msra.mxu1 %v12663_v39  ;;  %v14042_v38 = vld [vmem:[#allocation31_spill] sm:$0xff]  ;;  %v14043_v39 = vld [vmem:[#allocation32_spill] sm:$0xff] }
 0x4e3   : > { %6720 = vmatprep.subr.bf16.mxu0 %v12665_v7  ;;  %6761 = vmatprep.subr.bf16.mxu1 %v12668_v60  ;;  %v14044_v7 = vld [vmem:[#allocation33_spill] sm:$0xff]  ;;  %v14045_v60 = vld [vmem:[#allocation34_spill] sm:$0xff] }
 0x4e6   : > { %6721 = vmatpush1.bf16.msra.mxu0 %v12671_v20  ;;  %6762 = vmatpush1.bf16.msra.mxu1 %v12675_v22  ;;  %v14046_v20 = vld [vmem:[#allocation35_spill] sm:$0xff] }
 0x4e7   : > { %6722 = vmatprep.subr.bf16.mxu0 %v12677_v16  ;;  %6763 = vmatprep.subr.bf16.mxu1 %v12680_v44 }
 0x4ea   : > { %6723 = vmatpush1.bf16.msra.mxu0 %v12683_v10  ;;  %6764 = vmatpush1.bf16.msra.mxu1 %v12687_v19 }
 0x4eb   : > { %6724 = vmatprep.subr.bf16.mxu0 %v12689_v56  ;;  %6765 = vmatprep.subr.bf16.mxu1 %v12692_v57 }
 0x4ee   : > { %6725 = vmatpush1.bf16.msra.mxu0 %v12695_v23  ;;  %6766 = vmatpush1.bf16.msra.mxu1 %v12699_v4  ;;  %v13072_v4 = vld [vmem:[%s13069_s18] sm:$0xff] }
 0x4ef   : > { %6726 = vmatprep.subr.bf16.mxu0 %v12701_v6  ;;  %6767 = vmatprep.subr.bf16.mxu1 %v12704_v9  ;;  %v13075_v6 = vld [vmem:[%s13069_s18 + $0x10] sm:$0xff]  ;;  %v13078_v9 = vld [vmem:[%s13069_s18 + $0x18] sm:$0xff] }
 0x4f2   : > { %6727 = vmatpush2.bf16.msra.mxu0 %v12707_v28  ;;  %6768 = vmatpush2.bf16.msra.mxu1 %v12711_v35 }
 0x4f3   : > { %6728 = vmatprep.subr.bf16.mxu0 %v12713_v32  ;;  %6769 = vmatprep.subr.bf16.mxu1 %v12716_v33  ;;  %v13083_v32 = vld [vmem:[%s13069_s18 + $0x8] sm:$0xff] }
 0x4f6   : > { %6729 = vmatpush2.bf16.msra.mxu0 %v12719_v13  ;;  %6770 = vmatpush2.bf16.msra.mxu1 %v12723_v45 }
 0x4f7   : > { %6730 = vmatprep.subr.bf16.mxu0 %v12725_v47  ;;  %6771 = vmatprep.subr.bf16.mxu1 %v12728_v8 }
 0x4fa   : > { %6731 = vmatpush2.bf16.msra.mxu0 %v14024_v52  ;;  %6772 = vmatpush2.bf16.msra.mxu1 %v14025_v58  ;;  %v13091_v52 = vld [vmem:[%s13069_s18 + $0x30] sm:$0xff] }
 0x4fb   : > { %6732 = vmatprep.subr.bf16.mxu0 %v14026_v62  ;;  %6773 = vmatprep.subr.bf16.mxu1 %v14027_v15  ;;  %v13094_v15 = vld [vmem:[%s13069_s18 + $0x28] sm:$0xff] }
 0x4fe   : > { %6733 = vmatpush2.bf16.msra.mxu0 %v14028_v63  ;;  %6774 = vmatpush2.bf16.msra.mxu1 %v14029_v3 }
 0x4ff   : > { %6734 = vmatprep.subr.bf16.mxu0 %v14030_v12  ;;  %6775 = vmatprep.subr.bf16.mxu1 %v14031_v25  ;;  %v13098_v12 = vld [vmem:[%s13069_s18 + $0x38] sm:$0xff] }
 0x502   : > { %6735 = vmatpush2.bf16.msra.mxu0 %v14032_v14  ;;  %6776 = vmatpush2.bf16.msra.mxu1 %v14033_v26 }
 0x503   : > { %6736 = vmatprep.subr.bf16.mxu0 %v14034_v59  ;;  %6777 = vmatprep.subr.bf16.mxu1 %v14035_v29 }
 0x506   : > { %6737 = vmatpush2.bf16.msra.mxu0 %v14036_v30  ;;  %6778 = vmatpush2.bf16.msra.mxu1 %v14037_v31 }
 0x507   : > { %6738 = vmatprep.subr.bf16.mxu0 %v14038_v5  ;;  %6779 = vmatprep.subr.bf16.mxu1 %v14039_v34 }
 0x50a   : > { %6739 = vmatpush2.bf16.msra.mxu0 %v14040_v37  ;;  %6780 = vmatpush2.bf16.msra.mxu1 %v12783_v50 }
 0x50b   : > { %6740 = vmatprep.subr.bf16.mxu0 %v14041_v40  ;;  %6781 = vmatprep.subr.bf16.mxu1 %v14042_v38 }
 0x50e   : > { %6741 = vmatpush2.bf16.msra.mxu0 %v14043_v39  ;;  %6782 = vmatpush2.bf16.msra.mxu1 %v14044_v7  ;;  %v14047_v39 = vld [vmem:[#allocation12_spill] sm:$0xff] }
 0x50f   : > { %6792 = vmatprep.subr.bf16.mxu0 %v14045_v60  ;;  %6833 = vmatprep.subr.bf16.mxu1 %v14046_v20  ;;  %v5910_v7 = vrot.slane %v14047_v39, 6  ;;  %v14064_v39 = vld [vmem:[#allocation51_spill] sm:$0xff] }
 0x551   : > { %v5732_v22 = vpop.f32.mrf.mxu0  ;;  %v5773_v16 = vpop.f32.mrf.mxu1 }
 0x552   : > { %v5862_v28 = vadd.f32 %v5732_v22, %v13072_v4  ;;  %v5864_v35 = vadd.f32 %v5773_v16, %v13075_v6  ;;  %v14048_v22 = vld [vmem:[#allocation11_spill] sm:$0xff] }
 0x553   : > { %v5734_v44 = vpop.f32.mrf.mxu0  ;;  %v5775_v10 = vpop.f32.mrf.mxu1  ;;  %v5911_v16 = vrot.slane %v14048_v22, 6  ;;  %v14068_v22 = vld [vmem:[#allocation55_spill] sm:$0xff] }
 0x554   : > { %v5865_v33 = vadd.f32 %v5775_v10, %v13078_v9  ;;  %v9588_v13 = vmul.f32 -1.442695, %v5862_v28  ;;  %v5863_v45 = vadd.f32 %v5734_v44, %v13083_v32  ;;  %v9590_v47 = vmul.f32 -1.442695, %v5864_v35 }
 0x555   : > { %v5736_v19 = vpop.f32.mrf.mxu0  ;;  %v5777_v56 = vpop.f32.mrf.mxu1 }
 0x556   : > { %v9591_v8 = vmul.f32 -1.442695, %v5865_v33  ;;  %10498 = vpow2.f32 %v9588_v13  ;;  %v9589_v11 = vmul.f32 -1.442695, %v5863_v45 }
 0x557   : > { %v5737_v57 = vpop.f32.mrf.mxu0  ;;  %v5778_v23 = vpop.f32.mrf.mxu1  ;;  %10500 = vpow2.f32 %v9590_v47 }
 0x558   : > { %10502 = vpow2.f32 %v9591_v8 }
 0x559   : > { %10504 = vpow2.f32 %v9589_v11 }
 0x563   : > { %v10499_v50 = vpop.eup %10498 }
 0x564   : > { %v10501_v43 = vpop.eup %10500  ;;  %v5876_v21 = vadd.f32 1.0, %v10499_v50 }
 0x565   : > { %v10503_v36 = vpop.eup %10502  ;;  %v5888_v2 = vadd.f32 1.0, %v10501_v43 }
 0x566   : > { %v10505_v48 = vpop.eup %10504  ;;  %v5889_v49 = vadd.f32 1.0, %v10503_v36  ;;  %10506 = vrcp.f32 %v5876_v21 }
 0x567   : > { %v5877_v58 = vadd.f32 1.0, %v10505_v48  ;;  %10508 = vrcp.f32 %v5888_v2 }
 0x568   : > { %10510 = vrcp.f32 %v5889_v49 }
 0x573   : > { %v10507_v38 = vpop.eup %10506 }
 0x574   : > { %v10509_v60 = vpop.eup %10508 }
 0x575   : > { %v10511_v20 = vpop.eup %10510  ;;  %v5914_v19 = vmul.f32 %v10509_v60, %v5910_v7  ;;  %v14065_v7 = vld [vmem:[#allocation52_spill] sm:$0xff]  ;;  %v14066_v60 = vld [vmem:[#allocation53_spill] sm:$0xff] }
 0x576   : > { %v5915_v35 = vmul.f32 %v10511_v20, %v5911_v16  ;;  %v14067_v20 = vld [vmem:[#allocation54_spill] sm:$0xff]  ;;  %v14069_v16 = vld [vmem:[#allocation56_spill] sm:$0xff] }
 0x591   : > { %v5814_v62 = vpop.f32.mrf.mxu0  ;;  %v5855_v3 = vpop.f32.mrf.mxu1 }
 0x592   : > { %v5866_v63 = vadd.f32 %v5814_v62, %v13088_v61  ;;  %v5868_v25 = vadd.f32 %v5855_v3, %v13091_v52  ;;  %v14049_v62 = vld [vmem:[#allocation36_spill] sm:$0xff]  ;;  %v14051_v3 = vld [vmem:[#allocation38_spill] sm:$0xff] }
 0x593   : > { %v5816_v14 = vpop.f32.mrf.mxu0  ;;  %v5857_v59 = vpop.f32.mrf.mxu1 }
 0x594   : > { %10512 = vtanh.f32 %v5866_v63  ;;  %v5867_v26 = vadd.f32 %v5816_v14, %v13094_v15  ;;  %v9592_v29 = vmul.f32 -1.442695, %v5868_v25  ;;  %v5869_v30 = vadd.f32 %v5857_v59, %v13098_v12  ;;  %v14050_v63 = vld [vmem:[#allocation37_spill] sm:$0xff]  ;;  %v14052_v25 = vld [vmem:[#allocation39_spill] sm:$0xff]  ;;  %v14053_v14 = vld [vmem:[#allocation40_spill] sm:$0xff] }
 0x595   : > { %10514 = vrcp.f32 %v5877_v58  ;;  %v5818_v31 = vpop.f32.mrf.mxu0  ;;  %v5859_v5 = vpop.f32.mrf.mxu1  ;;  %v14055_v59 = vld [vmem:[#allocation42_spill] sm:$0xff] }
 0x596   : > { %10516 = vtanh.f32 %v5867_v26  ;;  %v9593_v34 = vmul.f32 -1.442695, %v5869_v30  ;;  %v14054_v26 = vld [vmem:[#allocation41_spill] sm:$0xff]  ;;  %v14057_v30 = vld [vmem:[#allocation44_spill] sm:$0xff]  ;;  %v14059_v5 = vld [vmem:[#allocation46_spill] sm:$0xff] }
 0x597   : > { %10518 = vpow2.f32 %v9592_v29  ;;  %v5819_v37 = vpop.f32.mrf.mxu0  ;;  %v5860_v40 = vpop.f32.mrf.mxu1  ;;  %v14056_v29 = vld [vmem:[#allocation43_spill] sm:$0xff]  ;;  %v14058_v31 = vld [vmem:[#allocation45_spill] sm:$0xff] }
 0x598   : > { %10520 = vpow2.f32 %v9593_v34  ;;  %v14060_v34 = vld [vmem:[#allocation47_spill] sm:$0xff]  ;;  %v14061_v37 = vld [vmem:[#allocation48_spill] sm:$0xff]  ;;  %v14062_v40 = vld [vmem:[#allocation49_spill] sm:$0xff] }
 0x5a1   : > { %v10513_v44 = vpop.eup %10512 }
 0x5a2   : > { %v10515_v10 = vpop.eup %10514  ;;  %v5916_v56 = vmul.f32 %v10513_v44, %v10507_v38  ;;  %v14063_v38 = vld [vmem:[#allocation50_spill] sm:$0xff]  ;;  %v14070_v44 = vld [vmem:[#allocation57_spill] sm:$0xff] }
 0x5a3   : > { %v10517_v57 = vpop.eup %10516 }
 0x5a4   : > { %v10519_v23 = vpop.eup %10518  ;;  %v13105_v28 = vadd.f32 %v5916_v56, %v5914_v19  ;;  %v5917_v33 = vmul.f32 %v10517_v57, %v10515_v10  ;;  %v14071_v10 = vld [vmem:[#allocation58_spill] sm:$0xff]  ;;  %v14072_v19 = vld [vmem:[#allocation59_spill] sm:$0xff]  ;;  %v14073_v56 = vld [vmem:[#allocation60_spill] sm:$0xff] }
 0x5a5   : > { %v5902_v13 = vadd.f32 1.0, %v10519_v23  ;;  %v10521_v45 = vpop.eup %10520  ;;  %v14074_v57 = vld [vmem:[#allocation61_spill] sm:$0xff]  ;;  %v14075_v23 = vld [vmem:[#allocation62_spill] sm:$0xff] }
 0x5a6   : > { %10522 = vtanh.f32 %v13105_v28  ;;  %v13108_v47 = vadd.f32 %v5917_v33, %v5915_v35  ;;  %v5903_v8 = vadd.f32 1.0, %v10521_v45  ;;  %v14076_v35 = vld [vmem:[#allocation63_spill] sm:$0xff]  ;;  %v14077_v33 = vld [vmem:[#allocation64_spill] sm:$0xff]  ;;  %v14079_v45 = vld [vmem:[#allocation66_spill] sm:$0xff] }
 0x5a7   : > { %10524 = vrcp.f32 %v5902_v13  ;;  %v14078_v13 = vld [vmem:[#allocation65_spill] sm:$0xff] }
 0x5a8   : > { %10526 = vtanh.f32 %v13108_v47 }
 0x5a9   : > { %10528 = vrcp.f32 %v5903_v8  ;;  %v14080_v8 = vld [vmem:[#allocation67_spill] sm:$0xff] }
 0x5b3   : > { %v10523_v11 = vpop.eup %10522 }
 0x5b4   : > { %v10525_v50 = vpop.eup %10524 }
 0x5b5   : > { %v10527_v43 = vpop.eup %10526  ;;  %v5922_v21 = vmul.f32 %v10525_v50, %v10523_v11  ;;  %v14081_v11 = vld [vmem:[#allocation68_spill] sm:$0xff]  ;;  %v14082_v50 = vld [vmem:[#allocation69_spill] sm:$0xff] }
 0x5b6   : > { %v10529_v36 = vpop.eup %10528 }
 0x5b7   : > { %v5923_v48 = vmul.f32 %v10529_v36, %v10527_v43  ;;  %v13117_v58 = vpack.c.bf16 %v5922_v21, %v5922_v21  ;;  %v14083_v43 = vld [vmem:[#allocation70_spill] sm:$0xff]  ;;  %v14084_v36 = vld [vmem:[#allocation71_spill] sm:$0xff] }
 0x5b9   : > { %v5941_v2 = vpack.c.bf16 %v5923_v48, %v5923_v48  ;;  %v5927_v49 = vcombine.low %v5922_v21, %v5923_v48  ;;  %v14085_v21 = vld [vmem:[#allocation72_spill] sm:$0xff]  ;;  %v14086_v48 = vld [vmem:[#allocation73_spill] sm:$0xff] }
 0x5bb   : > { %6742 = vmatprep.mubr.bf16.mxu0 %v5941_v2  ;;  %6783 = vmatprep.mubr.bf16.mxu1 %v5941_v2  ;;  %9597 = vst.sshfl [vmem:[%s13115_s22] sm:$0x33 pattern:$0x76325410] %v5927_v49  ;;  %v14088_v49 = vld [vmem:[#allocation75_spill] sm:$0xff] }
 0x5bc   : > { %6743 = vmatmul.mubr.bf16.vlgmr.msra.gmra.mxu0 %v13117_v58  ;;  %6784 = vmatmul.mubr.bf16.vlgmr.msra.gmra.mxu1 %v13117_v58 }
 0x5bd   : > { %6793 = vmatpush1.bf16.msra.mxu0 %v14049_v62  ;;  %6834 = vmatpush1.bf16.msra.mxu1 %v14050_v63  ;;  %v14089_v62 = vld [vmem:[#allocation76_spill] sm:$0xff]  ;;  %v14090_v63 = vld [vmem:[#allocation77_spill] sm:$0xff] }
 0x5be   : > { %6824 = vmatprep.mubr.bf16.mxu0 %v5941_v2  ;;  %6865 = vmatprep.mubr.bf16.mxu1 %v5941_v2  ;;  %v14087_v2 = vld [vmem:[#allocation74_spill] sm:$0xff] }
 0x5bf   : > { %6794 = vmatprep.subr.bf16.mxu0 %v14051_v3  ;;  %6835 = vmatprep.subr.bf16.mxu1 %v14052_v25  ;;  %v14091_v3 = vld [vmem:[#allocation78_spill] sm:$0xff]  ;;  %v14092_v25 = vld [vmem:[#allocation79_spill] sm:$0xff] }
 0x5c1   : > { %6795 = vmatpush1.bf16.msra.mxu0 %v14053_v14  ;;  %6836 = vmatpush1.bf16.msra.mxu1 %v14054_v26  ;;  %v14093_v14 = vld [vmem:[#allocation80_spill] sm:$0xff]  ;;  %v14094_v26 = vld [vmem:[#allocation81_spill] sm:$0xff] }
 0x5c2   : > { %6796 = vmatprep.subr.bf16.mxu0 %v14055_v59  ;;  %6837 = vmatprep.subr.bf16.mxu1 %v14056_v29  ;;  %v14095_v59 = vld [vmem:[#allocation82_spill] sm:$0xff]  ;;  %v14096_v29 = vld [vmem:[#allocation83_spill] sm:$0xff] }
 0x5c5   : > { %6797 = vmatpush1.bf16.msra.mxu0 %v14057_v30  ;;  %6838 = vmatpush1.bf16.msra.mxu1 %v14058_v31  ;;  %v14097_v30 = vld [vmem:[#allocation84_spill] sm:$0xff]  ;;  %v7019_v31 = vld [vmem:[#allocation7 + $0x140] sm:$0xff] }
 0x5c6   : > { %6798 = vmatprep.subr.bf16.mxu0 %v14059_v5  ;;  %6839 = vmatprep.subr.bf16.mxu1 %v14060_v34  ;;  %v7023_v5 = vld [vmem:[#allocation7 + $0x160] sm:$0xff]  ;;  %v7020_v34 = vld [vmem:[#allocation7 + $0x148] sm:$0xff] }
 0x5c9   : > { %6799 = vmatpush1.bf16.msra.mxu0 %v14061_v37  ;;  %6840 = vmatpush1.bf16.msra.mxu1 %v14062_v40  ;;  %v7024_v37 = vld [vmem:[#allocation7 + $0x168] sm:$0xff] }
 0x5ca   : > { %6800 = vmatprep.subr.bf16.mxu0 %v14063_v38  ;;  %6841 = vmatprep.subr.bf16.mxu1 %v14064_v39  ;;  %v13207_v39 = vcombine.high %v7019_v31, %v7023_v5 }
 0x5cd   : > { %6801 = vmatpush1.bf16.msra.mxu0 %v14065_v7  ;;  %6842 = vmatpush1.bf16.msra.mxu1 %v14066_v60  ;;  %v13210_v7 = vcombine.high %v7020_v34, %v7024_v37  ;;  %v7011_v60 = vld [vmem:[#allocation7 + $0x100] sm:$0xff] }
 0x5ce   : > { %6802 = vmatprep.subr.bf16.mxu0 %v14067_v20  ;;  %6843 = vmatprep.subr.bf16.mxu1 %v14068_v22  ;;  %v7015_v20 = vld [vmem:[#allocation7 + $0x120] sm:$0xff]  ;;  %v7012_v22 = vld [vmem:[#allocation7 + $0x108] sm:$0xff] }
 0x5d1   : > { %6803 = vmatpush1.bf16.msra.mxu0 %v14069_v16  ;;  %6844 = vmatpush1.bf16.msra.mxu1 %v14070_v44  ;;  %v7016_v16 = vld [vmem:[#allocation7 + $0x128] sm:$0xff]  ;;  %v13213_v44 = vcombine.low %v7019_v31, %v7023_v5 }
 0x5d2   : > { %6804 = vmatprep.subr.bf16.mxu0 %v14071_v10  ;;  %6845 = vmatprep.subr.bf16.mxu1 %v14072_v19  ;;  %v13217_v10 = vcombine.low %v7020_v34, %v7024_v37  ;;  %v13219_v19 = vcombine.high %v7011_v60, %v7015_v20  ;;  %v7099_v34 = vld [vmem:[#allocation7 + $0x3c0] sm:$0xff] }
 0x5d3   : > { %v7103_v37 = vld [vmem:[#allocation7 + $0x3e0] sm:$0xff] }
 0x5d5   : > { %6805 = vmatpush1.bf16.msra.mxu0 %v14073_v56  ;;  %6846 = vmatpush1.bf16.msra.mxu1 %v14074_v57  ;;  %v13222_v56 = vcombine.high %v7012_v22, %v7016_v16  ;;  %v7003_v57 = vld [vmem:[#allocation7 + $0xc0] sm:$0xff] }
 0x5d6   : > { %6806 = vmatprep.subr.bf16.mxu0 %v14075_v23  ;;  %6847 = vmatprep.subr.bf16.mxu1 %v14076_v35  ;;  %v7007_v23 = vld [vmem:[#allocation7 + $0xe0] sm:$0xff]  ;;  %v7004_v35 = vld [vmem:[#allocation7 + $0xc8] sm:$0xff] }
 0x5d9   : > { %6807 = vmatpush1.bf16.msra.mxu0 %v14077_v33  ;;  %6848 = vmatpush1.bf16.msra.mxu1 %v14078_v13  ;;  %v7008_v33 = vld [vmem:[#allocation7 + $0xe8] sm:$0xff]  ;;  %v13225_v13 = vcombine.low %v7011_v60, %v7015_v20  ;;  %v13282_v20 = vcombine.high %v7099_v34, %v7103_v37 }
 0x5da   : > { %6808 = vmatprep.subr.bf16.mxu0 %v14079_v45  ;;  %6849 = vmatprep.subr.bf16.mxu1 %v14080_v8  ;;  %v13229_v45 = vcombine.low %v7012_v22, %v7016_v16  ;;  %v13231_v8 = vcombine.high %v7003_v57, %v7007_v23  ;;  %v7100_v60 = vld [vmem:[#allocation7 + $0x3c8] sm:$0xff]  ;;  %v13284_v16 = vcombine.low %v7099_v34, %v7103_v37 }
 0x5db   : > { %v7104_v22 = vld [vmem:[#allocation7 + $0x3e8] sm:$0xff] }
 0x5dc   : > { %14098 = vst [vmem:[#allocation13_spill] sm:$0xff] %v13284_v16 }
 0x5dd   : > { %6809 = vmatpush2.bf16.msra.mxu0 %v14081_v11  ;;  %6850 = vmatpush2.bf16.msra.mxu1 %v14082_v50  ;;  %v13234_v11 = vcombine.high %v7004_v35, %v7008_v33  ;;  %v13237_v50 = vcombine.low %v7003_v57, %v7007_v23  ;;  %v13286_v57 = vcombine.low %v7100_v60, %v7104_v22 }
 0x5de   : > { %6810 = vmatprep.subr.bf16.mxu0 %v14083_v43  ;;  %6851 = vmatprep.subr.bf16.mxu1 %v14084_v36  ;;  %v13241_v43 = vcombine.low %v7004_v35, %v7008_v33  ;;  %v6995_v36 = vld [vmem:[#allocation7 + $0x80] sm:$0xff]  ;;  %v13288_v23 = vcombine.high %v7100_v60, %v7104_v22 }
 0x5df   : > { %14099 = vst [vmem:[#allocation14_spill] sm:$0xff] %v13286_v57  ;;  %v7091_v35 = vld [vmem:[#allocation7 + $0x380] sm:$0xff] }
 0x5e0   : > { %14100 = vst [vmem:[#allocation15_spill] sm:$0xff] %v13288_v23  ;;  %v7095_v33 = vld [vmem:[#allocation7 + $0x3a0] sm:$0xff] }
 0x5e1   : > { %6811 = vmatpush2.bf16.msra.mxu0 %v14085_v21  ;;  %6852 = vmatpush2.bf16.msra.mxu1 %v14086_v48  ;;  %v6999_v21 = vld [vmem:[#allocation7 + $0xa0] sm:$0xff]  ;;  %v6996_v48 = vld [vmem:[#allocation7 + $0x88] sm:$0xff] }
 0x5e2   : > { %6812 = vmatprep.subr.bf16.mxu0 %v14087_v2  ;;  %6853 = vmatprep.subr.bf16.mxu1 %v14088_v49  ;;  %v13246_v2 = vcombine.high %v6995_v36, %v6999_v21  ;;  %v7000_v49 = vld [vmem:[#allocation7 + $0xa8] sm:$0xff]  ;;  %v7075_v60 = vld [vmem:[#allocation7 + $0x300] sm:$0xff] }
 0x5e3   : > { %v7079_v22 = vld [vmem:[#allocation7 + $0x320] sm:$0xff] }
 0x5e5   : > { %6813 = vmatpush2.bf16.msra.mxu0 %v14089_v62  ;;  %6854 = vmatpush2.bf16.msra.mxu1 %v14090_v63  ;;  %v13248_v62 = vcombine.low %v6995_v36, %v6999_v21  ;;  %v13250_v63 = vcombine.low %v6996_v48, %v7000_v49  ;;  %v7092_v36 = vld [vmem:[#allocation7 + $0x388] sm:$0xff]  ;;  %v13294_v21 = vcombine.high %v7091_v35, %v7095_v33 }
 0x5e6   : > { %6814 = vmatprep.subr.bf16.mxu0 %v14091_v3  ;;  %6855 = vmatprep.subr.bf16.mxu1 %v14092_v25  ;;  %v13252_v3 = vcombine.high %v6996_v48, %v7000_v49  ;;  %v6987_v25 = vld [vmem:[#allocation7 + $0x40] sm:$0xff]  ;;  %v7096_v48 = vld [vmem:[#allocation7 + $0x3a8] sm:$0xff]  ;;  %v13296_v49 = vcombine.low %v7091_v35, %v7095_v33  ;;  %v13318_v33 = vcombine.high %v7075_v60, %v7079_v22 }
 0x5e7   : > { %14101 = vst [vmem:[#allocation16_spill] sm:$0xff] %v13294_v21  ;;  %v7076_v35 = vld [vmem:[#allocation7 + $0x308] sm:$0xff] }
 0x5e8   : > { %14102 = vst [vmem:[#allocation17_spill] sm:$0xff] %v13296_v49  ;;  %14109 = vst [vmem:[#allocation24_spill] sm:$0xff] %v13318_v33 }
 0x5e9   : > { %6815 = vmatpush2.bf16.msra.mxu0 %v14093_v14  ;;  %6856 = vmatpush2.bf16.msra.mxu1 %v14094_v26  ;;  %v6991_v14 = vld [vmem:[#allocation7 + $0x60] sm:$0xff]  ;;  %v6988_v26 = vld [vmem:[#allocation7 + $0x48] sm:$0xff] }
 0x5ea   : > { %6816 = vmatprep.subr.bf16.mxu0 %v14095_v59  ;;  %6857 = vmatprep.subr.bf16.mxu1 %v14096_v29  ;;  %v13258_v59 = vcombine.high %v6987_v25, %v6991_v14  ;;  %v6992_v29 = vld [vmem:[#allocation7 + $0x68] sm:$0xff] }
 0x5ed   : > { %6817 = vmatpush2.bf16.msra.mxu0 %v12955_v18  ;;  %6858 = vmatpush2.bf16.msra.mxu1 %v12959_v41  ;;  %v7035_v18 = vld [vmem:[#allocation7 + $0x1c0] sm:$0xff] }
 0x5ee   : > { %6818 = vmatprep.subr.bf16.mxu0 %v12961_v46  ;;  %6859 = vmatprep.subr.bf16.mxu1 %v14097_v30  ;;  %v7039_v41 = vld [vmem:[#allocation7 + $0x1e0] sm:$0xff]  ;;  %v7036_v46 = vld [vmem:[#allocation7 + $0x1c8] sm:$0xff]  ;;  %v13260_v30 = vcombine.low %v6987_v25, %v6991_v14  ;;  %v13298_v25 = vcombine.low %v7092_v36, %v7096_v48  ;;  %v13300_v14 = vcombine.high %v7092_v36, %v7096_v48 }
 0x5ef   : > { %v7080_v36 = vld [vmem:[#allocation7 + $0x328] sm:$0xff]  ;;  %v13320_v48 = vcombine.low %v7075_v60, %v7079_v22  ;;  %v7059_v60 = vld [vmem:[#allocation7 + $0x280] sm:$0xff] }
 0x5f0   : > { %14103 = vst [vmem:[#allocation18_spill] sm:$0xff] %v13298_v25  ;;  %14104 = vst [vmem:[#allocation19_spill] sm:$0xff] %v13300_v14  ;;  %v7063_v22 = vld [vmem:[#allocation7 + $0x2a0] sm:$0xff] }
 0x5f1   : > { %6819 = vmatpush2.bf16.msra.mxu0 %v12967_v54  ;;  %6860 = vmatpush2.bf16.msra.mxu1 %v12971_v1  ;;  %v13186_v54 = vcombine.low %v7035_v18, %v7039_v41  ;;  %v13188_v1 = vcombine.high %v7035_v18, %v7039_v41  ;;  %v13262_v18 = vcombine.low %v6988_v26, %v6992_v29 }
 0x5f2   : > { %6820 = vmatprep.subr.bf16.mxu0 %v12973_v51  ;;  %6861 = vmatprep.subr.bf16.mxu1 %v12976_v24  ;;  %v7040_v51 = vld [vmem:[#allocation7 + $0x1e8] sm:$0xff]  ;;  %v7027_v24 = vld [vmem:[#allocation7 + $0x180] sm:$0xff]  ;;  %v13264_v41 = vcombine.high %v6988_v26, %v6992_v29  ;;  %14110 = vst [vmem:[#allocation25_spill] sm:$0xff] %v13320_v48 }
 0x5f3   : > { %v7083_v26 = vld [vmem:[#allocation7 + $0x340] sm:$0xff] }
 0x5f4   : > { %v7087_v29 = vld [vmem:[#allocation7 + $0x360] sm:$0xff] }
 0x5f5   : > { %6821 = vmatpush2.bf16.msra.mxu0 %v12979_v53  ;;  %6862 = vmatpush2.bf16.msra.mxu1 %v12983_v55  ;;  %v7031_v53 = vld [vmem:[#allocation7 + $0x1a0] sm:$0xff]  ;;  %v13190_v55 = vcombine.low %v7036_v46, %v7040_v51 }
 0x5f6   : > { %6822 = vmatprep.subr.bf16.mxu0 %v12985_v27  ;;  %6863 = vmatprep.subr.bf16.mxu1 %v12988_v42  ;;  %v13192_v27 = vcombine.high %v7036_v46, %v7040_v51  ;;  %v7028_v42 = vld [vmem:[#allocation7 + $0x188] sm:$0xff]  ;;  %v13201_v40 = vcombine.low %v7027_v24, %v7031_v53  ;;  %v6979_v46 = vld [vmem:[#allocation7] sm:$0xff] }
 0x5f7   : > { %v6983_v51 = vld [vmem:[#allocation7 + $0x20] sm:$0xff] }
 0x5f9   : > { %6823 = vmatpush2.bf16.msra.mxu0 %v12991_v17  ;;  %6864 = vmatpush2.bf16.msra.mxu1 %v12995_v0  ;;  %v13194_v17 = vcombine.high %v7027_v24, %v7031_v53  ;;  %v7032_v0 = vld [vmem:[#allocation7 + $0x1a8] sm:$0xff]  ;;  %v13270_v53 = vcombine.high %v6979_v46, %v6983_v51 }
 0x5fa   : > { %7753 = vmatprep.subr.bf16.mxu0 %v13188_v1  ;;  %7794 = vmatprep.subr.bf16.mxu1 %v13192_v27  ;;  %v13205_v38 = vcombine.low %v7028_v42, %v7032_v0  ;;  %v6980_v24 = vld [vmem:[#allocation7 + $0x8] sm:$0xff] }
 0x5fc   : > { %6825 = vmatmul.mubr.bf16.vlgmr.msra.gmra.mxu0 %v13117_v58  ;;  %6866 = vmatmul.mubr.bf16.vlgmr.msra.gmra.mxu1 %v13117_v58  ;;  %v13197_v58 = vcombine.high %v7028_v42, %v7032_v0  ;;  %v6984_v42 = vld [vmem:[#allocation7 + $0x28] sm:$0xff]  ;;  %v13272_v0 = vcombine.low %v6979_v46, %v6983_v51  ;;  %v13306_v51 = vcombine.high %v7083_v26, %v7087_v29 }
 0x5fd   : > { %7754 = vmatpush1.bf16.msra.mxu0 %v13186_v54  ;;  %7795 = vmatpush1.bf16.msra.mxu1 %v13190_v55  ;;  %v13274_v31 = vcombine.low %v6980_v24, %v6984_v42  ;;  %v13276_v5 = vcombine.high %v6980_v24, %v6984_v42  ;;  %v7084_v46 = vld [vmem:[#allocation7 + $0x348] sm:$0xff]  ;;  %v13308_v42 = vcombine.low %v7083_v26, %v7087_v29 }
 0x5fe   : > { %7755 = vmatprep.subr.bf16.mxu0 %v13194_v17  ;;  %7796 = vmatprep.subr.bf16.mxu1 %v13197_v58  ;;  %14105 = vst [vmem:[#allocation20_spill] sm:$0xff] %v13306_v51  ;;  %v7088_v24 = vld [vmem:[#allocation7 + $0x368] sm:$0xff]  ;;  %v13322_v26 = vcombine.low %v7076_v35, %v7080_v36  ;;  %v13324_v29 = vcombine.high %v7076_v35, %v7080_v36 }
 0x5ff   : > { %14106 = vst [vmem:[#allocation21_spill] sm:$0xff] %v13308_v42  ;;  %v13310_v34 = vcombine.low %v7084_v46, %v7088_v24  ;;  %v13312_v37 = vcombine.high %v7084_v46, %v7088_v24  ;;  %v7067_v46 = vld [vmem:[#allocation7 + $0x2c0] sm:$0xff] }
 0x600   : > { %14111 = vst [vmem:[#allocation26_spill] sm:$0xff] %v13322_v26  ;;  %14112 = vst [vmem:[#allocation27_spill] sm:$0xff] %v13324_v29  ;;  %v7071_v24 = vld [vmem:[#allocation7 + $0x2e0] sm:$0xff] }
 0x601   : > { %7756 = vmatpush1.bf16.msra.mxu0 %v13201_v40  ;;  %7797 = vmatpush1.bf16.msra.mxu1 %v13205_v38  ;;  %14107 = vst [vmem:[#allocation22_spill] sm:$0xff] %v13310_v34  ;;  %14108 = vst [vmem:[#allocation23_spill] sm:$0xff] %v13312_v37 }
 0x602   : > { %7757 = vmatprep.subr.bf16.mxu0 %v13207_v39  ;;  %7798 = vmatprep.subr.bf16.mxu1 %v13210_v7 }
 0x605   : > { %7758 = vmatpush1.bf16.msra.mxu0 %v13213_v44  ;;  %7799 = vmatpush1.bf16.msra.mxu1 %v13217_v10 }
 0x606   : > { %7759 = vmatprep.subr.bf16.mxu0 %v13219_v19  ;;  %7800 = vmatprep.subr.bf16.mxu1 %v13222_v56 }
 0x609   : > { %7760 = vmatpush1.bf16.msra.mxu0 %v13225_v13  ;;  %7801 = vmatpush1.bf16.msra.mxu1 %v13229_v45 }
 0x60a   : > { %7761 = vmatprep.subr.bf16.mxu0 %v13231_v8  ;;  %7802 = vmatprep.subr.bf16.mxu1 %v13234_v11 }
 0x60d   : > { %7762 = vmatpush1.bf16.msra.mxu0 %v13237_v50  ;;  %7803 = vmatpush1.bf16.msra.mxu1 %v13241_v43 }
 0x60e   : > { %7763 = vmatprep.subr.bf16.mxu0 %v13246_v2  ;;  %7804 = vmatprep.subr.bf16.mxu1 %v13252_v3 }
 0x611   : > { %7764 = vmatpush1.bf16.msra.mxu0 %v13248_v62  ;;  %7805 = vmatpush1.bf16.msra.mxu1 %v13250_v63 }
 0x612   : > { %7765 = vmatprep.subr.bf16.mxu0 %v13258_v59  ;;  %7806 = vmatprep.subr.bf16.mxu1 %v13264_v41 }
 0x615   : > { %7766 = vmatpush1.bf16.msra.mxu0 %v13260_v30  ;;  %7807 = vmatpush1.bf16.msra.mxu1 %v13262_v18 }
 0x616   : > { %7767 = vmatprep.subr.bf16.mxu0 %v13270_v53  ;;  %7808 = vmatprep.subr.bf16.mxu1 %v13276_v5 }
 0x619   : > { %7768 = vmatpush1.bf16.msra.mxu0 %v13272_v0  ;;  %7809 = vmatpush1.bf16.msra.mxu1 %v13274_v31 }
 0x61a   : > { %7769 = vmatprep.subr.bf16.mxu0 %v13282_v20  ;;  %7810 = vmatprep.subr.bf16.mxu1 %v13288_v23 }
 0x61d   : > { %7770 = vmatpush2.bf16.msra.mxu0 %v13284_v16  ;;  %7811 = vmatpush2.bf16.msra.mxu1 %v13286_v57  ;;  %v7044_v57 = vld [vmem:[#allocation7 + $0x208] sm:$0xff] }
 0x61e   : > { %7771 = vmatprep.subr.bf16.mxu0 %v13294_v21  ;;  %7812 = vmatprep.subr.bf16.mxu1 %v13300_v14  ;;  %v7056_v14 = vld [vmem:[#allocation7 + $0x268] sm:$0xff]  ;;  %v7043_v21 = vld [vmem:[#allocation7 + $0x200] sm:$0xff] }
 0x61f   : > { %v7048_v16 = vld [vmem:[#allocation7 + $0x228] sm:$0xff] }
 0x621   : > { %7772 = vmatpush2.bf16.msra.mxu0 %v13296_v49  ;;  %7813 = vmatpush2.bf16.msra.mxu1 %v13298_v25  ;;  %v7060_v25 = vld [vmem:[#allocation7 + $0x288] sm:$0xff] }
 0x622   : > { %7773 = vmatprep.subr.bf16.mxu0 %v13306_v51  ;;  %7814 = vmatprep.subr.bf16.mxu1 %v13312_v37  ;;  %v7068_v37 = vld [vmem:[#allocation7 + $0x2c8] sm:$0xff] }
 0x623   : > { %v7072_v51 = vld [vmem:[#allocation7 + $0x2e8] sm:$0xff] }
 0x624   : > { %v13334_v35 = vcombine.low %v7068_v37, %v7072_v51  ;;  %v13336_v36 = vcombine.high %v7068_v37, %v7072_v51  ;;  %v7064_v49 = vld [vmem:[#allocation7 + $0x2a8] sm:$0xff] }
 0x625   : > { %7774 = vmatpush2.bf16.msra.mxu0 %v13308_v42  ;;  %7815 = vmatpush2.bf16.msra.mxu1 %v13310_v34  ;;  %v13329_v42 = vcombine.low %v7067_v46, %v7071_v24  ;;  %v13331_v34 = vcombine.high %v7067_v46, %v7071_v24  ;;  %v7055_v46 = vld [vmem:[#allocation7 + $0x260] sm:$0xff]  ;;  %v7052_v24 = vld [vmem:[#allocation7 + $0x248] sm:$0xff]  ;;  %v13349_v51 = vcombine.low %v7060_v25, %v7064_v49 }
 0x626   : > { %7775 = vmatprep.subr.bf16.mxu0 %v13318_v33  ;;  %7816 = vmatprep.subr.bf16.mxu1 %v13324_v29  ;;  %14115 = vst [vmem:[#allocation30_spill] sm:$0xff] %v13334_v35  ;;  %14116 = vst [vmem:[#allocation31_spill] sm:$0xff] %v13336_v36  ;;  %v13338_v33 = vcombine.high %v7059_v60, %v7063_v22  ;;  %v7051_v29 = vld [vmem:[#allocation7 + $0x240] sm:$0xff] }
 0x627   : > { %14113 = vst [vmem:[#allocation28_spill] sm:$0xff] %v13329_v42  ;;  %14114 = vst [vmem:[#allocation29_spill] sm:$0xff] %v13331_v34  ;;  %v13351_v37 = vcombine.high %v7051_v29, %v7055_v46 }
 0x628   : > { %14117 = vst [vmem:[#allocation32_spill] sm:$0xff] %v13338_v33  ;;  %14120 = vst [vmem:[#allocation35_spill] sm:$0xff] %v13349_v51 }
 0x629   : > { %7776 = vmatpush2.bf16.msra.mxu0 %v13320_v48  ;;  %7817 = vmatpush2.bf16.msra.mxu1 %v13322_v26  ;;  %v13341_v48 = vcombine.high %v7060_v25, %v7064_v49  ;;  %v13345_v26 = vcombine.low %v7059_v60, %v7063_v22  ;;  %14121 = vst [vmem:[#allocation12_spill] sm:$0xff] %v13351_v37 }
 0x62a   : > { %7777 = vmatprep.subr.bf16.mxu0 %v13331_v34  ;;  %7818 = vmatprep.subr.bf16.mxu1 %v13336_v36  ;;  %v13354_v34 = vcombine.high %v7052_v24, %v7056_v14  ;;  %v7047_v36 = vld [vmem:[#allocation7 + $0x220] sm:$0xff]  ;;  %v13357_v60 = vcombine.low %v7051_v29, %v7055_v46  ;;  %v13361_v49 = vcombine.low %v7052_v24, %v7056_v14  ;;  %v7037_v14 = vld [vmem:[#allocation7 + $0x1d0] sm:$0xff]  ;;  %v7038_v24 = vld [vmem:[#allocation7 + $0x1d8] sm:$0xff] }
 0x62b   : > { %14118 = vst [vmem:[#allocation33_spill] sm:$0xff] %v13341_v48  ;;  %14119 = vst [vmem:[#allocation34_spill] sm:$0xff] %v13345_v26  ;;  %v13363_v25 = vcombine.high %v7043_v21, %v7047_v36  ;;  %v13366_v22 = vcombine.high %v7044_v57, %v7048_v16  ;;  %v13373_v29 = vcombine.low %v7044_v57, %v7048_v16  ;;  %v7041_v46 = vld [vmem:[#allocation7 + $0x1f0] sm:$0xff] }
 0x62c   : > { %14122 = vst [vmem:[#allocation11_spill] sm:$0xff] %v13354_v34  ;;  %14123 = vst [vmem:[#allocation36_spill] sm:$0xff] %v13357_v60 }
 0x62d   : > { %7778 = vmatpush2.bf16.msra.mxu0 %v13329_v42  ;;  %7819 = vmatpush2.bf16.msra.mxu1 %v13334_v35  ;;  %14124 = vst [vmem:[#allocation37_spill] sm:$0xff] %v13361_v49  ;;  %14125 = vst [vmem:[#allocation38_spill] sm:$0xff] %v13363_v25 }
 0x62e   : > { %7779 = vmatprep.subr.bf16.mxu0 %v13338_v33  ;;  %7820 = vmatprep.subr.bf16.mxu1 %v13341_v48  ;;  %14126 = vst [vmem:[#allocation39_spill] sm:$0xff] %v13366_v22  ;;  %v13369_v48 = vcombine.low %v7043_v21, %v7047_v36  ;;  %14128 = vst [vmem:[#allocation41_spill] sm:$0xff] %v13373_v29  ;;  %v13380_v21 = vcombine.low %v7037_v14, %v7041_v46 }
 0x630   : > { %14127 = vst [vmem:[#allocation40_spill] sm:$0xff] %v13369_v48 }
 0x631   : > { %7780 = vmatpush2.bf16.msra.mxu0 %v13345_v26  ;;  %7821 = vmatpush2.bf16.msra.mxu1 %v13349_v51 }
 0x632   : > { %7781 = vmatprep.subr.bf16.mxu0 %v13351_v37  ;;  %7822 = vmatprep.subr.bf16.mxu1 %v13354_v34  ;;  %v13378_v34 = vcombine.high %v7037_v14, %v7041_v46 }
 0x634   : > { %14129 = vst [vmem:[#allocation42_spill] sm:$0xff] %v13378_v34 }
 0x635   : > { %7782 = vmatpush2.bf16.msra.mxu0 %v13357_v60  ;;  %7823 = vmatpush2.bf16.msra.mxu1 %v13361_v49  ;;  %v7042_v60 = vld [vmem:[#allocation7 + $0x1f8] sm:$0xff] }
 0x636   : > { %7783 = vmatprep.subr.bf16.mxu0 %v13363_v25  ;;  %7824 = vmatprep.subr.bf16.mxu1 %v13366_v22  ;;  %v13382_v36 = vcombine.low %v7038_v24, %v7042_v60  ;;  %v13384_v49 = vcombine.high %v7038_v24, %v7042_v60 }
 0x638   : > { %14130 = vst [vmem:[#allocation43_spill] sm:$0xff] %v13384_v49 }
 0x639   : > { %7784 = vmatpush2.bf16.msra.mxu0 %v13369_v48  ;;  %7825 = vmatpush2.bf16.msra.mxu1 %v13373_v29 }
 0x63a   : > { %7835 = vmatprep.subr.bf16.mxu0 %v13378_v34  ;;  %7876 = vmatprep.subr.bf16.mxu1 %v13384_v49 }
 0x67c   : > { %v6744_v16 = vpop.f32.mrf.mxu0  ;;  %v6785_v57 = vpop.f32.mrf.mxu1 }
 0x67d   : > { %v6882_v26 = vrot.slane %v6744_v16, 6  ;;  %v6884_v33 = vrot.slane %v6785_v57, 6 }
 0x67e   : > { %v6746_v48 = vpop.f32.mrf.mxu0  ;;  %v6787_v22 = vpop.f32.mrf.mxu1 }
 0x67f   : > { %v6883_v14 = vrot.slane %v6746_v48, 6  ;;  %v6898_v46 = vadd.f32 %v6882_v26, %v13072_v4  ;;  %v6900_v60 = vadd.f32 %v6884_v33, %v13075_v6  ;;  %v6885_v24 = vrot.slane %v6787_v22, 6 }
 0x680   : > { %v6748_v25 = vpop.f32.mrf.mxu0  ;;  %v6789_v37 = vpop.f32.mrf.mxu1 }
 0x681   : > { %v6899_v34 = vadd.f32 %v6883_v14, %v13083_v32  ;;  %v9726_v35 = vmul.f32 -1.442695, %v6898_v46  ;;  %v9728_v49 = vmul.f32 -1.442695, %v6900_v60  ;;  %v6901_v42 = vadd.f32 %v6885_v24, %v13078_v9 }
 0x682   : > { %v6749_v29 = vpop.f32.mrf.mxu0  ;;  %v6790_v51 = vpop.f32.mrf.mxu1 }
 0x683   : > { %v9727_v23 = vmul.f32 -1.442695, %v6899_v34  ;;  %10530 = vpow2.f32 %v9726_v35  ;;  %v9729_v37 = vmul.f32 -1.442695, %v6901_v42 }
 0x684   : > { %10532 = vpow2.f32 %v9728_v49 }
 0x685   : > { %10534 = vpow2.f32 %v9727_v23 }
 0x686   : > { %10536 = vpow2.f32 %v9729_v37 }
 0x690   : > { %v10531_v51 = vpop.eup %10530 }
 0x691   : > { %v10533_v25 = vpop.eup %10532  ;;  %v6912_v29 = vadd.f32 1.0, %v10531_v51 }
 0x692   : > { %v10535_v48 = vpop.eup %10534  ;;  %v6924_v4 = vadd.f32 1.0, %v10533_v25 }
 0x693   : > { %v10537_v26 = vpop.eup %10536  ;;  %v6913_v6 = vadd.f32 1.0, %v10535_v48  ;;  %10538 = vrcp.f32 %v6912_v29 }
 0x694   : > { %10540 = vrcp.f32 %v6924_v4  ;;  %v6925_v9 = vadd.f32 1.0, %v10537_v26  ;;  %v6946_v4 = vrot.slane %v13105_v28, 6  ;;  %v10743_v28 = vmov 1983009808  }
 0x695   : > { %10542 = vrcp.f32 %v6913_v6 }
 0x6bc   : > { %v6826_v33 = vpop.f32.mrf.mxu0  ;;  %v6867_v22 = vpop.f32.mrf.mxu1 }
 0x6bd   : > { %v6886_v32 = vrot.slane %v6826_v33, 6  ;;  %v6888_v16 = vrot.slane %v6867_v22, 6 }
 0x6be   : > { %v6828_v34 = vpop.f32.mrf.mxu0  ;;  %v6869_v35 = vpop.f32.mrf.mxu1 }
 0x6bf   : > { %v6902_v42 = vadd.f32 %v6886_v32, %v13088_v61  ;;  %v6904_v23 = vadd.f32 %v6888_v16, %v13091_v52  ;;  %v6887_v49 = vrot.slane %v6828_v34, 6  ;;  %v6889_v57 = vrot.slane %v6869_v35, 6  ;;  %v10539_v61 = vpop.eup %10538 }
 0x6c0   : > { %v6830_v14 = vpop.f32.mrf.mxu0  ;;  %v6871_v46 = vpop.f32.mrf.mxu1 }
 0x6c1   : > { %10544 = vtanh.f32 %v6902_v42  ;;  %v9730_v60 = vmul.f32 -1.442695, %v6904_v23  ;;  %v6903_v24 = vadd.f32 %v6887_v49, %v13094_v15  ;;  %v6905_v37 = vadd.f32 %v6889_v57, %v13098_v12  ;;  %v10541_v52 = vpop.eup %10540 }
 0x6c2   : > { %10546 = vrcp.f32 %v6925_v9  ;;  %v6831_v51 = vpop.f32.mrf.mxu0  ;;  %v6872_v25 = vpop.f32.mrf.mxu1  ;;  %v6950_v33 = vmul.f32 %v10541_v52, %v6946_v4  ;;  %v6947_v15 = vrot.slane %v13108_v47, 6  ;;  %v6965_v57 = vunpack.c.l.s4 %v10743_v28  ;;  %v7029_v4 = vld [vmem:[#allocation7 + $0x190] sm:$0xff]  ;;  %v7026_v28 = vld [vmem:[#allocation7 + $0x178] sm:$0xff] }
 0x6c3   : > { %10548 = vpow2.f32 %v9730_v60  ;;  %v9731_v48 = vmul.f32 -1.442695, %v6905_v37  ;;  %v10543_v29 = vpop.eup %10542  ;;  %v14131_v25 = vld [vmem:[#allocation10_spill] sm:$0xff] }
 0x6c4   : > { %10550 = vtanh.f32 %v6903_v24  ;;  %v6966_v47 = vunpack.c.0.s8 %v6965_v57 }
 0x6c5   : > { %10552 = vpow2.f32 %v9731_v48 }
 0x6c6   : > { %v13405_v48 = vsub.s32 %v6966_v47, %v14131_v25 }
 0x6c8   : > { %14132 = vst [vmem:[#allocation44_spill] sm:$0xff] %v13405_v48 }
 0x6ce   : > { %v10545_v26 = vpop.eup %10544 }
 0x6cf   : > { %v10547_v6 = vpop.eup %10546  ;;  %v6952_v22 = vmul.f32 %v10545_v26, %v10539_v61  ;;  %v7033_v26 = vld [vmem:[#allocation7 + $0x1b0] sm:$0xff] }
 0x6d0   : > { %v10549_v32 = vpop.eup %10548  ;;  %v6951_v35 = vmul.f32 %v10547_v6, %v6947_v15  ;;  %v7030_v6 = vld [vmem:[#allocation7 + $0x198] sm:$0xff]  ;;  %v13419_v57 = vcombine.low %v7029_v4, %v7033_v26 }
 0x6d1   : > { %v10551_v12 = vpop.eup %10550  ;;  %v13398_v16 = vadd.f32 %v6952_v22, %v6950_v33  ;;  %v6938_v9 = vadd.f32 1.0, %v10549_v32  ;;  %v7034_v33 = vld [vmem:[#allocation7 + $0x1b8] sm:$0xff] }
 0x6d2   : > { %v10553_v34 = vpop.eup %10552  ;;  %v6953_v42 = vmul.f32 %v10551_v12, %v10543_v29  ;;  %v7021_v12 = vld [vmem:[#allocation7 + $0x150] sm:$0xff] }
 0x6d3   : > { %10554 = vtanh.f32 %v13398_v16  ;;  %v6939_v23 = vadd.f32 1.0, %v10553_v34  ;;  %v13410_v34 = vcombine.high %v7029_v4, %v7033_v26  ;;  %v7005_v4 = vld [vmem:[#allocation7 + $0xd0] sm:$0xff] }
 0x6d4   : > { %10556 = vrcp.f32 %v6938_v9  ;;  %v13401_v49 = vadd.f32 %v6953_v42, %v6951_v35  ;;  %v13412_v35 = vcombine.high %v7030_v6, %v7034_v33  ;;  %v7025_v42 = vld [vmem:[#allocation7 + $0x170] sm:$0xff] }
 0x6d5   : > { %10558 = vrcp.f32 %v6939_v23  ;;  %v7022_v23 = vld [vmem:[#allocation7 + $0x158] sm:$0xff]  ;;  %v13423_v47 = vcombine.high %v7021_v12, %v7025_v42  ;;  %v13431_v25 = vcombine.low %v7021_v12, %v7025_v42  ;;  %v7009_v26 = vld [vmem:[#allocation7 + $0xf0] sm:$0xff] }
 0x6d6   : > { %10560 = vtanh.f32 %v13401_v49  ;;  %v13449_v12 = vcombine.high %v7005_v4, %v7009_v26  ;;  %v6997_v42 = vld [vmem:[#allocation7 + $0x90] sm:$0xff] }
 0x6d7   : > { %14133 = vst [vmem:[#allocation45_spill] sm:$0xff] %v13431_v25 }
 0x6d8   : > { %14139 = vst [vmem:[#allocation51_spill] sm:$0xff] %v13449_v12 }
 0x6e0   : > { %v10555_v14 = vpop.eup %10554 }
 0x6e1   : > { %v10557_v46 = vpop.eup %10556 }
 0x6e2   : > { %v10559_v60 = vpop.eup %10558  ;;  %v6958_v24 = vmul.f32 %v10557_v46, %v10555_v14  ;;  %v13421_v14 = vcombine.low %v7030_v6, %v7034_v33  ;;  %v13425_v46 = vcombine.high %v7022_v23, %v7026_v28  ;;  %v7006_v6 = vld [vmem:[#allocation7 + $0xd8] sm:$0xff] }
 0x6e3   : > { %v10561_v37 = vpop.eup %10560  ;;  %v7010_v33 = vld [vmem:[#allocation7 + $0xf8] sm:$0xff] }
 0x6e4   : > { %v6959_v51 = vmul.f32 %v10561_v37, %v10559_v60  ;;  %v6977_v61 = vpack.c.bf16 %v6958_v24, %v6958_v24  ;;  %v7013_v60 = vld [vmem:[#allocation7 + $0x110] sm:$0xff]  ;;  %v7014_v37 = vld [vmem:[#allocation7 + $0x118] sm:$0xff] }
 0x6e6   : > { %v6978_v52 = vpack.c.bf16 %v6959_v51, %v6959_v51  ;;  %v6963_v29 = vcombine.low %v6958_v24, %v6959_v51  ;;  %v13408_v15 = vrot.slane %v6977_v61, 1  ;;  %v7017_v24 = vld [vmem:[#allocation7 + $0x130] sm:$0xff]  ;;  %v7018_v51 = vld [vmem:[#allocation7 + $0x138] sm:$0xff]  ;;  %v13433_v61 = vcombine.low %v7022_v23, %v7026_v28 }
 0x6e7   : > { %v7001_v23 = vld [vmem:[#allocation7 + $0xb0] sm:$0xff]  ;;  %v6998_v28 = vld [vmem:[#allocation7 + $0x98] sm:$0xff] }
 0x6e8   : > { %v7110_v22 = vrot.slane %v6978_v52, 1  ;;  %v6970_v32 = vrot.slane %v6963_v29, %v13405_v48  ;;  %14134 = vst [vmem:[#allocation46_spill] sm:$0xff] %v13433_v61  ;;  %v13437_v52 = vcombine.high %v7013_v60, %v7017_v24  ;;  %v13439_v29 = vcombine.high %v7014_v37, %v7018_v51  ;;  %v7002_v48 = vld [vmem:[#allocation7 + $0xb8] sm:$0xff] }
 0x6ea   : > { %7785 = vmatprep.mubr.bf16.mxu0 %v7110_v22  ;;  %7826 = vmatprep.mubr.bf16.mxu1 %v7110_v22  ;;  %v6971_v9 = vcombine.high %v6970_v32, %v6970_v32  ;;  %14135 = vst [vmem:[#allocation47_spill] sm:$0xff] %v13437_v52  ;;  %14136 = vst [vmem:[#allocation48_spill] sm:$0xff] %v13439_v29  ;;  %v13445_v32 = vcombine.low %v7014_v37, %v7018_v51 }
 0x6eb   : > { %7786 = vmatmul.mubr.bf16.vlgmr.msra.gmra.mxu0 %v13408_v15  ;;  %7827 = vmatmul.mubr.bf16.vlgmr.msra.gmra.mxu1 %v13408_v15  ;;  %v13461_v37 = vcombine.high %v6997_v42, %v7001_v23  ;;  %v13463_v51 = vcombine.high %v6998_v28, %v7002_v48 }
 0x6ec   : > { %9734 = vst [vmem:[%s13115_s22 + $0x4] sm:$0xf] %v6971_v9  ;;  %7836 = vmatpush1.bf16.msra.mxu0 %v13380_v21  ;;  %7877 = vmatpush1.bf16.msra.mxu1 %v13382_v36  ;;  %14138 = vst [vmem:[#allocation50_spill] sm:$0xff] %v13445_v32  ;;  %v13451_v9 = vcombine.high %v7006_v6, %v7010_v33 }
 0x6ed   : > { %7867 = vmatprep.mubr.bf16.mxu0 %v7110_v22  ;;  %7908 = vmatprep.mubr.bf16.mxu1 %v7110_v22  ;;  %v13443_v22 = vcombine.low %v7013_v60, %v7017_v24  ;;  %v13455_v60 = vcombine.low %v7005_v4, %v7009_v26  ;;  %v13457_v24 = vcombine.low %v7006_v6, %v7010_v33 }
 0x6ee   : > { %7837 = vmatprep.subr.bf16.mxu0 %v13410_v34  ;;  %7878 = vmatprep.subr.bf16.mxu1 %v13412_v35  ;;  %14140 = vst [vmem:[#allocation52_spill] sm:$0xff] %v13451_v9  ;;  %14143 = vst [vmem:[#allocation55_spill] sm:$0xff] %v13461_v37  ;;  %v13467_v4 = vcombine.low %v6997_v42, %v7001_v23  ;;  %v13469_v26 = vcombine.low %v6998_v28, %v7002_v48 }
 0x6ef   : > { %14137 = vst [vmem:[#allocation49_spill] sm:$0xff] %v13443_v22  ;;  %14141 = vst [vmem:[#allocation53_spill] sm:$0xff] %v13455_v60 }
 0x6f0   : > { %7838 = vmatpush1.bf16.msra.mxu0 %v13419_v57  ;;  %7879 = vmatpush1.bf16.msra.mxu1 %v13421_v14  ;;  %14142 = vst [vmem:[#allocation54_spill] sm:$0xff] %v13457_v24  ;;  %14144 = vst [vmem:[#allocation56_spill] sm:$0xff] %v13463_v51 }
 0x6f1   : > { %7839 = vmatprep.subr.bf16.mxu0 %v13423_v47  ;;  %7880 = vmatprep.subr.bf16.mxu1 %v13425_v46  ;;  %14145 = vst [vmem:[#allocation57_spill] sm:$0xff] %v13467_v4  ;;  %14146 = vst [vmem:[#allocation58_spill] sm:$0xff] %v13469_v26 }
 0x6f4   : > { %7840 = vmatpush1.bf16.msra.mxu0 %v13431_v25  ;;  %7881 = vmatpush1.bf16.msra.mxu1 %v13433_v61  ;;  %v6990_v61 = vld [vmem:[#allocation7 + $0x58] sm:$0xff] }
 0x6f5   : > { %7841 = vmatprep.subr.bf16.mxu0 %v13437_v52  ;;  %7882 = vmatprep.subr.bf16.mxu1 %v13439_v29  ;;  %v6989_v29 = vld [vmem:[#allocation7 + $0x50] sm:$0xff]  ;;  %v6994_v25 = vld [vmem:[#allocation7 + $0x78] sm:$0xff] }
 0x6f6   : > { %v6993_v52 = vld [vmem:[#allocation7 + $0x70] sm:$0xff]  ;;  %v13475_v33 = vcombine.high %v6990_v61, %v6994_v25  ;;  %v13481_v48 = vcombine.low %v6990_v61, %v6994_v25 }
 0x6f7   : > { %v13473_v6 = vcombine.high %v6989_v29, %v6993_v52  ;;  %v13479_v42 = vcombine.low %v6989_v29, %v6993_v52 }
 0x6f8   : > { %7842 = vmatpush1.bf16.msra.mxu0 %v13443_v22  ;;  %7883 = vmatpush1.bf16.msra.mxu1 %v13445_v32  ;;  %14148 = vst [vmem:[#allocation60_spill] sm:$0xff] %v13475_v33  ;;  %v6982_v32 = vld [vmem:[#allocation7 + $0x18] sm:$0xff]  ;;  %14150 = vst [vmem:[#allocation62_spill] sm:$0xff] %v13481_v48 }
 0x6f9   : > { %7843 = vmatprep.subr.bf16.mxu0 %v13449_v12  ;;  %7884 = vmatprep.subr.bf16.mxu1 %v13451_v9  ;;  %14147 = vst [vmem:[#allocation59_spill] sm:$0xff] %v13473_v6  ;;  %v6981_v9 = vld [vmem:[#allocation7 + $0x10] sm:$0xff]  ;;  %v6986_v22 = vld [vmem:[#allocation7 + $0x38] sm:$0xff]  ;;  %14149 = vst [vmem:[#allocation61_spill] sm:$0xff] %v13479_v42 }
 0x6fa   : > { %v6985_v12 = vld [vmem:[#allocation7 + $0x30] sm:$0xff]  ;;  %v13487_v28 = vcombine.high %v6982_v32, %v6986_v22  ;;  %v13493_v25 = vcombine.low %v6982_v32, %v6986_v22 }
 0x6fb   : > { %v13485_v23 = vcombine.high %v6981_v9, %v6985_v12  ;;  %v13491_v52 = vcombine.low %v6981_v9, %v6985_v12 }
 0x6fc   : > { %7844 = vmatpush1.bf16.msra.mxu0 %v13455_v60  ;;  %7885 = vmatpush1.bf16.msra.mxu1 %v13457_v24  ;;  %14152 = vst [vmem:[#allocation64_spill] sm:$0xff] %v13487_v28  ;;  %v7102_v24 = vld [vmem:[#allocation7 + $0x3d8] sm:$0xff]  ;;  %14154 = vst [vmem:[#allocation66_spill] sm:$0xff] %v13493_v25 }
 0x6fd   : > { %7845 = vmatprep.subr.bf16.mxu0 %v13461_v37  ;;  %7886 = vmatprep.subr.bf16.mxu1 %v13463_v51  ;;  %14151 = vst [vmem:[#allocation63_spill] sm:$0xff] %v13485_v23  ;;  %v7101_v51 = vld [vmem:[#allocation7 + $0x3d0] sm:$0xff]  ;;  %v7106_v60 = vld [vmem:[#allocation7 + $0x3f8] sm:$0xff]  ;;  %14153 = vst [vmem:[#allocation65_spill] sm:$0xff] %v13491_v52 }
 0x6fe   : > { %v7105_v37 = vld [vmem:[#allocation7 + $0x3f0] sm:$0xff]  ;;  %v13499_v29 = vcombine.high %v7102_v24, %v7106_v60  ;;  %v13505_v22 = vcombine.low %v7102_v24, %v7106_v60 }
 0x6ff   : > { %v13497_v61 = vcombine.high %v7101_v51, %v7105_v37  ;;  %v13503_v12 = vcombine.low %v7101_v51, %v7105_v37 }
 0x700   : > { %7846 = vmatpush1.bf16.msra.mxu0 %v13467_v4  ;;  %7887 = vmatpush1.bf16.msra.mxu1 %v13469_v26  ;;  %14156 = vst [vmem:[#allocation68_spill] sm:$0xff] %v13499_v29  ;;  %v7094_v26 = vld [vmem:[#allocation7 + $0x398] sm:$0xff]  ;;  %14158 = vst [vmem:[#allocation70_spill] sm:$0xff] %v13505_v22 }
 0x701   : > { %7847 = vmatprep.subr.bf16.mxu0 %v13473_v6  ;;  %7888 = vmatprep.subr.bf16.mxu1 %v13475_v33  ;;  %14155 = vst [vmem:[#allocation67_spill] sm:$0xff] %v13497_v61  ;;  %v7093_v33 = vld [vmem:[#allocation7 + $0x390] sm:$0xff]  ;;  %v7098_v4 = vld [vmem:[#allocation7 + $0x3b8] sm:$0xff]  ;;  %14157 = vst [vmem:[#allocation69_spill] sm:$0xff] %v13503_v12 }
 0x702   : > { %v7097_v6 = vld [vmem:[#allocation7 + $0x3b0] sm:$0xff]  ;;  %v13511_v9 = vcombine.high %v7094_v26, %v7098_v4  ;;  %v13517_v60 = vcombine.low %v7094_v26, %v7098_v4 }
 0x703   : > { %v13509_v32 = vcombine.high %v7093_v33, %v7097_v6  ;;  %v13515_v37 = vcombine.low %v7093_v33, %v7097_v6 }
 0x704   : > { %7848 = vmatpush1.bf16.msra.mxu0 %v13479_v42  ;;  %7889 = vmatpush1.bf16.msra.mxu1 %v13481_v48  ;;  %14160 = vst [vmem:[#allocation72_spill] sm:$0xff] %v13511_v9  ;;  %v7086_v48 = vld [vmem:[#allocation7 + $0x358] sm:$0xff]  ;;  %14162 = vst [vmem:[#allocation74_spill] sm:$0xff] %v13517_v60 }
 0x705   : > { %7849 = vmatprep.subr.bf16.mxu0 %v13485_v23  ;;  %7890 = vmatprep.subr.bf16.mxu1 %v13487_v28  ;;  %14159 = vst [vmem:[#allocation71_spill] sm:$0xff] %v13509_v32  ;;  %v7085_v28 = vld [vmem:[#allocation7 + $0x350] sm:$0xff]  ;;  %v7090_v42 = vld [vmem:[#allocation7 + $0x378] sm:$0xff]  ;;  %14161 = vst [vmem:[#allocation73_spill] sm:$0xff] %v13515_v37 }
 0x706   : > { %v7089_v23 = vld [vmem:[#allocation7 + $0x370] sm:$0xff]  ;;  %v13523_v51 = vcombine.high %v7086_v48, %v7090_v42  ;;  %v13529_v4 = vcombine.low %v7086_v48, %v7090_v42 }
 0x707   : > { %v13521_v24 = vcombine.high %v7085_v28, %v7089_v23  ;;  %v13527_v6 = vcombine.low %v7085_v28, %v7089_v23 }
 0x708   : > { %7850 = vmatpush1.bf16.msra.mxu0 %v13491_v52  ;;  %7891 = vmatpush1.bf16.msra.mxu1 %v13493_v25  ;;  %14164 = vst [vmem:[#allocation76_spill] sm:$0xff] %v13523_v51  ;;  %v7078_v25 = vld [vmem:[#allocation7 + $0x318] sm:$0xff]  ;;  %14166 = vst [vmem:[#allocation78_spill] sm:$0xff] %v13529_v4 }
 0x709   : > { %7851 = vmatprep.subr.bf16.mxu0 %v13497_v61  ;;  %7892 = vmatprep.subr.bf16.mxu1 %v13499_v29  ;;  %14163 = vst [vmem:[#allocation75_spill] sm:$0xff] %v13521_v24  ;;  %v7077_v29 = vld [vmem:[#allocation7 + $0x310] sm:$0xff]  ;;  %v7082_v52 = vld [vmem:[#allocation7 + $0x338] sm:$0xff]  ;;  %14165 = vst [vmem:[#allocation77_spill] sm:$0xff] %v13527_v6 }
 0x70a   : > { %v7081_v61 = vld [vmem:[#allocation7 + $0x330] sm:$0xff]  ;;  %v13535_v33 = vcombine.high %v7078_v25, %v7082_v52  ;;  %v13541_v42 = vcombine.low %v7078_v25, %v7082_v52 }
 0x70b   : > { %v13533_v26 = vcombine.high %v7077_v29, %v7081_v61  ;;  %v13539_v23 = vcombine.low %v7077_v29, %v7081_v61 }
 0x70c   : > { %7852 = vmatpush2.bf16.msra.mxu0 %v13503_v12  ;;  %7893 = vmatpush2.bf16.msra.mxu1 %v13505_v22  ;;  %14168 = vst [vmem:[#allocation80_spill] sm:$0xff] %v13535_v33  ;;  %v7070_v22 = vld [vmem:[#allocation7 + $0x2d8] sm:$0xff]  ;;  %14170 = vst [vmem:[#allocation82_spill] sm:$0xff] %v13541_v42 }
 0x70d   : > { %7853 = vmatprep.subr.bf16.mxu0 %v13509_v32  ;;  %7894 = vmatprep.subr.bf16.mxu1 %v13511_v9  ;;  %14167 = vst [vmem:[#allocation79_spill] sm:$0xff] %v13533_v26  ;;  %v7069_v9 = vld [vmem:[#allocation7 + $0x2d0] sm:$0xff]  ;;  %v7074_v12 = vld [vmem:[#allocation7 + $0x2f8] sm:$0xff]  ;;  %14169 = vst [vmem:[#allocation81_spill] sm:$0xff] %v13539_v23 }
 0x70e   : > { %v7073_v32 = vld [vmem:[#allocation7 + $0x2f0] sm:$0xff]  ;;  %v13547_v28 = vcombine.high %v7070_v22, %v7074_v12  ;;  %v13553_v52 = vcombine.low %v7070_v22, %v7074_v12 }
 0x70f   : > { %v13545_v48 = vcombine.high %v7069_v9, %v7073_v32  ;;  %v13551_v61 = vcombine.low %v7069_v9, %v7073_v32 }
 0x710   : > { %7854 = vmatpush2.bf16.msra.mxu0 %v13515_v37  ;;  %7895 = vmatpush2.bf16.msra.mxu1 %v13517_v60  ;;  %14172 = vst [vmem:[#allocation84_spill] sm:$0xff] %v13547_v28  ;;  %v7062_v60 = vld [vmem:[#allocation7 + $0x298] sm:$0xff] }
 0x711   : > { %7855 = vmatprep.subr.bf16.mxu0 %v13521_v24  ;;  %7896 = vmatprep.subr.bf16.mxu1 %v13523_v51  ;;  %14171 = vst [vmem:[#allocation83_spill] sm:$0xff] %v13545_v48  ;;  %v7061_v51 = vld [vmem:[#allocation7 + $0x290] sm:$0xff]  ;;  %v7066_v37 = vld [vmem:[#allocation7 + $0x2b8] sm:$0xff] }
 0x712   : > { %v7065_v24 = vld [vmem:[#allocation7 + $0x2b0] sm:$0xff]  ;;  %v13559_v29 = vcombine.high %v7062_v60, %v7066_v37  ;;  %v13565_v12 = vcombine.low %v7062_v60, %v7066_v37 }
 0x713   : > { %v13557_v25 = vcombine.high %v7061_v51, %v7065_v24  ;;  %v13563_v32 = vcombine.low %v7061_v51, %v7065_v24 }
 0x714   : > { %7856 = vmatpush2.bf16.msra.mxu0 %v13527_v6  ;;  %7897 = vmatpush2.bf16.msra.mxu1 %v13529_v4  ;;  %14173 = vst [vmem:[#allocation85_spill] sm:$0xff] %v13559_v29  ;;  %v7054_v4 = vld [vmem:[#allocation7 + $0x258] sm:$0xff] }
 0x715   : > { %7857 = vmatprep.subr.bf16.mxu0 %v13533_v26  ;;  %7898 = vmatprep.subr.bf16.mxu1 %v13535_v33  ;;  %v7053_v33 = vld [vmem:[#allocation7 + $0x250] sm:$0xff]  ;;  %v7058_v6 = vld [vmem:[#allocation7 + $0x278] sm:$0xff]  ;;  %14174 = vst [vmem:[#allocation86_spill] sm:$0xff] %v13563_v32 }
 0x716   : > { %v7057_v26 = vld [vmem:[#allocation7 + $0x270] sm:$0xff]  ;;  %v13571_v9 = vcombine.high %v7054_v4, %v7058_v6  ;;  %v13577_v37 = vcombine.low %v7054_v4, %v7058_v6 }
 0x717   : > { %v13569_v22 = vcombine.high %v7053_v33, %v7057_v26  ;;  %v13575_v24 = vcombine.low %v7053_v33, %v7057_v26 }
 0x718   : > { %7858 = vmatpush2.bf16.msra.mxu0 %v13539_v23  ;;  %7899 = vmatpush2.bf16.msra.mxu1 %v13541_v42  ;;  %v7046_v42 = vld [vmem:[#allocation7 + $0x218] sm:$0xff] }
 0x719   : > { %7859 = vmatprep.subr.bf16.mxu0 %v13545_v48  ;;  %7900 = vmatprep.subr.bf16.mxu1 %v13547_v28  ;;  %v7045_v28 = vld [vmem:[#allocation7 + $0x210] sm:$0xff]  ;;  %v7050_v23 = vld [vmem:[#allocation7 + $0x238] sm:$0xff] }
 0x71a   : > { %v7049_v48 = vld [vmem:[#allocation7 + $0x230] sm:$0xff]  ;;  %v13583_v51 = vcombine.high %v7046_v42, %v7050_v23 }
 0x71b   : > { %v13581_v60 = vcombine.high %v7045_v28, %v7049_v48 }
 0x71c   : > { %7860 = vmatpush2.bf16.msra.mxu0 %v13551_v61  ;;  %7901 = vmatpush2.bf16.msra.mxu1 %v13553_v52 }
 0x71d   : > { %7861 = vmatprep.subr.bf16.mxu0 %v13557_v25  ;;  %7902 = vmatprep.subr.bf16.mxu1 %v13559_v29  ;;  %v13587_v29 = vcombine.low %v7045_v28, %v7049_v48 }
 0x720   : > { %7862 = vmatpush2.bf16.msra.mxu0 %v13563_v32  ;;  %7903 = vmatpush2.bf16.msra.mxu1 %v13565_v12  ;;  %v13589_v32 = vcombine.low %v7046_v42, %v7050_v23 }
 0x721   : > { %7863 = vmatprep.subr.bf16.mxu0 %v13569_v22  ;;  %7904 = vmatprep.subr.bf16.mxu1 %v13571_v9 }
 0x724   : > { %7864 = vmatpush2.bf16.msra.mxu0 %v13575_v24  ;;  %7905 = vmatpush2.bf16.msra.mxu1 %v13577_v37 }
 0x725   : > { %7865 = vmatprep.subr.bf16.mxu0 %v13581_v60  ;;  %7906 = vmatprep.subr.bf16.mxu1 %v13583_v51 }
 0x728   : > { %7866 = vmatpush2.bf16.msra.mxu0 %v13587_v29  ;;  %7907 = vmatpush2.bf16.msra.mxu1 %v13589_v32 }
 0x729   : > { %8795 = vmatprep.subr.bf16.mxu0 %v13188_v1  ;;  %8836 = vmatprep.subr.bf16.mxu1 %v13192_v27  ;;  %v14176_v1 = vld [vmem:[#allocation13_spill] sm:$0xff]  ;;  %v14178_v27 = vld [vmem:[#allocation16_spill] sm:$0xff] }
 0x72b   : > { %7868 = vmatmul.mubr.bf16.vlgmr.msra.gmra.mxu0 %v13408_v15  ;;  %7909 = vmatmul.mubr.bf16.vlgmr.msra.gmra.mxu1 %v13408_v15 }
 0x72c   : > { %8796 = vmatpush1.bf16.msra.mxu0 %v13186_v54  ;;  %8837 = vmatpush1.bf16.msra.mxu1 %v13190_v55  ;;  %v14175_v54 = vld [vmem:[#allocation15_spill] sm:$0xff]  ;;  %v14177_v55 = vld [vmem:[#allocation14_spill] sm:$0xff] }
 0x72d   : > { %8797 = vmatprep.subr.bf16.mxu0 %v13194_v17  ;;  %8838 = vmatprep.subr.bf16.mxu1 %v13197_v58  ;;  %v14179_v17 = vld [vmem:[#allocation19_spill] sm:$0xff]  ;;  %v14180_v58 = vld [vmem:[#allocation17_spill] sm:$0xff] }
 0x730   : > { %8798 = vmatpush1.bf16.msra.mxu0 %v13201_v40  ;;  %8839 = vmatpush1.bf16.msra.mxu1 %v13205_v38  ;;  %v14181_v40 = vld [vmem:[#allocation18_spill] sm:$0xff]  ;;  %v14182_v38 = vld [vmem:[#allocation20_spill] sm:$0xff] }
 0x731   : > { %8799 = vmatprep.subr.bf16.mxu0 %v13207_v39  ;;  %8840 = vmatprep.subr.bf16.mxu1 %v13210_v7  ;;  %v14183_v39 = vld [vmem:[#allocation23_spill] sm:$0xff]  ;;  %v14184_v7 = vld [vmem:[#allocation21_spill] sm:$0xff] }
 0x734   : > { %8800 = vmatpush1.bf16.msra.mxu0 %v13213_v44  ;;  %8841 = vmatpush1.bf16.msra.mxu1 %v13217_v10  ;;  %v14185_v44 = vld [vmem:[#allocation22_spill] sm:$0xff]  ;;  %v14186_v10 = vld [vmem:[#allocation24_spill] sm:$0xff] }
 0x735   : > { %8801 = vmatprep.subr.bf16.mxu0 %v13219_v19  ;;  %8842 = vmatprep.subr.bf16.mxu1 %v13222_v56  ;;  %v14187_v19 = vld [vmem:[#allocation27_spill] sm:$0xff]  ;;  %v14188_v56 = vld [vmem:[#allocation25_spill] sm:$0xff] }
 0x738   : > { %8802 = vmatpush1.bf16.msra.mxu0 %v13225_v13  ;;  %8843 = vmatpush1.bf16.msra.mxu1 %v13229_v45  ;;  %v14189_v13 = vld [vmem:[#allocation26_spill] sm:$0xff]  ;;  %v14190_v45 = vld [vmem:[#allocation29_spill] sm:$0xff] }
 0x739   : > { %8803 = vmatprep.subr.bf16.mxu0 %v13231_v8  ;;  %8844 = vmatprep.subr.bf16.mxu1 %v13234_v11  ;;  %v14191_v8 = vld [vmem:[#allocation31_spill] sm:$0xff]  ;;  %v14192_v11 = vld [vmem:[#allocation28_spill] sm:$0xff] }
 0x73c   : > { %8804 = vmatpush1.bf16.msra.mxu0 %v13237_v50  ;;  %8845 = vmatpush1.bf16.msra.mxu1 %v13241_v43  ;;  %v14193_v50 = vld [vmem:[#allocation30_spill] sm:$0xff]  ;;  %v14194_v43 = vld [vmem:[#allocation32_spill] sm:$0xff] }
 0x73d   : > { %8805 = vmatprep.subr.bf16.mxu0 %v13246_v2  ;;  %8846 = vmatprep.subr.bf16.mxu1 %v13252_v3  ;;  %v14195_v2 = vld [vmem:[#allocation33_spill] sm:$0xff]  ;;  %v14198_v3 = vld [vmem:[#allocation12_spill] sm:$0xff] }
 0x740   : > { %8806 = vmatpush1.bf16.msra.mxu0 %v13248_v62  ;;  %8847 = vmatpush1.bf16.msra.mxu1 %v13250_v63  ;;  %v14196_v62 = vld [vmem:[#allocation34_spill] sm:$0xff]  ;;  %v14197_v63 = vld [vmem:[#allocation35_spill] sm:$0xff] }
 0x741   : > { %8807 = vmatprep.subr.bf16.mxu0 %v13258_v59  ;;  %8848 = vmatprep.subr.bf16.mxu1 %v13264_v41  ;;  %v14199_v59 = vld [vmem:[#allocation11_spill] sm:$0xff]  ;;  %v14202_v41 = vld [vmem:[#allocation38_spill] sm:$0xff] }
 0x744   : > { %8808 = vmatpush1.bf16.msra.mxu0 %v13260_v30  ;;  %8849 = vmatpush1.bf16.msra.mxu1 %v13262_v18  ;;  %v14200_v30 = vld [vmem:[#allocation36_spill] sm:$0xff]  ;;  %v14201_v18 = vld [vmem:[#allocation37_spill] sm:$0xff] }
 0x745   : > { %8809 = vmatprep.subr.bf16.mxu0 %v13270_v53  ;;  %8850 = vmatprep.subr.bf16.mxu1 %v13276_v5  ;;  %v14203_v53 = vld [vmem:[#allocation39_spill] sm:$0xff]  ;;  %v14206_v5 = vld [vmem:[#allocation42_spill] sm:$0xff] }
 0x748   : > { %8810 = vmatpush1.bf16.msra.mxu0 %v13272_v0  ;;  %8851 = vmatpush1.bf16.msra.mxu1 %v13274_v31  ;;  %v14204_v0 = vld [vmem:[#allocation40_spill] sm:$0xff]  ;;  %v14205_v31 = vld [vmem:[#allocation41_spill] sm:$0xff] }
 0x749   : > { %8811 = vmatprep.subr.bf16.mxu0 %v13282_v20  ;;  %8852 = vmatprep.subr.bf16.mxu1 %v14175_v54  ;;  %v14207_v20 = vld [vmem:[#allocation43_spill] sm:$0xff] }
 0x74c   : > { %8812 = vmatpush2.bf16.msra.mxu0 %v14176_v1  ;;  %8853 = vmatpush2.bf16.msra.mxu1 %v14177_v55  ;;  %v13664_v55 = vld [vmem:[%s13069_s18] sm:$0xff] }
 0x74d   : > { %8813 = vmatprep.subr.bf16.mxu0 %v14178_v27  ;;  %8854 = vmatprep.subr.bf16.mxu1 %v14179_v17  ;;  %v13668_v17 = vld [vmem:[%s13069_s18 + $0x10] sm:$0xff] }
 0x750   : > { %8814 = vmatpush2.bf16.msra.mxu0 %v14180_v58  ;;  %8855 = vmatpush2.bf16.msra.mxu1 %v14181_v40 }
 0x751   : > { %8815 = vmatprep.subr.bf16.mxu0 %v14182_v38  ;;  %8856 = vmatprep.subr.bf16.mxu1 %v14183_v39  ;;  %v13672_v38 = vld [vmem:[%s13069_s18 + $0x8] sm:$0xff] }
 0x754   : > { %8816 = vmatpush2.bf16.msra.mxu0 %v14184_v7  ;;  %8857 = vmatpush2.bf16.msra.mxu1 %v14185_v44 }
 0x755   : > { %8817 = vmatprep.subr.bf16.mxu0 %v14186_v10  ;;  %8858 = vmatprep.subr.bf16.mxu1 %v14187_v19  ;;  %v13676_v10 = vld [vmem:[%s13069_s18 + $0x18] sm:$0xff] }
 0x758   : > { %8818 = vmatpush2.bf16.msra.mxu0 %v14188_v56  ;;  %8859 = vmatpush2.bf16.msra.mxu1 %v14189_v13 }
 0x759   : > { %8819 = vmatprep.subr.bf16.mxu0 %v14190_v45  ;;  %8860 = vmatprep.subr.bf16.mxu1 %v14191_v8 }
 0x75c   : > { %8820 = vmatpush2.bf16.msra.mxu0 %v14192_v11  ;;  %8861 = vmatpush2.bf16.msra.mxu1 %v14193_v50 }
 0x75d   : > { %8821 = vmatprep.subr.bf16.mxu0 %v14194_v43  ;;  %8862 = vmatprep.subr.bf16.mxu1 %v14195_v2 }
 0x760   : > { %8822 = vmatpush2.bf16.msra.mxu0 %v14196_v62  ;;  %8863 = vmatpush2.bf16.msra.mxu1 %v14197_v63 }
 0x761   : > { %8823 = vmatprep.subr.bf16.mxu0 %v14198_v3  ;;  %8864 = vmatprep.subr.bf16.mxu1 %v14199_v59 }
 0x764   : > { %8824 = vmatpush2.bf16.msra.mxu0 %v14200_v30  ;;  %8865 = vmatpush2.bf16.msra.mxu1 %v14201_v18 }
 0x765   : > { %8825 = vmatprep.subr.bf16.mxu0 %v14202_v41  ;;  %8866 = vmatprep.subr.bf16.mxu1 %v14203_v53 }
 0x768   : > { %8826 = vmatpush2.bf16.msra.mxu0 %v14204_v0  ;;  %8867 = vmatpush2.bf16.msra.mxu1 %v14205_v31  ;;  %v13680_v0 = vld [vmem:[%s13069_s18 + $0x20] sm:$0xff] }
 0x769   : > { %8877 = vmatprep.subr.bf16.mxu0 %v14206_v5  ;;  %8918 = vmatprep.subr.bf16.mxu1 %v14207_v20  ;;  %v13684_v5 = vld [vmem:[%s13069_s18 + $0x30] sm:$0xff] }
 0x7ab   : > { %v7787_v15 = vpop.f32.mrf.mxu0  ;;  %v7828_v6 = vpop.f32.mrf.mxu1 }
 0x7ac   : > { %v7925_v28 = vrot.slane %v7787_v15, 4  ;;  %v7927_v54 = vrot.slane %v7828_v6, 4 }
 0x7ad   : > { %v7789_v4 = vpop.f32.mrf.mxu0  ;;  %v7830_v26 = vpop.f32.mrf.mxu1 }
 0x7ae   : > { %v7926_v1 = vrot.slane %v7789_v4, 4  ;;  %v7941_v27 = vadd.f32 %v13664_v55, %v7925_v28  ;;  %v7943_v58 = vadd.f32 %v13668_v17, %v7927_v54  ;;  %v7928_v40 = vrot.slane %v7830_v26, 4 }
 0x7af   : > { %v7791_v33 = vpop.f32.mrf.mxu0  ;;  %v7832_v23 = vpop.f32.mrf.mxu1 }
 0x7b0   : > { %v7942_v39 = vadd.f32 %v13672_v38, %v7926_v1  ;;  %v9863_v7 = vmul.f32 -1.442695, %v7941_v27  ;;  %v9865_v44 = vmul.f32 -1.442695, %v7943_v58  ;;  %v7944_v19 = vadd.f32 %v13676_v10, %v7928_v40  ;;  %v13688_v23 = vld [vmem:[%s13069_s18 + $0x28] sm:$0xff] }
 0x7b1   : > { %v7792_v42 = vpop.f32.mrf.mxu0  ;;  %v7833_v48 = vpop.f32.mrf.mxu1 }
 0x7b2   : > { %v9864_v56 = vmul.f32 -1.442695, %v7942_v39  ;;  %10562 = vpow2.f32 %v9863_v7  ;;  %v9866_v13 = vmul.f32 -1.442695, %v7944_v19  ;;  %v13692_v48 = vld [vmem:[%s13069_s18 + $0x38] sm:$0xff]  ;;  %v7989_v7 = vrot.slane %v13398_v16, 6 }
 0x7b3   : > { %10564 = vpow2.f32 %v9865_v44 }
 0x7b4   : > { %10566 = vpow2.f32 %v9864_v56 }
 0x7b5   : > { %10568 = vpow2.f32 %v9866_v13 }
 0x7bf   : > { %v10563_v45 = vpop.eup %10562 }
 0x7c0   : > { %v10565_v8 = vpop.eup %10564  ;;  %v7955_v50 = vadd.f32 1.0, %v10563_v45 }
 0x7c1   : > { %v10567_v11 = vpop.eup %10566  ;;  %v7967_v43 = vadd.f32 1.0, %v10565_v8  ;;  %v7990_v8 = vrot.slane %v13401_v49, 6 }
 0x7c2   : > { %v10569_v2 = vpop.eup %10568  ;;  %v7956_v62 = vadd.f32 1.0, %v10567_v11  ;;  %10570 = vrcp.f32 %v7955_v50 }
 0x7c3   : > { %10572 = vrcp.f32 %v7967_v43  ;;  %v7968_v18 = vadd.f32 1.0, %v10569_v2 }
 0x7c4   : > { %10574 = vrcp.f32 %v7956_v62 }
 0x7cf   : > { %v10571_v58 = vpop.eup %10570 }
 0x7d0   : > { %v10573_v40 = vpop.eup %10572 }
 0x7d1   : > { %v10575_v39 = vpop.eup %10574  ;;  %v7993_v56 = vmul.f32 %v10573_v40, %v7989_v7  ;;  %v14224_v40 = vld [vmem:[#allocation61_spill] sm:$0xff]  ;;  %v14226_v7 = vld [vmem:[#allocation63_spill] sm:$0xff] }
 0x7eb   : > { %v7869_v63 = vpop.f32.mrf.mxu0  ;;  %v7910_v3 = vpop.f32.mrf.mxu1 }
 0x7ec   : > { %v7929_v59 = vrot.slane %v7869_v63, 4  ;;  %v7931_v30 = vrot.slane %v7910_v3, 4 }
 0x7ed   : > { %v7871_v41 = vpop.f32.mrf.mxu0  ;;  %v7912_v53 = vpop.f32.mrf.mxu1 }
 0x7ee   : > { %v7945_v31 = vadd.f32 %v13680_v0, %v7929_v59  ;;  %v7947_v20 = vadd.f32 %v13684_v5, %v7931_v30  ;;  %v7930_v15 = vrot.slane %v7871_v41, 4  ;;  %v7932_v6 = vrot.slane %v7912_v53, 4 }
 0x7ef   : > { %v7873_v4 = vpop.f32.mrf.mxu0  ;;  %v7914_v26 = vpop.f32.mrf.mxu1 }
 0x7f0   : > { %10576 = vtanh.f32 %v7945_v31  ;;  %v9867_v33 = vmul.f32 -1.442695, %v7947_v20  ;;  %v7946_v42 = vadd.f32 %v13688_v23, %v7930_v15  ;;  %v7948_v28 = vadd.f32 %v13692_v48, %v7932_v6  ;;  %v14208_v26 = vld [vmem:[#allocation45_spill] sm:$0xff] }
 0x7f1   : > { %10578 = vrcp.f32 %v7968_v18  ;;  %v7874_v54 = vpop.f32.mrf.mxu0  ;;  %v7915_v1 = vpop.f32.mrf.mxu1 }
 0x7f2   : > { %10580 = vpow2.f32 %v9867_v33  ;;  %v9868_v27 = vmul.f32 -1.442695, %v7948_v28  ;;  %v14209_v33 = vld [vmem:[#allocation46_spill] sm:$0xff]  ;;  %v14219_v28 = vld [vmem:[#allocation56_spill] sm:$0xff]  ;;  %v14220_v54 = vld [vmem:[#allocation57_spill] sm:$0xff] }
 0x7f3   : > { %10582 = vtanh.f32 %v7946_v42  ;;  %v14212_v42 = vld [vmem:[#allocation49_spill] sm:$0xff]  ;;  %v14221_v1 = vld [vmem:[#allocation58_spill] sm:$0xff] }
 0x7f4   : > { %10584 = vpow2.f32 %v9868_v27  ;;  %v14222_v27 = vld [vmem:[#allocation59_spill] sm:$0xff] }
 0x7fd   : > { %v10577_v44 = vpop.eup %10576 }
 0x7fe   : > { %v10579_v19 = vpop.eup %10578  ;;  %v7995_v13 = vmul.f32 %v10577_v44, %v10571_v58  ;;  %v14223_v58 = vld [vmem:[#allocation60_spill] sm:$0xff] }
 0x7ff   : > { %v10581_v45 = vpop.eup %10580  ;;  %v7994_v62 = vmul.f32 %v10579_v19, %v7990_v8  ;;  %v14227_v44 = vld [vmem:[#allocation64_spill] sm:$0xff]  ;;  %v14228_v19 = vld [vmem:[#allocation65_spill] sm:$0xff] }
 0x800   : > { %v10583_v11 = vpop.eup %10582  ;;  %v13697_v50 = vadd.f32 %v7995_v13, %v7993_v56  ;;  %v7981_v43 = vadd.f32 1.0, %v10581_v45  ;;  %v14229_v56 = vld [vmem:[#allocation66_spill] sm:$0xff]  ;;  %v14230_v13 = vld [vmem:[#allocation67_spill] sm:$0xff]  ;;  %v14231_v45 = vld [vmem:[#allocation68_spill] sm:$0xff] }
 0x801   : > { %v10585_v2 = vpop.eup %10584  ;;  %v7996_v63 = vmul.f32 %v10583_v11, %v10575_v39  ;;  %v14225_v39 = vld [vmem:[#allocation62_spill] sm:$0xff]  ;;  %v14232_v8 = vld [vmem:[#allocation69_spill] sm:$0xff] }
 0x802   : > { %10586 = vtanh.f32 %v13697_v50  ;;  %v7982_v3 = vadd.f32 1.0, %v10585_v2  ;;  %v14233_v11 = vld [vmem:[#allocation70_spill] sm:$0xff]  ;;  %v14235_v2 = vld [vmem:[#allocation72_spill] sm:$0xff] }
 0x803   : > { %10588 = vrcp.f32 %v7981_v43  ;;  %v13700_v16 = vadd.f32 %v7996_v63, %v7994_v62  ;;  %v14234_v43 = vld [vmem:[#allocation71_spill] sm:$0xff]  ;;  %v14236_v62 = vld [vmem:[#allocation73_spill] sm:$0xff]  ;;  %v14237_v63 = vld [vmem:[#allocation74_spill] sm:$0xff] }
 0x804   : > { %10590 = vrcp.f32 %v7982_v3  ;;  %v14238_v3 = vld [vmem:[#allocation75_spill] sm:$0xff] }
 0x805   : > { %10592 = vtanh.f32 %v13700_v16 }
 0x80f   : > { %v10587_v59 = vpop.eup %10586 }
 0x810   : > { %v10589_v30 = vpop.eup %10588 }
 0x811   : > { %v10591_v49 = vpop.eup %10590  ;;  %v8001_v18 = vmul.f32 %v10589_v30, %v10587_v59  ;;  %v14239_v59 = vld [vmem:[#allocation76_spill] sm:$0xff]  ;;  %v14240_v30 = vld [vmem:[#allocation77_spill] sm:$0xff] }
 0x812   : > { %v10593_v41 = vpop.eup %10592 }
 0x813   : > { %v8002_v53 = vmul.f32 %v10593_v41, %v10591_v49  ;;  %v8019_v31 = vpack.c.bf16 %v8001_v18, %v8001_v18  ;;  %v14241_v49 = vld [vmem:[#allocation78_spill] sm:$0xff]  ;;  %v14243_v41 = vld [vmem:[#allocation80_spill] sm:$0xff] }
 0x815   : > { %v8020_v20 = vpack.c.bf16 %v8002_v53, %v8002_v53  ;;  %v8006_v15 = vcombine.high %v8001_v18, %v8002_v53  ;;  %v13704_v4 = vrot.slane %v8019_v31, 2  ;;  %v14242_v18 = vld [vmem:[#allocation79_spill] sm:$0xff]  ;;  %v14244_v53 = vld [vmem:[#allocation81_spill] sm:$0xff]  ;;  %v14245_v31 = vld [vmem:[#allocation82_spill] sm:$0xff] }
 0x817   : > { %v8152_v6 = vrot.slane %v8020_v20, 2  ;;  %10014 = vst.sshfl [vmem:[%s13115_s22 + $0x8] sm:$0x33 pattern:$0x76325410] %v8006_v15  ;;  %v14246_v20 = vld [vmem:[#allocation83_spill] sm:$0xff] }
 0x818   : > { %v14247_v15 = vld [vmem:[#allocation84_spill] sm:$0xff] }
 0x819   : > { %8827 = vmatprep.mubr.bf16.mxu0 %v8152_v6  ;;  %8868 = vmatprep.mubr.bf16.mxu1 %v8152_v6 }
 0x81a   : > { %8828 = vmatmul.mubr.bf16.vlgmr.msra.gmra.mxu0 %v13704_v4  ;;  %8869 = vmatmul.mubr.bf16.vlgmr.msra.gmra.mxu1 %v13704_v4 }
 0x81b   : > { %8878 = vmatpush1.bf16.msra.mxu0 %v13380_v21  ;;  %8919 = vmatpush1.bf16.msra.mxu1 %v13382_v36  ;;  %v14210_v21 = vld [vmem:[#allocation47_spill] sm:$0xff]  ;;  %v14211_v36 = vld [vmem:[#allocation48_spill] sm:$0xff] }
 0x81c   : > { %8909 = vmatprep.mubr.bf16.mxu0 %v8152_v6  ;;  %8950 = vmatprep.mubr.bf16.mxu1 %v8152_v6  ;;  %v14248_v6 = vld [vmem:[#allocation85_spill] sm:$0xff] }
 0x81d   : > { %8879 = vmatprep.subr.bf16.mxu0 %v13410_v34  ;;  %8920 = vmatprep.subr.bf16.mxu1 %v13412_v35  ;;  %v14213_v34 = vld [vmem:[#allocation50_spill] sm:$0xff]  ;;  %v14214_v35 = vld [vmem:[#allocation51_spill] sm:$0xff] }
 0x81f   : > { %8880 = vmatpush1.bf16.msra.mxu0 %v13419_v57  ;;  %8921 = vmatpush1.bf16.msra.mxu1 %v13421_v14  ;;  %v14215_v57 = vld [vmem:[#allocation52_spill] sm:$0xff]  ;;  %v14216_v14 = vld [vmem:[#allocation53_spill] sm:$0xff] }
 0x820   : > { %8881 = vmatprep.subr.bf16.mxu0 %v13423_v47  ;;  %8922 = vmatprep.subr.bf16.mxu1 %v13425_v46  ;;  %v14217_v47 = vld [vmem:[#allocation54_spill] sm:$0xff]  ;;  %v14218_v46 = vld [vmem:[#allocation55_spill] sm:$0xff] }
 0x823   : > { %8882 = vmatpush1.bf16.msra.mxu0 %v14208_v26  ;;  %8923 = vmatpush1.bf16.msra.mxu1 %v14209_v33  ;;  %v14249_v26 = vld [vmem:[#allocation86_spill] sm:$0xff] }
 0x824   : > { %8883 = vmatprep.subr.bf16.mxu0 %v14210_v21  ;;  %8924 = vmatprep.subr.bf16.mxu1 %v14211_v36 }
 0x827   : > { %8884 = vmatpush1.bf16.msra.mxu0 %v14212_v42  ;;  %8925 = vmatpush1.bf16.msra.mxu1 %v14213_v34 }
 0x828   : > { %8885 = vmatprep.subr.bf16.mxu0 %v14214_v35  ;;  %8926 = vmatprep.subr.bf16.mxu1 %v14215_v57 }
 0x82b   : > { %8886 = vmatpush1.bf16.msra.mxu0 %v14216_v14  ;;  %8927 = vmatpush1.bf16.msra.mxu1 %v14217_v47 }
 0x82c   : > { %8887 = vmatprep.subr.bf16.mxu0 %v14218_v46  ;;  %8928 = vmatprep.subr.bf16.mxu1 %v14219_v28 }
 0x82f   : > { %8888 = vmatpush1.bf16.msra.mxu0 %v14220_v54  ;;  %8929 = vmatpush1.bf16.msra.mxu1 %v14221_v1 }
 0x830   : > { %8889 = vmatprep.subr.bf16.mxu0 %v14222_v27  ;;  %8930 = vmatprep.subr.bf16.mxu1 %v14223_v58 }
 0x833   : > { %8890 = vmatpush1.bf16.msra.mxu0 %v14224_v40  ;;  %8931 = vmatpush1.bf16.msra.mxu1 %v14225_v39 }
 0x834   : > { %8891 = vmatprep.subr.bf16.mxu0 %v14226_v7  ;;  %8932 = vmatprep.subr.bf16.mxu1 %v14227_v44 }
 0x837   : > { %8892 = vmatpush1.bf16.msra.mxu0 %v14228_v19  ;;  %8933 = vmatpush1.bf16.msra.mxu1 %v14229_v56 }
 0x838   : > { %8893 = vmatprep.subr.bf16.mxu0 %v14230_v13  ;;  %8934 = vmatprep.subr.bf16.mxu1 %v14231_v45 }
 0x83b   : > { %8894 = vmatpush2.bf16.msra.mxu0 %v14232_v8  ;;  %8935 = vmatpush2.bf16.msra.mxu1 %v14233_v11 }
 0x83c   : > { %8895 = vmatprep.subr.bf16.mxu0 %v14234_v43  ;;  %8936 = vmatprep.subr.bf16.mxu1 %v14235_v2 }
 0x83f   : > { %8896 = vmatpush2.bf16.msra.mxu0 %v14236_v62  ;;  %8937 = vmatpush2.bf16.msra.mxu1 %v14237_v63 }
 0x840   : > { %8897 = vmatprep.subr.bf16.mxu0 %v14238_v3  ;;  %8938 = vmatprep.subr.bf16.mxu1 %v14239_v59  ;;  %v9031_v59 = vrot.slane %v13697_v50, 6 }
 0x843   : > { %8898 = vmatpush2.bf16.msra.mxu0 %v14240_v30  ;;  %8939 = vmatpush2.bf16.msra.mxu1 %v14241_v49 }
 0x844   : > { %8899 = vmatprep.subr.bf16.mxu0 %v14242_v18  ;;  %8940 = vmatprep.subr.bf16.mxu1 %v14243_v41 }
 0x847   : > { %8900 = vmatpush2.bf16.msra.mxu0 %v14244_v53  ;;  %8941 = vmatpush2.bf16.msra.mxu1 %v14245_v31 }
 0x848   : > { %8901 = vmatprep.subr.bf16.mxu0 %v14246_v20  ;;  %8942 = vmatprep.subr.bf16.mxu1 %v14247_v15 }
 0x84b   : > { %8902 = vmatpush2.bf16.msra.mxu0 %v13551_v61  ;;  %8943 = vmatpush2.bf16.msra.mxu1 %v13553_v52 }
 0x84c   : > { %8903 = vmatprep.subr.bf16.mxu0 %v13557_v25  ;;  %8944 = vmatprep.subr.bf16.mxu1 %v14248_v6 }
 0x84f   : > { %8904 = vmatpush2.bf16.msra.mxu0 %v14249_v26  ;;  %8945 = vmatpush2.bf16.msra.mxu1 %v13565_v12 }
 0x850   : > { %8905 = vmatprep.subr.bf16.mxu0 %v13569_v22  ;;  %8946 = vmatprep.subr.bf16.mxu1 %v13571_v9 }
 0x853   : > { %8906 = vmatpush2.bf16.msra.mxu0 %v13575_v24  ;;  %8947 = vmatpush2.bf16.msra.mxu1 %v13577_v37 }
 0x854   : > { %8907 = vmatprep.subr.bf16.mxu0 %v13581_v60  ;;  %8948 = vmatprep.subr.bf16.mxu1 %v13583_v51 }
 0x857   : > { %8908 = vmatpush2.bf16.msra.mxu0 %v13587_v29  ;;  %8949 = vmatpush2.bf16.msra.mxu1 %v13589_v32 }
 0x85a   : > { %8910 = vmatmul.mubr.bf16.vlgmr.msra.gmra.mxu0 %v13704_v4  ;;  %8951 = vmatmul.mubr.bf16.vlgmr.msra.gmra.mxu1 %v13704_v4 }
 0x8da   : > { %v8829_v61 = vpop.f32.mrf.mxu0  ;;  %v8870_v52 = vpop.f32.mrf.mxu1 }
 0x8db   : > { %v8967_v33 = vrot.slane %v8829_v61, 2  ;;  %v8969_v60 = vrot.slane %v8870_v52, 2 }
 0x8dc   : > { %v8831_v25 = vpop.f32.mrf.mxu0  ;;  %v8872_v12 = vpop.f32.mrf.mxu1 }
 0x8dd   : > { %v8968_v21 = vrot.slane %v8831_v25, 2  ;;  %v8983_v51 = vadd.f32 %v13664_v55, %v8967_v33  ;;  %v8985_v29 = vadd.f32 %v13668_v17, %v8969_v60  ;;  %v8970_v32 = vrot.slane %v8872_v12, 2 }
 0x8de   : > { %v8833_v22 = vpop.f32.mrf.mxu0  ;;  %v8874_v9 = vpop.f32.mrf.mxu1 }
 0x8df   : > { %v8984_v36 = vadd.f32 %v13672_v38, %v8968_v21  ;;  %v10000_v42 = vmul.f32 -1.442695, %v8983_v51  ;;  %v10002_v4 = vmul.f32 -1.442695, %v8985_v29  ;;  %v8986_v34 = vadd.f32 %v13676_v10, %v8970_v32  ;;  %v14250_v22 = vld [vmem:[#allocation44_spill] sm:$0xff] }
 0x8e0   : > { %v8834_v24 = vpop.f32.mrf.mxu0  ;;  %v8875_v37 = vpop.f32.mrf.mxu1 }
 0x8e1   : > { %v10001_v35 = vmul.f32 -1.442695, %v8984_v36  ;;  %10594 = vpow2.f32 %v10000_v42  ;;  %v10003_v57 = vmul.f32 -1.442695, %v8986_v34 }
 0x8e2   : > { %10596 = vpow2.f32 %v10002_v4 }
 0x8e3   : > { %10598 = vpow2.f32 %v10001_v35 }
 0x8e4   : > { %10600 = vpow2.f32 %v10003_v57 }
 0x8ee   : > { %v10595_v14 = vpop.eup %10594 }
 0x8ef   : > { %v10597_v47 = vpop.eup %10596  ;;  %v8997_v28 = vadd.f32 1.0, %v10595_v14 }
 0x8f0   : > { %v10599_v46 = vpop.eup %10598  ;;  %v9009_v55 = vadd.f32 1.0, %v10597_v47 }
 0x8f1   : > { %v10601_v54 = vpop.eup %10600  ;;  %v8998_v17 = vadd.f32 1.0, %v10599_v46  ;;  %10602 = vrcp.f32 %v8997_v28 }
 0x8f2   : > { %10604 = vrcp.f32 %v9009_v55  ;;  %v9010_v10 = vadd.f32 1.0, %v10601_v54 }
 0x8f3   : > { %10606 = vrcp.f32 %v8998_v17 }
 0x91a   : > { %v8911_v1 = vpop.f32.mrf.mxu0  ;;  %v8952_v27 = vpop.f32.mrf.mxu1 }
 0x91b   : > { %v8971_v38 = vrot.slane %v8911_v1, 2  ;;  %v8973_v58 = vrot.slane %v8952_v27, 2 }
 0x91c   : > { %v8913_v40 = vpop.f32.mrf.mxu0  ;;  %v8954_v39 = vpop.f32.mrf.mxu1 }
 0x91d   : > { %v8987_v7 = vadd.f32 %v13680_v0, %v8971_v38  ;;  %v8989_v44 = vadd.f32 %v13684_v5, %v8973_v58  ;;  %v8972_v19 = vrot.slane %v8913_v40, 2  ;;  %v8974_v56 = vrot.slane %v8954_v39, 2  ;;  %v10603_v0 = vpop.eup %10602 }
 0x91e   : > { %v8915_v13 = vpop.f32.mrf.mxu0  ;;  %v8956_v45 = vpop.f32.mrf.mxu1 }
 0x91f   : > { %10608 = vtanh.f32 %v8987_v7  ;;  %v10004_v8 = vmul.f32 -1.442695, %v8989_v44  ;;  %v8988_v11 = vadd.f32 %v13688_v23, %v8972_v19  ;;  %v8990_v43 = vadd.f32 %v13692_v48, %v8974_v56  ;;  %v10605_v5 = vpop.eup %10604 }
 0x920   : > { %10610 = vrcp.f32 %v9010_v10  ;;  %v8916_v2 = vpop.f32.mrf.mxu0  ;;  %v8957_v62 = vpop.f32.mrf.mxu1  ;;  %v9035_v18 = vmul.f32 %v10605_v5, %v9031_v59  ;;  %v9032_v23 = vrot.slane %v13700_v16, 6 }
 0x921   : > { %10612 = vpow2.f32 %v10004_v8  ;;  %v10005_v63 = vmul.f32 -1.442695, %v8990_v43  ;;  %v10607_v3 = vpop.eup %10606 }
 0x922   : > { %10614 = vtanh.f32 %v8988_v11 }
 0x923   : > { %10616 = vpow2.f32 %v10005_v63 }
 0x92c   : > { %v10609_v30 = vpop.eup %10608 }
 0x92d   : > { %v10611_v49 = vpop.eup %10610  ;;  %v9037_v41 = vmul.f32 %v10609_v30, %v10603_v0 }
 0x92e   : > { %v10613_v53 = vpop.eup %10612  ;;  %v9036_v15 = vmul.f32 %v10611_v49, %v9032_v23 }
 0x92f   : > { %v10615_v48 = vpop.eup %10614  ;;  %v9039_v54 = vadd.f32 %v9037_v41, %v9035_v18   ;;  %v9023_v31 = vadd.f32 1.0, %v10613_v53 }
 0x930   : > { %v10617_v20 = vpop.eup %10616  ;;  %v9038_v6 = vmul.f32 %v10615_v48, %v10607_v3 }
 0x931   : > { %10618 = vtanh.f32 %v9039_v54  ;;  %v9024_v26 = vadd.f32 1.0, %v10617_v20 }
 0x932   : > { %10620 = vrcp.f32 %v9023_v31  ;;  %v9040_v50 = vadd.f32 %v9038_v6, %v9036_v15  }
 0x933   : > { %10622 = vrcp.f32 %v9024_v26 }
 0x934   : > { %10624 = vtanh.f32 %v9040_v50 }
 0x93e   : > { %v10619_v61 = vpop.eup %10618 }
 0x93f   : > { %v10621_v52 = vpop.eup %10620 }
 0x940   : > { %v10623_v25 = vpop.eup %10622  ;;  %v9043_v17 = vmul.f32 %v10621_v52, %v10619_v61  }
 0x941   : > { %v10625_v12 = vpop.eup %10624 }
 0x942   : > { %v9044_v53 = vmul.f32 %v10625_v12, %v10623_v25  }
 0x944   : > { %v9048_v16 = vcombine.high %v9043_v17, %v9044_v53 }
 0x946   : > { %v9055_v9 = vrot.slane %v9048_v16, %v14250_v22  ;;  %4902 = sbr.rel (!%p4900_p1) target bundleno = 1101 (0x44d), region = 60 }
 0x948   : > { %v9056_v24 = vcombine.high %v9055_v9, %v9055_v9 }
 0x94a   : > { %10008 = vst [vmem:[%s13115_s22 + $0xc] sm:$0xf] %v9056_v24 }
 0x94b   :  { %9066 = vsyncpa [#allocation4], 1 }
 0x94c   :  { %9067 = vsyncpa [#allocation6], 1 }

// kernel: forward.3
= control target key start
LH: loop header
LB: loop body
LE: loop exit
PB: predicated region body
PF: predicated region fallthrough
CT: control target
= control target key end

     0   :  { %s5321_s26 = smov 0   ;;  %s5769_s0 = inlined_call_operand.vmem [shape: f32[2,25600], index: 0, kind: input, shape index: {}]   ;;  %s5770_s1 = inlined_call_operand.vmem [shape: bf16[25600,128], index: 1, kind: input, shape index: {}]   ;;  %s5771_s2 = inlined_call_operand.vmem [shape: f32[1,128], index: 2, kind: input, shape index: {}]   ;;  %s5772_s3 = inlined_call_operand.vmem [shape: f32[128,32], index: 3, kind: input, shape index: {}]   ;;  %s5773_s4 = inlined_call_operand.vmem [shape: f32[1,32], index: 4, kind: input, shape index: {}]   ;;  %s5774_s5 = inlined_call_operand.vmem [shape: f32[1,32], index: 5, kind: input, shape index: {}]   ;;  %s5775_s6 = inlined_call_operand.<no memory space> [shape: f32[1,1], index: 6, kind: input, shape index: {}]   ;;  %s5776_s7 = inlined_call_operand.vmem [shape: f32[2,1], index: 7, kind: output, shape index: {}]  }
   0x1   :  { %v12_v0 = vstv %s5775_s6 }
   0x2   :  { %13 = vst [vmem:[#allocation3] sm:$0x1] %v12_v0 }
   0x3 LB: > { %s5327_s27 = sadd.s32 4294967295, %s5272_s26   ;;  %p4101_p0 = scmp.ge.s32.totalorder %s5272_s26, 1  ;;  %s5272_s26 = sphi %s5321_s26, %s19_s26  }
   0x4   : > { %p246_p1 = scmp.lt.s32.totalorder %s5272_s26, 6 }
   0x6   : > { %p247_p2 = pnand %p4101_p0, %p246_p1 }
   0x7   : > { %s278_s6 = smul.u32 (!%p247_p2), 40, %s5327_s27  ;;  %p4104_p5 = scmp.ne.s32.totalorder (!%p247_p2), %s5327_s27, 0 }
   0x8   : > { %250 = sbr.rel (%p247_p2) target bundleno = 921 (0x399), region = 48 }
   0x9   : > { %s284_s28 = smul.u32 (!%p247_p2), 640, %s5327_s27  ;;  %p279_p3 = scmp.lt.s32.totalorder (!%p247_p2), %s278_s6, 199 }
   0xb   : > { %p285_p4 = scmp.lt.s32.totalorder (!%p247_p2), %s284_s28, 3199 }
   0xd   : > { %s5778_s6 = smov (!%p279_p3, %s278_s6), 199  ;;  %s5780_s28 = smov (!%p285_p4, %s284_s28), 3199 }
   0xe   : > { %s4102_s29 = sshll.u32 %s5778_s6, 1  ;;  %s4103_s10 = sshll.u32 %s5780_s28, 2 }
   0xf   : > { %s5336_s9 = scalar_lea.vmem %s5769_s0, %s4102_s29  ;;  %s5341_s13 = scalar_lea.vmem %s5770_s1, %s4103_s10 }
  0x10   : > { %294 = sbr.rel (%p4104_p5) target bundleno = 23 (0x17), region = 52 }
  0x15   : > { %v5274_v1 = vmov 0.0  }
  0x16   : > { %295 = vst [vmem:[#allocation2] sm:$0x3] %v5274_v1 }
  0x17 PF: > { %v4936_v2 = vld [vmem:[%s5341_s13 + $0x78] sm:$0xff]   ;;  %v4940_v6 = vld [vmem:[%s5341_s13 + $0x70] sm:$0xff]   ;;  %v4944_v10 = vld [vmem:[%s5341_s13 + $0x68] sm:$0xff]   ;;  %v321_v30 = vlaneseq  ;;  %v5275_v38 = vmov 1983009808   ;;  %p4425_p6 = scmp.ne.s32.totalorder %s5327_s27, 4 }
  0x18   : > { %v4937_v3 = vld [vmem:[%s5341_s13 + $0xf8] sm:$0xff]   ;;  %4432 = vmatprep.subr.bf16.mxu0 %v4936_v2  ;;  %v4941_v7 = vld [vmem:[%s5341_s13 + $0xf0] sm:$0xff]   ;;  %v4945_v11 = vld [vmem:[%s5341_s13 + $0xe8] sm:$0xff]   ;;  %v319_v39 = vunpack.c.l.s4 %v5275_v38 }
  0x19   : > { %v4938_v4 = vld [vmem:[%s5341_s13 + $0x38] sm:$0xff]   ;;  %4454 = vmatprep.subr.bf16.mxu1 %v4937_v3  ;;  %v4942_v8 = vld [vmem:[%s5341_s13 + $0x30] sm:$0xff]   ;;  %v4946_v12 = vld [vmem:[%s5341_s13 + $0x28] sm:$0xff]   ;;  %v322_v35 = vshrl.u32 %v321_v30, 7 }
  0x1a   : > { %v4939_v5 = vld [vmem:[%s5341_s13 + $0xb8] sm:$0xff]   ;;  %4433 = vmatpush3.bf16.msra.mxu0 %v4938_v4  ;;  %v4943_v9 = vld [vmem:[%s5341_s13 + $0xb0] sm:$0xff]   ;;  %v4947_v13 = vld [vmem:[%s5341_s13 + $0xa8] sm:$0xff]   ;;  %v320_v41 = vunpack.c.0.s8 %v319_v39 }
  0x1b   : > { %4455 = vmatpush3.bf16.msra.mxu1 %v4939_v5  ;;  %4434 = vmatprep.subr.bf16.mxu0 %v4940_v6  ;;  %v4948_v14 = vld [vmem:[%s5341_s13 + $0x60] sm:$0xff]   ;;  %v4952_v18 = vld [vmem:[%s5341_s13 + $0x58] sm:$0xff]   ;;  %v4956_v22 = vld [vmem:[%s5341_s13 + $0x50] sm:$0xff]  }
  0x1c   : > { %4456 = vmatprep.subr.bf16.mxu1 %v4941_v7  ;;  %v4949_v15 = vld [vmem:[%s5341_s13 + $0xe0] sm:$0xff]   ;;  %v4953_v19 = vld [vmem:[%s5341_s13 + $0xd8] sm:$0xff]   ;;  %v4957_v23 = vld [vmem:[%s5341_s13 + $0xd0] sm:$0xff]   ;;  %v5379_v43 = vsub.s32 %v320_v41, %v322_v35 }
  0x1d   : > { %v4950_v16 = vld [vmem:[%s5341_s13 + $0x20] sm:$0xff]   ;;  %v4954_v20 = vld [vmem:[%s5341_s13 + $0x18] sm:$0xff]   ;;  %v4958_v24 = vld [vmem:[%s5341_s13 + $0x10] sm:$0xff]  }
  0x1e   : > { %4435 = vmatpush3.bf16.msra.mxu0 %v4942_v8  ;;  %v4951_v17 = vld [vmem:[%s5341_s13 + $0xa0] sm:$0xff]   ;;  %v4955_v21 = vld [vmem:[%s5341_s13 + $0x98] sm:$0xff]   ;;  %v4959_v25 = vld [vmem:[%s5341_s13 + $0x90] sm:$0xff]  }
  0x1f   : > { %4457 = vmatpush3.bf16.msra.mxu1 %v4943_v9  ;;  %4436 = vmatprep.subr.bf16.mxu0 %v4944_v10  ;;  %v4960_v26 = vld [vmem:[%s5341_s13 + $0x48] sm:$0xff]   ;;  %v4964_v31 = vld [vmem:[%s5341_s13 + $0x40] sm:$0xff]   ;;  %v4969_v37 = vld [vmem:[%s5341_s13 + $0x178] sm:$0xff]  }
  0x20   : > { %4458 = vmatprep.subr.bf16.mxu1 %v4945_v11  ;;  %v4961_v27 = vld [vmem:[%s5341_s13 + $0xc8] sm:$0xff]   ;;  %v4965_v32 = vld [vmem:[%s5341_s13 + $0xc0] sm:$0xff]   ;;  %v4970_v40 = vld [vmem:[%s5341_s13 + $0x1f8] sm:$0xff]  }
  0x21   : > { %v4962_v28 = vld [vmem:[%s5341_s13 + $0x8] sm:$0xff]   ;;  %v4966_v33 = vld [vmem:[%s5341_s13] sm:$0xff]   ;;  %v4971_v48 = vld [vmem:[%s5341_s13 + $0x138] sm:$0xff]  }
  0x22   : > { %4437 = vmatpush3.bf16.msra.mxu0 %v4946_v12  ;;  %v4963_v29 = vld [vmem:[%s5341_s13 + $0x88] sm:$0xff]   ;;  %v4967_v34 = vld [vmem:[%s5341_s13 + $0x80] sm:$0xff]   ;;  %v4972_v51 = vld [vmem:[%s5341_s13 + $0x1b8] sm:$0xff]  }
  0x23   : > { %4459 = vmatpush3.bf16.msra.mxu1 %v4947_v13  ;;  %4438 = vmatprep.subr.bf16.mxu0 %v4948_v14  ;;  %v297_v36 = vld [vmem:[%s5336_s9] sm:$0xff]  ;;  %v4973_v54 = vld [vmem:[%s5341_s13 + $0x170] sm:$0xff]   ;;  %v4977_v58 = vld [vmem:[%s5341_s13 + $0x168] sm:$0xff]  }
  0x24   : > { %4460 = vmatprep.subr.bf16.mxu1 %v4949_v15  ;;  %v317_v42 = vcombine.high %v297_v36, %v297_v36  ;;  %v324_v44 = vrot.slane %v297_v36, %v5379_v43  ;;  %v4974_v55 = vld [vmem:[%s5341_s13 + $0x1f0] sm:$0xff]   ;;  %v4978_v59 = vld [vmem:[%s5341_s13 + $0x1e8] sm:$0xff]   ;;  %v4981_v62 = vld [vmem:[%s5341_s13 + $0x160] sm:$0xff]  }
  0x25   : > { %v4975_v56 = vld [vmem:[%s5341_s13 + $0x130] sm:$0xff]   ;;  %v4979_v60 = vld [vmem:[%s5341_s13 + $0x128] sm:$0xff]   ;;  %v4982_v63 = vld [vmem:[%s5341_s13 + $0x1e0] sm:$0xff]  }
  0x26   : > { %4439 = vmatpush3.bf16.msra.mxu0 %v4950_v16  ;;  %v331_v45 = vrot.slane %v317_v42, %v5379_v43  ;;  %v332_v46 = vcombine.high %v324_v44, %v324_v44  ;;  %v527_v49 = vpack.c.bf16 %v324_v44, %v324_v44  ;;  %v4976_v57 = vld [vmem:[%s5341_s13 + $0x1b0] sm:$0xff]   ;;  %v4980_v61 = vld [vmem:[%s5341_s13 + $0x1a8] sm:$0xff]   ;;  %v4983_v0 = vld [vmem:[%s5341_s13 + $0x120] sm:$0xff]  }
  0x27   : > { %4461 = vmatpush3.bf16.msra.mxu1 %v4951_v17  ;;  %4440 = vmatprep.subr.bf16.mxu0 %v4952_v18  ;;  %v4984_v1 = vld [vmem:[%s5341_s13 + $0x1a0] sm:$0xff]   ;;  %v4985_v2 = vld [vmem:[%s5341_s13 + $0x158] sm:$0xff]   ;;  %v4989_v6 = vld [vmem:[%s5341_s13 + $0x150] sm:$0xff]  }
  0x28   : > { %4462 = vmatprep.subr.bf16.mxu1 %v4953_v19  ;;  %v333_v47 = vcombine.high %v331_v45, %v331_v45  ;;  %v529_v50 = vpack.c.bf16 %v331_v45, %v331_v45  ;;  %v528_v52 = vpack.c.bf16 %v332_v46, %v332_v46  ;;  %v4986_v3 = vld [vmem:[%s5341_s13 + $0x1d8] sm:$0xff]   ;;  %v4990_v7 = vld [vmem:[%s5341_s13 + $0x1d0] sm:$0xff]   ;;  %v4993_v10 = vld [vmem:[%s5341_s13 + $0x148] sm:$0xff]  }
  0x29   : > { %v4987_v4 = vld [vmem:[%s5341_s13 + $0x118] sm:$0xff]   ;;  %v4991_v8 = vld [vmem:[%s5341_s13 + $0x110] sm:$0xff]   ;;  %v4994_v11 = vld [vmem:[%s5341_s13 + $0x1c8] sm:$0xff]  }
  0x2a   : > { %4441 = vmatpush3.bf16.msra.mxu0 %v4954_v20  ;;  %v530_v53 = vpack.c.bf16 %v333_v47, %v333_v47  ;;  %3159 = vmatprep.mubr.bf16.mxu0 %v528_v52  ;;  %v4988_v5 = vld [vmem:[%s5341_s13 + $0x198] sm:$0xff]   ;;  %v4992_v9 = vld [vmem:[%s5341_s13 + $0x190] sm:$0xff]   ;;  %v298_v12 = vld [vmem:[%s5336_s9 + $0x8] sm:$0xff] }
  0x2b   : > { %4463 = vmatpush3.bf16.msra.mxu1 %v4955_v21  ;;  %4442 = vmatprep.subr.bf16.mxu0 %v4956_v22  ;;  %v4995_v13 = vld [vmem:[%s5341_s13 + $0x108] sm:$0xff]   ;;  %v341_v14 = vrot.slane %v298_v12, %v5379_v43  ;;  %v334_v15 = vcombine.high %v298_v12, %v298_v12  ;;  %v4997_v17 = vld [vmem:[%s5341_s13 + $0x140] sm:$0xff]   ;;  %v5009_v35 = vld [vmem:[%s5341_s13 + $0x2b0] sm:$0xff]  }
  0x2c   : > { %4464 = vmatprep.subr.bf16.mxu1 %v4957_v23  ;;  %3199 = vmatprep.mubr.bf16.mxu1 %v530_v53  ;;  %v4996_v16 = vld [vmem:[%s5341_s13 + $0x188] sm:$0xff]   ;;  %v4998_v20 = vld [vmem:[%s5341_s13 + $0x1c0] sm:$0xff]   ;;  %v5018_v45 = vld [vmem:[%s5341_s13 + $0x258] sm:$0xff]  }
  0x2d   : > { %v349_v18 = vcombine.high %v341_v14, %v341_v14  ;;  %v348_v19 = vrot.slane %v334_v15, %v5379_v43  ;;  %v4999_v21 = vld [vmem:[%s5341_s13 + $0x100] sm:$0xff]   ;;  %v5010_v36 = vld [vmem:[%s5341_s13 + $0x268] sm:$0xff]   ;;  %v5019_v46 = vld [vmem:[%s5341_s13 + $0x2d8] sm:$0xff]  }
  0x2e   : > { %4443 = vmatpush3.bf16.msra.mxu0 %v4958_v24  ;;  %v5000_v24 = vld [vmem:[%s5341_s13 + $0x180] sm:$0xff]   ;;  %v5012_v38 = vld [vmem:[%s5341_s13 + $0x228] sm:$0xff]   ;;  %v5020_v47 = vld [vmem:[%s5341_s13 + $0x218] sm:$0xff]  }
  0x2f   : > { %4465 = vmatpush3.bf16.msra.mxu1 %v4959_v25  ;;  %4444 = vmatprep.subr.bf16.mxu0 %v4960_v26  ;;  %v532_v22 = vpack.c.bf16 %v349_v18, %v349_v18  ;;  %v350_v23 = vcombine.high %v348_v19, %v348_v19  ;;  %v5002_v26 = vld [vmem:[%s5341_s13 + $0x278] sm:$0xff]   ;;  %v533_v30 = vpack.c.bf16 %v348_v19, %v348_v19  ;;  %v5013_v39 = vld [vmem:[%s5341_s13 + $0x2a8] sm:$0xff]   ;;  %v5015_v41 = vld [vmem:[%s5341_s13 + $0x2e0] sm:$0xff]  }
  0x30   : > { %4466 = vmatprep.subr.bf16.mxu1 %v4961_v27  ;;  %v5003_v27 = vld [vmem:[%s5341_s13 + $0x2f8] sm:$0xff]   ;;  %v5016_v42 = vld [vmem:[%s5341_s13 + $0x220] sm:$0xff]   ;;  %v5025_v52 = vld [vmem:[%s5341_s13 + $0x290] sm:$0xff]  }
  0x31   : > { %v534_v25 = vpack.c.bf16 %v350_v23, %v350_v23  ;;  %v5017_v44 = vld [vmem:[%s5341_s13 + $0x2a0] sm:$0xff]   ;;  %v5026_v53 = vld [vmem:[%s5341_s13 + $0x248] sm:$0xff]   ;;  %v5040_v12 = vld [vmem:[%s5341_s13 + $0x3f0] sm:$0xff]  }
  0x32   : > { %4445 = vmatpush3.bf16.msra.mxu0 %v4962_v28  ;;  %v5004_v28 = vld [vmem:[%s5341_s13 + $0x238] sm:$0xff]   ;;  %v5043_v15 = vld [vmem:[%s5341_s13 + $0x368] sm:$0xff]   ;;  %v5047_v19 = vld [vmem:[%s5341_s13 + $0x360] sm:$0xff]  }
  0x33   : > { %4467 = vmatpush3.bf16.msra.mxu1 %v4963_v29  ;;  %4446 = vmatprep.subr.bf16.mxu0 %v4964_v31  ;;  %v531_v29 = vpack.c.bf16 %v341_v14, %v341_v14  ;;  %v5005_v31 = vld [vmem:[%s5341_s13 + $0x2b8] sm:$0xff]   ;;  %v5042_v14 = vld [vmem:[%s5341_s13 + $0x3b0] sm:$0xff]   ;;  %v5046_v18 = vld [vmem:[%s5341_s13 + $0x3a8] sm:$0xff]  }
  0x34   : > { %4468 = vmatprep.subr.bf16.mxu1 %v4965_v32  ;;  %v5006_v32 = vld [vmem:[%s5341_s13 + $0x270] sm:$0xff]   ;;  %v5051_v23 = vld [vmem:[%s5341_s13 + $0x358] sm:$0xff]  }
  0x36   : > { %4447 = vmatpush3.bf16.msra.mxu0 %v4966_v33  ;;  %v5007_v33 = vld [vmem:[%s5341_s13 + $0x2f0] sm:$0xff]  }
  0x37   : > { %4469 = vmatpush3.bf16.msra.mxu1 %v4967_v34  ;;  %4476 = vmatprep.subr.bf16.mxu0 %v4969_v37  ;;  %v5008_v34 = vld [vmem:[%s5341_s13 + $0x230] sm:$0xff]   ;;  %v5011_v37 = vld [vmem:[%s5341_s13 + $0x2e8] sm:$0xff]  }
  0x38   : > { %4498 = vmatprep.subr.bf16.mxu1 %v4970_v40  ;;  %v5014_v40 = vld [vmem:[%s5341_s13 + $0x260] sm:$0xff]  }
  0x39   : > { %3160 = vmatmul.mubr.bf16.vlgmr.msra.gmra.mxu0 %v527_v49  ;;  %v5022_v49 = vld [vmem:[%s5341_s13 + $0x250] sm:$0xff]  }
  0x3a   : > { %3200 = vmatmul.mubr.bf16.vlgmr.msra.gmra.mxu1 %v529_v50  ;;  %4477 = vmatpush3.bf16.msra.mxu0 %v4971_v48  ;;  %v5021_v48 = vld [vmem:[%s5341_s13 + $0x298] sm:$0xff]   ;;  %v5023_v50 = vld [vmem:[%s5341_s13 + $0x2d0] sm:$0xff]  }
  0x3b   : > { %4499 = vmatpush3.bf16.msra.mxu1 %v4972_v51  ;;  %4478 = vmatprep.subr.bf16.mxu0 %v4973_v54  ;;  %v5024_v51 = vld [vmem:[%s5341_s13 + $0x210] sm:$0xff]   ;;  %v5027_v54 = vld [vmem:[%s5341_s13 + $0x2c8] sm:$0xff]  }
  0x3c   : > { %4500 = vmatprep.subr.bf16.mxu1 %v4974_v55  ;;  %3239 = vmatprep.mubr.bf16.mxu0 %v532_v22  ;;  %v299_v55 = vld [vmem:[%s5336_s9 + $0x10] sm:$0xff]  ;;  %v5050_v22 = vld [vmem:[%s5341_s13 + $0x3a0] sm:$0xff]  }
  0x3d   : > { %3279 = vmatprep.mubr.bf16.mxu1 %v534_v25  ;;  %v5053_v25 = vld [vmem:[%s5341_s13 + $0x318] sm:$0xff]  }
  0x3e   : > { %4479 = vmatpush3.bf16.msra.mxu0 %v4975_v56  ;;  %v5028_v56 = vld [vmem:[%s5341_s13 + $0x208] sm:$0xff]  }
  0x3f   : > { %4501 = vmatpush3.bf16.msra.mxu1 %v4976_v57  ;;  %4480 = vmatprep.subr.bf16.mxu0 %v4977_v58  ;;  %v358_v57 = vrot.slane %v299_v55, %v5379_v43  ;;  %v351_v58 = vcombine.high %v299_v55, %v299_v55  ;;  %v5073_v55 = vld [vmem:[%s5341_s13 + $0x4f0] sm:$0xff]  }
  0x40   : > { %4502 = vmatprep.subr.bf16.mxu1 %v4978_v59  ;;  %v5029_v59 = vld [vmem:[%s5341_s13 + $0x288] sm:$0xff]  }
  0x42   : > { %4481 = vmatpush3.bf16.msra.mxu0 %v4979_v60  ;;  %v5030_v60 = vld [vmem:[%s5341_s13 + $0x240] sm:$0xff]  }
  0x43   : > { %4503 = vmatpush3.bf16.msra.mxu1 %v4980_v61  ;;  %4482 = vmatprep.subr.bf16.mxu0 %v4981_v62  ;;  %v366_v61 = vcombine.high %v358_v57, %v358_v57  ;;  %v365_v62 = vrot.slane %v351_v58, %v5379_v43  ;;  %v5076_v58 = vld [vmem:[%s5341_s13 + $0x468] sm:$0xff]  }
  0x44   : > { %4504 = vmatprep.subr.bf16.mxu1 %v4982_v63  ;;  %v5031_v63 = vld [vmem:[%s5341_s13 + $0x2c0] sm:$0xff]  }
  0x46   : > { %4483 = vmatpush3.bf16.msra.mxu0 %v4983_v0  ;;  %v5032_v0 = vld [vmem:[%s5341_s13 + $0x200] sm:$0xff]  }
  0x47   : > { %4505 = vmatpush3.bf16.msra.mxu1 %v4984_v1  ;;  %4484 = vmatprep.subr.bf16.mxu0 %v4985_v2  ;;  %v536_v1 = vpack.c.bf16 %v366_v61, %v366_v61  ;;  %v367_v2 = vcombine.high %v365_v62, %v365_v62  ;;  %v5079_v61 = vld [vmem:[%s5341_s13 + $0x4a8] sm:$0xff]  }
  0x48   : > { %4506 = vmatprep.subr.bf16.mxu1 %v4986_v3  ;;  %v5033_v3 = vld [vmem:[%s5341_s13 + $0x280] sm:$0xff]  }
  0x4a   : > { %4485 = vmatpush3.bf16.msra.mxu0 %v4987_v4  ;;  %v538_v4 = vpack.c.bf16 %v367_v2, %v367_v2  ;;  %v5084_v2 = vld [vmem:[%s5341_s13 + $0x458] sm:$0xff]  }
  0x4b   : > { %4507 = vmatpush3.bf16.msra.mxu1 %v4988_v5  ;;  %4486 = vmatprep.subr.bf16.mxu0 %v4989_v6  ;;  %v5035_v5 = vld [vmem:[%s5341_s13 + $0x378] sm:$0xff]  }
  0x4c   : > { %4508 = vmatprep.subr.bf16.mxu1 %v4990_v7  ;;  %v5036_v6 = vld [vmem:[%s5341_s13 + $0x3f8] sm:$0xff]  }
  0x4d   : > { %v5037_v7 = vld [vmem:[%s5341_s13 + $0x338] sm:$0xff]  }
  0x4e   : > { %4487 = vmatpush3.bf16.msra.mxu0 %v4991_v8  ;;  %v535_v8 = vpack.c.bf16 %v358_v57, %v358_v57  ;;  %v5075_v57 = vld [vmem:[%s5341_s13 + $0x4b0] sm:$0xff]  }
  0x4f   : > { %4509 = vmatpush3.bf16.msra.mxu1 %v4992_v9  ;;  %4488 = vmatprep.subr.bf16.mxu0 %v4993_v10  ;;  %v537_v9 = vpack.c.bf16 %v365_v62, %v365_v62  ;;  %v5038_v10 = vld [vmem:[%s5341_s13 + $0x3b8] sm:$0xff]   ;;  %v5080_v62 = vld [vmem:[%s5341_s13 + $0x460] sm:$0xff]  }
  0x50   : > { %4510 = vmatprep.subr.bf16.mxu1 %v4994_v11  ;;  %v5039_v11 = vld [vmem:[%s5341_s13 + $0x370] sm:$0xff]  }
  0x52   : > { %4489 = vmatpush3.bf16.msra.mxu0 %v4995_v13  ;;  %v5041_v13 = vld [vmem:[%s5341_s13 + $0x330] sm:$0xff]  }
  0x53   : > { %4511 = vmatpush3.bf16.msra.mxu1 %v4996_v16  ;;  %4490 = vmatprep.subr.bf16.mxu0 %v4997_v17  ;;  %v5044_v16 = vld [vmem:[%s5341_s13 + $0x3e8] sm:$0xff]  }
  0x54   : > { %4512 = vmatprep.subr.bf16.mxu1 %v4998_v20  ;;  %v5045_v17 = vld [vmem:[%s5341_s13 + $0x328] sm:$0xff]   ;;  %v5048_v20 = vld [vmem:[%s5341_s13 + $0x3e0] sm:$0xff]  }
  0x56   : > { %4491 = vmatpush3.bf16.msra.mxu0 %v4999_v21  ;;  %v5049_v21 = vld [vmem:[%s5341_s13 + $0x320] sm:$0xff]  }
  0x57   : > { %4513 = vmatpush3.bf16.msra.mxu1 %v5000_v24  ;;  %4520 = vmatprep.subr.bf16.mxu0 %v5002_v26  ;;  %v5052_v24 = vld [vmem:[%s5341_s13 + $0x3d8] sm:$0xff]  }
  0x58   : > { %4542 = vmatprep.subr.bf16.mxu1 %v5003_v27  ;;  %v5054_v26 = vld [vmem:[%s5341_s13 + $0x398] sm:$0xff]   ;;  %v5055_v27 = vld [vmem:[%s5341_s13 + $0x350] sm:$0xff]  }
  0x59   : > { %3240 = vmatmul.mubr.bf16.vlgmr.msra.gmra.mxu0 %v531_v29  ;;  %v5057_v29 = vld [vmem:[%s5341_s13 + $0x310] sm:$0xff]  }
  0x5a   : > { %3280 = vmatmul.mubr.bf16.vlgmr.msra.gmra.mxu1 %v533_v30  ;;  %4521 = vmatpush3.bf16.msra.mxu0 %v5004_v28  ;;  %v5056_v28 = vld [vmem:[%s5341_s13 + $0x3d0] sm:$0xff]  }
  0x5b   : > { %4543 = vmatpush3.bf16.msra.mxu1 %v5005_v31  ;;  %4522 = vmatprep.subr.bf16.mxu0 %v5006_v32  ;;  %v5058_v30 = vld [vmem:[%s5341_s13 + $0x390] sm:$0xff]   ;;  %v5059_v31 = vld [vmem:[%s5341_s13 + $0x348] sm:$0xff]  }
  0x5c   : > { %4544 = vmatprep.subr.bf16.mxu1 %v5007_v33  ;;  %3319 = vmatprep.mubr.bf16.mxu0 %v536_v1  ;;  %v5060_v32 = vld [vmem:[%s5341_s13 + $0x3c8] sm:$0xff]   ;;  %v5083_v1 = vld [vmem:[%s5341_s13 + $0x4a0] sm:$0xff]  }
  0x5d   : > { %3359 = vmatprep.mubr.bf16.mxu1 %v538_v4  ;;  %v5061_v33 = vld [vmem:[%s5341_s13 + $0x308] sm:$0xff]   ;;  %v5086_v4 = vld [vmem:[%s5341_s13 + $0x418] sm:$0xff]  }
  0x5e   : > { %4523 = vmatpush3.bf16.msra.mxu0 %v5008_v34  ;;  %v300_v34 = vld [vmem:[%s5336_s9 + $0x18] sm:$0xff] }
  0x5f   : > { %4545 = vmatpush3.bf16.msra.mxu1 %v5009_v35  ;;  %4524 = vmatprep.subr.bf16.mxu0 %v5010_v36  ;;  %v5062_v35 = vld [vmem:[%s5341_s13 + $0x388] sm:$0xff]   ;;  %v375_v36 = vrot.slane %v300_v34, %v5379_v43 }
  0x60   : > { %4546 = vmatprep.subr.bf16.mxu1 %v5011_v37  ;;  %v368_v37 = vcombine.high %v300_v34, %v300_v34  ;;  %v5107_v34 = vld [vmem:[%s5341_s13 + $0x530] sm:$0xff]  }
  0x62   : > { %4525 = vmatpush3.bf16.msra.mxu0 %v5012_v38  ;;  %v5063_v38 = vld [vmem:[%s5341_s13 + $0x340] sm:$0xff]  }
  0x63   : > { %4547 = vmatpush3.bf16.msra.mxu1 %v5013_v39  ;;  %4526 = vmatprep.subr.bf16.mxu0 %v5014_v40  ;;  %v5064_v39 = vld [vmem:[%s5341_s13 + $0x3c0] sm:$0xff]   ;;  %v383_v40 = vcombine.high %v375_v36, %v375_v36 }
  0x64   : > { %4548 = vmatprep.subr.bf16.mxu1 %v5015_v41  ;;  %v382_v41 = vrot.slane %v368_v37, %v5379_v43  ;;  %v5110_v37 = vld [vmem:[%s5341_s13 + $0x5e8] sm:$0xff]  }
  0x66   : > { %4527 = vmatpush3.bf16.msra.mxu0 %v5016_v42  ;;  %v5065_v42 = vld [vmem:[%s5341_s13 + $0x300] sm:$0xff]  }
  0x67   : > { %4549 = vmatpush3.bf16.msra.mxu1 %v5017_v44  ;;  %4528 = vmatprep.subr.bf16.mxu0 %v5018_v45  ;;  %v5066_v44 = vld [vmem:[%s5341_s13 + $0x380] sm:$0xff]   ;;  %v540_v45 = vpack.c.bf16 %v383_v40, %v383_v40 }
  0x68   : > { %4550 = vmatprep.subr.bf16.mxu1 %v5019_v46  ;;  %v384_v46 = vcombine.high %v382_v41, %v382_v41  ;;  %v5113_v40 = vld [vmem:[%s5341_s13 + $0x560] sm:$0xff]  }
  0x6a   : > { %4529 = vmatpush3.bf16.msra.mxu0 %v5020_v47  ;;  %v5068_v47 = vld [vmem:[%s5341_s13 + $0x478] sm:$0xff]  }
  0x6b   : > { %4551 = vmatpush3.bf16.msra.mxu1 %v5021_v48  ;;  %4530 = vmatprep.subr.bf16.mxu0 %v5022_v49  ;;  %v542_v48 = vpack.c.bf16 %v384_v46, %v384_v46  ;;  %v5069_v49 = vld [vmem:[%s5341_s13 + $0x4f8] sm:$0xff]  }
  0x6c   : > { %4552 = vmatprep.subr.bf16.mxu1 %v5023_v50  ;;  %v5070_v50 = vld [vmem:[%s5341_s13 + $0x438] sm:$0xff]  }
  0x6d   : > { %v5118_v46 = vld [vmem:[%s5341_s13 + $0x5d8] sm:$0xff]  }
  0x6e   : > { %4531 = vmatpush3.bf16.msra.mxu0 %v5024_v51  ;;  %v539_v51 = vpack.c.bf16 %v375_v36, %v375_v36  ;;  %v5109_v36 = vld [vmem:[%s5341_s13 + $0x568] sm:$0xff]  }
  0x6f   : > { %4553 = vmatpush3.bf16.msra.mxu1 %v5025_v52  ;;  %4532 = vmatprep.subr.bf16.mxu0 %v5026_v53  ;;  %v541_v52 = vpack.c.bf16 %v382_v41, %v382_v41  ;;  %v5071_v53 = vld [vmem:[%s5341_s13 + $0x4b8] sm:$0xff]   ;;  %v5114_v41 = vld [vmem:[%s5341_s13 + $0x5e0] sm:$0xff]  }
  0x70   : > { %4554 = vmatprep.subr.bf16.mxu1 %v5027_v54  ;;  %v5072_v54 = vld [vmem:[%s5341_s13 + $0x470] sm:$0xff]  }
  0x72   : > { %4533 = vmatpush3.bf16.msra.mxu0 %v5028_v56  ;;  %v5074_v56 = vld [vmem:[%s5341_s13 + $0x430] sm:$0xff]  }
  0x73   : > { %4555 = vmatpush3.bf16.msra.mxu1 %v5029_v59  ;;  %4534 = vmatprep.subr.bf16.mxu0 %v5030_v60  ;;  %v5077_v59 = vld [vmem:[%s5341_s13 + $0x4e8] sm:$0xff]  }
  0x74   : > { %4556 = vmatprep.subr.bf16.mxu1 %v5031_v63  ;;  %v5078_v60 = vld [vmem:[%s5341_s13 + $0x428] sm:$0xff]   ;;  %v5081_v63 = vld [vmem:[%s5341_s13 + $0x4e0] sm:$0xff]  }
  0x76   : > { %4535 = vmatpush3.bf16.msra.mxu0 %v5032_v0  ;;  %v5082_v0 = vld [vmem:[%s5341_s13 + $0x420] sm:$0xff]  }
  0x77   : > { %4557 = vmatpush3.bf16.msra.mxu1 %v5033_v3  ;;  %4564 = vmatprep.subr.bf16.mxu0 %v5035_v5  ;;  %v5085_v3 = vld [vmem:[%s5341_s13 + $0x4d8] sm:$0xff]  }
  0x78   : > { %4586 = vmatprep.subr.bf16.mxu1 %v5036_v6  ;;  %v5087_v5 = vld [vmem:[%s5341_s13 + $0x498] sm:$0xff]   ;;  %v5088_v6 = vld [vmem:[%s5341_s13 + $0x450] sm:$0xff]  }
  0x79   : > { %3320 = vmatmul.mubr.bf16.vlgmr.msra.gmra.mxu0 %v535_v8  ;;  %v5090_v8 = vld [vmem:[%s5341_s13 + $0x410] sm:$0xff]  }
  0x7a   : > { %3360 = vmatmul.mubr.bf16.vlgmr.msra.gmra.mxu1 %v537_v9  ;;  %4565 = vmatpush3.bf16.msra.mxu0 %v5037_v7  ;;  %v5089_v7 = vld [vmem:[%s5341_s13 + $0x4d0] sm:$0xff]  }
  0x7b   : > { %4587 = vmatpush3.bf16.msra.mxu1 %v5038_v10  ;;  %4566 = vmatprep.subr.bf16.mxu0 %v5039_v11  ;;  %v5091_v9 = vld [vmem:[%s5341_s13 + $0x490] sm:$0xff]   ;;  %v5092_v10 = vld [vmem:[%s5341_s13 + $0x448] sm:$0xff]  }
  0x7c   : > { %4588 = vmatprep.subr.bf16.mxu1 %v5040_v12  ;;  %3399 = vmatprep.mubr.bf16.mxu0 %v540_v45  ;;  %v5093_v11 = vld [vmem:[%s5341_s13 + $0x4c8] sm:$0xff]   ;;  %v5117_v45 = vld [vmem:[%s5341_s13 + $0x558] sm:$0xff]  }
  0x7d   : > { %3439 = vmatprep.mubr.bf16.mxu1 %v542_v48  ;;  %v5094_v12 = vld [vmem:[%s5341_s13 + $0x408] sm:$0xff]   ;;  %v5120_v48 = vld [vmem:[%s5341_s13 + $0x598] sm:$0xff]  }
  0x7e   : > { %4567 = vmatpush3.bf16.msra.mxu0 %v5041_v13  ;;  %v301_v13 = vld [vmem:[%s5336_s9 + $0x20] sm:$0xff] }
  0x7f   : > { %4589 = vmatpush3.bf16.msra.mxu1 %v5042_v14  ;;  %4568 = vmatprep.subr.bf16.mxu0 %v5043_v15  ;;  %v5095_v14 = vld [vmem:[%s5341_s13 + $0x488] sm:$0xff]   ;;  %v392_v15 = vrot.slane %v301_v13, %v5379_v43 }
  0x80   : > { %4590 = vmatprep.subr.bf16.mxu1 %v5044_v16  ;;  %v385_v16 = vcombine.high %v301_v13, %v301_v13  ;;  %v5140_v13 = vld [vmem:[%s5341_s13 + $0x630] sm:$0xff]  }
  0x82   : > { %4569 = vmatpush3.bf16.msra.mxu0 %v5045_v17  ;;  %v5096_v17 = vld [vmem:[%s5341_s13 + $0x440] sm:$0xff]  }
  0x83   : > { %4591 = vmatpush3.bf16.msra.mxu1 %v5046_v18  ;;  %4570 = vmatprep.subr.bf16.mxu0 %v5047_v19  ;;  %v5097_v18 = vld [vmem:[%s5341_s13 + $0x4c0] sm:$0xff]   ;;  %v400_v19 = vcombine.high %v392_v15, %v392_v15 }
  0x84   : > { %4592 = vmatprep.subr.bf16.mxu1 %v5048_v20  ;;  %v399_v20 = vrot.slane %v385_v16, %v5379_v43  ;;  %v5143_v16 = vld [vmem:[%s5341_s13 + $0x6e8] sm:$0xff]  }
  0x86   : > { %4571 = vmatpush3.bf16.msra.mxu0 %v5049_v21  ;;  %v5098_v21 = vld [vmem:[%s5341_s13 + $0x400] sm:$0xff]  }
  0x87   : > { %4593 = vmatpush3.bf16.msra.mxu1 %v5050_v22  ;;  %4572 = vmatprep.subr.bf16.mxu0 %v5051_v23  ;;  %v5099_v22 = vld [vmem:[%s5341_s13 + $0x480] sm:$0xff]   ;;  %v544_v23 = vpack.c.bf16 %v400_v19, %v400_v19 }
  0x88   : > { %4594 = vmatprep.subr.bf16.mxu1 %v5052_v24  ;;  %v401_v24 = vcombine.high %v399_v20, %v399_v20  ;;  %v5146_v19 = vld [vmem:[%s5341_s13 + $0x660] sm:$0xff]  }
  0x8a   : > { %4573 = vmatpush3.bf16.msra.mxu0 %v5053_v25  ;;  %v5101_v25 = vld [vmem:[%s5341_s13 + $0x578] sm:$0xff]  }
  0x8b   : > { %4595 = vmatpush3.bf16.msra.mxu1 %v5054_v26  ;;  %4574 = vmatprep.subr.bf16.mxu0 %v5055_v27  ;;  %v546_v26 = vpack.c.bf16 %v401_v24, %v401_v24  ;;  %v5102_v27 = vld [vmem:[%s5341_s13 + $0x5f8] sm:$0xff]  }
  0x8c   : > { %4596 = vmatprep.subr.bf16.mxu1 %v5056_v28  ;;  %v5103_v28 = vld [vmem:[%s5341_s13 + $0x538] sm:$0xff]  }
  0x8d   : > { %v5151_v24 = vld [vmem:[%s5341_s13 + $0x6d8] sm:$0xff]  }
  0x8e   : > { %4575 = vmatpush3.bf16.msra.mxu0 %v5057_v29  ;;  %v543_v29 = vpack.c.bf16 %v392_v15, %v392_v15  ;;  %v5142_v15 = vld [vmem:[%s5341_s13 + $0x668] sm:$0xff]  }
  0x8f   : > { %4597 = vmatpush3.bf16.msra.mxu1 %v5058_v30  ;;  %4576 = vmatprep.subr.bf16.mxu0 %v5059_v31  ;;  %v545_v30 = vpack.c.bf16 %v399_v20, %v399_v20  ;;  %v5104_v31 = vld [vmem:[%s5341_s13 + $0x5b8] sm:$0xff]   ;;  %v5147_v20 = vld [vmem:[%s5341_s13 + $0x6e0] sm:$0xff]  }
  0x90   : > { %4598 = vmatprep.subr.bf16.mxu1 %v5060_v32  ;;  %v5105_v32 = vld [vmem:[%s5341_s13 + $0x570] sm:$0xff]  }
  0x92   : > { %4577 = vmatpush3.bf16.msra.mxu0 %v5061_v33  ;;  %v5106_v33 = vld [vmem:[%s5341_s13 + $0x5f0] sm:$0xff]  }
  0x93   : > { %4599 = vmatpush3.bf16.msra.mxu1 %v5062_v35  ;;  %4578 = vmatprep.subr.bf16.mxu0 %v5063_v38  ;;  %v5108_v35 = vld [vmem:[%s5341_s13 + $0x5b0] sm:$0xff]   ;;  %v5111_v38 = vld [vmem:[%s5341_s13 + $0x528] sm:$0xff]  }
  0x94   : > { %4600 = vmatprep.subr.bf16.mxu1 %v5064_v39  ;;  %v5112_v39 = vld [vmem:[%s5341_s13 + $0x5a8] sm:$0xff]  }
  0x96   : > { %4579 = vmatpush3.bf16.msra.mxu0 %v5065_v42  ;;  %v5115_v42 = vld [vmem:[%s5341_s13 + $0x520] sm:$0xff]  }
  0x97   : > { %4601 = vmatpush3.bf16.msra.mxu1 %v5066_v44  ;;  %4608 = vmatprep.subr.bf16.mxu0 %v5068_v47  ;;  %v5116_v44 = vld [vmem:[%s5341_s13 + $0x5a0] sm:$0xff]   ;;  %v5119_v47 = vld [vmem:[%s5341_s13 + $0x518] sm:$0xff]  }
  0x98   : > { %4630 = vmatprep.subr.bf16.mxu1 %v5069_v49  ;;  %v5121_v49 = vld [vmem:[%s5341_s13 + $0x550] sm:$0xff]  }
  0x99   : > { %3400 = vmatmul.mubr.bf16.vlgmr.msra.gmra.mxu0 %v539_v51  ;;  %v5123_v51 = vld [vmem:[%s5341_s13 + $0x510] sm:$0xff]  }
  0x9a   : > { %3440 = vmatmul.mubr.bf16.vlgmr.msra.gmra.mxu1 %v541_v52  ;;  %4609 = vmatpush3.bf16.msra.mxu0 %v5070_v50  ;;  %v5122_v50 = vld [vmem:[%s5341_s13 + $0x5d0] sm:$0xff]  }
  0x9b   : > { %4631 = vmatpush3.bf16.msra.mxu1 %v5071_v53  ;;  %4610 = vmatprep.subr.bf16.mxu0 %v5072_v54  ;;  %v5124_v52 = vld [vmem:[%s5341_s13 + $0x590] sm:$0xff]   ;;  %v5125_v53 = vld [vmem:[%s5341_s13 + $0x548] sm:$0xff]  }
  0x9c   : > { %4632 = vmatprep.subr.bf16.mxu1 %v5073_v55  ;;  %3479 = vmatprep.mubr.bf16.mxu0 %v544_v23  ;;  %v5126_v54 = vld [vmem:[%s5341_s13 + $0x5c8] sm:$0xff]   ;;  %v5150_v23 = vld [vmem:[%s5341_s13 + $0x658] sm:$0xff]  }
  0x9d   : > { %3519 = vmatprep.mubr.bf16.mxu1 %v546_v26  ;;  %v5127_v55 = vld [vmem:[%s5341_s13 + $0x508] sm:$0xff]   ;;  %v5153_v26 = vld [vmem:[%s5341_s13 + $0x698] sm:$0xff]  }
  0x9e   : > { %4611 = vmatpush3.bf16.msra.mxu0 %v5074_v56  ;;  %v302_v56 = vld [vmem:[%s5336_s9 + $0x28] sm:$0xff] }
  0x9f   : > { %4633 = vmatpush3.bf16.msra.mxu1 %v5075_v57  ;;  %4612 = vmatprep.subr.bf16.mxu0 %v5076_v58  ;;  %v5128_v57 = vld [vmem:[%s5341_s13 + $0x588] sm:$0xff]   ;;  %v409_v58 = vrot.slane %v302_v56, %v5379_v43 }
  0xa0   : > { %4634 = vmatprep.subr.bf16.mxu1 %v5077_v59  ;;  %v402_v59 = vcombine.high %v302_v56, %v302_v56  ;;  %v5173_v56 = vld [vmem:[%s5341_s13 + $0x730] sm:$0xff]  }
  0xa2   : > { %4613 = vmatpush3.bf16.msra.mxu0 %v5078_v60  ;;  %v5129_v60 = vld [vmem:[%s5341_s13 + $0x540] sm:$0xff]  }
  0xa3   : > { %4635 = vmatpush3.bf16.msra.mxu1 %v5079_v61  ;;  %4614 = vmatprep.subr.bf16.mxu0 %v5080_v62  ;;  %v5130_v61 = vld [vmem:[%s5341_s13 + $0x5c0] sm:$0xff]   ;;  %v417_v62 = vcombine.high %v409_v58, %v409_v58 }
  0xa4   : > { %4636 = vmatprep.subr.bf16.mxu1 %v5081_v63  ;;  %v416_v63 = vrot.slane %v402_v59, %v5379_v43  ;;  %v5174_v59 = vld [vmem:[%s5341_s13 + $0x7b0] sm:$0xff]  }
  0xa6   : > { %4615 = vmatpush3.bf16.msra.mxu0 %v5082_v0  ;;  %v5131_v0 = vld [vmem:[%s5341_s13 + $0x500] sm:$0xff]  }
  0xa7   : > { %4637 = vmatpush3.bf16.msra.mxu1 %v5083_v1  ;;  %4616 = vmatprep.subr.bf16.mxu0 %v5084_v2  ;;  %v5132_v1 = vld [vmem:[%s5341_s13 + $0x580] sm:$0xff]   ;;  %v548_v2 = vpack.c.bf16 %v417_v62, %v417_v62 }
  0xa8   : > { %4638 = vmatprep.subr.bf16.mxu1 %v5085_v3  ;;  %v418_v3 = vcombine.high %v416_v63, %v416_v63 }
  0xaa   : > { %4617 = vmatpush3.bf16.msra.mxu0 %v5086_v4  ;;  %v5134_v4 = vld [vmem:[%s5341_s13 + $0x678] sm:$0xff]  }
  0xab   : > { %4639 = vmatpush3.bf16.msra.mxu1 %v5087_v5  ;;  %4618 = vmatprep.subr.bf16.mxu0 %v5088_v6  ;;  %v550_v5 = vpack.c.bf16 %v418_v3, %v418_v3  ;;  %v5135_v6 = vld [vmem:[%s5341_s13 + $0x6f8] sm:$0xff]  }
  0xac   : > { %4640 = vmatprep.subr.bf16.mxu1 %v5089_v7  ;;  %v5136_v7 = vld [vmem:[%s5341_s13 + $0x638] sm:$0xff]  }
  0xae   : > { %4619 = vmatpush3.bf16.msra.mxu0 %v5090_v8  ;;  %v547_v8 = vpack.c.bf16 %v409_v58, %v409_v58 }
  0xaf   : > { %4641 = vmatpush3.bf16.msra.mxu1 %v5091_v9  ;;  %4620 = vmatprep.subr.bf16.mxu0 %v5092_v10  ;;  %v549_v9 = vpack.c.bf16 %v416_v63, %v416_v63  ;;  %v5137_v10 = vld [vmem:[%s5341_s13 + $0x6b8] sm:$0xff]   ;;  %v5176_v63 = vld [vmem:[%s5341_s13 + $0x7e8] sm:$0xff]  }
  0xb0   : > { %4642 = vmatprep.subr.bf16.mxu1 %v5093_v11  ;;  %v5138_v11 = vld [vmem:[%s5341_s13 + $0x670] sm:$0xff]  }
  0xb2   : > { %4621 = vmatpush3.bf16.msra.mxu0 %v5094_v12  ;;  %v5139_v12 = vld [vmem:[%s5341_s13 + $0x6f0] sm:$0xff]  }
  0xb3   : > { %4643 = vmatpush3.bf16.msra.mxu1 %v5095_v14  ;;  %4622 = vmatprep.subr.bf16.mxu0 %v5096_v17  ;;  %v5141_v14 = vld [vmem:[%s5341_s13 + $0x6b0] sm:$0xff]   ;;  %v5144_v17 = vld [vmem:[%s5341_s13 + $0x628] sm:$0xff]  }
  0xb4   : > { %4644 = vmatprep.subr.bf16.mxu1 %v5097_v18  ;;  %v5145_v18 = vld [vmem:[%s5341_s13 + $0x6a8] sm:$0xff]  }
  0xb6   : > { %4623 = vmatpush3.bf16.msra.mxu0 %v5098_v21  ;;  %v5148_v21 = vld [vmem:[%s5341_s13 + $0x620] sm:$0xff]  }
  0xb7   : > { %4645 = vmatpush3.bf16.msra.mxu1 %v5099_v22  ;;  %4652 = vmatprep.subr.bf16.mxu0 %v5101_v25  ;;  %v5149_v22 = vld [vmem:[%s5341_s13 + $0x6a0] sm:$0xff]   ;;  %v5152_v25 = vld [vmem:[%s5341_s13 + $0x618] sm:$0xff]  }
  0xb8   : > { %4674 = vmatprep.subr.bf16.mxu1 %v5102_v27  ;;  %v5154_v27 = vld [vmem:[%s5341_s13 + $0x650] sm:$0xff]  }
  0xb9   : > { %3480 = vmatmul.mubr.bf16.vlgmr.msra.gmra.mxu0 %v543_v29  ;;  %v5156_v29 = vld [vmem:[%s5341_s13 + $0x610] sm:$0xff]  }
  0xba   : > { %3520 = vmatmul.mubr.bf16.vlgmr.msra.gmra.mxu1 %v545_v30  ;;  %4653 = vmatpush3.bf16.msra.mxu0 %v5103_v28  ;;  %v5155_v28 = vld [vmem:[%s5341_s13 + $0x6d0] sm:$0xff]  }
  0xbb   : > { %4675 = vmatpush3.bf16.msra.mxu1 %v5104_v31  ;;  %4654 = vmatprep.subr.bf16.mxu0 %v5105_v32  ;;  %v5157_v30 = vld [vmem:[%s5341_s13 + $0x690] sm:$0xff]   ;;  %v5158_v31 = vld [vmem:[%s5341_s13 + $0x648] sm:$0xff]  }
  0xbc   : > { %4676 = vmatprep.subr.bf16.mxu1 %v5106_v33  ;;  %3559 = vmatprep.mubr.bf16.mxu0 %v548_v2  ;;  %v5159_v32 = vld [vmem:[%s5341_s13 + $0x6c8] sm:$0xff]  }
  0xbd   : > { %3599 = vmatprep.mubr.bf16.mxu1 %v550_v5  ;;  %v5160_v33 = vld [vmem:[%s5341_s13 + $0x608] sm:$0xff]  }
  0xbe   : > { %4655 = vmatpush3.bf16.msra.mxu0 %v5107_v34  ;;  %v5161_v34 = vld [vmem:[%s5341_s13 + $0x688] sm:$0xff]  }
  0xbf   : > { %4677 = vmatpush3.bf16.msra.mxu1 %v5108_v35  ;;  %4656 = vmatprep.subr.bf16.mxu0 %v5109_v36  ;;  %v303_v35 = vld [vmem:[%s5336_s9 + $0x30] sm:$0xff]  ;;  %v5162_v36 = vld [vmem:[%s5341_s13 + $0x640] sm:$0xff]   ;;  %v5177_v2 = vld [vmem:[%s5341_s13 + $0x728] sm:$0xff]  }
  0xc0   : > { %4678 = vmatprep.subr.bf16.mxu1 %v5110_v37  ;;  %v426_v37 = vrot.slane %v303_v35, %v5379_v43  ;;  %v5178_v5 = vld [vmem:[%s5341_s13 + $0x7a8] sm:$0xff]  }
  0xc2   : > { %4657 = vmatpush3.bf16.msra.mxu0 %v5111_v38  ;;  %v419_v38 = vcombine.high %v303_v35, %v303_v35 }
  0xc3   : > { %4679 = vmatpush3.bf16.msra.mxu1 %v5112_v39  ;;  %4658 = vmatprep.subr.bf16.mxu0 %v5113_v40  ;;  %v5163_v39 = vld [vmem:[%s5341_s13 + $0x6c0] sm:$0xff]  }
  0xc4   : > { %4680 = vmatprep.subr.bf16.mxu1 %v5114_v41  ;;  %v5164_v40 = vld [vmem:[%s5341_s13 + $0x600] sm:$0xff]   ;;  %v434_v41 = vcombine.high %v426_v37, %v426_v37 }
  0xc6   : > { %4659 = vmatpush3.bf16.msra.mxu0 %v5115_v42  ;;  %v433_v42 = vrot.slane %v419_v38, %v5379_v43 }
  0xc7   : > { %4681 = vmatpush3.bf16.msra.mxu1 %v5116_v44  ;;  %4660 = vmatprep.subr.bf16.mxu0 %v5117_v45  ;;  %v5165_v44 = vld [vmem:[%s5341_s13 + $0x680] sm:$0xff]   ;;  %v552_v45 = vpack.c.bf16 %v434_v41, %v434_v41 }
  0xc8   : > { %4682 = vmatprep.subr.bf16.mxu1 %v5118_v46  ;;  %v435_v46 = vcombine.high %v433_v42, %v433_v42 }
  0xca   : > { %4661 = vmatpush3.bf16.msra.mxu0 %v5119_v47  ;;  %v5167_v47 = vld [vmem:[%s5341_s13 + $0x778] sm:$0xff]  }
  0xcb   : > { %4683 = vmatpush3.bf16.msra.mxu1 %v5120_v48  ;;  %4662 = vmatprep.subr.bf16.mxu0 %v5121_v49  ;;  %v5168_v48 = vld [vmem:[%s5341_s13 + $0x7f8] sm:$0xff]   ;;  %v554_v49 = vpack.c.bf16 %v435_v46, %v435_v46  ;;  %v5206_v46 = vld [vmem:[%s5341_s13 + $0x830] sm:$0xff]  }
  0xcc   : > { %4684 = vmatprep.subr.bf16.mxu1 %v5122_v50  ;;  %v5169_v50 = vld [vmem:[%s5341_s13 + $0x738] sm:$0xff]  }
  0xce   : > { %4663 = vmatpush3.bf16.msra.mxu0 %v5123_v51  ;;  %v551_v51 = vpack.c.bf16 %v426_v37, %v426_v37  ;;  %v5201_v37 = vld [vmem:[%s5341_s13 + $0x8f8] sm:$0xff]  }
  0xcf   : > { %4685 = vmatpush3.bf16.msra.mxu1 %v5124_v52  ;;  %4664 = vmatprep.subr.bf16.mxu0 %v5125_v53  ;;  %v553_v52 = vpack.c.bf16 %v433_v42, %v433_v42  ;;  %v5170_v53 = vld [vmem:[%s5341_s13 + $0x7b8] sm:$0xff]  }
  0xd0   : > { %4686 = vmatprep.subr.bf16.mxu1 %v5126_v54  ;;  %v5171_v54 = vld [vmem:[%s5341_s13 + $0x770] sm:$0xff]   ;;  %v5203_v42 = vld [vmem:[%s5341_s13 + $0x8b8] sm:$0xff]  }
  0xd2   : > { %4665 = vmatpush3.bf16.msra.mxu0 %v5127_v55  ;;  %v5172_v55 = vld [vmem:[%s5341_s13 + $0x7f0] sm:$0xff]  }
  0xd3   : > { %4687 = vmatpush3.bf16.msra.mxu1 %v5128_v57  ;;  %4666 = vmatprep.subr.bf16.mxu0 %v5129_v60  ;;  %v5175_v60 = vld [vmem:[%s5341_s13 + $0x768] sm:$0xff]  }
  0xd4   : > { %4688 = vmatprep.subr.bf16.mxu1 %v5130_v61 }
  0xd6   : > { %4667 = vmatpush3.bf16.msra.mxu0 %v5131_v0 }
  0xd7   : > { %4689 = vmatpush3.bf16.msra.mxu1 %v5132_v1  ;;  %4696 = vmatprep.subr.bf16.mxu0 %v5134_v4 }
  0xd8   : > { %4718 = vmatprep.subr.bf16.mxu1 %v5135_v6 }
  0xd9   : > { %3560 = vmatmul.mubr.bf16.vlgmr.msra.gmra.mxu0 %v547_v8 }
  0xda   : > { %3600 = vmatmul.mubr.bf16.vlgmr.msra.gmra.mxu1 %v549_v9  ;;  %4697 = vmatpush3.bf16.msra.mxu0 %v5136_v7  ;;  %v5179_v7 = vld [vmem:[%s5341_s13 + $0x760] sm:$0xff]  }
  0xdb   : > { %4719 = vmatpush3.bf16.msra.mxu1 %v5137_v10  ;;  %4698 = vmatprep.subr.bf16.mxu0 %v5138_v11  ;;  %v5180_v10 = vld [vmem:[%s5341_s13 + $0x7e0] sm:$0xff]  }
  0xdc   : > { %4720 = vmatprep.subr.bf16.mxu1 %v5139_v12  ;;  %3639 = vmatprep.mubr.bf16.mxu0 %v552_v45  ;;  %v5181_v11 = vld [vmem:[%s5341_s13 + $0x720] sm:$0xff]   ;;  %v5205_v45 = vld [vmem:[%s5341_s13 + $0x8f0] sm:$0xff]  }
  0xdd   : > { %3679 = vmatprep.mubr.bf16.mxu1 %v554_v49  ;;  %v5182_v12 = vld [vmem:[%s5341_s13 + $0x7a0] sm:$0xff]   ;;  %v5207_v49 = vld [vmem:[%s5341_s13 + $0x8b0] sm:$0xff]  }
  0xde   : > { %4699 = vmatpush3.bf16.msra.mxu0 %v5140_v13  ;;  %v5183_v13 = vld [vmem:[%s5341_s13 + $0x758] sm:$0xff]  }
  0xdf   : > { %4721 = vmatpush3.bf16.msra.mxu1 %v5141_v14  ;;  %4700 = vmatprep.subr.bf16.mxu0 %v5142_v15  ;;  %v5184_v14 = vld [vmem:[%s5341_s13 + $0x7d8] sm:$0xff]  }
  0xe0   : > { %4722 = vmatprep.subr.bf16.mxu1 %v5143_v16  ;;  %v5185_v15 = vld [vmem:[%s5341_s13 + $0x718] sm:$0xff]  }
  0xe1   : > { %v5186_v16 = vld [vmem:[%s5341_s13 + $0x798] sm:$0xff]  }
  0xe2   : > { %4701 = vmatpush3.bf16.msra.mxu0 %v5144_v17  ;;  %v5187_v17 = vld [vmem:[%s5341_s13 + $0x750] sm:$0xff]  }
  0xe3   : > { %4723 = vmatpush3.bf16.msra.mxu1 %v5145_v18  ;;  %4702 = vmatprep.subr.bf16.mxu0 %v5146_v19  ;;  %v5188_v18 = vld [vmem:[%s5341_s13 + $0x7d0] sm:$0xff]  }
  0xe4   : > { %4724 = vmatprep.subr.bf16.mxu1 %v5147_v20  ;;  %v5189_v19 = vld [vmem:[%s5341_s13 + $0x710] sm:$0xff]  }
  0xe5   : > { %v5190_v20 = vld [vmem:[%s5341_s13 + $0x790] sm:$0xff]  }
  0xe6   : > { %4703 = vmatpush3.bf16.msra.mxu0 %v5148_v21  ;;  %v5191_v21 = vld [vmem:[%s5341_s13 + $0x748] sm:$0xff]  }
  0xe7   : > { %4725 = vmatpush3.bf16.msra.mxu1 %v5149_v22  ;;  %4704 = vmatprep.subr.bf16.mxu0 %v5150_v23  ;;  %v5192_v22 = vld [vmem:[%s5341_s13 + $0x7c8] sm:$0xff]  }
  0xe8   : > { %4726 = vmatprep.subr.bf16.mxu1 %v5151_v24  ;;  %v5193_v23 = vld [vmem:[%s5341_s13 + $0x708] sm:$0xff]  }
  0xe9   : > { %v5194_v24 = vld [vmem:[%s5341_s13 + $0x788] sm:$0xff]  }
  0xea   : > { %4705 = vmatpush3.bf16.msra.mxu0 %v5152_v25  ;;  %v304_v25 = vld [vmem:[%s5336_s9 + $0x38] sm:$0xff] }
  0xeb   : > { %4727 = vmatpush3.bf16.msra.mxu1 %v5153_v26  ;;  %4706 = vmatprep.subr.bf16.mxu0 %v5154_v27  ;;  %v5195_v26 = vld [vmem:[%s5341_s13 + $0x740] sm:$0xff]   ;;  %v443_v27 = vrot.slane %v304_v25, %v5379_v43 }
  0xec   : > { %4728 = vmatprep.subr.bf16.mxu1 %v5155_v28  ;;  %v436_v28 = vcombine.high %v304_v25, %v304_v25 }
  0xee   : > { %4707 = vmatpush3.bf16.msra.mxu0 %v5156_v29  ;;  %v5196_v29 = vld [vmem:[%s5341_s13 + $0x7c0] sm:$0xff]  }
  0xef   : > { %4729 = vmatpush3.bf16.msra.mxu1 %v5157_v30  ;;  %4708 = vmatprep.subr.bf16.mxu0 %v5158_v31  ;;  %v5197_v30 = vld [vmem:[%s5341_s13 + $0x700] sm:$0xff]   ;;  %v451_v31 = vcombine.high %v443_v27, %v443_v27 }
  0xf0   : > { %4730 = vmatprep.subr.bf16.mxu1 %v5159_v32  ;;  %v450_v32 = vrot.slane %v436_v28, %v5379_v43  ;;  %v5234_v28 = vld [vmem:[%s5341_s13 + $0x9f8] sm:$0xff]  }
  0xf2   : > { %4709 = vmatpush3.bf16.msra.mxu0 %v5160_v33  ;;  %v5198_v33 = vld [vmem:[%s5341_s13 + $0x780] sm:$0xff]   ;;  %v452_v35 = vcombine.high %v450_v32, %v450_v32  ;;  %v557_v41 = vpack.c.bf16 %v450_v32, %v450_v32 }
  0xf3   : > { %4731 = vmatpush3.bf16.msra.mxu1 %v5161_v34  ;;  %4710 = vmatprep.subr.bf16.mxu0 %v5162_v36  ;;  %v556_v34 = vpack.c.bf16 %v451_v31, %v451_v31  ;;  %v5200_v36 = vld [vmem:[%s5341_s13 + $0x878] sm:$0xff]  }
  0xf4   : > { %4732 = vmatprep.subr.bf16.mxu1 %v5163_v39  ;;  %v558_v38 = vpack.c.bf16 %v452_v35, %v452_v35  ;;  %v5202_v39 = vld [vmem:[%s5341_s13 + $0x838] sm:$0xff]   ;;  %v5238_v35 = vld [vmem:[%s5341_s13 + $0x9f0] sm:$0xff]  }
  0xf6   : > { %4711 = vmatpush3.bf16.msra.mxu0 %v5164_v40  ;;  %v555_v40 = vpack.c.bf16 %v443_v27, %v443_v27  ;;  %v5233_v27 = vld [vmem:[%s5341_s13 + $0x978] sm:$0xff]  }
  0xf7   : > { %4733 = vmatpush3.bf16.msra.mxu1 %v5165_v44  ;;  %4740 = vmatprep.subr.bf16.mxu0 %v5167_v47  ;;  %v5204_v44 = vld [vmem:[%s5341_s13 + $0x870] sm:$0xff]  }
  0xf8   : > { %4762 = vmatprep.subr.bf16.mxu1 %v5168_v48 }
  0xf9   : > { %v4448_v57 = vpop.f32.mrf.mxu0  ;;  %3640 = vmatmul.mubr.bf16.vlgmr.msra.gmra.mxu0 %v551_v51 }
  0xfa   : > { %v4470_v58 = vpop.f32.mrf.mxu1  ;;  %3680 = vmatmul.mubr.bf16.vlgmr.msra.gmra.mxu1 %v553_v52  ;;  %4741 = vmatpush3.bf16.msra.mxu0 %v5169_v50  ;;  %v5208_v50 = vld [vmem:[%s5341_s13 + $0x868] sm:$0xff]  }
  0xfb   : > { %4763 = vmatpush3.bf16.msra.mxu1 %v5170_v53  ;;  %v4449_v61 = vpop.f32.mrf.mxu0  ;;  %4742 = vmatprep.subr.bf16.mxu0 %v5171_v54  ;;  %v5209_v53 = vld [vmem:[%s5341_s13 + $0x8e8] sm:$0xff]  }
  0xfc   : > { %v4471_v62 = vpop.f32.mrf.mxu1  ;;  %4764 = vmatprep.subr.bf16.mxu1 %v5172_v55  ;;  %v4450_v0 = vadd.f32 %v4449_v61, %v4448_v57  ;;  %3719 = vmatprep.mubr.bf16.mxu0 %v556_v34  ;;  %v5212_v61 = vld [vmem:[%s5341_s13 + $0x860] sm:$0xff]   ;;  %v5237_v34 = vld [vmem:[%s5341_s13 + $0x970] sm:$0xff]  }
  0xfd   : > { %v4472_v1 = vadd.f32 %v4471_v62, %v4470_v58  ;;  %v4451_v3 = vpop.f32.mrf.mxu0  ;;  %3759 = vmatprep.mubr.bf16.mxu1 %v558_v38 }
  0xfe   : > { %v4473_v4 = vpop.f32.mrf.mxu1  ;;  %4743 = vmatpush3.bf16.msra.mxu0 %v5173_v56  ;;  %v5210_v56 = vld [vmem:[%s5341_s13 + $0x828] sm:$0xff]   ;;  %v5215_v3 = vld [vmem:[%s5341_s13 + $0x8a0] sm:$0xff]  }
  0xff   : > { %v5603_v6 = vadd.f32 %v4472_v1, %v4450_v0  ;;  %4765 = vmatpush3.bf16.msra.mxu1 %v5174_v59  ;;  %v4452_v8 = vpop.f32.mrf.mxu0  ;;  %4744 = vmatprep.subr.bf16.mxu0 %v5175_v60  ;;  %v5211_v59 = vld [vmem:[%s5341_s13 + $0x8a8] sm:$0xff]   ;;  %v5213_v0 = vld [vmem:[%s5341_s13 + $0x8e0] sm:$0xff]   ;;  %v5216_v4 = vld [vmem:[%s5341_s13 + $0x858] sm:$0xff]  }
 0x100   : > { %v4474_v9 = vpop.f32.mrf.mxu1  ;;  %4766 = vmatprep.subr.bf16.mxu1 %v5176_v63  ;;  %v5220_v8 = vld [vmem:[%s5341_s13 + $0x850] sm:$0xff]  }
 0x101   : > { %v5221_v9 = vld [vmem:[%s5341_s13 + $0x8d0] sm:$0xff]  }
 0x102   : > { %4745 = vmatpush3.bf16.msra.mxu0 %v5177_v2  ;;  %v5214_v2 = vld [vmem:[%s5341_s13 + $0x820] sm:$0xff]  }
 0x103   : > { %4767 = vmatpush3.bf16.msra.mxu1 %v5178_v5  ;;  %4746 = vmatprep.subr.bf16.mxu0 %v5179_v7  ;;  %v5217_v5 = vld [vmem:[%s5341_s13 + $0x8d8] sm:$0xff]  }
 0x104   : > { %4768 = vmatprep.subr.bf16.mxu1 %v5180_v10  ;;  %v5219_v7 = vld [vmem:[%s5341_s13 + $0x898] sm:$0xff]   ;;  %v5222_v10 = vld [vmem:[%s5341_s13 + $0x810] sm:$0xff]  }
 0x106   : > { %4747 = vmatpush3.bf16.msra.mxu0 %v5181_v11  ;;  %v5223_v11 = vld [vmem:[%s5341_s13 + $0x890] sm:$0xff]  }
 0x107   : > { %4769 = vmatpush3.bf16.msra.mxu1 %v5182_v12  ;;  %4748 = vmatprep.subr.bf16.mxu0 %v5183_v13  ;;  %v5224_v12 = vld [vmem:[%s5341_s13 + $0x848] sm:$0xff]  }
 0x108   : > { %4770 = vmatprep.subr.bf16.mxu1 %v5184_v14  ;;  %v5225_v13 = vld [vmem:[%s5341_s13 + $0x8c8] sm:$0xff]  }
 0x109   : > { %v5226_v14 = vld [vmem:[%s5341_s13 + $0x808] sm:$0xff]  }
 0x10a   : > { %4749 = vmatpush3.bf16.msra.mxu0 %v5185_v15  ;;  %v5227_v15 = vld [vmem:[%s5341_s13 + $0x888] sm:$0xff]  }
 0x10b   : > { %4771 = vmatpush3.bf16.msra.mxu1 %v5186_v16  ;;  %4750 = vmatprep.subr.bf16.mxu0 %v5187_v17  ;;  %v305_v16 = vld [vmem:[%s5336_s9 + $0x40] sm:$0xff] }
 0x10c   : > { %4772 = vmatprep.subr.bf16.mxu1 %v5188_v18  ;;  %v5228_v17 = vld [vmem:[%s5341_s13 + $0x840] sm:$0xff]   ;;  %v460_v18 = vrot.slane %v305_v16, %v5379_v43 }
 0x10e   : > { %4751 = vmatpush3.bf16.msra.mxu0 %v5189_v19  ;;  %v453_v19 = vcombine.high %v305_v16, %v305_v16  ;;  %v559_v31 = vpack.c.bf16 %v460_v18, %v460_v18 }
 0x10f   : > { %4773 = vmatpush3.bf16.msra.mxu1 %v5190_v20  ;;  %4752 = vmatprep.subr.bf16.mxu0 %v5191_v21  ;;  %v5229_v20 = vld [vmem:[%s5341_s13 + $0x8c0] sm:$0xff]  }
 0x110   : > { %4774 = vmatprep.subr.bf16.mxu1 %v5192_v22  ;;  %v5230_v21 = vld [vmem:[%s5341_s13 + $0x800] sm:$0xff]   ;;  %v468_v22 = vcombine.high %v460_v18, %v460_v18 }
 0x112   : > { %4753 = vmatpush3.bf16.msra.mxu0 %v5193_v23  ;;  %v467_v23 = vrot.slane %v453_v19, %v5379_v43  ;;  %v560_v25 = vpack.c.bf16 %v468_v22, %v468_v22 }
 0x113   : > { %4775 = vmatpush3.bf16.msra.mxu1 %v5194_v24  ;;  %4754 = vmatprep.subr.bf16.mxu0 %v5195_v26  ;;  %v5231_v24 = vld [vmem:[%s5341_s13 + $0x880] sm:$0xff]  }
 0x114   : > { %4776 = vmatprep.subr.bf16.mxu1 %v5196_v29  ;;  %v469_v26 = vcombine.high %v467_v23, %v467_v23  ;;  %v561_v32 = vpack.c.bf16 %v467_v23, %v467_v23 }
 0x116   : > { %4755 = vmatpush3.bf16.msra.mxu0 %v5197_v30  ;;  %v562_v29 = vpack.c.bf16 %v469_v26, %v469_v26  ;;  %v5235_v30 = vld [vmem:[%s5341_s13 + $0x938] sm:$0xff]  }
 0x117   : > { %4777 = vmatpush3.bf16.msra.mxu1 %v5198_v33  ;;  %4784 = vmatprep.subr.bf16.mxu0 %v5200_v36  ;;  %v5236_v33 = vld [vmem:[%s5341_s13 + $0x9b8] sm:$0xff]   ;;  %v5239_v36 = vld [vmem:[%s5341_s13 + $0x930] sm:$0xff]  }
 0x118   : > { %4806 = vmatprep.subr.bf16.mxu1 %v5201_v37 }
 0x119   : > { %v4492_v47 = vpop.f32.mrf.mxu0  ;;  %3720 = vmatmul.mubr.bf16.vlgmr.msra.gmra.mxu0 %v555_v40  ;;  %v5241_v40 = vld [vmem:[%s5341_s13 + $0x968] sm:$0xff]  }
 0x11a   : > { %v4514_v48 = vpop.f32.mrf.mxu1  ;;  %3760 = vmatmul.mubr.bf16.vlgmr.msra.gmra.mxu1 %v557_v41  ;;  %4785 = vmatpush3.bf16.msra.mxu0 %v5202_v39  ;;  %v5240_v39 = vld [vmem:[%s5341_s13 + $0x9b0] sm:$0xff]  }
 0x11b   : > { %4807 = vmatpush3.bf16.msra.mxu1 %v5203_v42  ;;  %v4493_v51 = vpop.f32.mrf.mxu0  ;;  %4786 = vmatprep.subr.bf16.mxu0 %v5204_v44  ;;  %v5242_v44 = vld [vmem:[%s5341_s13 + $0x9e8] sm:$0xff]  }
 0x11c   : > { %v4515_v52 = vpop.f32.mrf.mxu1  ;;  %4808 = vmatprep.subr.bf16.mxu1 %v5205_v45  ;;  %v4494_v54 = vadd.f32 %v4493_v51, %v4492_v47  ;;  %3799 = vmatprep.mubr.bf16.mxu0 %v560_v25  ;;  %v5243_v47 = vld [vmem:[%s5341_s13 + $0x928] sm:$0xff]  }
 0x11d   : > { %v4516_v55 = vadd.f32 %v4515_v52, %v4514_v48  ;;  %v4495_v57 = vpop.f32.mrf.mxu0  ;;  %3839 = vmatprep.mubr.bf16.mxu1 %v562_v29  ;;  %v5245_v52 = vld [vmem:[%s5341_s13 + $0x960] sm:$0xff]  }
 0x11e   : > { %v4517_v58 = vpop.f32.mrf.mxu1  ;;  %v3242_v60 = vadd.f32 %v4494_v54, %v5603_v6  ;;  %4787 = vmatpush3.bf16.msra.mxu0 %v5206_v46  ;;  %v5218_v6 = vld [vmem:[%s5341_s13 + $0x818] sm:$0xff]   ;;  %v5247_v57 = vld [vmem:[%s5341_s13 + $0x920] sm:$0xff]  }
 0x11f   : > { %4809 = vmatpush3.bf16.msra.mxu1 %v5207_v49  ;;  %v4496_v62 = vpop.f32.mrf.mxu0  ;;  %4788 = vmatprep.subr.bf16.mxu0 %v5208_v50  ;;  %v5244_v50 = vld [vmem:[%s5341_s13 + $0x9a8] sm:$0xff]   ;;  %v5248_v58 = vld [vmem:[%s5341_s13 + $0x9a0] sm:$0xff]  }
 0x120   : > { %v4518_v63 = vpop.f32.mrf.mxu1  ;;  %4810 = vmatprep.subr.bf16.mxu1 %v5209_v53  ;;  %v5643_v1 = vadd.f32 %v4516_v55, %v3242_v60  ;;  %v5246_v55 = vld [vmem:[%s5341_s13 + $0x9e0] sm:$0xff]   ;;  %v5250_v60 = vld [vmem:[%s5341_s13 + $0x9d8] sm:$0xff]  }
 0x121   : > { %v5252_v62 = vld [vmem:[%s5341_s13 + $0x998] sm:$0xff]   ;;  %v5253_v63 = vld [vmem:[%s5341_s13 + $0x950] sm:$0xff]  }
 0x122   : > { %4789 = vmatpush3.bf16.msra.mxu0 %v5210_v56 }
 0x123   : > { %4811 = vmatpush3.bf16.msra.mxu1 %v5211_v59  ;;  %4790 = vmatprep.subr.bf16.mxu0 %v5212_v61  ;;  %v5249_v59 = vld [vmem:[%s5341_s13 + $0x958] sm:$0xff]  }
 0x124   : > { %4812 = vmatprep.subr.bf16.mxu1 %v5213_v0  ;;  %v5251_v61 = vld [vmem:[%s5341_s13 + $0x918] sm:$0xff]   ;;  %v5254_v0 = vld [vmem:[%s5341_s13 + $0x9d0] sm:$0xff]  }
 0x126   : > { %4791 = vmatpush3.bf16.msra.mxu0 %v5214_v2  ;;  %v5256_v2 = vld [vmem:[%s5341_s13 + $0x990] sm:$0xff]  }
 0x127   : > { %4813 = vmatpush3.bf16.msra.mxu1 %v5215_v3  ;;  %4792 = vmatprep.subr.bf16.mxu0 %v5216_v4  ;;  %v5257_v3 = vld [vmem:[%s5341_s13 + $0x948] sm:$0xff]  }
 0x128   : > { %4814 = vmatprep.subr.bf16.mxu1 %v5217_v5  ;;  %v5258_v4 = vld [vmem:[%s5341_s13 + $0x9c8] sm:$0xff]  }
 0x129   : > { %v5259_v5 = vld [vmem:[%s5341_s13 + $0x908] sm:$0xff]  }
 0x12a   : > { %4793 = vmatpush3.bf16.msra.mxu0 %v5218_v6  ;;  %v5260_v6 = vld [vmem:[%s5341_s13 + $0x988] sm:$0xff]  }
 0x12b   : > { %4815 = vmatpush3.bf16.msra.mxu1 %v5219_v7  ;;  %4794 = vmatprep.subr.bf16.mxu0 %v5220_v8  ;;  %v306_v7 = vld [vmem:[%s5336_s9 + $0x48] sm:$0xff]  ;;  %v5261_v8 = vld [vmem:[%s5341_s13 + $0x940] sm:$0xff]  }
 0x12c   : > { %4816 = vmatprep.subr.bf16.mxu1 %v5221_v9  ;;  %v5262_v9 = vld [vmem:[%s5341_s13 + $0x9c0] sm:$0xff]  }
 0x12e   : > { %4795 = vmatpush3.bf16.msra.mxu0 %v5222_v10  ;;  %v477_v10 = vrot.slane %v306_v7, %v5379_v43 }
 0x12f   : > { %4817 = vmatpush3.bf16.msra.mxu1 %v5223_v11  ;;  %4796 = vmatprep.subr.bf16.mxu0 %v5224_v12  ;;  %v470_v11 = vcombine.high %v306_v7, %v306_v7 }
 0x130   : > { %4818 = vmatprep.subr.bf16.mxu1 %v5225_v13  ;;  %v485_v12 = vcombine.high %v477_v10, %v477_v10  ;;  %v563_v19 = vpack.c.bf16 %v477_v10, %v477_v10 }
 0x131   : > { %v484_v13 = vrot.slane %v470_v11, %v5379_v43 }
 0x132   : > { %4797 = vmatpush3.bf16.msra.mxu0 %v5226_v14  ;;  %v5263_v14 = vld [vmem:[%s5341_s13 + $0x900] sm:$0xff]   ;;  %v564_v16 = vpack.c.bf16 %v485_v12, %v485_v12 }
 0x133   : > { %4819 = vmatpush3.bf16.msra.mxu1 %v5227_v15  ;;  %4798 = vmatprep.subr.bf16.mxu0 %v5228_v17  ;;  %v5264_v15 = vld [vmem:[%s5341_s13 + $0x980] sm:$0xff]   ;;  %v486_v17 = vcombine.high %v484_v13, %v484_v13 }
 0x134   : > { %4820 = vmatprep.subr.bf16.mxu1 %v5229_v20  ;;  %v565_v20 = vpack.c.bf16 %v484_v13, %v484_v13 }
 0x135   : > { %v566_v18 = vpack.c.bf16 %v486_v17, %v486_v17 }
 0x136   : > { %4799 = vmatpush3.bf16.msra.mxu0 %v5230_v21 }
 0x137   : > { %4821 = vmatpush3.bf16.msra.mxu1 %v5231_v24  ;;  %4828 = vmatprep.subr.bf16.mxu0 %v5233_v27 }
 0x138   : > { %4850 = vmatprep.subr.bf16.mxu1 %v5234_v28 }
 0x139   : > { %v4536_v37 = vpop.f32.mrf.mxu0  ;;  %3800 = vmatmul.mubr.bf16.vlgmr.msra.gmra.mxu0 %v559_v31 }
 0x13a   : > { %v4558_v38 = vpop.f32.mrf.mxu1  ;;  %3840 = vmatmul.mubr.bf16.vlgmr.msra.gmra.mxu1 %v561_v32  ;;  %4829 = vmatpush3.bf16.msra.mxu0 %v5235_v30 }
 0x13b   : > { %4851 = vmatpush3.bf16.msra.mxu1 %v5236_v33  ;;  %v4537_v41 = vpop.f32.mrf.mxu0  ;;  %4830 = vmatprep.subr.bf16.mxu0 %v5237_v34 }
 0x13c   : > { %v4559_v42 = vpop.f32.mrf.mxu1  ;;  %4852 = vmatprep.subr.bf16.mxu1 %v5238_v35  ;;  %v4538_v45 = vadd.f32 %v4537_v41, %v4536_v37  ;;  %3879 = vmatprep.mubr.bf16.mxu0 %v564_v16 }
 0x13d   : > { %v4560_v46 = vadd.f32 %v4559_v42, %v4558_v38  ;;  %v4539_v48 = vpop.f32.mrf.mxu0  ;;  %3919 = vmatprep.mubr.bf16.mxu1 %v566_v18 }
 0x13e   : > { %v4561_v49 = vpop.f32.mrf.mxu1  ;;  %v3322_v51 = vadd.f32 %v4538_v45, %v5643_v1  ;;  %4831 = vmatpush3.bf16.msra.mxu0 %v5239_v36  ;;  %v5255_v1 = vld [vmem:[%s5341_s13 + $0x910] sm:$0xff]  }
 0x13f   : > { %4853 = vmatpush3.bf16.msra.mxu1 %v5240_v39  ;;  %v4540_v53 = vpop.f32.mrf.mxu0  ;;  %4832 = vmatprep.subr.bf16.mxu0 %v5241_v40 }
 0x140   : > { %v4562_v54 = vpop.f32.mrf.mxu1  ;;  %4854 = vmatprep.subr.bf16.mxu1 %v5242_v44  ;;  %v5681_v56 = vadd.f32 %v4560_v46, %v3322_v51 }
 0x142   : > { %4833 = vmatpush3.bf16.msra.mxu0 %v5243_v47 }
 0x143   : > { %4855 = vmatpush3.bf16.msra.mxu1 %v5244_v50  ;;  %4834 = vmatprep.subr.bf16.mxu0 %v5245_v52 }
 0x144   : > { %4856 = vmatprep.subr.bf16.mxu1 %v5246_v55 }
 0x146   : > { %4835 = vmatpush3.bf16.msra.mxu0 %v5247_v57 }
 0x147   : > { %4857 = vmatpush3.bf16.msra.mxu1 %v5248_v58  ;;  %4836 = vmatprep.subr.bf16.mxu0 %v5249_v59 }
 0x148   : > { %4858 = vmatprep.subr.bf16.mxu1 %v5250_v60 }
 0x14a   : > { %4837 = vmatpush3.bf16.msra.mxu0 %v5251_v61 }
 0x14b   : > { %4859 = vmatpush3.bf16.msra.mxu1 %v5252_v62  ;;  %4838 = vmatprep.subr.bf16.mxu0 %v5253_v63 }
 0x14c   : > { %4860 = vmatprep.subr.bf16.mxu1 %v5254_v0 }
 0x14e   : > { %4839 = vmatpush3.bf16.msra.mxu0 %v5255_v1 }
 0x14f   : > { %4861 = vmatpush3.bf16.msra.mxu1 %v5256_v2  ;;  %4840 = vmatprep.subr.bf16.mxu0 %v5257_v3 }
 0x150   : > { %4862 = vmatprep.subr.bf16.mxu1 %v5258_v4 }
 0x152   : > { %4841 = vmatpush3.bf16.msra.mxu0 %v5259_v5 }
 0x153   : > { %4863 = vmatpush3.bf16.msra.mxu1 %v5260_v6  ;;  %4842 = vmatprep.subr.bf16.mxu0 %v5261_v8 }
 0x154   : > { %4864 = vmatprep.subr.bf16.mxu1 %v5262_v9 }
 0x156   : > { %4843 = vmatpush3.bf16.msra.mxu0 %v5263_v14 }
 0x157   : > { %4865 = vmatpush3.bf16.msra.mxu1 %v5264_v15 }
 0x159   : > { %v4580_v21 = vpop.f32.mrf.mxu0  ;;  %3880 = vmatmul.mubr.bf16.vlgmr.msra.gmra.mxu0 %v563_v19 }
 0x15a   : > { %v4602_v22 = vpop.f32.mrf.mxu1  ;;  %3920 = vmatmul.mubr.bf16.vlgmr.msra.gmra.mxu1 %v565_v20 }
 0x15b   : > { %v4581_v43 = vpop.f32.mrf.mxu0 }
 0x15c   : > { %v4603_v23 = vpop.f32.mrf.mxu1  ;;  %v4582_v24 = vadd.f32 %v4581_v43, %v4580_v21 }
 0x15d   : > { %v4604_v25 = vadd.f32 %v4603_v23, %v4602_v22  ;;  %v4583_v26 = vpop.f32.mrf.mxu0 }
 0x15e   : > { %v4605_v27 = vpop.f32.mrf.mxu1  ;;  %v3402_v28 = vadd.f32 %v4582_v24, %v5681_v56 }
 0x15f   : > { %v4584_v29 = vpop.f32.mrf.mxu0 }
 0x160   : > { %v4606_v30 = vpop.f32.mrf.mxu1  ;;  %v3442_v31 = vadd.f32 %v4604_v25, %v3402_v28 }
 0x179   : > { %v4624_v32 = vpop.f32.mrf.mxu0 }
 0x17a   : > { %v4646_v33 = vpop.f32.mrf.mxu1 }
 0x17b   : > { %v4625_v34 = vpop.f32.mrf.mxu0 }
 0x17c   : > { %v4647_v35 = vpop.f32.mrf.mxu1  ;;  %v4626_v36 = vadd.f32 %v4625_v34, %v4624_v32 }
 0x17d   : > { %v4648_v37 = vadd.f32 %v4647_v35, %v4646_v33  ;;  %v4627_v38 = vpop.f32.mrf.mxu0 }
 0x17e   : > { %v4649_v39 = vpop.f32.mrf.mxu1  ;;  %v3482_v40 = vadd.f32 %v4626_v36, %v3442_v31 }
 0x17f   : > { %v4628_v41 = vpop.f32.mrf.mxu0 }
 0x180   : > { %v4650_v42 = vpop.f32.mrf.mxu1  ;;  %v3522_v44 = vadd.f32 %v4648_v37, %v3482_v40  ;;  %v296_v37 = vld [vmem:[#allocation2] sm:$0x3] }
 0x199   : > { %v4668_v45 = vpop.f32.mrf.mxu0 }
 0x19a   : > { %v4690_v46 = vpop.f32.mrf.mxu1 }
 0x19b   : > { %v4669_v47 = vpop.f32.mrf.mxu0 }
 0x19c   : > { %v4691_v48 = vpop.f32.mrf.mxu1  ;;  %v4670_v49 = vadd.f32 %v4669_v47, %v4668_v45 }
 0x19d   : > { %v4692_v50 = vadd.f32 %v4691_v48, %v4690_v46  ;;  %v4671_v51 = vpop.f32.mrf.mxu0 }
 0x19e   : > { %v4693_v52 = vpop.f32.mrf.mxu1  ;;  %v3562_v53 = vadd.f32 %v4670_v49, %v3522_v44 }
 0x19f   : > { %v4672_v54 = vpop.f32.mrf.mxu0 }
 0x1a0   : > { %v4694_v55 = vpop.f32.mrf.mxu1  ;;  %v3602_v56 = vadd.f32 %v4692_v50, %v3562_v53 }
 0x1b9   : > { %v4712_v57 = vpop.f32.mrf.mxu0 }
 0x1ba   : > { %v4734_v58 = vpop.f32.mrf.mxu1 }
 0x1bb   : > { %v4713_v59 = vpop.f32.mrf.mxu0 }
 0x1bc   : > { %v4735_v60 = vpop.f32.mrf.mxu1  ;;  %v4714_v61 = vadd.f32 %v4713_v59, %v4712_v57 }
 0x1bd   : > { %v4736_v62 = vadd.f32 %v4735_v60, %v4734_v58  ;;  %v4715_v63 = vpop.f32.mrf.mxu0 }
 0x1be   : > { %v4737_v0 = vpop.f32.mrf.mxu1  ;;  %v3642_v1 = vadd.f32 %v4714_v61, %v3602_v56 }
 0x1bf   : > { %v4716_v2 = vpop.f32.mrf.mxu0 }
 0x1c0   : > { %v4738_v3 = vpop.f32.mrf.mxu1  ;;  %v3682_v4 = vadd.f32 %v4736_v62, %v3642_v1 }
 0x1d9   : > { %v4756_v5 = vpop.f32.mrf.mxu0 }
 0x1da   : > { %v4778_v6 = vpop.f32.mrf.mxu1 }
 0x1db   : > { %v4757_v7 = vpop.f32.mrf.mxu0 }
 0x1dc   : > { %v4779_v8 = vpop.f32.mrf.mxu1  ;;  %v4758_v21 = vadd.f32 %v4757_v7, %v4756_v5 }
 0x1dd   : > { %v4759_v9 = vpop.f32.mrf.mxu0  ;;  %v4780_v43 = vadd.f32 %v4779_v8, %v4778_v6 }
 0x1de   : > { %v4781_v10 = vpop.f32.mrf.mxu1  ;;  %v3722_v22 = vadd.f32 %v4758_v21, %v3682_v4 }
 0x1df   : > { %v4760_v11 = vpop.f32.mrf.mxu0 }
 0x1e0   : > { %v4782_v12 = vpop.f32.mrf.mxu1  ;;  %v3762_v24 = vadd.f32 %v4780_v43, %v3722_v22 }
 0x1f9   : > { %v4800_v13 = vpop.f32.mrf.mxu0 }
 0x1fa   : > { %v4822_v14 = vpop.f32.mrf.mxu1 }
 0x1fb   : > { %v4801_v15 = vpop.f32.mrf.mxu0 }
 0x1fc   : > { %v4823_v16 = vpop.f32.mrf.mxu1  ;;  %v4802_v23 = vadd.f32 %v4801_v15, %v4800_v13 }
 0x1fd   : > { %v4803_v17 = vpop.f32.mrf.mxu0  ;;  %v4824_v26 = vadd.f32 %v4823_v16, %v4822_v14 }
 0x1fe   : > { %v4825_v18 = vpop.f32.mrf.mxu1  ;;  %v3802_v25 = vadd.f32 %v4802_v23, %v3762_v24 }
 0x1ff   : > { %v4804_v19 = vpop.f32.mrf.mxu0 }
 0x200   : > { %v4826_v20 = vpop.f32.mrf.mxu1  ;;  %v3842_v31 = vadd.f32 %v4824_v26, %v3802_v25 }
 0x219   : > { %v4844_v27 = vpop.f32.mrf.mxu0 }
 0x21a   : > { %v4866_v28 = vpop.f32.mrf.mxu1 }
 0x21b   : > { %v4845_v29 = vpop.f32.mrf.mxu0 }
 0x21c   : > { %v4867_v30 = vpop.f32.mrf.mxu1  ;;  %v4846_v32 = vadd.f32 %v4845_v29, %v4844_v27 }
 0x21d   : > { %v4847_v33 = vpop.f32.mrf.mxu0  ;;  %v4868_v36 = vadd.f32 %v4867_v30, %v4866_v28 }
 0x21e   : > { %v4869_v34 = vpop.f32.mrf.mxu1  ;;  %v3882_v35 = vadd.f32 %v4846_v32, %v3842_v31 }
 0x21f   : > { %v4848_v38 = vpop.f32.mrf.mxu0 }
 0x220   : > { %v4870_v39 = vpop.f32.mrf.mxu1  ;;  %v3922_v40 = vadd.f32 %v4868_v36, %v3882_v35  ;;  %3932 = sbr.rel (%p4425_p6) target bundleno = 921 (0x399), region = 56 }
 0x222   : > { %v3927_v41 = vadd.f32 %v3922_v40, %v296_v37 }
 0x224   : > { %3928 = vst [vmem:[#allocation2] sm:$0x3] %v3927_v41 }
 0x225   : > { %v3958_v42 = vld [vmem:[%s5772_s3 + $0x78] sm:$0xff]  ;;  %v5276_v44 = vmov 0.0   ;;  %v3957_v45 = vld [vmem:[%s5772_s3 + $0x70] sm:$0xff]  ;;  %vm5277_vm0 = vmmov 0   ;;  %v3956_v46 = vld [vmem:[%s5772_s3 + $0x68] sm:$0xff]  ;;  %vm4044_vm1 = vcmask 254976  }
 0x226   : > { %4889 = vmatprep.subr.mxu0 %v5276_v44  ;;  %4921 = vmatprep.mubr.msk.f32.mxu0 %vm5277_vm0, %v5276_v44  ;;  %v3955_v47 = vld [vmem:[%s5772_s3 + $0x60] sm:$0xff]  ;;  %v3954_v48 = vld [vmem:[%s5772_s3 + $0x58] sm:$0xff]  ;;  %v3953_v49 = vld [vmem:[%s5772_s3 + $0x50] sm:$0xff]  ;;  %vm4056_vm2 = vcmask 1024  }
 0x227   : > { %4890 = vmatpush3.msra.mxu0 %v3958_v42  ;;  %v3952_v50 = vld [vmem:[%s5772_s3 + $0x48] sm:$0xff]  ;;  %v3951_v51 = vld [vmem:[%s5772_s3 + $0x40] sm:$0xff]  ;;  %v3950_v52 = vld [vmem:[%s5772_s3 + $0x38] sm:$0xff] }
 0x228   : > { %4891 = vmatprep.subr.mxu0 %v5276_v44  ;;  %v3949_v53 = vld [vmem:[%s5772_s3 + $0x30] sm:$0xff]  ;;  %v3948_v54 = vld [vmem:[%s5772_s3 + $0x28] sm:$0xff]  ;;  %v3947_v55 = vld [vmem:[%s5772_s3 + $0x20] sm:$0xff] }
 0x229   : > { %4892 = vmatpush3.msra.mxu0 %v3957_v45  ;;  %v4426_v57 = vld [vmem:[%s5771_s2] ss:$0 sm:$0xff]  ;;  %v3946_v58 = vld [vmem:[%s5772_s3 + $0x18] sm:$0xff]  ;;  %v3945_v59 = vld [vmem:[%s5772_s3 + $0x10] sm:$0xff] }
 0x22a   : > { %4893 = vmatprep.subr.mxu0 %v5276_v44  ;;  %v3944_v61 = vld [vmem:[%s5772_s3 + $0x8] sm:$0xff]  ;;  %v3943_v62 = vld [vmem:[%s5772_s3] sm:$0xff] }
 0x22b   : > { %4894 = vmatpush3.msra.mxu0 %v3956_v46  ;;  %v3933_v56 = vld [vmem:[#allocation2] sm:$0x3]  ;;  %v4429_v7 = vld [vmem:[#allocation3] ss:$0 sm:$0xff] }
 0x22c   : > { %4895 = vmatprep.subr.mxu0 %v5276_v44  ;;  %v3941_v60 = vadd.f32 %v4426_v57, %v3933_v56  ;;  %v4427_v0 = vld [vmem:[%s5773_s4] ss:$0 sm:$0xff] }
 0x22d   : > { %4896 = vmatpush3.msra.mxu0 %v3955_v47  ;;  %v4428_v2 = vld [vmem:[%s5774_s5] ss:$0 sm:$0xff] }
 0x22e   : > { %4897 = vmatprep.subr.mxu0 %v5276_v44  ;;  %v3942_v63 = vmax.f32 %v3941_v60, 0.0 }
 0x22f   : > { %4898 = vmatpush3.msra.mxu0 %v3954_v48 }
 0x230   : > { %4899 = vmatprep.subr.mxu0 %v5276_v44 }
 0x231   : > { %4900 = vmatpush3.msra.mxu0 %v3953_v49 }
 0x232   : > { %4901 = vmatprep.subr.mxu0 %v5276_v44 }
 0x233   : > { %4902 = vmatpush3.msra.mxu0 %v3952_v50 }
 0x234   : > { %4903 = vmatprep.subr.mxu0 %v5276_v44 }
 0x235   : > { %4904 = vmatpush3.msra.mxu0 %v3951_v51 }
 0x236   : > { %4905 = vmatprep.subr.mxu0 %v5276_v44 }
 0x237   : > { %4906 = vmatpush3.msra.mxu0 %v3950_v52 }
 0x238   : > { %4907 = vmatprep.subr.mxu0 %v5276_v44 }
 0x239   : > { %4908 = vmatpush3.msra.mxu0 %v3949_v53 }
 0x23a   : > { %4909 = vmatprep.subr.mxu0 %v5276_v44 }
 0x23b   : > { %4910 = vmatpush3.msra.mxu0 %v3948_v54 }
 0x23c   : > { %4911 = vmatprep.subr.mxu0 %v5276_v44 }
 0x23d   : > { %4912 = vmatpush3.msra.mxu0 %v3947_v55 }
 0x23e   : > { %4913 = vmatprep.subr.mxu0 %v5276_v44 }
 0x23f   : > { %4914 = vmatpush3.msra.mxu0 %v3946_v58 }
 0x240   : > { %4915 = vmatprep.subr.mxu0 %v5276_v44 }
 0x241   : > { %4916 = vmatpush3.msra.mxu0 %v3945_v59 }
 0x242   : > { %4917 = vmatprep.subr.mxu0 %v5276_v44 }
 0x243   : > { %4918 = vmatpush3.msra.mxu0 %v3944_v61 }
 0x244   : > { %4919 = vmatprep.subr.mxu0 %v5276_v44 }
 0x245   : > { %4920 = vmatpush3.msra.mxu0 %v3943_v62 }
 0x246   : > { %4922 = vmatmul.mubr.f32.vlgmr.msra.gmra.mxu0 %v3942_v63 }
 0x306   : > { %v4032_v1 = vpop.f32.mrf.mxu0 }
 0x307   : > { %v4033_v3 = vadd.f32 %v4427_v0, %v4032_v1 }
 0x308   : > { %v4923_v4 = vpop.f32.mrf.mxu0 }
 0x309   : > { %v4043_v5 = vmul.f32 %v4428_v2, %v4033_v3 }
 0x30b   : > { %v4045_v6 = vsel %vm4044_vm1, %v4043_v5, 0.0 }
 0x30c   : > { %4046 = vadd.xlane.f32.xlu0 %v4045_v6 }
 0x395   : > { %v4047_v8 = vpop.xlane.xlu0 %4046 }
 0x396   : > { %v4055_v9 = vadd.f32 %v4429_v7, %v4047_v8 }
 0x398   : > { %4057 = vst.msk [vmem:[%s5776_s7] sm:$0x3] %vm4056_vm2, %v4055_v9 }
 0x399 PF: > { %s19_s26 = sadd.s32 1, %s5272_s26  }
 0x39a   : > { %p16_p7 = scmp.ge.s32.totalorder %s19_s26, 7  }
 0x39c   :  { %18 = sbr.rel (!%p16_p7) target bundleno = 3 (0x3), region = 85 }

</bundles_post_ra>
